<compile_context>
chip_gen: v5e
topology: v5e:2x2
jax: 0.10.0
libtpu: 0.0.40
codegen_flags: <defaults>
</compile_context>

<pallas_src>
import functools

import jax
import jax.numpy as jnp
from jax.experimental import pallas as pl
from jax.experimental.pallas import tpu as pltpu


# ----------------------------------------------------------------------------
# Single fused kernel: all layers, all weights VMEM-resident, activations in-register
# ----------------------------------------------------------------------------
def _transformer_stack_kernel(
    x_ref, wqkv_ref, bqkv_ref, wo_ref, w1_ref, b1_ref, w2_ref, vec_ref,
    o_ref, *, num_layers, num_heads, batch, eps,
):
    N, D = x_ref.shape                      # N = seq * batch (row = s*batch + b)
    H = num_heads
    hd = D // H

    def layer_norm(y, g, b):
        # single-pass variance + gamma folded into the rsqrt factor
        mean = jnp.mean(y, axis=-1, keepdims=True)
        var = jnp.mean(y * y, axis=-1, keepdims=True) - mean * mean
        return (y - mean) * (jax.lax.rsqrt(var + eps) * g) + b

    def split_heads(y, off):
        # (N, H*hd) lanes -> (H, N, hd) leading head-batch, via lane slices + stack.
        return jnp.stack([y[:, off + h * hd: off + (h + 1) * hd] for h in range(H)])

    # Additive mask so flattened tokens only attend within their own batch element
    # (row index n -> batch id n % batch).  Hoisted: built once per forward.
    bi = jax.lax.broadcasted_iota(jnp.int32, (N, N), 0) % batch
    bj = jax.lax.broadcasted_iota(jnp.int32, (N, N), 1) % batch
    attn_mask = jnp.where(bi == bj, 0.0, -1e30).astype(jnp.float32)   # (N, N)

    x = x_ref[...]                                                    # (N, D)

    for l in range(num_layers):                                       # static unroll (L = 6)
        # ---- self-attention: fused QKV projection (q-scale folded into weights) ----
        qkv = jnp.dot(x, wqkv_ref[l], preferred_element_type=jnp.float32) + bqkv_ref[l]
        q = split_heads(qkv, 0)                                       # (H, N, hd)
        k = split_heads(qkv, D)
        v = split_heads(qkv, 2 * D)

        # one batched score matmul + ONE softmax for all heads
        s = jnp.einsum('hqd,hkd->hqk', q, k,
                       preferred_element_type=jnp.float32) + attn_mask     # (H, N, N)
        s = s - jnp.max(s, axis=-1, keepdims=True)
        p = jnp.exp(s)
        p = p * pl.reciprocal(jnp.sum(p, axis=-1, keepdims=True))          # exact (EUP)
        ctx = jnp.einsum('hqk,hkd->hqd', p, v,
                         preferred_element_type=jnp.float32)               # (H, N, hd)

        attn = jnp.concatenate([ctx[h] for h in range(H)], axis=-1)        # (N, D)

        vec = vec_ref[l]                      # (6, D): b_out, b2, ln1_g, ln1_b, ln2_g, ln2_b
        attn = jnp.dot(attn, wo_ref[l], preferred_element_type=jnp.float32) + vec[0:1]

        # ---- residual + norm1 (post-norm) ----
        x = layer_norm(x + attn, vec[2:3], vec[3:4])

        # ---- feed-forward (ReLU) ----
        h1 = jnp.dot(x, w1_ref[l], preferred_element_type=jnp.float32) + b1_ref[l]
        h1 = jnp.maximum(h1, 0.0)
        h2 = jnp.dot(h1, w2_ref[l], preferred_element_type=jnp.float32) + vec[1:2]

        # ---- residual + norm2 ----
        x = layer_norm(x + h2, vec[4:5], vec[5:6])

    o_ref[...] = x.astype(o_ref.dtype)


# ----------------------------------------------------------------------------
# Wrapper: single launch, no grid, no transposes (only free row-major reshapes)
# ----------------------------------------------------------------------------
def custom_transformer_forward(x, params, num_heads, mask=None):
    assert mask is None  # TODO(synk): src_key_padding_mask unsupported
    S, B, D = x.shape
    assert D % num_heads == 0, "embedding_dim must be divisible by num_heads"
    L = params["w_qkv"].shape[0]

    x2 = x.reshape(S * B, D)                       # free: keeps (seq, batch) row order

    kernel = functools.partial(
        _transformer_stack_kernel,
        num_layers=L, num_heads=num_heads, batch=B, eps=1e-5)

    vmem = pl.BlockSpec(memory_space=pltpu.MemorySpace.VMEM)
    out = pl.pallas_call(
        kernel,
        out_shape=jax.ShapeDtypeStruct((S * B, D), x.dtype),
        in_specs=[vmem] * 8,
        out_specs=vmem,
    )(x2,
      params["w_qkv"], params["b_qkv"], params["w_out"],
      params["w1"], params["b1"], params["w2"], params["vec"])

    return out.reshape(S, B, D)                    # free


# ----------------------------------------------------------------------------
# Deterministic parameters: weights pre-transposed to x @ W layout, attention scale
# pre-folded into the Q projection, small per-layer vectors packed into one slab.
# ----------------------------------------------------------------------------
def init_params(key, d, num_layers, num_heads):
    f32 = jnp.float32
    s = 0.05
    hd = d // num_heads
    scale = 1.0 / (hd ** 0.5)

    wq_l, wo_l, w1_l, w2_l = [], [], [], []
    for lk in jax.random.split(key, num_layers):
        k0, k1, k2, k3 = jax.random.split(lk, 4)
        wqkv = s * jax.random.normal(k0, (d, 3 * d), f32)
        wqkv = wqkv.at[:, :d].multiply(scale)        # fold 1/sqrt(head_dim) into Q cols
        wq_l.append(wqkv)
        wo_l.append(s * jax.random.normal(k1, (d, d), f32))
        w1_l.append(s * jax.random.normal(k2, (d, 4 * d), f32))
        w2_l.append(s * jax.random.normal(k3, (4 * d, d), f32))

    L = num_layers
    b_qkv = jnp.zeros((L, 1, 3 * d), f32)
    b_qkv = b_qkv.at[:, :, :d].multiply(scale)       # keep Q bias consistent with folding
    # vec rows: 0=b_out, 1=b2, 2=ln1_gamma, 3=ln1_beta, 4=ln2_gamma, 5=ln2_beta
    vec = jnp.zeros((L, 6, d), f32).at[:, 2].set(1.0).at[:, 4].set(1.0)

    return dict(
        w_qkv=jnp.stack(wq_l), b_qkv=b_qkv,
        w_out=jnp.stack(wo_l),
        w1=jnp.stack(w1_l), b1=jnp.zeros((L, 1, 4 * d), f32),
        w2=jnp.stack(w2_l),
        vec=vec,
    )


if __name__ == "__main__":
    embedding_dim = 32
    num_heads = 8
    num_layers = 6
    seq_len, batch = 8, 2

    key = jax.random.PRNGKey(0)
    kx, kp = jax.random.split(key)
    # PyTorch batch_first=False layout: (seq, batch, embed)
    x = jax.random.normal(kx, (seq_len, batch, embedding_dim), jnp.float32)
    params = init_params(kp, embedding_dim, num_layers, num_heads)

    fwd = jax.jit(functools.partial(custom_transformer_forward, num_heads=num_heads))
    out = fwd(x, params)
    out = jax.block_until_ready(out)
    assert out.shape == (seq_len, batch, embedding_dim)
    assert bool(jnp.all(jnp.isfinite(out)))
    print("KERNEL_OK")
</pallas_src>

<mosaic_0001>
module attributes {stable_mosaic.version = 11 : i64} {
  func.func @_transformer_stack_kernel(%arg0: memref<16x32xf32, #tpu.memory_space<vmem>>, %arg1: memref<6x32x96xf32, #tpu.memory_space<vmem>>, %arg2: memref<6x1x96xf32, #tpu.memory_space<vmem>>, %arg3: memref<6x32x32xf32, #tpu.memory_space<vmem>>, %arg4: memref<6x32x128xf32, #tpu.memory_space<vmem>>, %arg5: memref<6x1x128xf32, #tpu.memory_space<vmem>>, %arg6: memref<6x128x32xf32, #tpu.memory_space<vmem>>, %arg7: memref<6x6x32xf32, #tpu.memory_space<vmem>>, %arg8: memref<16x32xf32, #tpu.memory_space<vmem>>) attributes {dimension_semantics = [], scalar_prefetch = 0 : i64, scratch_operands = 0 : i64, tpu.core_type = #tpu.core_type<tc>} {
    %0 = tpu.iota {dimensions = array<i32: 0>} : vector<16x16xi32>
    %c2_i32 = arith.constant 2 : i32
    %c0_i32 = arith.constant 0 : i32
    %1 = arith.cmpi eq, %c2_i32, %c0_i32 : i32
    %c1_i32 = arith.constant 1 : i32
    %2 = arith.select %1, %c1_i32, %c2_i32 : i32
    %3 = vector.broadcast %2 : i32 to vector<16x16xi32>
    %4 = arith.remsi %0, %3 : vector<16x16xi32>
    %c0_i32_0 = arith.constant 0 : i32
    %5 = vector.broadcast %c0_i32_0 : i32 to vector<16x16xi32>
    %6 = arith.cmpi ne, %4, %5 : vector<16x16xi32>
    %c0_i32_1 = arith.constant 0 : i32
    %7 = vector.broadcast %c0_i32_1 : i32 to vector<16x16xi32>
    %8 = arith.cmpi slt, %4, %7 : vector<16x16xi32>
    %c0_i32_2 = arith.constant 0 : i32
    %9 = arith.cmpi slt, %2, %c0_i32_2 : i32
    %10 = vector.broadcast %9 : i1 to vector<16x16xi1>
    %11 = vector.broadcast %10 : vector<16x16xi1> to vector<16x16xi1>
    %12 = arith.xori %8, %11 : vector<16x16xi1>
    %13 = arith.andi %12, %6 : vector<16x16xi1>
    %14 = vector.broadcast %2 : i32 to vector<16x16xi32>
    %15 = arith.addi %4, %14 : vector<16x16xi32>
    %16 = arith.select %13, %15, %4 : vector<16x16xi1>, vector<16x16xi32>
    %17 = tpu.iota {dimensions = array<i32: 1>} : vector<16x16xi32>
    %c2_i32_3 = arith.constant 2 : i32
    %c0_i32_4 = arith.constant 0 : i32
    %18 = arith.cmpi eq, %c2_i32_3, %c0_i32_4 : i32
    %c1_i32_5 = arith.constant 1 : i32
    %19 = arith.select %18, %c1_i32_5, %c2_i32_3 : i32
    %20 = vector.broadcast %19 : i32 to vector<16x16xi32>
    %21 = arith.remsi %17, %20 : vector<16x16xi32>
    %c0_i32_6 = arith.constant 0 : i32
    %22 = vector.broadcast %c0_i32_6 : i32 to vector<16x16xi32>
    %23 = arith.cmpi ne, %21, %22 : vector<16x16xi32>
    %c0_i32_7 = arith.constant 0 : i32
    %24 = vector.broadcast %c0_i32_7 : i32 to vector<16x16xi32>
    %25 = arith.cmpi slt, %21, %24 : vector<16x16xi32>
    %c0_i32_8 = arith.constant 0 : i32
    %26 = arith.cmpi slt, %19, %c0_i32_8 : i32
    %27 = vector.broadcast %26 : i1 to vector<16x16xi1>
    %28 = vector.broadcast %27 : vector<16x16xi1> to vector<16x16xi1>
    %29 = arith.xori %25, %28 : vector<16x16xi1>
    %30 = arith.andi %29, %23 : vector<16x16xi1>
    %31 = vector.broadcast %19 : i32 to vector<16x16xi32>
    %32 = arith.addi %21, %31 : vector<16x16xi32>
    %33 = arith.select %30, %32, %21 : vector<16x16xi1>, vector<16x16xi32>
    %34 = arith.cmpi eq, %16, %33 : vector<16x16xi32>
    %cst = arith.constant 0.000000e+00 : f32
    %cst_9 = arith.constant -1.000000e+30 : f32
    %35 = vector.broadcast %cst : f32 to vector<16x16xf32>
    %36 = vector.broadcast %cst_9 : f32 to vector<16x16xf32>
    %37 = arith.select %34, %35, %36 : vector<16x16xi1>, vector<16x16xf32>
    %c0 = arith.constant 0 : index
    %c0_10 = arith.constant 0 : index
    %38 = vector.load %arg0[%c0, %c0_10] : memref<16x32xf32, #tpu.memory_space<vmem>>, vector<16x32xf32>
    %c0_11 = arith.constant 0 : index
    %c0_12 = arith.constant 0 : index
    %c0_13 = arith.constant 0 : index
    %39 = vector.load %arg1[%c0_11, %c0_12, %c0_13] : memref<6x32x96xf32, #tpu.memory_space<vmem>>, vector<1x32x96xf32>
    %40 = vector.shape_cast %39 : vector<1x32x96xf32> to vector<32x96xf32>
    %cst_14 = arith.constant dense<0.000000e+00> : vector<16x96xf32>
    %41 = tpu.matmul %38, %40, %cst_14 {dimension_numbers = #tpu.dot_dimension_numbers<[1], [0], [0], [1], [0, 0, 1, 1], [], []>} : vector<16x32xf32>, vector<32x96xf32>, vector<16x96xf32> -> vector<16x96xf32>
    %c0_15 = arith.constant 0 : index
    %c0_16 = arith.constant 0 : index
    %c0_17 = arith.constant 0 : index
    %42 = vector.load %arg2[%c0_15, %c0_16, %c0_17] : memref<6x1x96xf32, #tpu.memory_space<vmem>>, vector<1x1x96xf32>
    %43 = vector.shape_cast %42 : vector<1x1x96xf32> to vector<1x96xf32>
    %44 = vector.broadcast %43 : vector<1x96xf32> to vector<16x96xf32>
    %45 = arith.addf %41, %44 : vector<16x96xf32>
    %46 = vector.extract_strided_slice %45 {offsets = [0, 0], sizes = [16, 4], strides = [1, 1]} : vector<16x96xf32> to vector<16x4xf32>
    %47 = vector.extract_strided_slice %45 {offsets = [0, 4], sizes = [16, 4], strides = [1, 1]} : vector<16x96xf32> to vector<16x4xf32>
    %48 = vector.extract_strided_slice %45 {offsets = [0, 8], sizes = [16, 4], strides = [1, 1]} : vector<16x96xf32> to vector<16x4xf32>
    %49 = vector.extract_strided_slice %45 {offsets = [0, 12], sizes = [16, 4], strides = [1, 1]} : vector<16x96xf32> to vector<16x4xf32>
    %50 = vector.extract_strided_slice %45 {offsets = [0, 16], sizes = [16, 4], strides = [1, 1]} : vector<16x96xf32> to vector<16x4xf32>
    %51 = vector.extract_strided_slice %45 {offsets = [0, 20], sizes = [16, 4], strides = [1, 1]} : vector<16x96xf32> to vector<16x4xf32>
    %52 = vector.extract_strided_slice %45 {offsets = [0, 24], sizes = [16, 4], strides = [1, 1]} : vector<16x96xf32> to vector<16x4xf32>
    %53 = vector.extract_strided_slice %45 {offsets = [0, 28], sizes = [16, 4], strides = [1, 1]} : vector<16x96xf32> to vector<16x4xf32>
    %54 = vector.shape_cast %46 : vector<16x4xf32> to vector<1x16x4xf32>
    %55 = vector.shape_cast %47 : vector<16x4xf32> to vector<1x16x4xf32>
    %56 = vector.shape_cast %48 : vector<16x4xf32> to vector<1x16x4xf32>
    %57 = vector.shape_cast %49 : vector<16x4xf32> to vector<1x16x4xf32>
    %58 = vector.shape_cast %50 : vector<16x4xf32> to vector<1x16x4xf32>
    %59 = vector.shape_cast %51 : vector<16x4xf32> to vector<1x16x4xf32>
    %60 = vector.shape_cast %52 : vector<16x4xf32> to vector<1x16x4xf32>
    %61 = vector.shape_cast %53 : vector<16x4xf32> to vector<1x16x4xf32>
    %62 = tpu.concatenate %54, %55, %56, %57, %58, %59, %60, %61 in 0 : vector<1x16x4xf32>, vector<1x16x4xf32>, vector<1x16x4xf32>, vector<1x16x4xf32>, vector<1x16x4xf32>, vector<1x16x4xf32>, vector<1x16x4xf32>, vector<1x16x4xf32> -> vector<8x16x4xf32>
    %63 = vector.extract_strided_slice %45 {offsets = [0, 32], sizes = [16, 4], strides = [1, 1]} : vector<16x96xf32> to vector<16x4xf32>
    %64 = vector.extract_strided_slice %45 {offsets = [0, 36], sizes = [16, 4], strides = [1, 1]} : vector<16x96xf32> to vector<16x4xf32>
    %65 = vector.extract_strided_slice %45 {offsets = [0, 40], sizes = [16, 4], strides = [1, 1]} : vector<16x96xf32> to vector<16x4xf32>
    %66 = vector.extract_strided_slice %45 {offsets = [0, 44], sizes = [16, 4], strides = [1, 1]} : vector<16x96xf32> to vector<16x4xf32>
    %67 = vector.extract_strided_slice %45 {offsets = [0, 48], sizes = [16, 4], strides = [1, 1]} : vector<16x96xf32> to vector<16x4xf32>
    %68 = vector.extract_strided_slice %45 {offsets = [0, 52], sizes = [16, 4], strides = [1, 1]} : vector<16x96xf32> to vector<16x4xf32>
    %69 = vector.extract_strided_slice %45 {offsets = [0, 56], sizes = [16, 4], strides = [1, 1]} : vector<16x96xf32> to vector<16x4xf32>
    %70 = vector.extract_strided_slice %45 {offsets = [0, 60], sizes = [16, 4], strides = [1, 1]} : vector<16x96xf32> to vector<16x4xf32>
    %71 = vector.shape_cast %63 : vector<16x4xf32> to vector<1x16x4xf32>
    %72 = vector.shape_cast %64 : vector<16x4xf32> to vector<1x16x4xf32>
    %73 = vector.shape_cast %65 : vector<16x4xf32> to vector<1x16x4xf32>
    %74 = vector.shape_cast %66 : vector<16x4xf32> to vector<1x16x4xf32>
    %75 = vector.shape_cast %67 : vector<16x4xf32> to vector<1x16x4xf32>
    %76 = vector.shape_cast %68 : vector<16x4xf32> to vector<1x16x4xf32>
    %77 = vector.shape_cast %69 : vector<16x4xf32> to vector<1x16x4xf32>
    %78 = vector.shape_cast %70 : vector<16x4xf32> to vector<1x16x4xf32>
    %79 = tpu.concatenate %71, %72, %73, %74, %75, %76, %77, %78 in 0 : vector<1x16x4xf32>, vector<1x16x4xf32>, vector<1x16x4xf32>, vector<1x16x4xf32>, vector<1x16x4xf32>, vector<1x16x4xf32>, vector<1x16x4xf32>, vector<1x16x4xf32> -> vector<8x16x4xf32>
    %80 = vector.extract_strided_slice %45 {offsets = [0, 64], sizes = [16, 4], strides = [1, 1]} : vector<16x96xf32> to vector<16x4xf32>
    %81 = vector.extract_strided_slice %45 {offsets = [0, 68], sizes = [16, 4], strides = [1, 1]} : vector<16x96xf32> to vector<16x4xf32>
    %82 = vector.extract_strided_slice %45 {offsets = [0, 72], sizes = [16, 4], strides = [1, 1]} : vector<16x96xf32> to vector<16x4xf32>
    %83 = vector.extract_strided_slice %45 {offsets = [0, 76], sizes = [16, 4], strides = [1, 1]} : vector<16x96xf32> to vector<16x4xf32>
    %84 = vector.extract_strided_slice %45 {offsets = [0, 80], sizes = [16, 4], strides = [1, 1]} : vector<16x96xf32> to vector<16x4xf32>
    %85 = vector.extract_strided_slice %45 {offsets = [0, 84], sizes = [16, 4], strides = [1, 1]} : vector<16x96xf32> to vector<16x4xf32>
    %86 = vector.extract_strided_slice %45 {offsets = [0, 88], sizes = [16, 4], strides = [1, 1]} : vector<16x96xf32> to vector<16x4xf32>
    %87 = vector.extract_strided_slice %45 {offsets = [0, 92], sizes = [16, 4], strides = [1, 1]} : vector<16x96xf32> to vector<16x4xf32>
    %88 = vector.shape_cast %80 : vector<16x4xf32> to vector<1x16x4xf32>
    %89 = vector.shape_cast %81 : vector<16x4xf32> to vector<1x16x4xf32>
    %90 = vector.shape_cast %82 : vector<16x4xf32> to vector<1x16x4xf32>
    %91 = vector.shape_cast %83 : vector<16x4xf32> to vector<1x16x4xf32>
    %92 = vector.shape_cast %84 : vector<16x4xf32> to vector<1x16x4xf32>
    %93 = vector.shape_cast %85 : vector<16x4xf32> to vector<1x16x4xf32>
    %94 = vector.shape_cast %86 : vector<16x4xf32> to vector<1x16x4xf32>
    %95 = vector.shape_cast %87 : vector<16x4xf32> to vector<1x16x4xf32>
    %96 = tpu.concatenate %88, %89, %90, %91, %92, %93, %94, %95 in 0 : vector<1x16x4xf32>, vector<1x16x4xf32>, vector<1x16x4xf32>, vector<1x16x4xf32>, vector<1x16x4xf32>, vector<1x16x4xf32>, vector<1x16x4xf32>, vector<1x16x4xf32> -> vector<8x16x4xf32>
    "tpu.trace_start"() <{level = 10 : i32, message = "hqd,hkd->hqk"}> : () -> ()
    %cst_18 = arith.constant dense<0.000000e+00> : vector<8x16x16xf32>
    %97 = tpu.matmul %62, %79, %cst_18 {dimension_numbers = #tpu.dot_dimension_numbers<[2], [2], [1], [1], [0, 0, 0, 1, 1, 1], [0], [0]>} : vector<8x16x4xf32>, vector<8x16x4xf32>, vector<8x16x16xf32> -> vector<8x16x16xf32>
    "tpu.trace_stop"() : () -> ()
    %98 = vector.shape_cast %37 : vector<16x16xf32> to vector<1x16x16xf32>
    %99 = vector.broadcast %98 : vector<1x16x16xf32> to vector<8x16x16xf32>
    %100 = arith.addf %97, %99 : vector<8x16x16xf32>
    %cst_19 = arith.constant dense<0xFF800000> : vector<8x16xf32>
    %101 = vector.multi_reduction <maximumf>, %100, %cst_19 [2] : vector<8x16x16xf32> to vector<8x16xf32>
    %102 = vector.shape_cast %101 : vector<8x16xf32> to vector<8x16x1xf32>
    %103 = vector.broadcast %102 : vector<8x16x1xf32> to vector<8x16x16xf32>
    %104 = arith.subf %100, %103 : vector<8x16x16xf32>
    %105 = math.exp %104 : vector<8x16x16xf32>
    %cst_20 = arith.constant dense<0.000000e+00> : vector<8x16xf32>
    %106 = vector.multi_reduction <add>, %105, %cst_20 [2] : vector<8x16x16xf32> to vector<8x16xf32>
    %107 = vector.shape_cast %106 : vector<8x16xf32> to vector<8x16x1xf32>
    %108 = tpu.reciprocal %107 : vector<8x16x1xf32> -> vector<8x16x1xf32>
    %109 = vector.broadcast %108 : vector<8x16x1xf32> to vector<8x16x16xf32>
    %110 = arith.mulf %105, %109 : vector<8x16x16xf32>
    "tpu.trace_start"() <{level = 10 : i32, message = "hqk,hkd->hqd"}> : () -> ()
    %cst_21 = arith.constant dense<0.000000e+00> : vector<8x16x4xf32>
    %111 = tpu.matmul %110, %96, %cst_21 {dimension_numbers = #tpu.dot_dimension_numbers<[2], [1], [1], [2], [0, 0, 0, 1, 1, 2], [0], [0]>} : vector<8x16x16xf32>, vector<8x16x4xf32>, vector<8x16x4xf32> -> vector<8x16x4xf32>
    "tpu.trace_stop"() : () -> ()
    %112 = vector.extract_strided_slice %111 {offsets = [0, 0, 0], sizes = [1, 16, 4], strides = [1, 1, 1]} : vector<8x16x4xf32> to vector<1x16x4xf32>
    %113 = vector.shape_cast %112 : vector<1x16x4xf32> to vector<16x4xf32>
    %114 = vector.extract_strided_slice %111 {offsets = [1, 0, 0], sizes = [1, 16, 4], strides = [1, 1, 1]} : vector<8x16x4xf32> to vector<1x16x4xf32>
    %115 = vector.shape_cast %114 : vector<1x16x4xf32> to vector<16x4xf32>
    %116 = vector.extract_strided_slice %111 {offsets = [2, 0, 0], sizes = [1, 16, 4], strides = [1, 1, 1]} : vector<8x16x4xf32> to vector<1x16x4xf32>
    %117 = vector.shape_cast %116 : vector<1x16x4xf32> to vector<16x4xf32>
    %118 = vector.extract_strided_slice %111 {offsets = [3, 0, 0], sizes = [1, 16, 4], strides = [1, 1, 1]} : vector<8x16x4xf32> to vector<1x16x4xf32>
    %119 = vector.shape_cast %118 : vector<1x16x4xf32> to vector<16x4xf32>
    %120 = vector.extract_strided_slice %111 {offsets = [4, 0, 0], sizes = [1, 16, 4], strides = [1, 1, 1]} : vector<8x16x4xf32> to vector<1x16x4xf32>
    %121 = vector.shape_cast %120 : vector<1x16x4xf32> to vector<16x4xf32>
    %122 = vector.extract_strided_slice %111 {offsets = [5, 0, 0], sizes = [1, 16, 4], strides = [1, 1, 1]} : vector<8x16x4xf32> to vector<1x16x4xf32>
    %123 = vector.shape_cast %122 : vector<1x16x4xf32> to vector<16x4xf32>
    %124 = vector.extract_strided_slice %111 {offsets = [6, 0, 0], sizes = [1, 16, 4], strides = [1, 1, 1]} : vector<8x16x4xf32> to vector<1x16x4xf32>
    %125 = vector.shape_cast %124 : vector<1x16x4xf32> to vector<16x4xf32>
    %126 = vector.extract_strided_slice %111 {offsets = [7, 0, 0], sizes = [1, 16, 4], strides = [1, 1, 1]} : vector<8x16x4xf32> to vector<1x16x4xf32>
    %127 = vector.shape_cast %126 : vector<1x16x4xf32> to vector<16x4xf32>
    %128 = tpu.concatenate %113, %115, %117, %119, %121, %123, %125, %127 in 1 : vector<16x4xf32>, vector<16x4xf32>, vector<16x4xf32>, vector<16x4xf32>, vector<16x4xf32>, vector<16x4xf32>, vector<16x4xf32>, vector<16x4xf32> -> vector<16x32xf32>
    %c0_22 = arith.constant 0 : index
    %c0_23 = arith.constant 0 : index
    %c0_24 = arith.constant 0 : index
    %129 = vector.load %arg7[%c0_22, %c0_23, %c0_24] : memref<6x6x32xf32, #tpu.memory_space<vmem>>, vector<1x6x32xf32>
    %130 = vector.shape_cast %129 : vector<1x6x32xf32> to vector<6x32xf32>
    %c0_25 = arith.constant 0 : index
    %c0_26 = arith.constant 0 : index
    %c0_27 = arith.constant 0 : index
    %131 = vector.load %arg3[%c0_25, %c0_26, %c0_27] : memref<6x32x32xf32, #tpu.memory_space<vmem>>, vector<1x32x32xf32>
    %132 = vector.shape_cast %131 : vector<1x32x32xf32> to vector<32x32xf32>
    %cst_28 = arith.constant dense<0.000000e+00> : vector<16x32xf32>
    %133 = tpu.matmul %128, %132, %cst_28 {dimension_numbers = #tpu.dot_dimension_numbers<[1], [0], [0], [1], [0, 0, 1, 1], [], []>} : vector<16x32xf32>, vector<32x32xf32>, vector<16x32xf32> -> vector<16x32xf32>
    %134 = vector.extract_strided_slice %130 {offsets = [0, 0], sizes = [1, 32], strides = [1, 1]} : vector<6x32xf32> to vector<1x32xf32>
    %135 = vector.broadcast %134 : vector<1x32xf32> to vector<16x32xf32>
    %136 = arith.addf %133, %135 : vector<16x32xf32>
    %137 = arith.addf %38, %136 : vector<16x32xf32>
    %138 = vector.extract_strided_slice %130 {offsets = [2, 0], sizes = [1, 32], strides = [1, 1]} : vector<6x32xf32> to vector<1x32xf32>
    %139 = vector.extract_strided_slice %130 {offsets = [3, 0], sizes = [1, 32], strides = [1, 1]} : vector<6x32xf32> to vector<1x32xf32>
    %cst_29 = arith.constant dense<0.000000e+00> : vector<16xf32>
    %140 = vector.multi_reduction <add>, %137, %cst_29 [1] : vector<16x32xf32> to vector<16xf32>
    %141 = vector.shape_cast %140 : vector<16xf32> to vector<16x1xf32>
    %cst_30 = arith.constant 3.200000e+01 : f32
    %142 = vector.broadcast %cst_30 : f32 to vector<16x1xf32>
    %143 = arith.divf %141, %142 : vector<16x1xf32>
    %144 = arith.mulf %137, %137 : vector<16x32xf32>
    %cst_31 = arith.constant dense<0.000000e+00> : vector<16xf32>
    %145 = vector.multi_reduction <add>, %144, %cst_31 [1] : vector<16x32xf32> to vector<16xf32>
    %146 = vector.shape_cast %145 : vector<16xf32> to vector<16x1xf32>
    %cst_32 = arith.constant 3.200000e+01 : f32
    %147 = vector.broadcast %cst_32 : f32 to vector<16x1xf32>
    %148 = arith.divf %146, %147 : vector<16x1xf32>
    %149 = arith.mulf %143, %143 : vector<16x1xf32>
    %150 = arith.subf %148, %149 : vector<16x1xf32>
    %151 = vector.broadcast %143 : vector<16x1xf32> to vector<16x32xf32>
    %152 = arith.subf %137, %151 : vector<16x32xf32>
    %cst_33 = arith.constant 9.99999974E-6 : f32
    %153 = vector.broadcast %cst_33 : f32 to vector<16x1xf32>
    %154 = arith.addf %150, %153 : vector<16x1xf32>
    %155 = math.rsqrt %154 : vector<16x1xf32>
    %156 = vector.broadcast %155 : vector<16x1xf32> to vector<16x32xf32>
    %157 = vector.broadcast %138 : vector<1x32xf32> to vector<16x32xf32>
    %158 = arith.mulf %156, %157 : vector<16x32xf32>
    %159 = arith.mulf %152, %158 : vector<16x32xf32>
    %160 = vector.broadcast %139 : vector<1x32xf32> to vector<16x32xf32>
    %161 = arith.addf %159, %160 : vector<16x32xf32>
    %c0_34 = arith.constant 0 : index
    %c0_35 = arith.constant 0 : index
    %c0_36 = arith.constant 0 : index
    %162 = vector.load %arg4[%c0_34, %c0_35, %c0_36] : memref<6x32x128xf32, #tpu.memory_space<vmem>>, vector<1x32x128xf32>
    %163 = vector.shape_cast %162 : vector<1x32x128xf32> to vector<32x128xf32>
    %cst_37 = arith.constant dense<0.000000e+00> : vector<16x128xf32>
    %164 = tpu.matmul %161, %163, %cst_37 {dimension_numbers = #tpu.dot_dimension_numbers<[1], [0], [0], [1], [0, 0, 1, 1], [], []>} : vector<16x32xf32>, vector<32x128xf32>, vector<16x128xf32> -> vector<16x128xf32>
    %c0_38 = arith.constant 0 : index
    %c0_39 = arith.constant 0 : index
    %c0_40 = arith.constant 0 : index
    %165 = vector.load %arg5[%c0_38, %c0_39, %c0_40] : memref<6x1x128xf32, #tpu.memory_space<vmem>>, vector<1x1x128xf32>
    %166 = vector.shape_cast %165 : vector<1x1x128xf32> to vector<1x128xf32>
    %167 = vector.broadcast %166 : vector<1x128xf32> to vector<16x128xf32>
    %168 = arith.addf %164, %167 : vector<16x128xf32>
    %cst_41 = arith.constant 0.000000e+00 : f32
    %169 = vector.broadcast %cst_41 : f32 to vector<16x128xf32>
    %170 = arith.maximumf %168, %169 : vector<16x128xf32>
    %c0_42 = arith.constant 0 : index
    %c0_43 = arith.constant 0 : index
    %c0_44 = arith.constant 0 : index
    %171 = vector.load %arg6[%c0_42, %c0_43, %c0_44] : memref<6x128x32xf32, #tpu.memory_space<vmem>>, vector<1x128x32xf32>
    %172 = vector.shape_cast %171 : vector<1x128x32xf32> to vector<128x32xf32>
    %cst_45 = arith.constant dense<0.000000e+00> : vector<16x32xf32>
    %173 = tpu.matmul %170, %172, %cst_45 {dimension_numbers = #tpu.dot_dimension_numbers<[1], [0], [0], [1], [0, 0, 1, 1], [], []>} : vector<16x128xf32>, vector<128x32xf32>, vector<16x32xf32> -> vector<16x32xf32>
    %174 = vector.extract_strided_slice %130 {offsets = [1, 0], sizes = [1, 32], strides = [1, 1]} : vector<6x32xf32> to vector<1x32xf32>
    %175 = vector.broadcast %174 : vector<1x32xf32> to vector<16x32xf32>
    %176 = arith.addf %173, %175 : vector<16x32xf32>
    %177 = arith.addf %161, %176 : vector<16x32xf32>
    %178 = vector.extract_strided_slice %130 {offsets = [4, 0], sizes = [1, 32], strides = [1, 1]} : vector<6x32xf32> to vector<1x32xf32>
    %179 = vector.extract_strided_slice %130 {offsets = [5, 0], sizes = [1, 32], strides = [1, 1]} : vector<6x32xf32> to vector<1x32xf32>
    %cst_46 = arith.constant dense<0.000000e+00> : vector<16xf32>
    %180 = vector.multi_reduction <add>, %177, %cst_46 [1] : vector<16x32xf32> to vector<16xf32>
    %181 = vector.shape_cast %180 : vector<16xf32> to vector<16x1xf32>
    %cst_47 = arith.constant 3.200000e+01 : f32
    %182 = vector.broadcast %cst_47 : f32 to vector<16x1xf32>
    %183 = arith.divf %181, %182 : vector<16x1xf32>
    %184 = arith.mulf %177, %177 : vector<16x32xf32>
    %cst_48 = arith.constant dense<0.000000e+00> : vector<16xf32>
    %185 = vector.multi_reduction <add>, %184, %cst_48 [1] : vector<16x32xf32> to vector<16xf32>
    %186 = vector.shape_cast %185 : vector<16xf32> to vector<16x1xf32>
    %cst_49 = arith.constant 3.200000e+01 : f32
    %187 = vector.broadcast %cst_49 : f32 to vector<16x1xf32>
    %188 = arith.divf %186, %187 : vector<16x1xf32>
    %189 = arith.mulf %183, %183 : vector<16x1xf32>
    %190 = arith.subf %188, %189 : vector<16x1xf32>
    %191 = vector.broadcast %183 : vector<16x1xf32> to vector<16x32xf32>
    %192 = arith.subf %177, %191 : vector<16x32xf32>
    %cst_50 = arith.constant 9.99999974E-6 : f32
    %193 = vector.broadcast %cst_50 : f32 to vector<16x1xf32>
    %194 = arith.addf %190, %193 : vector<16x1xf32>
    %195 = math.rsqrt %194 : vector<16x1xf32>
    %196 = vector.broadcast %195 : vector<16x1xf32> to vector<16x32xf32>
    %197 = vector.broadcast %178 : vector<1x32xf32> to vector<16x32xf32>
    %198 = arith.mulf %196, %197 : vector<16x32xf32>
    %199 = arith.mulf %192, %198 : vector<16x32xf32>
    %200 = vector.broadcast %179 : vector<1x32xf32> to vector<16x32xf32>
    %201 = arith.addf %199, %200 : vector<16x32xf32>
    %c1 = arith.constant 1 : index
    %c0_51 = arith.constant 0 : index
    %c0_52 = arith.constant 0 : index
    %202 = vector.load %arg1[%c1, %c0_51, %c0_52] : memref<6x32x96xf32, #tpu.memory_space<vmem>>, vector<1x32x96xf32>
    %203 = vector.shape_cast %202 : vector<1x32x96xf32> to vector<32x96xf32>
    %cst_53 = arith.constant dense<0.000000e+00> : vector<16x96xf32>
    %204 = tpu.matmul %201, %203, %cst_53 {dimension_numbers = #tpu.dot_dimension_numbers<[1], [0], [0], [1], [0, 0, 1, 1], [], []>} : vector<16x32xf32>, vector<32x96xf32>, vector<16x96xf32> -> vector<16x96xf32>
    %c1_54 = arith.constant 1 : index
    %c0_55 = arith.constant 0 : index
    %c0_56 = arith.constant 0 : index
    %205 = vector.load %arg2[%c1_54, %c0_55, %c0_56] : memref<6x1x96xf32, #tpu.memory_space<vmem>>, vector<1x1x96xf32>
    %206 = vector.shape_cast %205 : vector<1x1x96xf32> to vector<1x96xf32>
    %207 = vector.broadcast %206 : vector<1x96xf32> to vector<16x96xf32>
    %208 = arith.addf %204, %207 : vector<16x96xf32>
    %209 = vector.extract_strided_slice %208 {offsets = [0, 0], sizes = [16, 4], strides = [1, 1]} : vector<16x96xf32> to vector<16x4xf32>
    %210 = vector.extract_strided_slice %208 {offsets = [0, 4], sizes = [16, 4], strides = [1, 1]} : vector<16x96xf32> to vector<16x4xf32>
    %211 = vector.extract_strided_slice %208 {offsets = [0, 8], sizes = [16, 4], strides = [1, 1]} : vector<16x96xf32> to vector<16x4xf32>
    %212 = vector.extract_strided_slice %208 {offsets = [0, 12], sizes = [16, 4], strides = [1, 1]} : vector<16x96xf32> to vector<16x4xf32>
    %213 = vector.extract_strided_slice %208 {offsets = [0, 16], sizes = [16, 4], strides = [1, 1]} : vector<16x96xf32> to vector<16x4xf32>
    %214 = vector.extract_strided_slice %208 {offsets = [0, 20], sizes = [16, 4], strides = [1, 1]} : vector<16x96xf32> to vector<16x4xf32>
    %215 = vector.extract_strided_slice %208 {offsets = [0, 24], sizes = [16, 4], strides = [1, 1]} : vector<16x96xf32> to vector<16x4xf32>
    %216 = vector.extract_strided_slice %208 {offsets = [0, 28], sizes = [16, 4], strides = [1, 1]} : vector<16x96xf32> to vector<16x4xf32>
    %217 = vector.shape_cast %209 : vector<16x4xf32> to vector<1x16x4xf32>
    %218 = vector.shape_cast %210 : vector<16x4xf32> to vector<1x16x4xf32>
    %219 = vector.shape_cast %211 : vector<16x4xf32> to vector<1x16x4xf32>
    %220 = vector.shape_cast %212 : vector<16x4xf32> to vector<1x16x4xf32>
    %221 = vector.shape_cast %213 : vector<16x4xf32> to vector<1x16x4xf32>
    %222 = vector.shape_cast %214 : vector<16x4xf32> to vector<1x16x4xf32>
    %223 = vector.shape_cast %215 : vector<16x4xf32> to vector<1x16x4xf32>
    %224 = vector.shape_cast %216 : vector<16x4xf32> to vector<1x16x4xf32>
    %225 = tpu.concatenate %217, %218, %219, %220, %221, %222, %223, %224 in 0 : vector<1x16x4xf32>, vector<1x16x4xf32>, vector<1x16x4xf32>, vector<1x16x4xf32>, vector<1x16x4xf32>, vector<1x16x4xf32>, vector<1x16x4xf32>, vector<1x16x4xf32> -> vector<8x16x4xf32>
    %226 = vector.extract_strided_slice %208 {offsets = [0, 32], sizes = [16, 4], strides = [1, 1]} : vector<16x96xf32> to vector<16x4xf32>
    %227 = vector.extract_strided_slice %208 {offsets = [0, 36], sizes = [16, 4], strides = [1, 1]} : vector<16x96xf32> to vector<16x4xf32>
    %228 = vector.extract_strided_slice %208 {offsets = [0, 40], sizes = [16, 4], strides = [1, 1]} : vector<16x96xf32> to vector<16x4xf32>
    %229 = vector.extract_strided_slice %208 {offsets = [0, 44], sizes = [16, 4], strides = [1, 1]} : vector<16x96xf32> to vector<16x4xf32>
    %230 = vector.extract_strided_slice %208 {offsets = [0, 48], sizes = [16, 4], strides = [1, 1]} : vector<16x96xf32> to vector<16x4xf32>
    %231 = vector.extract_strided_slice %208 {offsets = [0, 52], sizes = [16, 4], strides = [1, 1]} : vector<16x96xf32> to vector<16x4xf32>
    %232 = vector.extract_strided_slice %208 {offsets = [0, 56], sizes = [16, 4], strides = [1, 1]} : vector<16x96xf32> to vector<16x4xf32>
    %233 = vector.extract_strided_slice %208 {offsets = [0, 60], sizes = [16, 4], strides = [1, 1]} : vector<16x96xf32> to vector<16x4xf32>
    %234 = vector.shape_cast %226 : vector<16x4xf32> to vector<1x16x4xf32>
    %235 = vector.shape_cast %227 : vector<16x4xf32> to vector<1x16x4xf32>
    %236 = vector.shape_cast %228 : vector<16x4xf32> to vector<1x16x4xf32>
    %237 = vector.shape_cast %229 : vector<16x4xf32> to vector<1x16x4xf32>
    %238 = vector.shape_cast %230 : vector<16x4xf32> to vector<1x16x4xf32>
    %239 = vector.shape_cast %231 : vector<16x4xf32> to vector<1x16x4xf32>
    %240 = vector.shape_cast %232 : vector<16x4xf32> to vector<1x16x4xf32>
    %241 = vector.shape_cast %233 : vector<16x4xf32> to vector<1x16x4xf32>
    %242 = tpu.concatenate %234, %235, %236, %237, %238, %239, %240, %241 in 0 : vector<1x16x4xf32>, vector<1x16x4xf32>, vector<1x16x4xf32>, vector<1x16x4xf32>, vector<1x16x4xf32>, vector<1x16x4xf32>, vector<1x16x4xf32>, vector<1x16x4xf32> -> vector<8x16x4xf32>
    %243 = vector.extract_strided_slice %208 {offsets = [0, 64], sizes = [16, 4], strides = [1, 1]} : vector<16x96xf32> to vector<16x4xf32>
    %244 = vector.extract_strided_slice %208 {offsets = [0, 68], sizes = [16, 4], strides = [1, 1]} : vector<16x96xf32> to vector<16x4xf32>
    %245 = vector.extract_strided_slice %208 {offsets = [0, 72], sizes = [16, 4], strides = [1, 1]} : vector<16x96xf32> to vector<16x4xf32>
    %246 = vector.extract_strided_slice %208 {offsets = [0, 76], sizes = [16, 4], strides = [1, 1]} : vector<16x96xf32> to vector<16x4xf32>
    %247 = vector.extract_strided_slice %208 {offsets = [0, 80], sizes = [16, 4], strides = [1, 1]} : vector<16x96xf32> to vector<16x4xf32>
    %248 = vector.extract_strided_slice %208 {offsets = [0, 84], sizes = [16, 4], strides = [1, 1]} : vector<16x96xf32> to vector<16x4xf32>
    %249 = vector.extract_strided_slice %208 {offsets = [0, 88], sizes = [16, 4], strides = [1, 1]} : vector<16x96xf32> to vector<16x4xf32>
    %250 = vector.extract_strided_slice %208 {offsets = [0, 92], sizes = [16, 4], strides = [1, 1]} : vector<16x96xf32> to vector<16x4xf32>
    %251 = vector.shape_cast %243 : vector<16x4xf32> to vector<1x16x4xf32>
    %252 = vector.shape_cast %244 : vector<16x4xf32> to vector<1x16x4xf32>
    %253 = vector.shape_cast %245 : vector<16x4xf32> to vector<1x16x4xf32>
    %254 = vector.shape_cast %246 : vector<16x4xf32> to vector<1x16x4xf32>
    %255 = vector.shape_cast %247 : vector<16x4xf32> to vector<1x16x4xf32>
    %256 = vector.shape_cast %248 : vector<16x4xf32> to vector<1x16x4xf32>
    %257 = vector.shape_cast %249 : vector<16x4xf32> to vector<1x16x4xf32>
    %258 = vector.shape_cast %250 : vector<16x4xf32> to vector<1x16x4xf32>
    %259 = tpu.concatenate %251, %252, %253, %254, %255, %256, %257, %258 in 0 : vector<1x16x4xf32>, vector<1x16x4xf32>, vector<1x16x4xf32>, vector<1x16x4xf32>, vector<1x16x4xf32>, vector<1x16x4xf32>, vector<1x16x4xf32>, vector<1x16x4xf32> -> vector<8x16x4xf32>
    "tpu.trace_start"() <{level = 10 : i32, message = "hqd,hkd->hqk"}> : () -> ()
    %cst_57 = arith.constant dense<0.000000e+00> : vector<8x16x16xf32>
    %260 = tpu.matmul %225, %242, %cst_57 {dimension_numbers = #tpu.dot_dimension_numbers<[2], [2], [1], [1], [0, 0, 0, 1, 1, 1], [0], [0]>} : vector<8x16x4xf32>, vector<8x16x4xf32>, vector<8x16x16xf32> -> vector<8x16x16xf32>
    "tpu.trace_stop"() : () -> ()
    %261 = vector.shape_cast %37 : vector<16x16xf32> to vector<1x16x16xf32>
    %262 = vector.broadcast %261 : vector<1x16x16xf32> to vector<8x16x16xf32>
    %263 = arith.addf %260, %262 : vector<8x16x16xf32>
    %cst_58 = arith.constant dense<0xFF800000> : vector<8x16xf32>
    %264 = vector.multi_reduction <maximumf>, %263, %cst_58 [2] : vector<8x16x16xf32> to vector<8x16xf32>
    %265 = vector.shape_cast %264 : vector<8x16xf32> to vector<8x16x1xf32>
    %266 = vector.broadcast %265 : vector<8x16x1xf32> to vector<8x16x16xf32>
    %267 = arith.subf %263, %266 : vector<8x16x16xf32>
    %268 = math.exp %267 : vector<8x16x16xf32>
    %cst_59 = arith.constant dense<0.000000e+00> : vector<8x16xf32>
    %269 = vector.multi_reduction <add>, %268, %cst_59 [2] : vector<8x16x16xf32> to vector<8x16xf32>
    %270 = vector.shape_cast %269 : vector<8x16xf32> to vector<8x16x1xf32>
    %271 = tpu.reciprocal %270 : vector<8x16x1xf32> -> vector<8x16x1xf32>
    %272 = vector.broadcast %271 : vector<8x16x1xf32> to vector<8x16x16xf32>
    %273 = arith.mulf %268, %272 : vector<8x16x16xf32>
    "tpu.trace_start"() <{level = 10 : i32, message = "hqk,hkd->hqd"}> : () -> ()
    %cst_60 = arith.constant dense<0.000000e+00> : vector<8x16x4xf32>
    %274 = tpu.matmul %273, %259, %cst_60 {dimension_numbers = #tpu.dot_dimension_numbers<[2], [1], [1], [2], [0, 0, 0, 1, 1, 2], [0], [0]>} : vector<8x16x16xf32>, vector<8x16x4xf32>, vector<8x16x4xf32> -> vector<8x16x4xf32>
    "tpu.trace_stop"() : () -> ()
    %275 = vector.extract_strided_slice %274 {offsets = [0, 0, 0], sizes = [1, 16, 4], strides = [1, 1, 1]} : vector<8x16x4xf32> to vector<1x16x4xf32>
    %276 = vector.shape_cast %275 : vector<1x16x4xf32> to vector<16x4xf32>
    %277 = vector.extract_strided_slice %274 {offsets = [1, 0, 0], sizes = [1, 16, 4], strides = [1, 1, 1]} : vector<8x16x4xf32> to vector<1x16x4xf32>
    %278 = vector.shape_cast %277 : vector<1x16x4xf32> to vector<16x4xf32>
    %279 = vector.extract_strided_slice %274 {offsets = [2, 0, 0], sizes = [1, 16, 4], strides = [1, 1, 1]} : vector<8x16x4xf32> to vector<1x16x4xf32>
    %280 = vector.shape_cast %279 : vector<1x16x4xf32> to vector<16x4xf32>
    %281 = vector.extract_strided_slice %274 {offsets = [3, 0, 0], sizes = [1, 16, 4], strides = [1, 1, 1]} : vector<8x16x4xf32> to vector<1x16x4xf32>
    %282 = vector.shape_cast %281 : vector<1x16x4xf32> to vector<16x4xf32>
    %283 = vector.extract_strided_slice %274 {offsets = [4, 0, 0], sizes = [1, 16, 4], strides = [1, 1, 1]} : vector<8x16x4xf32> to vector<1x16x4xf32>
    %284 = vector.shape_cast %283 : vector<1x16x4xf32> to vector<16x4xf32>
    %285 = vector.extract_strided_slice %274 {offsets = [5, 0, 0], sizes = [1, 16, 4], strides = [1, 1, 1]} : vector<8x16x4xf32> to vector<1x16x4xf32>
    %286 = vector.shape_cast %285 : vector<1x16x4xf32> to vector<16x4xf32>
    %287 = vector.extract_strided_slice %274 {offsets = [6, 0, 0], sizes = [1, 16, 4], strides = [1, 1, 1]} : vector<8x16x4xf32> to vector<1x16x4xf32>
    %288 = vector.shape_cast %287 : vector<1x16x4xf32> to vector<16x4xf32>
    %289 = vector.extract_strided_slice %274 {offsets = [7, 0, 0], sizes = [1, 16, 4], strides = [1, 1, 1]} : vector<8x16x4xf32> to vector<1x16x4xf32>
    %290 = vector.shape_cast %289 : vector<1x16x4xf32> to vector<16x4xf32>
    %291 = tpu.concatenate %276, %278, %280, %282, %284, %286, %288, %290 in 1 : vector<16x4xf32>, vector<16x4xf32>, vector<16x4xf32>, vector<16x4xf32>, vector<16x4xf32>, vector<16x4xf32>, vector<16x4xf32>, vector<16x4xf32> -> vector<16x32xf32>
    %c1_61 = arith.constant 1 : index
    %c0_62 = arith.constant 0 : index
    %c0_63 = arith.constant 0 : index
    %292 = vector.load %arg7[%c1_61, %c0_62, %c0_63] : memref<6x6x32xf32, #tpu.memory_space<vmem>>, vector<1x6x32xf32>
    %293 = vector.shape_cast %292 : vector<1x6x32xf32> to vector<6x32xf32>
    %c1_64 = arith.constant 1 : index
    %c0_65 = arith.constant 0 : index
    %c0_66 = arith.constant 0 : index
    %294 = vector.load %arg3[%c1_64, %c0_65, %c0_66] : memref<6x32x32xf32, #tpu.memory_space<vmem>>, vector<1x32x32xf32>
    %295 = vector.shape_cast %294 : vector<1x32x32xf32> to vector<32x32xf32>
    %cst_67 = arith.constant dense<0.000000e+00> : vector<16x32xf32>
    %296 = tpu.matmul %291, %295, %cst_67 {dimension_numbers = #tpu.dot_dimension_numbers<[1], [0], [0], [1], [0, 0, 1, 1], [], []>} : vector<16x32xf32>, vector<32x32xf32>, vector<16x32xf32> -> vector<16x32xf32>
    %297 = vector.extract_strided_slice %293 {offsets = [0, 0], sizes = [1, 32], strides = [1, 1]} : vector<6x32xf32> to vector<1x32xf32>
    %298 = vector.broadcast %297 : vector<1x32xf32> to vector<16x32xf32>
    %299 = arith.addf %296, %298 : vector<16x32xf32>
    %300 = arith.addf %201, %299 : vector<16x32xf32>
    %301 = vector.extract_strided_slice %293 {offsets = [2, 0], sizes = [1, 32], strides = [1, 1]} : vector<6x32xf32> to vector<1x32xf32>
    %302 = vector.extract_strided_slice %293 {offsets = [3, 0], sizes = [1, 32], strides = [1, 1]} : vector<6x32xf32> to vector<1x32xf32>
    %cst_68 = arith.constant dense<0.000000e+00> : vector<16xf32>
    %303 = vector.multi_reduction <add>, %300, %cst_68 [1] : vector<16x32xf32> to vector<16xf32>
    %304 = vector.shape_cast %303 : vector<16xf32> to vector<16x1xf32>
    %cst_69 = arith.constant 3.200000e+01 : f32
    %305 = vector.broadcast %cst_69 : f32 to vector<16x1xf32>
    %306 = arith.divf %304, %305 : vector<16x1xf32>
    %307 = arith.mulf %300, %300 : vector<16x32xf32>
    %cst_70 = arith.constant dense<0.000000e+00> : vector<16xf32>
    %308 = vector.multi_reduction <add>, %307, %cst_70 [1] : vector<16x32xf32> to vector<16xf32>
    %309 = vector.shape_cast %308 : vector<16xf32> to vector<16x1xf32>
    %cst_71 = arith.constant 3.200000e+01 : f32
    %310 = vector.broadcast %cst_71 : f32 to vector<16x1xf32>
    %311 = arith.divf %309, %310 : vector<16x1xf32>
    %312 = arith.mulf %306, %306 : vector<16x1xf32>
    %313 = arith.subf %311, %312 : vector<16x1xf32>
    %314 = vector.broadcast %306 : vector<16x1xf32> to vector<16x32xf32>
    %315 = arith.subf %300, %314 : vector<16x32xf32>
    %cst_72 = arith.constant 9.99999974E-6 : f32
    %316 = vector.broadcast %cst_72 : f32 to vector<16x1xf32>
    %317 = arith.addf %313, %316 : vector<16x1xf32>
    %318 = math.rsqrt %317 : vector<16x1xf32>
    %319 = vector.broadcast %318 : vector<16x1xf32> to vector<16x32xf32>
    %320 = vector.broadcast %301 : vector<1x32xf32> to vector<16x32xf32>
    %321 = arith.mulf %319, %320 : vector<16x32xf32>
    %322 = arith.mulf %315, %321 : vector<16x32xf32>
    %323 = vector.broadcast %302 : vector<1x32xf32> to vector<16x32xf32>
    %324 = arith.addf %322, %323 : vector<16x32xf32>
    %c1_73 = arith.constant 1 : index
    %c0_74 = arith.constant 0 : index
    %c0_75 = arith.constant 0 : index
    %325 = vector.load %arg4[%c1_73, %c0_74, %c0_75] : memref<6x32x128xf32, #tpu.memory_space<vmem>>, vector<1x32x128xf32>
    %326 = vector.shape_cast %325 : vector<1x32x128xf32> to vector<32x128xf32>
    %cst_76 = arith.constant dense<0.000000e+00> : vector<16x128xf32>
    %327 = tpu.matmul %324, %326, %cst_76 {dimension_numbers = #tpu.dot_dimension_numbers<[1], [0], [0], [1], [0, 0, 1, 1], [], []>} : vector<16x32xf32>, vector<32x128xf32>, vector<16x128xf32> -> vector<16x128xf32>
    %c1_77 = arith.constant 1 : index
    %c0_78 = arith.constant 0 : index
    %c0_79 = arith.constant 0 : index
    %328 = vector.load %arg5[%c1_77, %c0_78, %c0_79] : memref<6x1x128xf32, #tpu.memory_space<vmem>>, vector<1x1x128xf32>
    %329 = vector.shape_cast %328 : vector<1x1x128xf32> to vector<1x128xf32>
    %330 = vector.broadcast %329 : vector<1x128xf32> to vector<16x128xf32>
    %331 = arith.addf %327, %330 : vector<16x128xf32>
    %cst_80 = arith.constant 0.000000e+00 : f32
    %332 = vector.broadcast %cst_80 : f32 to vector<16x128xf32>
    %333 = arith.maximumf %331, %332 : vector<16x128xf32>
    %c1_81 = arith.constant 1 : index
    %c0_82 = arith.constant 0 : index
    %c0_83 = arith.constant 0 : index
    %334 = vector.load %arg6[%c1_81, %c0_82, %c0_83] : memref<6x128x32xf32, #tpu.memory_space<vmem>>, vector<1x128x32xf32>
    %335 = vector.shape_cast %334 : vector<1x128x32xf32> to vector<128x32xf32>
    %cst_84 = arith.constant dense<0.000000e+00> : vector<16x32xf32>
    %336 = tpu.matmul %333, %335, %cst_84 {dimension_numbers = #tpu.dot_dimension_numbers<[1], [0], [0], [1], [0, 0, 1, 1], [], []>} : vector<16x128xf32>, vector<128x32xf32>, vector<16x32xf32> -> vector<16x32xf32>
    %337 = vector.extract_strided_slice %293 {offsets = [1, 0], sizes = [1, 32], strides = [1, 1]} : vector<6x32xf32> to vector<1x32xf32>
    %338 = vector.broadcast %337 : vector<1x32xf32> to vector<16x32xf32>
    %339 = arith.addf %336, %338 : vector<16x32xf32>
    %340 = arith.addf %324, %339 : vector<16x32xf32>
    %341 = vector.extract_strided_slice %293 {offsets = [4, 0], sizes = [1, 32], strides = [1, 1]} : vector<6x32xf32> to vector<1x32xf32>
    %342 = vector.extract_strided_slice %293 {offsets = [5, 0], sizes = [1, 32], strides = [1, 1]} : vector<6x32xf32> to vector<1x32xf32>
    %cst_85 = arith.constant dense<0.000000e+00> : vector<16xf32>
    %343 = vector.multi_reduction <add>, %340, %cst_85 [1] : vector<16x32xf32> to vector<16xf32>
    %344 = vector.shape_cast %343 : vector<16xf32> to vector<16x1xf32>
    %cst_86 = arith.constant 3.200000e+01 : f32
    %345 = vector.broadcast %cst_86 : f32 to vector<16x1xf32>
    %346 = arith.divf %344, %345 : vector<16x1xf32>
    %347 = arith.mulf %340, %340 : vector<16x32xf32>
    %cst_87 = arith.constant dense<0.000000e+00> : vector<16xf32>
    %348 = vector.multi_reduction <add>, %347, %cst_87 [1] : vector<16x32xf32> to vector<16xf32>
    %349 = vector.shape_cast %348 : vector<16xf32> to vector<16x1xf32>
    %cst_88 = arith.constant 3.200000e+01 : f32
    %350 = vector.broadcast %cst_88 : f32 to vector<16x1xf32>
    %351 = arith.divf %349, %350 : vector<16x1xf32>
    %352 = arith.mulf %346, %346 : vector<16x1xf32>
    %353 = arith.subf %351, %352 : vector<16x1xf32>
    %354 = vector.broadcast %346 : vector<16x1xf32> to vector<16x32xf32>
    %355 = arith.subf %340, %354 : vector<16x32xf32>
    %cst_89 = arith.constant 9.99999974E-6 : f32
    %356 = vector.broadcast %cst_89 : f32 to vector<16x1xf32>
    %357 = arith.addf %353, %356 : vector<16x1xf32>
    %358 = math.rsqrt %357 : vector<16x1xf32>
    %359 = vector.broadcast %358 : vector<16x1xf32> to vector<16x32xf32>
    %360 = vector.broadcast %341 : vector<1x32xf32> to vector<16x32xf32>
    %361 = arith.mulf %359, %360 : vector<16x32xf32>
    %362 = arith.mulf %355, %361 : vector<16x32xf32>
    %363 = vector.broadcast %342 : vector<1x32xf32> to vector<16x32xf32>
    %364 = arith.addf %362, %363 : vector<16x32xf32>
    %c2 = arith.constant 2 : index
    %c0_90 = arith.constant 0 : index
    %c0_91 = arith.constant 0 : index
    %365 = vector.load %arg1[%c2, %c0_90, %c0_91] : memref<6x32x96xf32, #tpu.memory_space<vmem>>, vector<1x32x96xf32>
    %366 = vector.shape_cast %365 : vector<1x32x96xf32> to vector<32x96xf32>
    %cst_92 = arith.constant dense<0.000000e+00> : vector<16x96xf32>
    %367 = tpu.matmul %364, %366, %cst_92 {dimension_numbers = #tpu.dot_dimension_numbers<[1], [0], [0], [1], [0, 0, 1, 1], [], []>} : vector<16x32xf32>, vector<32x96xf32>, vector<16x96xf32> -> vector<16x96xf32>
    %c2_93 = arith.constant 2 : index
    %c0_94 = arith.constant 0 : index
    %c0_95 = arith.constant 0 : index
    %368 = vector.load %arg2[%c2_93, %c0_94, %c0_95] : memref<6x1x96xf32, #tpu.memory_space<vmem>>, vector<1x1x96xf32>
    %369 = vector.shape_cast %368 : vector<1x1x96xf32> to vector<1x96xf32>
    %370 = vector.broadcast %369 : vector<1x96xf32> to vector<16x96xf32>
    %371 = arith.addf %367, %370 : vector<16x96xf32>
    %372 = vector.extract_strided_slice %371 {offsets = [0, 0], sizes = [16, 4], strides = [1, 1]} : vector<16x96xf32> to vector<16x4xf32>
    %373 = vector.extract_strided_slice %371 {offsets = [0, 4], sizes = [16, 4], strides = [1, 1]} : vector<16x96xf32> to vector<16x4xf32>
    %374 = vector.extract_strided_slice %371 {offsets = [0, 8], sizes = [16, 4], strides = [1, 1]} : vector<16x96xf32> to vector<16x4xf32>
    %375 = vector.extract_strided_slice %371 {offsets = [0, 12], sizes = [16, 4], strides = [1, 1]} : vector<16x96xf32> to vector<16x4xf32>
    %376 = vector.extract_strided_slice %371 {offsets = [0, 16], sizes = [16, 4], strides = [1, 1]} : vector<16x96xf32> to vector<16x4xf32>
    %377 = vector.extract_strided_slice %371 {offsets = [0, 20], sizes = [16, 4], strides = [1, 1]} : vector<16x96xf32> to vector<16x4xf32>
    %378 = vector.extract_strided_slice %371 {offsets = [0, 24], sizes = [16, 4], strides = [1, 1]} : vector<16x96xf32> to vector<16x4xf32>
    %379 = vector.extract_strided_slice %371 {offsets = [0, 28], sizes = [16, 4], strides = [1, 1]} : vector<16x96xf32> to vector<16x4xf32>
    %380 = vector.shape_cast %372 : vector<16x4xf32> to vector<1x16x4xf32>
    %381 = vector.shape_cast %373 : vector<16x4xf32> to vector<1x16x4xf32>
    %382 = vector.shape_cast %374 : vector<16x4xf32> to vector<1x16x4xf32>
    %383 = vector.shape_cast %375 : vector<16x4xf32> to vector<1x16x4xf32>
    %384 = vector.shape_cast %376 : vector<16x4xf32> to vector<1x16x4xf32>
    %385 = vector.shape_cast %377 : vector<16x4xf32> to vector<1x16x4xf32>
    %386 = vector.shape_cast %378 : vector<16x4xf32> to vector<1x16x4xf32>
    %387 = vector.shape_cast %379 : vector<16x4xf32> to vector<1x16x4xf32>
    %388 = tpu.concatenate %380, %381, %382, %383, %384, %385, %386, %387 in 0 : vector<1x16x4xf32>, vector<1x16x4xf32>, vector<1x16x4xf32>, vector<1x16x4xf32>, vector<1x16x4xf32>, vector<1x16x4xf32>, vector<1x16x4xf32>, vector<1x16x4xf32> -> vector<8x16x4xf32>
    %389 = vector.extract_strided_slice %371 {offsets = [0, 32], sizes = [16, 4], strides = [1, 1]} : vector<16x96xf32> to vector<16x4xf32>
    %390 = vector.extract_strided_slice %371 {offsets = [0, 36], sizes = [16, 4], strides = [1, 1]} : vector<16x96xf32> to vector<16x4xf32>
    %391 = vector.extract_strided_slice %371 {offsets = [0, 40], sizes = [16, 4], strides = [1, 1]} : vector<16x96xf32> to vector<16x4xf32>
    %392 = vector.extract_strided_slice %371 {offsets = [0, 44], sizes = [16, 4], strides = [1, 1]} : vector<16x96xf32> to vector<16x4xf32>
    %393 = vector.extract_strided_slice %371 {offsets = [0, 48], sizes = [16, 4], strides = [1, 1]} : vector<16x96xf32> to vector<16x4xf32>
    %394 = vector.extract_strided_slice %371 {offsets = [0, 52], sizes = [16, 4], strides = [1, 1]} : vector<16x96xf32> to vector<16x4xf32>
    %395 = vector.extract_strided_slice %371 {offsets = [0, 56], sizes = [16, 4], strides = [1, 1]} : vector<16x96xf32> to vector<16x4xf32>
    %396 = vector.extract_strided_slice %371 {offsets = [0, 60], sizes = [16, 4], strides = [1, 1]} : vector<16x96xf32> to vector<16x4xf32>
    %397 = vector.shape_cast %389 : vector<16x4xf32> to vector<1x16x4xf32>
    %398 = vector.shape_cast %390 : vector<16x4xf32> to vector<1x16x4xf32>
    %399 = vector.shape_cast %391 : vector<16x4xf32> to vector<1x16x4xf32>
    %400 = vector.shape_cast %392 : vector<16x4xf32> to vector<1x16x4xf32>
    %401 = vector.shape_cast %393 : vector<16x4xf32> to vector<1x16x4xf32>
    %402 = vector.shape_cast %394 : vector<16x4xf32> to vector<1x16x4xf32>
    %403 = vector.shape_cast %395 : vector<16x4xf32> to vector<1x16x4xf32>
    %404 = vector.shape_cast %396 : vector<16x4xf32> to vector<1x16x4xf32>
    %405 = tpu.concatenate %397, %398, %399, %400, %401, %402, %403, %404 in 0 : vector<1x16x4xf32>, vector<1x16x4xf32>, vector<1x16x4xf32>, vector<1x16x4xf32>, vector<1x16x4xf32>, vector<1x16x4xf32>, vector<1x16x4xf32>, vector<1x16x4xf32> -> vector<8x16x4xf32>
    %406 = vector.extract_strided_slice %371 {offsets = [0, 64], sizes = [16, 4], strides = [1, 1]} : vector<16x96xf32> to vector<16x4xf32>
    %407 = vector.extract_strided_slice %371 {offsets = [0, 68], sizes = [16, 4], strides = [1, 1]} : vector<16x96xf32> to vector<16x4xf32>
    %408 = vector.extract_strided_slice %371 {offsets = [0, 72], sizes = [16, 4], strides = [1, 1]} : vector<16x96xf32> to vector<16x4xf32>
    %409 = vector.extract_strided_slice %371 {offsets = [0, 76], sizes = [16, 4], strides = [1, 1]} : vector<16x96xf32> to vector<16x4xf32>
    %410 = vector.extract_strided_slice %371 {offsets = [0, 80], sizes = [16, 4], strides = [1, 1]} : vector<16x96xf32> to vector<16x4xf32>
    %411 = vector.extract_strided_slice %371 {offsets = [0, 84], sizes = [16, 4], strides = [1, 1]} : vector<16x96xf32> to vector<16x4xf32>
    %412 = vector.extract_strided_slice %371 {offsets = [0, 88], sizes = [16, 4], strides = [1, 1]} : vector<16x96xf32> to vector<16x4xf32>
    %413 = vector.extract_strided_slice %371 {offsets = [0, 92], sizes = [16, 4], strides = [1, 1]} : vector<16x96xf32> to vector<16x4xf32>
    %414 = vector.shape_cast %406 : vector<16x4xf32> to vector<1x16x4xf32>
    %415 = vector.shape_cast %407 : vector<16x4xf32> to vector<1x16x4xf32>
    %416 = vector.shape_cast %408 : vector<16x4xf32> to vector<1x16x4xf32>
    %417 = vector.shape_cast %409 : vector<16x4xf32> to vector<1x16x4xf32>
    %418 = vector.shape_cast %410 : vector<16x4xf32> to vector<1x16x4xf32>
    %419 = vector.shape_cast %411 : vector<16x4xf32> to vector<1x16x4xf32>
    %420 = vector.shape_cast %412 : vector<16x4xf32> to vector<1x16x4xf32>
    %421 = vector.shape_cast %413 : vector<16x4xf32> to vector<1x16x4xf32>
    %422 = tpu.concatenate %414, %415, %416, %417, %418, %419, %420, %421 in 0 : vector<1x16x4xf32>, vector<1x16x4xf32>, vector<1x16x4xf32>, vector<1x16x4xf32>, vector<1x16x4xf32>, vector<1x16x4xf32>, vector<1x16x4xf32>, vector<1x16x4xf32> -> vector<8x16x4xf32>
    "tpu.trace_start"() <{level = 10 : i32, message = "hqd,hkd->hqk"}> : () -> ()
    %cst_96 = arith.constant dense<0.000000e+00> : vector<8x16x16xf32>
    %423 = tpu.matmul %388, %405, %cst_96 {dimension_numbers = #tpu.dot_dimension_numbers<[2], [2], [1], [1], [0, 0, 0, 1, 1, 1], [0], [0]>} : vector<8x16x4xf32>, vector<8x16x4xf32>, vector<8x16x16xf32> -> vector<8x16x16xf32>
    "tpu.trace_stop"() : () -> ()
    %424 = vector.shape_cast %37 : vector<16x16xf32> to vector<1x16x16xf32>
    %425 = vector.broadcast %424 : vector<1x16x16xf32> to vector<8x16x16xf32>
    %426 = arith.addf %423, %425 : vector<8x16x16xf32>
    %cst_97 = arith.constant dense<0xFF800000> : vector<8x16xf32>
    %427 = vector.multi_reduction <maximumf>, %426, %cst_97 [2] : vector<8x16x16xf32> to vector<8x16xf32>
    %428 = vector.shape_cast %427 : vector<8x16xf32> to vector<8x16x1xf32>
    %429 = vector.broadcast %428 : vector<8x16x1xf32> to vector<8x16x16xf32>
    %430 = arith.subf %426, %429 : vector<8x16x16xf32>
    %431 = math.exp %430 : vector<8x16x16xf32>
    %cst_98 = arith.constant dense<0.000000e+00> : vector<8x16xf32>
    %432 = vector.multi_reduction <add>, %431, %cst_98 [2] : vector<8x16x16xf32> to vector<8x16xf32>
    %433 = vector.shape_cast %432 : vector<8x16xf32> to vector<8x16x1xf32>
    %434 = tpu.reciprocal %433 : vector<8x16x1xf32> -> vector<8x16x1xf32>
    %435 = vector.broadcast %434 : vector<8x16x1xf32> to vector<8x16x16xf32>
    %436 = arith.mulf %431, %435 : vector<8x16x16xf32>
    "tpu.trace_start"() <{level = 10 : i32, message = "hqk,hkd->hqd"}> : () -> ()
    %cst_99 = arith.constant dense<0.000000e+00> : vector<8x16x4xf32>
    %437 = tpu.matmul %436, %422, %cst_99 {dimension_numbers = #tpu.dot_dimension_numbers<[2], [1], [1], [2], [0, 0, 0, 1, 1, 2], [0], [0]>} : vector<8x16x16xf32>, vector<8x16x4xf32>, vector<8x16x4xf32> -> vector<8x16x4xf32>
    "tpu.trace_stop"() : () -> ()
    %438 = vector.extract_strided_slice %437 {offsets = [0, 0, 0], sizes = [1, 16, 4], strides = [1, 1, 1]} : vector<8x16x4xf32> to vector<1x16x4xf32>
    %439 = vector.shape_cast %438 : vector<1x16x4xf32> to vector<16x4xf32>
    %440 = vector.extract_strided_slice %437 {offsets = [1, 0, 0], sizes = [1, 16, 4], strides = [1, 1, 1]} : vector<8x16x4xf32> to vector<1x16x4xf32>
    %441 = vector.shape_cast %440 : vector<1x16x4xf32> to vector<16x4xf32>
    %442 = vector.extract_strided_slice %437 {offsets = [2, 0, 0], sizes = [1, 16, 4], strides = [1, 1, 1]} : vector<8x16x4xf32> to vector<1x16x4xf32>
    %443 = vector.shape_cast %442 : vector<1x16x4xf32> to vector<16x4xf32>
    %444 = vector.extract_strided_slice %437 {offsets = [3, 0, 0], sizes = [1, 16, 4], strides = [1, 1, 1]} : vector<8x16x4xf32> to vector<1x16x4xf32>
    %445 = vector.shape_cast %444 : vector<1x16x4xf32> to vector<16x4xf32>
    %446 = vector.extract_strided_slice %437 {offsets = [4, 0, 0], sizes = [1, 16, 4], strides = [1, 1, 1]} : vector<8x16x4xf32> to vector<1x16x4xf32>
    %447 = vector.shape_cast %446 : vector<1x16x4xf32> to vector<16x4xf32>
    %448 = vector.extract_strided_slice %437 {offsets = [5, 0, 0], sizes = [1, 16, 4], strides = [1, 1, 1]} : vector<8x16x4xf32> to vector<1x16x4xf32>
    %449 = vector.shape_cast %448 : vector<1x16x4xf32> to vector<16x4xf32>
    %450 = vector.extract_strided_slice %437 {offsets = [6, 0, 0], sizes = [1, 16, 4], strides = [1, 1, 1]} : vector<8x16x4xf32> to vector<1x16x4xf32>
    %451 = vector.shape_cast %450 : vector<1x16x4xf32> to vector<16x4xf32>
    %452 = vector.extract_strided_slice %437 {offsets = [7, 0, 0], sizes = [1, 16, 4], strides = [1, 1, 1]} : vector<8x16x4xf32> to vector<1x16x4xf32>
    %453 = vector.shape_cast %452 : vector<1x16x4xf32> to vector<16x4xf32>
    %454 = tpu.concatenate %439, %441, %443, %445, %447, %449, %451, %453 in 1 : vector<16x4xf32>, vector<16x4xf32>, vector<16x4xf32>, vector<16x4xf32>, vector<16x4xf32>, vector<16x4xf32>, vector<16x4xf32>, vector<16x4xf32> -> vector<16x32xf32>
    %c2_100 = arith.constant 2 : index
    %c0_101 = arith.constant 0 : index
    %c0_102 = arith.constant 0 : index
    %455 = vector.load %arg7[%c2_100, %c0_101, %c0_102] : memref<6x6x32xf32, #tpu.memory_space<vmem>>, vector<1x6x32xf32>
    %456 = vector.shape_cast %455 : vector<1x6x32xf32> to vector<6x32xf32>
    %c2_103 = arith.constant 2 : index
    %c0_104 = arith.constant 0 : index
    %c0_105 = arith.constant 0 : index
    %457 = vector.load %arg3[%c2_103, %c0_104, %c0_105] : memref<6x32x32xf32, #tpu.memory_space<vmem>>, vector<1x32x32xf32>
    %458 = vector.shape_cast %457 : vector<1x32x32xf32> to vector<32x32xf32>
    %cst_106 = arith.constant dense<0.000000e+00> : vector<16x32xf32>
    %459 = tpu.matmul %454, %458, %cst_106 {dimension_numbers = #tpu.dot_dimension_numbers<[1], [0], [0], [1], [0, 0, 1, 1], [], []>} : vector<16x32xf32>, vector<32x32xf32>, vector<16x32xf32> -> vector<16x32xf32>
    %460 = vector.extract_strided_slice %456 {offsets = [0, 0], sizes = [1, 32], strides = [1, 1]} : vector<6x32xf32> to vector<1x32xf32>
    %461 = vector.broadcast %460 : vector<1x32xf32> to vector<16x32xf32>
    %462 = arith.addf %459, %461 : vector<16x32xf32>
    %463 = arith.addf %364, %462 : vector<16x32xf32>
    %464 = vector.extract_strided_slice %456 {offsets = [2, 0], sizes = [1, 32], strides = [1, 1]} : vector<6x32xf32> to vector<1x32xf32>
    %465 = vector.extract_strided_slice %456 {offsets = [3, 0], sizes = [1, 32], strides = [1, 1]} : vector<6x32xf32> to vector<1x32xf32>
    %cst_107 = arith.constant dense<0.000000e+00> : vector<16xf32>
    %466 = vector.multi_reduction <add>, %463, %cst_107 [1] : vector<16x32xf32> to vector<16xf32>
    %467 = vector.shape_cast %466 : vector<16xf32> to vector<16x1xf32>
    %cst_108 = arith.constant 3.200000e+01 : f32
    %468 = vector.broadcast %cst_108 : f32 to vector<16x1xf32>
    %469 = arith.divf %467, %468 : vector<16x1xf32>
    %470 = arith.mulf %463, %463 : vector<16x32xf32>
    %cst_109 = arith.constant dense<0.000000e+00> : vector<16xf32>
    %471 = vector.multi_reduction <add>, %470, %cst_109 [1] : vector<16x32xf32> to vector<16xf32>
    %472 = vector.shape_cast %471 : vector<16xf32> to vector<16x1xf32>
    %cst_110 = arith.constant 3.200000e+01 : f32
    %473 = vector.broadcast %cst_110 : f32 to vector<16x1xf32>
    %474 = arith.divf %472, %473 : vector<16x1xf32>
    %475 = arith.mulf %469, %469 : vector<16x1xf32>
    %476 = arith.subf %474, %475 : vector<16x1xf32>
    %477 = vector.broadcast %469 : vector<16x1xf32> to vector<16x32xf32>
    %478 = arith.subf %463, %477 : vector<16x32xf32>
    %cst_111 = arith.constant 9.99999974E-6 : f32
    %479 = vector.broadcast %cst_111 : f32 to vector<16x1xf32>
    %480 = arith.addf %476, %479 : vector<16x1xf32>
    %481 = math.rsqrt %480 : vector<16x1xf32>
    %482 = vector.broadcast %481 : vector<16x1xf32> to vector<16x32xf32>
    %483 = vector.broadcast %464 : vector<1x32xf32> to vector<16x32xf32>
    %484 = arith.mulf %482, %483 : vector<16x32xf32>
    %485 = arith.mulf %478, %484 : vector<16x32xf32>
    %486 = vector.broadcast %465 : vector<1x32xf32> to vector<16x32xf32>
    %487 = arith.addf %485, %486 : vector<16x32xf32>
    %c2_112 = arith.constant 2 : index
    %c0_113 = arith.constant 0 : index
    %c0_114 = arith.constant 0 : index
    %488 = vector.load %arg4[%c2_112, %c0_113, %c0_114] : memref<6x32x128xf32, #tpu.memory_space<vmem>>, vector<1x32x128xf32>
    %489 = vector.shape_cast %488 : vector<1x32x128xf32> to vector<32x128xf32>
    %cst_115 = arith.constant dense<0.000000e+00> : vector<16x128xf32>
    %490 = tpu.matmul %487, %489, %cst_115 {dimension_numbers = #tpu.dot_dimension_numbers<[1], [0], [0], [1], [0, 0, 1, 1], [], []>} : vector<16x32xf32>, vector<32x128xf32>, vector<16x128xf32> -> vector<16x128xf32>
    %c2_116 = arith.constant 2 : index
    %c0_117 = arith.constant 0 : index
    %c0_118 = arith.constant 0 : index
    %491 = vector.load %arg5[%c2_116, %c0_117, %c0_118] : memref<6x1x128xf32, #tpu.memory_space<vmem>>, vector<1x1x128xf32>
    %492 = vector.shape_cast %491 : vector<1x1x128xf32> to vector<1x128xf32>
    %493 = vector.broadcast %492 : vector<1x128xf32> to vector<16x128xf32>
    %494 = arith.addf %490, %493 : vector<16x128xf32>
    %cst_119 = arith.constant 0.000000e+00 : f32
    %495 = vector.broadcast %cst_119 : f32 to vector<16x128xf32>
    %496 = arith.maximumf %494, %495 : vector<16x128xf32>
    %c2_120 = arith.constant 2 : index
    %c0_121 = arith.constant 0 : index
    %c0_122 = arith.constant 0 : index
    %497 = vector.load %arg6[%c2_120, %c0_121, %c0_122] : memref<6x128x32xf32, #tpu.memory_space<vmem>>, vector<1x128x32xf32>
    %498 = vector.shape_cast %497 : vector<1x128x32xf32> to vector<128x32xf32>
    %cst_123 = arith.constant dense<0.000000e+00> : vector<16x32xf32>
    %499 = tpu.matmul %496, %498, %cst_123 {dimension_numbers = #tpu.dot_dimension_numbers<[1], [0], [0], [1], [0, 0, 1, 1], [], []>} : vector<16x128xf32>, vector<128x32xf32>, vector<16x32xf32> -> vector<16x32xf32>
    %500 = vector.extract_strided_slice %456 {offsets = [1, 0], sizes = [1, 32], strides = [1, 1]} : vector<6x32xf32> to vector<1x32xf32>
    %501 = vector.broadcast %500 : vector<1x32xf32> to vector<16x32xf32>
    %502 = arith.addf %499, %501 : vector<16x32xf32>
    %503 = arith.addf %487, %502 : vector<16x32xf32>
    %504 = vector.extract_strided_slice %456 {offsets = [4, 0], sizes = [1, 32], strides = [1, 1]} : vector<6x32xf32> to vector<1x32xf32>
    %505 = vector.extract_strided_slice %456 {offsets = [5, 0], sizes = [1, 32], strides = [1, 1]} : vector<6x32xf32> to vector<1x32xf32>
    %cst_124 = arith.constant dense<0.000000e+00> : vector<16xf32>
    %506 = vector.multi_reduction <add>, %503, %cst_124 [1] : vector<16x32xf32> to vector<16xf32>
    %507 = vector.shape_cast %506 : vector<16xf32> to vector<16x1xf32>
    %cst_125 = arith.constant 3.200000e+01 : f32
    %508 = vector.broadcast %cst_125 : f32 to vector<16x1xf32>
    %509 = arith.divf %507, %508 : vector<16x1xf32>
    %510 = arith.mulf %503, %503 : vector<16x32xf32>
    %cst_126 = arith.constant dense<0.000000e+00> : vector<16xf32>
    %511 = vector.multi_reduction <add>, %510, %cst_126 [1] : vector<16x32xf32> to vector<16xf32>
    %512 = vector.shape_cast %511 : vector<16xf32> to vector<16x1xf32>
    %cst_127 = arith.constant 3.200000e+01 : f32
    %513 = vector.broadcast %cst_127 : f32 to vector<16x1xf32>
    %514 = arith.divf %512, %513 : vector<16x1xf32>
    %515 = arith.mulf %509, %509 : vector<16x1xf32>
    %516 = arith.subf %514, %515 : vector<16x1xf32>
    %517 = vector.broadcast %509 : vector<16x1xf32> to vector<16x32xf32>
    %518 = arith.subf %503, %517 : vector<16x32xf32>
    %cst_128 = arith.constant 9.99999974E-6 : f32
    %519 = vector.broadcast %cst_128 : f32 to vector<16x1xf32>
    %520 = arith.addf %516, %519 : vector<16x1xf32>
    %521 = math.rsqrt %520 : vector<16x1xf32>
    %522 = vector.broadcast %521 : vector<16x1xf32> to vector<16x32xf32>
    %523 = vector.broadcast %504 : vector<1x32xf32> to vector<16x32xf32>
    %524 = arith.mulf %522, %523 : vector<16x32xf32>
    %525 = arith.mulf %518, %524 : vector<16x32xf32>
    %526 = vector.broadcast %505 : vector<1x32xf32> to vector<16x32xf32>
    %527 = arith.addf %525, %526 : vector<16x32xf32>
    %c3 = arith.constant 3 : index
    %c0_129 = arith.constant 0 : index
    %c0_130 = arith.constant 0 : index
    %528 = vector.load %arg1[%c3, %c0_129, %c0_130] : memref<6x32x96xf32, #tpu.memory_space<vmem>>, vector<1x32x96xf32>
    %529 = vector.shape_cast %528 : vector<1x32x96xf32> to vector<32x96xf32>
    %cst_131 = arith.constant dense<0.000000e+00> : vector<16x96xf32>
    %530 = tpu.matmul %527, %529, %cst_131 {dimension_numbers = #tpu.dot_dimension_numbers<[1], [0], [0], [1], [0, 0, 1, 1], [], []>} : vector<16x32xf32>, vector<32x96xf32>, vector<16x96xf32> -> vector<16x96xf32>
    %c3_132 = arith.constant 3 : index
    %c0_133 = arith.constant 0 : index
    %c0_134 = arith.constant 0 : index
    %531 = vector.load %arg2[%c3_132, %c0_133, %c0_134] : memref<6x1x96xf32, #tpu.memory_space<vmem>>, vector<1x1x96xf32>
    %532 = vector.shape_cast %531 : vector<1x1x96xf32> to vector<1x96xf32>
    %533 = vector.broadcast %532 : vector<1x96xf32> to vector<16x96xf32>
    %534 = arith.addf %530, %533 : vector<16x96xf32>
    %535 = vector.extract_strided_slice %534 {offsets = [0, 0], sizes = [16, 4], strides = [1, 1]} : vector<16x96xf32> to vector<16x4xf32>
    %536 = vector.extract_strided_slice %534 {offsets = [0, 4], sizes = [16, 4], strides = [1, 1]} : vector<16x96xf32> to vector<16x4xf32>
    %537 = vector.extract_strided_slice %534 {offsets = [0, 8], sizes = [16, 4], strides = [1, 1]} : vector<16x96xf32> to vector<16x4xf32>
    %538 = vector.extract_strided_slice %534 {offsets = [0, 12], sizes = [16, 4], strides = [1, 1]} : vector<16x96xf32> to vector<16x4xf32>
    %539 = vector.extract_strided_slice %534 {offsets = [0, 16], sizes = [16, 4], strides = [1, 1]} : vector<16x96xf32> to vector<16x4xf32>
    %540 = vector.extract_strided_slice %534 {offsets = [0, 20], sizes = [16, 4], strides = [1, 1]} : vector<16x96xf32> to vector<16x4xf32>
    %541 = vector.extract_strided_slice %534 {offsets = [0, 24], sizes = [16, 4], strides = [1, 1]} : vector<16x96xf32> to vector<16x4xf32>
    %542 = vector.extract_strided_slice %534 {offsets = [0, 28], sizes = [16, 4], strides = [1, 1]} : vector<16x96xf32> to vector<16x4xf32>
    %543 = vector.shape_cast %535 : vector<16x4xf32> to vector<1x16x4xf32>
    %544 = vector.shape_cast %536 : vector<16x4xf32> to vector<1x16x4xf32>
    %545 = vector.shape_cast %537 : vector<16x4xf32> to vector<1x16x4xf32>
    %546 = vector.shape_cast %538 : vector<16x4xf32> to vector<1x16x4xf32>
    %547 = vector.shape_cast %539 : vector<16x4xf32> to vector<1x16x4xf32>
    %548 = vector.shape_cast %540 : vector<16x4xf32> to vector<1x16x4xf32>
    %549 = vector.shape_cast %541 : vector<16x4xf32> to vector<1x16x4xf32>
    %550 = vector.shape_cast %542 : vector<16x4xf32> to vector<1x16x4xf32>
    %551 = tpu.concatenate %543, %544, %545, %546, %547, %548, %549, %550 in 0 : vector<1x16x4xf32>, vector<1x16x4xf32>, vector<1x16x4xf32>, vector<1x16x4xf32>, vector<1x16x4xf32>, vector<1x16x4xf32>, vector<1x16x4xf32>, vector<1x16x4xf32> -> vector<8x16x4xf32>
    %552 = vector.extract_strided_slice %534 {offsets = [0, 32], sizes = [16, 4], strides = [1, 1]} : vector<16x96xf32> to vector<16x4xf32>
    %553 = vector.extract_strided_slice %534 {offsets = [0, 36], sizes = [16, 4], strides = [1, 1]} : vector<16x96xf32> to vector<16x4xf32>
    %554 = vector.extract_strided_slice %534 {offsets = [0, 40], sizes = [16, 4], strides = [1, 1]} : vector<16x96xf32> to vector<16x4xf32>
    %555 = vector.extract_strided_slice %534 {offsets = [0, 44], sizes = [16, 4], strides = [1, 1]} : vector<16x96xf32> to vector<16x4xf32>
    %556 = vector.extract_strided_slice %534 {offsets = [0, 48], sizes = [16, 4], strides = [1, 1]} : vector<16x96xf32> to vector<16x4xf32>
    %557 = vector.extract_strided_slice %534 {offsets = [0, 52], sizes = [16, 4], strides = [1, 1]} : vector<16x96xf32> to vector<16x4xf32>
    %558 = vector.extract_strided_slice %534 {offsets = [0, 56], sizes = [16, 4], strides = [1, 1]} : vector<16x96xf32> to vector<16x4xf32>
    %559 = vector.extract_strided_slice %534 {offsets = [0, 60], sizes = [16, 4], strides = [1, 1]} : vector<16x96xf32> to vector<16x4xf32>
    %560 = vector.shape_cast %552 : vector<16x4xf32> to vector<1x16x4xf32>
    %561 = vector.shape_cast %553 : vector<16x4xf32> to vector<1x16x4xf32>
    %562 = vector.shape_cast %554 : vector<16x4xf32> to vector<1x16x4xf32>
    %563 = vector.shape_cast %555 : vector<16x4xf32> to vector<1x16x4xf32>
    %564 = vector.shape_cast %556 : vector<16x4xf32> to vector<1x16x4xf32>
    %565 = vector.shape_cast %557 : vector<16x4xf32> to vector<1x16x4xf32>
    %566 = vector.shape_cast %558 : vector<16x4xf32> to vector<1x16x4xf32>
    %567 = vector.shape_cast %559 : vector<16x4xf32> to vector<1x16x4xf32>
    %568 = tpu.concatenate %560, %561, %562, %563, %564, %565, %566, %567 in 0 : vector<1x16x4xf32>, vector<1x16x4xf32>, vector<1x16x4xf32>, vector<1x16x4xf32>, vector<1x16x4xf32>, vector<1x16x4xf32>, vector<1x16x4xf32>, vector<1x16x4xf32> -> vector<8x16x4xf32>
    %569 = vector.extract_strided_slice %534 {offsets = [0, 64], sizes = [16, 4], strides = [1, 1]} : vector<16x96xf32> to vector<16x4xf32>
    %570 = vector.extract_strided_slice %534 {offsets = [0, 68], sizes = [16, 4], strides = [1, 1]} : vector<16x96xf32> to vector<16x4xf32>
    %571 = vector.extract_strided_slice %534 {offsets = [0, 72], sizes = [16, 4], strides = [1, 1]} : vector<16x96xf32> to vector<16x4xf32>
    %572 = vector.extract_strided_slice %534 {offsets = [0, 76], sizes = [16, 4], strides = [1, 1]} : vector<16x96xf32> to vector<16x4xf32>
    %573 = vector.extract_strided_slice %534 {offsets = [0, 80], sizes = [16, 4], strides = [1, 1]} : vector<16x96xf32> to vector<16x4xf32>
    %574 = vector.extract_strided_slice %534 {offsets = [0, 84], sizes = [16, 4], strides = [1, 1]} : vector<16x96xf32> to vector<16x4xf32>
    %575 = vector.extract_strided_slice %534 {offsets = [0, 88], sizes = [16, 4], strides = [1, 1]} : vector<16x96xf32> to vector<16x4xf32>
    %576 = vector.extract_strided_slice %534 {offsets = [0, 92], sizes = [16, 4], strides = [1, 1]} : vector<16x96xf32> to vector<16x4xf32>
    %577 = vector.shape_cast %569 : vector<16x4xf32> to vector<1x16x4xf32>
    %578 = vector.shape_cast %570 : vector<16x4xf32> to vector<1x16x4xf32>
    %579 = vector.shape_cast %571 : vector<16x4xf32> to vector<1x16x4xf32>
    %580 = vector.shape_cast %572 : vector<16x4xf32> to vector<1x16x4xf32>
    %581 = vector.shape_cast %573 : vector<16x4xf32> to vector<1x16x4xf32>
    %582 = vector.shape_cast %574 : vector<16x4xf32> to vector<1x16x4xf32>
    %583 = vector.shape_cast %575 : vector<16x4xf32> to vector<1x16x4xf32>
    %584 = vector.shape_cast %576 : vector<16x4xf32> to vector<1x16x4xf32>
    %585 = tpu.concatenate %577, %578, %579, %580, %581, %582, %583, %584 in 0 : vector<1x16x4xf32>, vector<1x16x4xf32>, vector<1x16x4xf32>, vector<1x16x4xf32>, vector<1x16x4xf32>, vector<1x16x4xf32>, vector<1x16x4xf32>, vector<1x16x4xf32> -> vector<8x16x4xf32>
    "tpu.trace_start"() <{level = 10 : i32, message = "hqd,hkd->hqk"}> : () -> ()
    %cst_135 = arith.constant dense<0.000000e+00> : vector<8x16x16xf32>
    %586 = tpu.matmul %551, %568, %cst_135 {dimension_numbers = #tpu.dot_dimension_numbers<[2], [2], [1], [1], [0, 0, 0, 1, 1, 1], [0], [0]>} : vector<8x16x4xf32>, vector<8x16x4xf32>, vector<8x16x16xf32> -> vector<8x16x16xf32>
    "tpu.trace_stop"() : () -> ()
    %587 = vector.shape_cast %37 : vector<16x16xf32> to vector<1x16x16xf32>
    %588 = vector.broadcast %587 : vector<1x16x16xf32> to vector<8x16x16xf32>
    %589 = arith.addf %586, %588 : vector<8x16x16xf32>
    %cst_136 = arith.constant dense<0xFF800000> : vector<8x16xf32>
    %590 = vector.multi_reduction <maximumf>, %589, %cst_136 [2] : vector<8x16x16xf32> to vector<8x16xf32>
    %591 = vector.shape_cast %590 : vector<8x16xf32> to vector<8x16x1xf32>
    %592 = vector.broadcast %591 : vector<8x16x1xf32> to vector<8x16x16xf32>
    %593 = arith.subf %589, %592 : vector<8x16x16xf32>
    %594 = math.exp %593 : vector<8x16x16xf32>
    %cst_137 = arith.constant dense<0.000000e+00> : vector<8x16xf32>
    %595 = vector.multi_reduction <add>, %594, %cst_137 [2] : vector<8x16x16xf32> to vector<8x16xf32>
    %596 = vector.shape_cast %595 : vector<8x16xf32> to vector<8x16x1xf32>
    %597 = tpu.reciprocal %596 : vector<8x16x1xf32> -> vector<8x16x1xf32>
    %598 = vector.broadcast %597 : vector<8x16x1xf32> to vector<8x16x16xf32>
    %599 = arith.mulf %594, %598 : vector<8x16x16xf32>
    "tpu.trace_start"() <{level = 10 : i32, message = "hqk,hkd->hqd"}> : () -> ()
    %cst_138 = arith.constant dense<0.000000e+00> : vector<8x16x4xf32>
    %600 = tpu.matmul %599, %585, %cst_138 {dimension_numbers = #tpu.dot_dimension_numbers<[2], [1], [1], [2], [0, 0, 0, 1, 1, 2], [0], [0]>} : vector<8x16x16xf32>, vector<8x16x4xf32>, vector<8x16x4xf32> -> vector<8x16x4xf32>
    "tpu.trace_stop"() : () -> ()
    %601 = vector.extract_strided_slice %600 {offsets = [0, 0, 0], sizes = [1, 16, 4], strides = [1, 1, 1]} : vector<8x16x4xf32> to vector<1x16x4xf32>
    %602 = vector.shape_cast %601 : vector<1x16x4xf32> to vector<16x4xf32>
    %603 = vector.extract_strided_slice %600 {offsets = [1, 0, 0], sizes = [1, 16, 4], strides = [1, 1, 1]} : vector<8x16x4xf32> to vector<1x16x4xf32>
    %604 = vector.shape_cast %603 : vector<1x16x4xf32> to vector<16x4xf32>
    %605 = vector.extract_strided_slice %600 {offsets = [2, 0, 0], sizes = [1, 16, 4], strides = [1, 1, 1]} : vector<8x16x4xf32> to vector<1x16x4xf32>
    %606 = vector.shape_cast %605 : vector<1x16x4xf32> to vector<16x4xf32>
    %607 = vector.extract_strided_slice %600 {offsets = [3, 0, 0], sizes = [1, 16, 4], strides = [1, 1, 1]} : vector<8x16x4xf32> to vector<1x16x4xf32>
    %608 = vector.shape_cast %607 : vector<1x16x4xf32> to vector<16x4xf32>
    %609 = vector.extract_strided_slice %600 {offsets = [4, 0, 0], sizes = [1, 16, 4], strides = [1, 1, 1]} : vector<8x16x4xf32> to vector<1x16x4xf32>
    %610 = vector.shape_cast %609 : vector<1x16x4xf32> to vector<16x4xf32>
    %611 = vector.extract_strided_slice %600 {offsets = [5, 0, 0], sizes = [1, 16, 4], strides = [1, 1, 1]} : vector<8x16x4xf32> to vector<1x16x4xf32>
    %612 = vector.shape_cast %611 : vector<1x16x4xf32> to vector<16x4xf32>
    %613 = vector.extract_strided_slice %600 {offsets = [6, 0, 0], sizes = [1, 16, 4], strides = [1, 1, 1]} : vector<8x16x4xf32> to vector<1x16x4xf32>
    %614 = vector.shape_cast %613 : vector<1x16x4xf32> to vector<16x4xf32>
    %615 = vector.extract_strided_slice %600 {offsets = [7, 0, 0], sizes = [1, 16, 4], strides = [1, 1, 1]} : vector<8x16x4xf32> to vector<1x16x4xf32>
    %616 = vector.shape_cast %615 : vector<1x16x4xf32> to vector<16x4xf32>
    %617 = tpu.concatenate %602, %604, %606, %608, %610, %612, %614, %616 in 1 : vector<16x4xf32>, vector<16x4xf32>, vector<16x4xf32>, vector<16x4xf32>, vector<16x4xf32>, vector<16x4xf32>, vector<16x4xf32>, vector<16x4xf32> -> vector<16x32xf32>
    %c3_139 = arith.constant 3 : index
    %c0_140 = arith.constant 0 : index
    %c0_141 = arith.constant 0 : index
    %618 = vector.load %arg7[%c3_139, %c0_140, %c0_141] : memref<6x6x32xf32, #tpu.memory_space<vmem>>, vector<1x6x32xf32>
    %619 = vector.shape_cast %618 : vector<1x6x32xf32> to vector<6x32xf32>
    %c3_142 = arith.constant 3 : index
    %c0_143 = arith.constant 0 : index
    %c0_144 = arith.constant 0 : index
    %620 = vector.load %arg3[%c3_142, %c0_143, %c0_144] : memref<6x32x32xf32, #tpu.memory_space<vmem>>, vector<1x32x32xf32>
    %621 = vector.shape_cast %620 : vector<1x32x32xf32> to vector<32x32xf32>
    %cst_145 = arith.constant dense<0.000000e+00> : vector<16x32xf32>
    %622 = tpu.matmul %617, %621, %cst_145 {dimension_numbers = #tpu.dot_dimension_numbers<[1], [0], [0], [1], [0, 0, 1, 1], [], []>} : vector<16x32xf32>, vector<32x32xf32>, vector<16x32xf32> -> vector<16x32xf32>
    %623 = vector.extract_strided_slice %619 {offsets = [0, 0], sizes = [1, 32], strides = [1, 1]} : vector<6x32xf32> to vector<1x32xf32>
    %624 = vector.broadcast %623 : vector<1x32xf32> to vector<16x32xf32>
    %625 = arith.addf %622, %624 : vector<16x32xf32>
    %626 = arith.addf %527, %625 : vector<16x32xf32>
    %627 = vector.extract_strided_slice %619 {offsets = [2, 0], sizes = [1, 32], strides = [1, 1]} : vector<6x32xf32> to vector<1x32xf32>
    %628 = vector.extract_strided_slice %619 {offsets = [3, 0], sizes = [1, 32], strides = [1, 1]} : vector<6x32xf32> to vector<1x32xf32>
    %cst_146 = arith.constant dense<0.000000e+00> : vector<16xf32>
    %629 = vector.multi_reduction <add>, %626, %cst_146 [1] : vector<16x32xf32> to vector<16xf32>
    %630 = vector.shape_cast %629 : vector<16xf32> to vector<16x1xf32>
    %cst_147 = arith.constant 3.200000e+01 : f32
    %631 = vector.broadcast %cst_147 : f32 to vector<16x1xf32>
    %632 = arith.divf %630, %631 : vector<16x1xf32>
    %633 = arith.mulf %626, %626 : vector<16x32xf32>
    %cst_148 = arith.constant dense<0.000000e+00> : vector<16xf32>
    %634 = vector.multi_reduction <add>, %633, %cst_148 [1] : vector<16x32xf32> to vector<16xf32>
    %635 = vector.shape_cast %634 : vector<16xf32> to vector<16x1xf32>
    %cst_149 = arith.constant 3.200000e+01 : f32
    %636 = vector.broadcast %cst_149 : f32 to vector<16x1xf32>
    %637 = arith.divf %635, %636 : vector<16x1xf32>
    %638 = arith.mulf %632, %632 : vector<16x1xf32>
    %639 = arith.subf %637, %638 : vector<16x1xf32>
    %640 = vector.broadcast %632 : vector<16x1xf32> to vector<16x32xf32>
    %641 = arith.subf %626, %640 : vector<16x32xf32>
    %cst_150 = arith.constant 9.99999974E-6 : f32
    %642 = vector.broadcast %cst_150 : f32 to vector<16x1xf32>
    %643 = arith.addf %639, %642 : vector<16x1xf32>
    %644 = math.rsqrt %643 : vector<16x1xf32>
    %645 = vector.broadcast %644 : vector<16x1xf32> to vector<16x32xf32>
    %646 = vector.broadcast %627 : vector<1x32xf32> to vector<16x32xf32>
    %647 = arith.mulf %645, %646 : vector<16x32xf32>
    %648 = arith.mulf %641, %647 : vector<16x32xf32>
    %649 = vector.broadcast %628 : vector<1x32xf32> to vector<16x32xf32>
    %650 = arith.addf %648, %649 : vector<16x32xf32>
    %c3_151 = arith.constant 3 : index
    %c0_152 = arith.constant 0 : index
    %c0_153 = arith.constant 0 : index
    %651 = vector.load %arg4[%c3_151, %c0_152, %c0_153] : memref<6x32x128xf32, #tpu.memory_space<vmem>>, vector<1x32x128xf32>
    %652 = vector.shape_cast %651 : vector<1x32x128xf32> to vector<32x128xf32>
    %cst_154 = arith.constant dense<0.000000e+00> : vector<16x128xf32>
    %653 = tpu.matmul %650, %652, %cst_154 {dimension_numbers = #tpu.dot_dimension_numbers<[1], [0], [0], [1], [0, 0, 1, 1], [], []>} : vector<16x32xf32>, vector<32x128xf32>, vector<16x128xf32> -> vector<16x128xf32>
    %c3_155 = arith.constant 3 : index
    %c0_156 = arith.constant 0 : index
    %c0_157 = arith.constant 0 : index
    %654 = vector.load %arg5[%c3_155, %c0_156, %c0_157] : memref<6x1x128xf32, #tpu.memory_space<vmem>>, vector<1x1x128xf32>
    %655 = vector.shape_cast %654 : vector<1x1x128xf32> to vector<1x128xf32>
    %656 = vector.broadcast %655 : vector<1x128xf32> to vector<16x128xf32>
    %657 = arith.addf %653, %656 : vector<16x128xf32>
    %cst_158 = arith.constant 0.000000e+00 : f32
    %658 = vector.broadcast %cst_158 : f32 to vector<16x128xf32>
    %659 = arith.maximumf %657, %658 : vector<16x128xf32>
    %c3_159 = arith.constant 3 : index
    %c0_160 = arith.constant 0 : index
    %c0_161 = arith.constant 0 : index
    %660 = vector.load %arg6[%c3_159, %c0_160, %c0_161] : memref<6x128x32xf32, #tpu.memory_space<vmem>>, vector<1x128x32xf32>
    %661 = vector.shape_cast %660 : vector<1x128x32xf32> to vector<128x32xf32>
    %cst_162 = arith.constant dense<0.000000e+00> : vector<16x32xf32>
    %662 = tpu.matmul %659, %661, %cst_162 {dimension_numbers = #tpu.dot_dimension_numbers<[1], [0], [0], [1], [0, 0, 1, 1], [], []>} : vector<16x128xf32>, vector<128x32xf32>, vector<16x32xf32> -> vector<16x32xf32>
    %663 = vector.extract_strided_slice %619 {offsets = [1, 0], sizes = [1, 32], strides = [1, 1]} : vector<6x32xf32> to vector<1x32xf32>
    %664 = vector.broadcast %663 : vector<1x32xf32> to vector<16x32xf32>
    %665 = arith.addf %662, %664 : vector<16x32xf32>
    %666 = arith.addf %650, %665 : vector<16x32xf32>
    %667 = vector.extract_strided_slice %619 {offsets = [4, 0], sizes = [1, 32], strides = [1, 1]} : vector<6x32xf32> to vector<1x32xf32>
    %668 = vector.extract_strided_slice %619 {offsets = [5, 0], sizes = [1, 32], strides = [1, 1]} : vector<6x32xf32> to vector<1x32xf32>
    %cst_163 = arith.constant dense<0.000000e+00> : vector<16xf32>
    %669 = vector.multi_reduction <add>, %666, %cst_163 [1] : vector<16x32xf32> to vector<16xf32>
    %670 = vector.shape_cast %669 : vector<16xf32> to vector<16x1xf32>
    %cst_164 = arith.constant 3.200000e+01 : f32
    %671 = vector.broadcast %cst_164 : f32 to vector<16x1xf32>
    %672 = arith.divf %670, %671 : vector<16x1xf32>
    %673 = arith.mulf %666, %666 : vector<16x32xf32>
    %cst_165 = arith.constant dense<0.000000e+00> : vector<16xf32>
    %674 = vector.multi_reduction <add>, %673, %cst_165 [1] : vector<16x32xf32> to vector<16xf32>
    %675 = vector.shape_cast %674 : vector<16xf32> to vector<16x1xf32>
    %cst_166 = arith.constant 3.200000e+01 : f32
    %676 = vector.broadcast %cst_166 : f32 to vector<16x1xf32>
    %677 = arith.divf %675, %676 : vector<16x1xf32>
    %678 = arith.mulf %672, %672 : vector<16x1xf32>
    %679 = arith.subf %677, %678 : vector<16x1xf32>
    %680 = vector.broadcast %672 : vector<16x1xf32> to vector<16x32xf32>
    %681 = arith.subf %666, %680 : vector<16x32xf32>
    %cst_167 = arith.constant 9.99999974E-6 : f32
    %682 = vector.broadcast %cst_167 : f32 to vector<16x1xf32>
    %683 = arith.addf %679, %682 : vector<16x1xf32>
    %684 = math.rsqrt %683 : vector<16x1xf32>
    %685 = vector.broadcast %684 : vector<16x1xf32> to vector<16x32xf32>
    %686 = vector.broadcast %667 : vector<1x32xf32> to vector<16x32xf32>
    %687 = arith.mulf %685, %686 : vector<16x32xf32>
    %688 = arith.mulf %681, %687 : vector<16x32xf32>
    %689 = vector.broadcast %668 : vector<1x32xf32> to vector<16x32xf32>
    %690 = arith.addf %688, %689 : vector<16x32xf32>
    %c4 = arith.constant 4 : index
    %c0_168 = arith.constant 0 : index
    %c0_169 = arith.constant 0 : index
    %691 = vector.load %arg1[%c4, %c0_168, %c0_169] : memref<6x32x96xf32, #tpu.memory_space<vmem>>, vector<1x32x96xf32>
    %692 = vector.shape_cast %691 : vector<1x32x96xf32> to vector<32x96xf32>
    %cst_170 = arith.constant dense<0.000000e+00> : vector<16x96xf32>
    %693 = tpu.matmul %690, %692, %cst_170 {dimension_numbers = #tpu.dot_dimension_numbers<[1], [0], [0], [1], [0, 0, 1, 1], [], []>} : vector<16x32xf32>, vector<32x96xf32>, vector<16x96xf32> -> vector<16x96xf32>
    %c4_171 = arith.constant 4 : index
    %c0_172 = arith.constant 0 : index
    %c0_173 = arith.constant 0 : index
    %694 = vector.load %arg2[%c4_171, %c0_172, %c0_173] : memref<6x1x96xf32, #tpu.memory_space<vmem>>, vector<1x1x96xf32>
    %695 = vector.shape_cast %694 : vector<1x1x96xf32> to vector<1x96xf32>
    %696 = vector.broadcast %695 : vector<1x96xf32> to vector<16x96xf32>
    %697 = arith.addf %693, %696 : vector<16x96xf32>
    %698 = vector.extract_strided_slice %697 {offsets = [0, 0], sizes = [16, 4], strides = [1, 1]} : vector<16x96xf32> to vector<16x4xf32>
    %699 = vector.extract_strided_slice %697 {offsets = [0, 4], sizes = [16, 4], strides = [1, 1]} : vector<16x96xf32> to vector<16x4xf32>
    %700 = vector.extract_strided_slice %697 {offsets = [0, 8], sizes = [16, 4], strides = [1, 1]} : vector<16x96xf32> to vector<16x4xf32>
    %701 = vector.extract_strided_slice %697 {offsets = [0, 12], sizes = [16, 4], strides = [1, 1]} : vector<16x96xf32> to vector<16x4xf32>
    %702 = vector.extract_strided_slice %697 {offsets = [0, 16], sizes = [16, 4], strides = [1, 1]} : vector<16x96xf32> to vector<16x4xf32>
    %703 = vector.extract_strided_slice %697 {offsets = [0, 20], sizes = [16, 4], strides = [1, 1]} : vector<16x96xf32> to vector<16x4xf32>
    %704 = vector.extract_strided_slice %697 {offsets = [0, 24], sizes = [16, 4], strides = [1, 1]} : vector<16x96xf32> to vector<16x4xf32>
    %705 = vector.extract_strided_slice %697 {offsets = [0, 28], sizes = [16, 4], strides = [1, 1]} : vector<16x96xf32> to vector<16x4xf32>
    %706 = vector.shape_cast %698 : vector<16x4xf32> to vector<1x16x4xf32>
    %707 = vector.shape_cast %699 : vector<16x4xf32> to vector<1x16x4xf32>
    %708 = vector.shape_cast %700 : vector<16x4xf32> to vector<1x16x4xf32>
    %709 = vector.shape_cast %701 : vector<16x4xf32> to vector<1x16x4xf32>
    %710 = vector.shape_cast %702 : vector<16x4xf32> to vector<1x16x4xf32>
    %711 = vector.shape_cast %703 : vector<16x4xf32> to vector<1x16x4xf32>
    %712 = vector.shape_cast %704 : vector<16x4xf32> to vector<1x16x4xf32>
    %713 = vector.shape_cast %705 : vector<16x4xf32> to vector<1x16x4xf32>
    %714 = tpu.concatenate %706, %707, %708, %709, %710, %711, %712, %713 in 0 : vector<1x16x4xf32>, vector<1x16x4xf32>, vector<1x16x4xf32>, vector<1x16x4xf32>, vector<1x16x4xf32>, vector<1x16x4xf32>, vector<1x16x4xf32>, vector<1x16x4xf32> -> vector<8x16x4xf32>
    %715 = vector.extract_strided_slice %697 {offsets = [0, 32], sizes = [16, 4], strides = [1, 1]} : vector<16x96xf32> to vector<16x4xf32>
    %716 = vector.extract_strided_slice %697 {offsets = [0, 36], sizes = [16, 4], strides = [1, 1]} : vector<16x96xf32> to vector<16x4xf32>
    %717 = vector.extract_strided_slice %697 {offsets = [0, 40], sizes = [16, 4], strides = [1, 1]} : vector<16x96xf32> to vector<16x4xf32>
    %718 = vector.extract_strided_slice %697 {offsets = [0, 44], sizes = [16, 4], strides = [1, 1]} : vector<16x96xf32> to vector<16x4xf32>
    %719 = vector.extract_strided_slice %697 {offsets = [0, 48], sizes = [16, 4], strides = [1, 1]} : vector<16x96xf32> to vector<16x4xf32>
    %720 = vector.extract_strided_slice %697 {offsets = [0, 52], sizes = [16, 4], strides = [1, 1]} : vector<16x96xf32> to vector<16x4xf32>
    %721 = vector.extract_strided_slice %697 {offsets = [0, 56], sizes = [16, 4], strides = [1, 1]} : vector<16x96xf32> to vector<16x4xf32>
    %722 = vector.extract_strided_slice %697 {offsets = [0, 60], sizes = [16, 4], strides = [1, 1]} : vector<16x96xf32> to vector<16x4xf32>
    %723 = vector.shape_cast %715 : vector<16x4xf32> to vector<1x16x4xf32>
    %724 = vector.shape_cast %716 : vector<16x4xf32> to vector<1x16x4xf32>
    %725 = vector.shape_cast %717 : vector<16x4xf32> to vector<1x16x4xf32>
    %726 = vector.shape_cast %718 : vector<16x4xf32> to vector<1x16x4xf32>
    %727 = vector.shape_cast %719 : vector<16x4xf32> to vector<1x16x4xf32>
    %728 = vector.shape_cast %720 : vector<16x4xf32> to vector<1x16x4xf32>
    %729 = vector.shape_cast %721 : vector<16x4xf32> to vector<1x16x4xf32>
    %730 = vector.shape_cast %722 : vector<16x4xf32> to vector<1x16x4xf32>
    %731 = tpu.concatenate %723, %724, %725, %726, %727, %728, %729, %730 in 0 : vector<1x16x4xf32>, vector<1x16x4xf32>, vector<1x16x4xf32>, vector<1x16x4xf32>, vector<1x16x4xf32>, vector<1x16x4xf32>, vector<1x16x4xf32>, vector<1x16x4xf32> -> vector<8x16x4xf32>
    %732 = vector.extract_strided_slice %697 {offsets = [0, 64], sizes = [16, 4], strides = [1, 1]} : vector<16x96xf32> to vector<16x4xf32>
    %733 = vector.extract_strided_slice %697 {offsets = [0, 68], sizes = [16, 4], strides = [1, 1]} : vector<16x96xf32> to vector<16x4xf32>
    %734 = vector.extract_strided_slice %697 {offsets = [0, 72], sizes = [16, 4], strides = [1, 1]} : vector<16x96xf32> to vector<16x4xf32>
    %735 = vector.extract_strided_slice %697 {offsets = [0, 76], sizes = [16, 4], strides = [1, 1]} : vector<16x96xf32> to vector<16x4xf32>
    %736 = vector.extract_strided_slice %697 {offsets = [0, 80], sizes = [16, 4], strides = [1, 1]} : vector<16x96xf32> to vector<16x4xf32>
    %737 = vector.extract_strided_slice %697 {offsets = [0, 84], sizes = [16, 4], strides = [1, 1]} : vector<16x96xf32> to vector<16x4xf32>
    %738 = vector.extract_strided_slice %697 {offsets = [0, 88], sizes = [16, 4], strides = [1, 1]} : vector<16x96xf32> to vector<16x4xf32>
    %739 = vector.extract_strided_slice %697 {offsets = [0, 92], sizes = [16, 4], strides = [1, 1]} : vector<16x96xf32> to vector<16x4xf32>
    %740 = vector.shape_cast %732 : vector<16x4xf32> to vector<1x16x4xf32>
    %741 = vector.shape_cast %733 : vector<16x4xf32> to vector<1x16x4xf32>
    %742 = vector.shape_cast %734 : vector<16x4xf32> to vector<1x16x4xf32>
    %743 = vector.shape_cast %735 : vector<16x4xf32> to vector<1x16x4xf32>
    %744 = vector.shape_cast %736 : vector<16x4xf32> to vector<1x16x4xf32>
    %745 = vector.shape_cast %737 : vector<16x4xf32> to vector<1x16x4xf32>
    %746 = vector.shape_cast %738 : vector<16x4xf32> to vector<1x16x4xf32>
    %747 = vector.shape_cast %739 : vector<16x4xf32> to vector<1x16x4xf32>
    %748 = tpu.concatenate %740, %741, %742, %743, %744, %745, %746, %747 in 0 : vector<1x16x4xf32>, vector<1x16x4xf32>, vector<1x16x4xf32>, vector<1x16x4xf32>, vector<1x16x4xf32>, vector<1x16x4xf32>, vector<1x16x4xf32>, vector<1x16x4xf32> -> vector<8x16x4xf32>
    "tpu.trace_start"() <{level = 10 : i32, message = "hqd,hkd->hqk"}> : () -> ()
    %cst_174 = arith.constant dense<0.000000e+00> : vector<8x16x16xf32>
    %749 = tpu.matmul %714, %731, %cst_174 {dimension_numbers = #tpu.dot_dimension_numbers<[2], [2], [1], [1], [0, 0, 0, 1, 1, 1], [0], [0]>} : vector<8x16x4xf32>, vector<8x16x4xf32>, vector<8x16x16xf32> -> vector<8x16x16xf32>
    "tpu.trace_stop"() : () -> ()
    %750 = vector.shape_cast %37 : vector<16x16xf32> to vector<1x16x16xf32>
    %751 = vector.broadcast %750 : vector<1x16x16xf32> to vector<8x16x16xf32>
    %752 = arith.addf %749, %751 : vector<8x16x16xf32>
    %cst_175 = arith.constant dense<0xFF800000> : vector<8x16xf32>
    %753 = vector.multi_reduction <maximumf>, %752, %cst_175 [2] : vector<8x16x16xf32> to vector<8x16xf32>
    %754 = vector.shape_cast %753 : vector<8x16xf32> to vector<8x16x1xf32>
    %755 = vector.broadcast %754 : vector<8x16x1xf32> to vector<8x16x16xf32>
    %756 = arith.subf %752, %755 : vector<8x16x16xf32>
    %757 = math.exp %756 : vector<8x16x16xf32>
    %cst_176 = arith.constant dense<0.000000e+00> : vector<8x16xf32>
    %758 = vector.multi_reduction <add>, %757, %cst_176 [2] : vector<8x16x16xf32> to vector<8x16xf32>
    %759 = vector.shape_cast %758 : vector<8x16xf32> to vector<8x16x1xf32>
    %760 = tpu.reciprocal %759 : vector<8x16x1xf32> -> vector<8x16x1xf32>
    %761 = vector.broadcast %760 : vector<8x16x1xf32> to vector<8x16x16xf32>
    %762 = arith.mulf %757, %761 : vector<8x16x16xf32>
    "tpu.trace_start"() <{level = 10 : i32, message = "hqk,hkd->hqd"}> : () -> ()
    %cst_177 = arith.constant dense<0.000000e+00> : vector<8x16x4xf32>
    %763 = tpu.matmul %762, %748, %cst_177 {dimension_numbers = #tpu.dot_dimension_numbers<[2], [1], [1], [2], [0, 0, 0, 1, 1, 2], [0], [0]>} : vector<8x16x16xf32>, vector<8x16x4xf32>, vector<8x16x4xf32> -> vector<8x16x4xf32>
    "tpu.trace_stop"() : () -> ()
    %764 = vector.extract_strided_slice %763 {offsets = [0, 0, 0], sizes = [1, 16, 4], strides = [1, 1, 1]} : vector<8x16x4xf32> to vector<1x16x4xf32>
    %765 = vector.shape_cast %764 : vector<1x16x4xf32> to vector<16x4xf32>
    %766 = vector.extract_strided_slice %763 {offsets = [1, 0, 0], sizes = [1, 16, 4], strides = [1, 1, 1]} : vector<8x16x4xf32> to vector<1x16x4xf32>
    %767 = vector.shape_cast %766 : vector<1x16x4xf32> to vector<16x4xf32>
    %768 = vector.extract_strided_slice %763 {offsets = [2, 0, 0], sizes = [1, 16, 4], strides = [1, 1, 1]} : vector<8x16x4xf32> to vector<1x16x4xf32>
    %769 = vector.shape_cast %768 : vector<1x16x4xf32> to vector<16x4xf32>
    %770 = vector.extract_strided_slice %763 {offsets = [3, 0, 0], sizes = [1, 16, 4], strides = [1, 1, 1]} : vector<8x16x4xf32> to vector<1x16x4xf32>
    %771 = vector.shape_cast %770 : vector<1x16x4xf32> to vector<16x4xf32>
    %772 = vector.extract_strided_slice %763 {offsets = [4, 0, 0], sizes = [1, 16, 4], strides = [1, 1, 1]} : vector<8x16x4xf32> to vector<1x16x4xf32>
    %773 = vector.shape_cast %772 : vector<1x16x4xf32> to vector<16x4xf32>
    %774 = vector.extract_strided_slice %763 {offsets = [5, 0, 0], sizes = [1, 16, 4], strides = [1, 1, 1]} : vector<8x16x4xf32> to vector<1x16x4xf32>
    %775 = vector.shape_cast %774 : vector<1x16x4xf32> to vector<16x4xf32>
    %776 = vector.extract_strided_slice %763 {offsets = [6, 0, 0], sizes = [1, 16, 4], strides = [1, 1, 1]} : vector<8x16x4xf32> to vector<1x16x4xf32>
    %777 = vector.shape_cast %776 : vector<1x16x4xf32> to vector<16x4xf32>
    %778 = vector.extract_strided_slice %763 {offsets = [7, 0, 0], sizes = [1, 16, 4], strides = [1, 1, 1]} : vector<8x16x4xf32> to vector<1x16x4xf32>
    %779 = vector.shape_cast %778 : vector<1x16x4xf32> to vector<16x4xf32>
    %780 = tpu.concatenate %765, %767, %769, %771, %773, %775, %777, %779 in 1 : vector<16x4xf32>, vector<16x4xf32>, vector<16x4xf32>, vector<16x4xf32>, vector<16x4xf32>, vector<16x4xf32>, vector<16x4xf32>, vector<16x4xf32> -> vector<16x32xf32>
    %c4_178 = arith.constant 4 : index
    %c0_179 = arith.constant 0 : index
    %c0_180 = arith.constant 0 : index
    %781 = vector.load %arg7[%c4_178, %c0_179, %c0_180] : memref<6x6x32xf32, #tpu.memory_space<vmem>>, vector<1x6x32xf32>
    %782 = vector.shape_cast %781 : vector<1x6x32xf32> to vector<6x32xf32>
    %c4_181 = arith.constant 4 : index
    %c0_182 = arith.constant 0 : index
    %c0_183 = arith.constant 0 : index
    %783 = vector.load %arg3[%c4_181, %c0_182, %c0_183] : memref<6x32x32xf32, #tpu.memory_space<vmem>>, vector<1x32x32xf32>
    %784 = vector.shape_cast %783 : vector<1x32x32xf32> to vector<32x32xf32>
    %cst_184 = arith.constant dense<0.000000e+00> : vector<16x32xf32>
    %785 = tpu.matmul %780, %784, %cst_184 {dimension_numbers = #tpu.dot_dimension_numbers<[1], [0], [0], [1], [0, 0, 1, 1], [], []>} : vector<16x32xf32>, vector<32x32xf32>, vector<16x32xf32> -> vector<16x32xf32>
    %786 = vector.extract_strided_slice %782 {offsets = [0, 0], sizes = [1, 32], strides = [1, 1]} : vector<6x32xf32> to vector<1x32xf32>
    %787 = vector.broadcast %786 : vector<1x32xf32> to vector<16x32xf32>
    %788 = arith.addf %785, %787 : vector<16x32xf32>
    %789 = arith.addf %690, %788 : vector<16x32xf32>
    %790 = vector.extract_strided_slice %782 {offsets = [2, 0], sizes = [1, 32], strides = [1, 1]} : vector<6x32xf32> to vector<1x32xf32>
    %791 = vector.extract_strided_slice %782 {offsets = [3, 0], sizes = [1, 32], strides = [1, 1]} : vector<6x32xf32> to vector<1x32xf32>
    %cst_185 = arith.constant dense<0.000000e+00> : vector<16xf32>
    %792 = vector.multi_reduction <add>, %789, %cst_185 [1] : vector<16x32xf32> to vector<16xf32>
    %793 = vector.shape_cast %792 : vector<16xf32> to vector<16x1xf32>
    %cst_186 = arith.constant 3.200000e+01 : f32
    %794 = vector.broadcast %cst_186 : f32 to vector<16x1xf32>
    %795 = arith.divf %793, %794 : vector<16x1xf32>
    %796 = arith.mulf %789, %789 : vector<16x32xf32>
    %cst_187 = arith.constant dense<0.000000e+00> : vector<16xf32>
    %797 = vector.multi_reduction <add>, %796, %cst_187 [1] : vector<16x32xf32> to vector<16xf32>
    %798 = vector.shape_cast %797 : vector<16xf32> to vector<16x1xf32>
    %cst_188 = arith.constant 3.200000e+01 : f32
    %799 = vector.broadcast %cst_188 : f32 to vector<16x1xf32>
    %800 = arith.divf %798, %799 : vector<16x1xf32>
    %801 = arith.mulf %795, %795 : vector<16x1xf32>
    %802 = arith.subf %800, %801 : vector<16x1xf32>
    %803 = vector.broadcast %795 : vector<16x1xf32> to vector<16x32xf32>
    %804 = arith.subf %789, %803 : vector<16x32xf32>
    %cst_189 = arith.constant 9.99999974E-6 : f32
    %805 = vector.broadcast %cst_189 : f32 to vector<16x1xf32>
    %806 = arith.addf %802, %805 : vector<16x1xf32>
    %807 = math.rsqrt %806 : vector<16x1xf32>
    %808 = vector.broadcast %807 : vector<16x1xf32> to vector<16x32xf32>
    %809 = vector.broadcast %790 : vector<1x32xf32> to vector<16x32xf32>
    %810 = arith.mulf %808, %809 : vector<16x32xf32>
    %811 = arith.mulf %804, %810 : vector<16x32xf32>
    %812 = vector.broadcast %791 : vector<1x32xf32> to vector<16x32xf32>
    %813 = arith.addf %811, %812 : vector<16x32xf32>
    %c4_190 = arith.constant 4 : index
    %c0_191 = arith.constant 0 : index
    %c0_192 = arith.constant 0 : index
    %814 = vector.load %arg4[%c4_190, %c0_191, %c0_192] : memref<6x32x128xf32, #tpu.memory_space<vmem>>, vector<1x32x128xf32>
    %815 = vector.shape_cast %814 : vector<1x32x128xf32> to vector<32x128xf32>
    %cst_193 = arith.constant dense<0.000000e+00> : vector<16x128xf32>
    %816 = tpu.matmul %813, %815, %cst_193 {dimension_numbers = #tpu.dot_dimension_numbers<[1], [0], [0], [1], [0, 0, 1, 1], [], []>} : vector<16x32xf32>, vector<32x128xf32>, vector<16x128xf32> -> vector<16x128xf32>
    %c4_194 = arith.constant 4 : index
    %c0_195 = arith.constant 0 : index
    %c0_196 = arith.constant 0 : index
    %817 = vector.load %arg5[%c4_194, %c0_195, %c0_196] : memref<6x1x128xf32, #tpu.memory_space<vmem>>, vector<1x1x128xf32>
    %818 = vector.shape_cast %817 : vector<1x1x128xf32> to vector<1x128xf32>
    %819 = vector.broadcast %818 : vector<1x128xf32> to vector<16x128xf32>
    %820 = arith.addf %816, %819 : vector<16x128xf32>
    %cst_197 = arith.constant 0.000000e+00 : f32
    %821 = vector.broadcast %cst_197 : f32 to vector<16x128xf32>
    %822 = arith.maximumf %820, %821 : vector<16x128xf32>
    %c4_198 = arith.constant 4 : index
    %c0_199 = arith.constant 0 : index
    %c0_200 = arith.constant 0 : index
    %823 = vector.load %arg6[%c4_198, %c0_199, %c0_200] : memref<6x128x32xf32, #tpu.memory_space<vmem>>, vector<1x128x32xf32>
    %824 = vector.shape_cast %823 : vector<1x128x32xf32> to vector<128x32xf32>
    %cst_201 = arith.constant dense<0.000000e+00> : vector<16x32xf32>
    %825 = tpu.matmul %822, %824, %cst_201 {dimension_numbers = #tpu.dot_dimension_numbers<[1], [0], [0], [1], [0, 0, 1, 1], [], []>} : vector<16x128xf32>, vector<128x32xf32>, vector<16x32xf32> -> vector<16x32xf32>
    %826 = vector.extract_strided_slice %782 {offsets = [1, 0], sizes = [1, 32], strides = [1, 1]} : vector<6x32xf32> to vector<1x32xf32>
    %827 = vector.broadcast %826 : vector<1x32xf32> to vector<16x32xf32>
    %828 = arith.addf %825, %827 : vector<16x32xf32>
    %829 = arith.addf %813, %828 : vector<16x32xf32>
    %830 = vector.extract_strided_slice %782 {offsets = [4, 0], sizes = [1, 32], strides = [1, 1]} : vector<6x32xf32> to vector<1x32xf32>
    %831 = vector.extract_strided_slice %782 {offsets = [5, 0], sizes = [1, 32], strides = [1, 1]} : vector<6x32xf32> to vector<1x32xf32>
    %cst_202 = arith.constant dense<0.000000e+00> : vector<16xf32>
    %832 = vector.multi_reduction <add>, %829, %cst_202 [1] : vector<16x32xf32> to vector<16xf32>
    %833 = vector.shape_cast %832 : vector<16xf32> to vector<16x1xf32>
    %cst_203 = arith.constant 3.200000e+01 : f32
    %834 = vector.broadcast %cst_203 : f32 to vector<16x1xf32>
    %835 = arith.divf %833, %834 : vector<16x1xf32>
    %836 = arith.mulf %829, %829 : vector<16x32xf32>
    %cst_204 = arith.constant dense<0.000000e+00> : vector<16xf32>
    %837 = vector.multi_reduction <add>, %836, %cst_204 [1] : vector<16x32xf32> to vector<16xf32>
    %838 = vector.shape_cast %837 : vector<16xf32> to vector<16x1xf32>
    %cst_205 = arith.constant 3.200000e+01 : f32
    %839 = vector.broadcast %cst_205 : f32 to vector<16x1xf32>
    %840 = arith.divf %838, %839 : vector<16x1xf32>
    %841 = arith.mulf %835, %835 : vector<16x1xf32>
    %842 = arith.subf %840, %841 : vector<16x1xf32>
    %843 = vector.broadcast %835 : vector<16x1xf32> to vector<16x32xf32>
    %844 = arith.subf %829, %843 : vector<16x32xf32>
    %cst_206 = arith.constant 9.99999974E-6 : f32
    %845 = vector.broadcast %cst_206 : f32 to vector<16x1xf32>
    %846 = arith.addf %842, %845 : vector<16x1xf32>
    %847 = math.rsqrt %846 : vector<16x1xf32>
    %848 = vector.broadcast %847 : vector<16x1xf32> to vector<16x32xf32>
    %849 = vector.broadcast %830 : vector<1x32xf32> to vector<16x32xf32>
    %850 = arith.mulf %848, %849 : vector<16x32xf32>
    %851 = arith.mulf %844, %850 : vector<16x32xf32>
    %852 = vector.broadcast %831 : vector<1x32xf32> to vector<16x32xf32>
    %853 = arith.addf %851, %852 : vector<16x32xf32>
    %c5 = arith.constant 5 : index
    %c0_207 = arith.constant 0 : index
    %c0_208 = arith.constant 0 : index
    %854 = vector.load %arg1[%c5, %c0_207, %c0_208] : memref<6x32x96xf32, #tpu.memory_space<vmem>>, vector<1x32x96xf32>
    %855 = vector.shape_cast %854 : vector<1x32x96xf32> to vector<32x96xf32>
    %cst_209 = arith.constant dense<0.000000e+00> : vector<16x96xf32>
    %856 = tpu.matmul %853, %855, %cst_209 {dimension_numbers = #tpu.dot_dimension_numbers<[1], [0], [0], [1], [0, 0, 1, 1], [], []>} : vector<16x32xf32>, vector<32x96xf32>, vector<16x96xf32> -> vector<16x96xf32>
    %c5_210 = arith.constant 5 : index
    %c0_211 = arith.constant 0 : index
    %c0_212 = arith.constant 0 : index
    %857 = vector.load %arg2[%c5_210, %c0_211, %c0_212] : memref<6x1x96xf32, #tpu.memory_space<vmem>>, vector<1x1x96xf32>
    %858 = vector.shape_cast %857 : vector<1x1x96xf32> to vector<1x96xf32>
    %859 = vector.broadcast %858 : vector<1x96xf32> to vector<16x96xf32>
    %860 = arith.addf %856, %859 : vector<16x96xf32>
    %861 = vector.extract_strided_slice %860 {offsets = [0, 0], sizes = [16, 4], strides = [1, 1]} : vector<16x96xf32> to vector<16x4xf32>
    %862 = vector.extract_strided_slice %860 {offsets = [0, 4], sizes = [16, 4], strides = [1, 1]} : vector<16x96xf32> to vector<16x4xf32>
    %863 = vector.extract_strided_slice %860 {offsets = [0, 8], sizes = [16, 4], strides = [1, 1]} : vector<16x96xf32> to vector<16x4xf32>
    %864 = vector.extract_strided_slice %860 {offsets = [0, 12], sizes = [16, 4], strides = [1, 1]} : vector<16x96xf32> to vector<16x4xf32>
    %865 = vector.extract_strided_slice %860 {offsets = [0, 16], sizes = [16, 4], strides = [1, 1]} : vector<16x96xf32> to vector<16x4xf32>
    %866 = vector.extract_strided_slice %860 {offsets = [0, 20], sizes = [16, 4], strides = [1, 1]} : vector<16x96xf32> to vector<16x4xf32>
    %867 = vector.extract_strided_slice %860 {offsets = [0, 24], sizes = [16, 4], strides = [1, 1]} : vector<16x96xf32> to vector<16x4xf32>
    %868 = vector.extract_strided_slice %860 {offsets = [0, 28], sizes = [16, 4], strides = [1, 1]} : vector<16x96xf32> to vector<16x4xf32>
    %869 = vector.shape_cast %861 : vector<16x4xf32> to vector<1x16x4xf32>
    %870 = vector.shape_cast %862 : vector<16x4xf32> to vector<1x16x4xf32>
    %871 = vector.shape_cast %863 : vector<16x4xf32> to vector<1x16x4xf32>
    %872 = vector.shape_cast %864 : vector<16x4xf32> to vector<1x16x4xf32>
    %873 = vector.shape_cast %865 : vector<16x4xf32> to vector<1x16x4xf32>
    %874 = vector.shape_cast %866 : vector<16x4xf32> to vector<1x16x4xf32>
    %875 = vector.shape_cast %867 : vector<16x4xf32> to vector<1x16x4xf32>
    %876 = vector.shape_cast %868 : vector<16x4xf32> to vector<1x16x4xf32>
    %877 = tpu.concatenate %869, %870, %871, %872, %873, %874, %875, %876 in 0 : vector<1x16x4xf32>, vector<1x16x4xf32>, vector<1x16x4xf32>, vector<1x16x4xf32>, vector<1x16x4xf32>, vector<1x16x4xf32>, vector<1x16x4xf32>, vector<1x16x4xf32> -> vector<8x16x4xf32>
    %878 = vector.extract_strided_slice %860 {offsets = [0, 32], sizes = [16, 4], strides = [1, 1]} : vector<16x96xf32> to vector<16x4xf32>
    %879 = vector.extract_strided_slice %860 {offsets = [0, 36], sizes = [16, 4], strides = [1, 1]} : vector<16x96xf32> to vector<16x4xf32>
    %880 = vector.extract_strided_slice %860 {offsets = [0, 40], sizes = [16, 4], strides = [1, 1]} : vector<16x96xf32> to vector<16x4xf32>
    %881 = vector.extract_strided_slice %860 {offsets = [0, 44], sizes = [16, 4], strides = [1, 1]} : vector<16x96xf32> to vector<16x4xf32>
    %882 = vector.extract_strided_slice %860 {offsets = [0, 48], sizes = [16, 4], strides = [1, 1]} : vector<16x96xf32> to vector<16x4xf32>
    %883 = vector.extract_strided_slice %860 {offsets = [0, 52], sizes = [16, 4], strides = [1, 1]} : vector<16x96xf32> to vector<16x4xf32>
    %884 = vector.extract_strided_slice %860 {offsets = [0, 56], sizes = [16, 4], strides = [1, 1]} : vector<16x96xf32> to vector<16x4xf32>
    %885 = vector.extract_strided_slice %860 {offsets = [0, 60], sizes = [16, 4], strides = [1, 1]} : vector<16x96xf32> to vector<16x4xf32>
    %886 = vector.shape_cast %878 : vector<16x4xf32> to vector<1x16x4xf32>
    %887 = vector.shape_cast %879 : vector<16x4xf32> to vector<1x16x4xf32>
    %888 = vector.shape_cast %880 : vector<16x4xf32> to vector<1x16x4xf32>
    %889 = vector.shape_cast %881 : vector<16x4xf32> to vector<1x16x4xf32>
    %890 = vector.shape_cast %882 : vector<16x4xf32> to vector<1x16x4xf32>
    %891 = vector.shape_cast %883 : vector<16x4xf32> to vector<1x16x4xf32>
    %892 = vector.shape_cast %884 : vector<16x4xf32> to vector<1x16x4xf32>
    %893 = vector.shape_cast %885 : vector<16x4xf32> to vector<1x16x4xf32>
    %894 = tpu.concatenate %886, %887, %888, %889, %890, %891, %892, %893 in 0 : vector<1x16x4xf32>, vector<1x16x4xf32>, vector<1x16x4xf32>, vector<1x16x4xf32>, vector<1x16x4xf32>, vector<1x16x4xf32>, vector<1x16x4xf32>, vector<1x16x4xf32> -> vector<8x16x4xf32>
    %895 = vector.extract_strided_slice %860 {offsets = [0, 64], sizes = [16, 4], strides = [1, 1]} : vector<16x96xf32> to vector<16x4xf32>
    %896 = vector.extract_strided_slice %860 {offsets = [0, 68], sizes = [16, 4], strides = [1, 1]} : vector<16x96xf32> to vector<16x4xf32>
    %897 = vector.extract_strided_slice %860 {offsets = [0, 72], sizes = [16, 4], strides = [1, 1]} : vector<16x96xf32> to vector<16x4xf32>
    %898 = vector.extract_strided_slice %860 {offsets = [0, 76], sizes = [16, 4], strides = [1, 1]} : vector<16x96xf32> to vector<16x4xf32>
    %899 = vector.extract_strided_slice %860 {offsets = [0, 80], sizes = [16, 4], strides = [1, 1]} : vector<16x96xf32> to vector<16x4xf32>
    %900 = vector.extract_strided_slice %860 {offsets = [0, 84], sizes = [16, 4], strides = [1, 1]} : vector<16x96xf32> to vector<16x4xf32>
    %901 = vector.extract_strided_slice %860 {offsets = [0, 88], sizes = [16, 4], strides = [1, 1]} : vector<16x96xf32> to vector<16x4xf32>
    %902 = vector.extract_strided_slice %860 {offsets = [0, 92], sizes = [16, 4], strides = [1, 1]} : vector<16x96xf32> to vector<16x4xf32>
    %903 = vector.shape_cast %895 : vector<16x4xf32> to vector<1x16x4xf32>
    %904 = vector.shape_cast %896 : vector<16x4xf32> to vector<1x16x4xf32>
    %905 = vector.shape_cast %897 : vector<16x4xf32> to vector<1x16x4xf32>
    %906 = vector.shape_cast %898 : vector<16x4xf32> to vector<1x16x4xf32>
    %907 = vector.shape_cast %899 : vector<16x4xf32> to vector<1x16x4xf32>
    %908 = vector.shape_cast %900 : vector<16x4xf32> to vector<1x16x4xf32>
    %909 = vector.shape_cast %901 : vector<16x4xf32> to vector<1x16x4xf32>
    %910 = vector.shape_cast %902 : vector<16x4xf32> to vector<1x16x4xf32>
    %911 = tpu.concatenate %903, %904, %905, %906, %907, %908, %909, %910 in 0 : vector<1x16x4xf32>, vector<1x16x4xf32>, vector<1x16x4xf32>, vector<1x16x4xf32>, vector<1x16x4xf32>, vector<1x16x4xf32>, vector<1x16x4xf32>, vector<1x16x4xf32> -> vector<8x16x4xf32>
    "tpu.trace_start"() <{level = 10 : i32, message = "hqd,hkd->hqk"}> : () -> ()
    %cst_213 = arith.constant dense<0.000000e+00> : vector<8x16x16xf32>
    %912 = tpu.matmul %877, %894, %cst_213 {dimension_numbers = #tpu.dot_dimension_numbers<[2], [2], [1], [1], [0, 0, 0, 1, 1, 1], [0], [0]>} : vector<8x16x4xf32>, vector<8x16x4xf32>, vector<8x16x16xf32> -> vector<8x16x16xf32>
    "tpu.trace_stop"() : () -> ()
    %913 = vector.shape_cast %37 : vector<16x16xf32> to vector<1x16x16xf32>
    %914 = vector.broadcast %913 : vector<1x16x16xf32> to vector<8x16x16xf32>
    %915 = arith.addf %912, %914 : vector<8x16x16xf32>
    %cst_214 = arith.constant dense<0xFF800000> : vector<8x16xf32>
    %916 = vector.multi_reduction <maximumf>, %915, %cst_214 [2] : vector<8x16x16xf32> to vector<8x16xf32>
    %917 = vector.shape_cast %916 : vector<8x16xf32> to vector<8x16x1xf32>
    %918 = vector.broadcast %917 : vector<8x16x1xf32> to vector<8x16x16xf32>
    %919 = arith.subf %915, %918 : vector<8x16x16xf32>
    %920 = math.exp %919 : vector<8x16x16xf32>
    %cst_215 = arith.constant dense<0.000000e+00> : vector<8x16xf32>
    %921 = vector.multi_reduction <add>, %920, %cst_215 [2] : vector<8x16x16xf32> to vector<8x16xf32>
    %922 = vector.shape_cast %921 : vector<8x16xf32> to vector<8x16x1xf32>
    %923 = tpu.reciprocal %922 : vector<8x16x1xf32> -> vector<8x16x1xf32>
    %924 = vector.broadcast %923 : vector<8x16x1xf32> to vector<8x16x16xf32>
    %925 = arith.mulf %920, %924 : vector<8x16x16xf32>
    "tpu.trace_start"() <{level = 10 : i32, message = "hqk,hkd->hqd"}> : () -> ()
    %cst_216 = arith.constant dense<0.000000e+00> : vector<8x16x4xf32>
    %926 = tpu.matmul %925, %911, %cst_216 {dimension_numbers = #tpu.dot_dimension_numbers<[2], [1], [1], [2], [0, 0, 0, 1, 1, 2], [0], [0]>} : vector<8x16x16xf32>, vector<8x16x4xf32>, vector<8x16x4xf32> -> vector<8x16x4xf32>
    "tpu.trace_stop"() : () -> ()
    %927 = vector.extract_strided_slice %926 {offsets = [0, 0, 0], sizes = [1, 16, 4], strides = [1, 1, 1]} : vector<8x16x4xf32> to vector<1x16x4xf32>
    %928 = vector.shape_cast %927 : vector<1x16x4xf32> to vector<16x4xf32>
    %929 = vector.extract_strided_slice %926 {offsets = [1, 0, 0], sizes = [1, 16, 4], strides = [1, 1, 1]} : vector<8x16x4xf32> to vector<1x16x4xf32>
    %930 = vector.shape_cast %929 : vector<1x16x4xf32> to vector<16x4xf32>
    %931 = vector.extract_strided_slice %926 {offsets = [2, 0, 0], sizes = [1, 16, 4], strides = [1, 1, 1]} : vector<8x16x4xf32> to vector<1x16x4xf32>
    %932 = vector.shape_cast %931 : vector<1x16x4xf32> to vector<16x4xf32>
    %933 = vector.extract_strided_slice %926 {offsets = [3, 0, 0], sizes = [1, 16, 4], strides = [1, 1, 1]} : vector<8x16x4xf32> to vector<1x16x4xf32>
    %934 = vector.shape_cast %933 : vector<1x16x4xf32> to vector<16x4xf32>
    %935 = vector.extract_strided_slice %926 {offsets = [4, 0, 0], sizes = [1, 16, 4], strides = [1, 1, 1]} : vector<8x16x4xf32> to vector<1x16x4xf32>
    %936 = vector.shape_cast %935 : vector<1x16x4xf32> to vector<16x4xf32>
    %937 = vector.extract_strided_slice %926 {offsets = [5, 0, 0], sizes = [1, 16, 4], strides = [1, 1, 1]} : vector<8x16x4xf32> to vector<1x16x4xf32>
    %938 = vector.shape_cast %937 : vector<1x16x4xf32> to vector<16x4xf32>
    %939 = vector.extract_strided_slice %926 {offsets = [6, 0, 0], sizes = [1, 16, 4], strides = [1, 1, 1]} : vector<8x16x4xf32> to vector<1x16x4xf32>
    %940 = vector.shape_cast %939 : vector<1x16x4xf32> to vector<16x4xf32>
    %941 = vector.extract_strided_slice %926 {offsets = [7, 0, 0], sizes = [1, 16, 4], strides = [1, 1, 1]} : vector<8x16x4xf32> to vector<1x16x4xf32>
    %942 = vector.shape_cast %941 : vector<1x16x4xf32> to vector<16x4xf32>
    %943 = tpu.concatenate %928, %930, %932, %934, %936, %938, %940, %942 in 1 : vector<16x4xf32>, vector<16x4xf32>, vector<16x4xf32>, vector<16x4xf32>, vector<16x4xf32>, vector<16x4xf32>, vector<16x4xf32>, vector<16x4xf32> -> vector<16x32xf32>
    %c5_217 = arith.constant 5 : index
    %c0_218 = arith.constant 0 : index
    %c0_219 = arith.constant 0 : index
    %944 = vector.load %arg7[%c5_217, %c0_218, %c0_219] : memref<6x6x32xf32, #tpu.memory_space<vmem>>, vector<1x6x32xf32>
    %945 = vector.shape_cast %944 : vector<1x6x32xf32> to vector<6x32xf32>
    %c5_220 = arith.constant 5 : index
    %c0_221 = arith.constant 0 : index
    %c0_222 = arith.constant 0 : index
    %946 = vector.load %arg3[%c5_220, %c0_221, %c0_222] : memref<6x32x32xf32, #tpu.memory_space<vmem>>, vector<1x32x32xf32>
    %947 = vector.shape_cast %946 : vector<1x32x32xf32> to vector<32x32xf32>
    %cst_223 = arith.constant dense<0.000000e+00> : vector<16x32xf32>
    %948 = tpu.matmul %943, %947, %cst_223 {dimension_numbers = #tpu.dot_dimension_numbers<[1], [0], [0], [1], [0, 0, 1, 1], [], []>} : vector<16x32xf32>, vector<32x32xf32>, vector<16x32xf32> -> vector<16x32xf32>
    %949 = vector.extract_strided_slice %945 {offsets = [0, 0], sizes = [1, 32], strides = [1, 1]} : vector<6x32xf32> to vector<1x32xf32>
    %950 = vector.broadcast %949 : vector<1x32xf32> to vector<16x32xf32>
    %951 = arith.addf %948, %950 : vector<16x32xf32>
    %952 = arith.addf %853, %951 : vector<16x32xf32>
    %953 = vector.extract_strided_slice %945 {offsets = [2, 0], sizes = [1, 32], strides = [1, 1]} : vector<6x32xf32> to vector<1x32xf32>
    %954 = vector.extract_strided_slice %945 {offsets = [3, 0], sizes = [1, 32], strides = [1, 1]} : vector<6x32xf32> to vector<1x32xf32>
    %cst_224 = arith.constant dense<0.000000e+00> : vector<16xf32>
    %955 = vector.multi_reduction <add>, %952, %cst_224 [1] : vector<16x32xf32> to vector<16xf32>
    %956 = vector.shape_cast %955 : vector<16xf32> to vector<16x1xf32>
    %cst_225 = arith.constant 3.200000e+01 : f32
    %957 = vector.broadcast %cst_225 : f32 to vector<16x1xf32>
    %958 = arith.divf %956, %957 : vector<16x1xf32>
    %959 = arith.mulf %952, %952 : vector<16x32xf32>
    %cst_226 = arith.constant dense<0.000000e+00> : vector<16xf32>
    %960 = vector.multi_reduction <add>, %959, %cst_226 [1] : vector<16x32xf32> to vector<16xf32>
    %961 = vector.shape_cast %960 : vector<16xf32> to vector<16x1xf32>
    %cst_227 = arith.constant 3.200000e+01 : f32
    %962 = vector.broadcast %cst_227 : f32 to vector<16x1xf32>
    %963 = arith.divf %961, %962 : vector<16x1xf32>
    %964 = arith.mulf %958, %958 : vector<16x1xf32>
    %965 = arith.subf %963, %964 : vector<16x1xf32>
    %966 = vector.broadcast %958 : vector<16x1xf32> to vector<16x32xf32>
    %967 = arith.subf %952, %966 : vector<16x32xf32>
    %cst_228 = arith.constant 9.99999974E-6 : f32
    %968 = vector.broadcast %cst_228 : f32 to vector<16x1xf32>
    %969 = arith.addf %965, %968 : vector<16x1xf32>
    %970 = math.rsqrt %969 : vector<16x1xf32>
    %971 = vector.broadcast %970 : vector<16x1xf32> to vector<16x32xf32>
    %972 = vector.broadcast %953 : vector<1x32xf32> to vector<16x32xf32>
    %973 = arith.mulf %971, %972 : vector<16x32xf32>
    %974 = arith.mulf %967, %973 : vector<16x32xf32>
    %975 = vector.broadcast %954 : vector<1x32xf32> to vector<16x32xf32>
    %976 = arith.addf %974, %975 : vector<16x32xf32>
    %c5_229 = arith.constant 5 : index
    %c0_230 = arith.constant 0 : index
    %c0_231 = arith.constant 0 : index
    %977 = vector.load %arg4[%c5_229, %c0_230, %c0_231] : memref<6x32x128xf32, #tpu.memory_space<vmem>>, vector<1x32x128xf32>
    %978 = vector.shape_cast %977 : vector<1x32x128xf32> to vector<32x128xf32>
    %cst_232 = arith.constant dense<0.000000e+00> : vector<16x128xf32>
    %979 = tpu.matmul %976, %978, %cst_232 {dimension_numbers = #tpu.dot_dimension_numbers<[1], [0], [0], [1], [0, 0, 1, 1], [], []>} : vector<16x32xf32>, vector<32x128xf32>, vector<16x128xf32> -> vector<16x128xf32>
    %c5_233 = arith.constant 5 : index
    %c0_234 = arith.constant 0 : index
    %c0_235 = arith.constant 0 : index
    %980 = vector.load %arg5[%c5_233, %c0_234, %c0_235] : memref<6x1x128xf32, #tpu.memory_space<vmem>>, vector<1x1x128xf32>
    %981 = vector.shape_cast %980 : vector<1x1x128xf32> to vector<1x128xf32>
    %982 = vector.broadcast %981 : vector<1x128xf32> to vector<16x128xf32>
    %983 = arith.addf %979, %982 : vector<16x128xf32>
    %cst_236 = arith.constant 0.000000e+00 : f32
    %984 = vector.broadcast %cst_236 : f32 to vector<16x128xf32>
    %985 = arith.maximumf %983, %984 : vector<16x128xf32>
    %c5_237 = arith.constant 5 : index
    %c0_238 = arith.constant 0 : index
    %c0_239 = arith.constant 0 : index
    %986 = vector.load %arg6[%c5_237, %c0_238, %c0_239] : memref<6x128x32xf32, #tpu.memory_space<vmem>>, vector<1x128x32xf32>
    %987 = vector.shape_cast %986 : vector<1x128x32xf32> to vector<128x32xf32>
    %cst_240 = arith.constant dense<0.000000e+00> : vector<16x32xf32>
    %988 = tpu.matmul %985, %987, %cst_240 {dimension_numbers = #tpu.dot_dimension_numbers<[1], [0], [0], [1], [0, 0, 1, 1], [], []>} : vector<16x128xf32>, vector<128x32xf32>, vector<16x32xf32> -> vector<16x32xf32>
    %989 = vector.extract_strided_slice %945 {offsets = [1, 0], sizes = [1, 32], strides = [1, 1]} : vector<6x32xf32> to vector<1x32xf32>
    %990 = vector.broadcast %989 : vector<1x32xf32> to vector<16x32xf32>
    %991 = arith.addf %988, %990 : vector<16x32xf32>
    %992 = arith.addf %976, %991 : vector<16x32xf32>
    %993 = vector.extract_strided_slice %945 {offsets = [4, 0], sizes = [1, 32], strides = [1, 1]} : vector<6x32xf32> to vector<1x32xf32>
    %994 = vector.extract_strided_slice %945 {offsets = [5, 0], sizes = [1, 32], strides = [1, 1]} : vector<6x32xf32> to vector<1x32xf32>
    %cst_241 = arith.constant dense<0.000000e+00> : vector<16xf32>
    %995 = vector.multi_reduction <add>, %992, %cst_241 [1] : vector<16x32xf32> to vector<16xf32>
    %996 = vector.shape_cast %995 : vector<16xf32> to vector<16x1xf32>
    %cst_242 = arith.constant 3.200000e+01 : f32
    %997 = vector.broadcast %cst_242 : f32 to vector<16x1xf32>
    %998 = arith.divf %996, %997 : vector<16x1xf32>
    %999 = arith.mulf %992, %992 : vector<16x32xf32>
    %cst_243 = arith.constant dense<0.000000e+00> : vector<16xf32>
    %1000 = vector.multi_reduction <add>, %999, %cst_243 [1] : vector<16x32xf32> to vector<16xf32>
    %1001 = vector.shape_cast %1000 : vector<16xf32> to vector<16x1xf32>
    %cst_244 = arith.constant 3.200000e+01 : f32
    %1002 = vector.broadcast %cst_244 : f32 to vector<16x1xf32>
    %1003 = arith.divf %1001, %1002 : vector<16x1xf32>
    %1004 = arith.mulf %998, %998 : vector<16x1xf32>
    %1005 = arith.subf %1003, %1004 : vector<16x1xf32>
    %1006 = vector.broadcast %998 : vector<16x1xf32> to vector<16x32xf32>
    %1007 = arith.subf %992, %1006 : vector<16x32xf32>
    %cst_245 = arith.constant 9.99999974E-6 : f32
    %1008 = vector.broadcast %cst_245 : f32 to vector<16x1xf32>
    %1009 = arith.addf %1005, %1008 : vector<16x1xf32>
    %1010 = math.rsqrt %1009 : vector<16x1xf32>
    %1011 = vector.broadcast %1010 : vector<16x1xf32> to vector<16x32xf32>
    %1012 = vector.broadcast %993 : vector<1x32xf32> to vector<16x32xf32>
    %1013 = arith.mulf %1011, %1012 : vector<16x32xf32>
    %1014 = arith.mulf %1007, %1013 : vector<16x32xf32>
    %1015 = vector.broadcast %994 : vector<1x32xf32> to vector<16x32xf32>
    %1016 = arith.addf %1014, %1015 : vector<16x32xf32>
    %c0_246 = arith.constant 0 : index
    %c0_247 = arith.constant 0 : index
    %1017 = vector.load %arg8[%c0_246, %c0_247] : memref<16x32xf32, #tpu.memory_space<vmem>>, vector<16x32xf32>
    tpu.vector_store %arg8[%c0_246, %c0_247], %1016 {strides = array<i32>} : memref<16x32xf32, #tpu.memory_space<vmem>>, vector<16x32xf32>,
    return
  }
}

</mosaic_0001>

<bundles_post_ra>
// kernel: custom_transformer_forward.1
= control target key start
LH: loop header
LB: loop body
LE: loop exit
PB: predicated region body
PF: predicated region fallthrough
CT: control target
= control target key end

     0   :  { %vm13149_vm0 = vcmask 261120   ;;  %s13136_s0 = inlined_call_operand.vmem [shape: f32[16,32], index: 0, kind: input, shape index: {}]   ;;  %s13137_s1 = inlined_call_operand.vmem [shape: f32[6,32,96], index: 1, kind: input, shape index: {}]   ;;  %s13138_s2 = inlined_call_operand.vmem [shape: f32[6,1,96], index: 2, kind: input, shape index: {}]   ;;  %s13139_s3 = inlined_call_operand.vmem [shape: f32[6,32,32], index: 3, kind: input, shape index: {}]   ;;  %s13140_s4 = inlined_call_operand.vmem [shape: f32[6,32,128], index: 4, kind: input, shape index: {}]   ;;  %s13141_s5 = inlined_call_operand.vmem [shape: f32[6,1,128], index: 5, kind: input, shape index: {}]   ;;  %s13142_s6 = inlined_call_operand.vmem [shape: f32[6,128,32], index: 6, kind: input, shape index: {}]   ;;  %s13143_s7 = inlined_call_operand.vmem [shape: f32[6,6,32], index: 7, kind: input, shape index: {}]   ;;  %s13144_s8 = inlined_call_operand.hbm [shape: f32[16,32], index: 8, kind: output, shape index: {}]  }
   0x1   :  { %v80_v0 = vld [vmem:[%s13137_s1 + $0x18] sm:$0xff]  ;;  %v79_v1 = vld [vmem:[%s13137_s1 + $0x10] sm:$0xff]  ;;  %v78_v2 = vld [vmem:[%s13137_s1 + $0x8] sm:$0xff] }
   0x2   :  { %104 = vmatpush.msra.mxu1 %v80_v0  ;;  %8468 = vmatpush.msra.mxu3 %v80_v0  ;;  %v77_v3 = vld [vmem:[%s13137_s1] sm:$0xff]  ;;  %v76_v5 = vld [vmem:[%s13136_s0 + $0x8] sm:$0xff] }
   0x3   :  { %v75_v4 = vld [vmem:[%s13136_s0] sm:$0xff] }
   0x4   :  { %105 = vmatpush.msra.mxu1 %v79_v1  ;;  %8469 = vmatpush.msra.mxu3 %v79_v1 }
   0x6   :  { %106 = vmatpush.msra.mxu1 %v78_v2  ;;  %8470 = vmatpush.msra.mxu3 %v78_v2 }
   0x7   :  { %13 = vsyncpa [#allocation3], 0  ;;  %v8734_v6 = vld [vmem:[%s13138_s2] ss:$0 sm:$0xff]  ;;  %s9208_s19 = smov 116   ;;  %s9209_s20 = smov 120   ;;  %v30_v57 = vlaneseq }
   0x8   :  { %107 = vmatpush.msra.mxu1 %v77_v3  ;;  %8471 = vmatpush.msra.mxu3 %v77_v3  ;;  %s9210_s21 = smov 124   ;;  %s9211_s22 = smov 108   ;;  %vm149_vm1 = vcmask 31744   ;;  %v9217_v62 = vmov -1e+30   ;;  %vm426_vm3 = vcmask 130048  }
   0x9   :  { %7989 = vmatmul.msk.f32.vlgmr.msra.gmra.mxu1 %vm13149_vm0, %v75_v4  ;;  %7990 = vmatmul.msk.f32.vlgmr.msra.gmra.mxu3 %vm13149_vm0, %v76_v5  ;;  %s9212_s23 = smov 104   ;;  %s9213_s24 = smov 100   ;;  %v31_v58 = vshrl.u32 %v30_v57, 7  ;;  %v58_v59 = vand.u32 127, %v30_v57 }
   0xa   :  { %s9214_s25 = smov 112   ;;  %s9215_s26 = smov 96  }
   0xb   :  { %s9216_s27 = smov 64   ;;  %v37_v60 = vand.u32 1, %v31_v58  ;;  %v63_v61 = vand.u32 1, %v58_v59  ;;  %v32_v5 = vadd.s32 8, %v31_v58  ;;  %s13157_s28 = smov 12  }
   0xc   :  { %s13152_s29 = smov 8   ;;  %s9220_s30 = smov 4  }
   0xd   :  { %vm71_vm2 = vcmp.eq.s32.totalorder %v37_v60, %v63_v61  ;;  %s13145_s9 = smov 16   ;;  %s13150_s10 = smov 24  }
   0xe   :  { %v9425_v63 = vsel %vm71_vm2, 0.0, %v9217_v62  ;;  %s13147_s11 = smov 20   ;;  %s13155_s12 = smov 28  }
   0xf   :  { %s13187_s15 = smov 20   ;;  %s13188_s16 = smov 16  }
  0x10   :  { %s13209_s13 = smov 24   ;;  %s13272_s17 = smov 28  }
  0x86   :  { %v109_v7 = vpop.f32.mrf.mxu1 }
  0x87   :  { %v9296_v8 = vadd.f32 %v8734_v6, %v109_v7 }
  0x89   :  { %125 = vrot.lane.b32.xlu2 %v9296_v8, %s9208_s19 }
  0x8c   :  { %v112_v9 = vpop.f32.mrf.mxu3 }
  0x8d   :  { %v9300_v10 = vadd.f32 %v8734_v6, %v112_v9 }
  0x8f   :  { %123 = vrot.lane.b32.xlu1 %v9300_v10, %s9209_s20  ;;  %119 = vrot.lane.b32.xlu0 %v9300_v10, %s9210_s21  ;;  %v8499_v27 = vpack.i.bf16 %v9296_v8, %v9300_v10 }
  0x91   :  { %127 = vrot.lane.b32.xlu2 %v9300_v10, %s9208_s19 }
  0x97   :  { %121 = vrot.lane.b32.xlu1 %v9296_v8, %s9209_s20  ;;  %117 = vrot.lane.b32.xlu0 %v9296_v8, %s9210_s21 }
  0x99   :  { %133 = vrot.lane.b32.xlu2 %v9296_v8, %s9211_s22 }
  0x9f   :  { %139 = vrot.lane.b32.xlu1 %v9300_v10, %s9212_s23  ;;  %135 = vrot.lane.b32.xlu0 %v9300_v10, %s9211_s22 }
  0xa1   :  { %143 = vrot.lane.b32.xlu2 %v9300_v10, %s9213_s24 }
  0xa7   :  { %131 = vrot.lane.b32.xlu1 %v9300_v10, %s9214_s25  ;;  %137 = vrot.lane.b32.xlu0 %v9296_v8, %s9212_s23 }
  0xa9   :  { %141 = vrot.lane.b32.xlu2 %v9296_v8, %s9213_s24 }
  0xaf   :  { %129 = vrot.lane.b32.xlu0 %v9296_v8, %s9214_s25 }
  0xe3   :  { %v9328_v11 = vpop.permute.xlu2 %125 }
  0xeb   :  { %v128_v16 = vpop.permute.xlu2 %127 }
  0xec   :  { %v8509_v28 = vpack.i.bf16 %v9328_v11, %v128_v16 }
  0xf3   :  { %v9339_v17 = vpop.permute.xlu2 %133 }
  0xfb   :  { %v9351_v20 = vpop.permute.xlu2 %143 }
 0x101   :  { %v124_v12 = vpop.permute.xlu1 %123  ;;  %v120_v13 = vpop.permute.xlu0 %119 }
 0x102   :  { %183 = vrot.lane.b32.xlu1 %v120_v13, %s9215_s26  ;;  %v8504_v26 = vpack.i.bf16 %v124_v12, %v120_v13 }
 0x103   :  { %v9363_v23 = vpop.permute.xlu2 %141 }
 0x109   :  { %v122_v14 = vpop.permute.xlu1 %121  ;;  %v118_v15 = vpop.permute.xlu0 %117 }
 0x10a   :  { %218 = vrot.lane.b32.xlu1 %v124_v12, %s9215_s26  ;;  %216 = vrot.lane.b32.xlu2 %v122_v14, %s9215_s26  ;;  %v8494_v25 = vpack.i.bf16 %v122_v14, %v118_v15 }
 0x10b   :  { %181 = vrot.lane.b32.xlu0 %v118_v15, %s9215_s26 }
 0x111   :  { %v9341_v18 = vpop.permute.xlu0 %135  ;;  %v9343_v19 = vpop.permute.xlu1 %139 }
 0x112   :  { %147 = vrot.lane.b32.xlu1 %v9300_v10, %s9215_s26  ;;  %251 = vrot.lane.b32.xlu2 %v9328_v11, %s9215_s26 }
 0x113   :  { %253 = vrot.lane.b32.xlu0 %v128_v16, %s9215_s26 }
 0x119   :  { %v9353_v21 = vpop.permute.xlu0 %137  ;;  %v9355_v22 = vpop.permute.xlu1 %131 }
 0x11a   :  { %358 = vrot.lane.b32.xlu2 %v9343_v19, %s9215_s26  ;;  %323 = vrot.lane.b32.xlu1 %v9341_v18, %s9215_s26 }
 0x11b   :  { %145 = vrot.lane.b32.xlu0 %v9296_v8, %s9215_s26 }
 0x121   :  { %v9365_v24 = vpop.permute.xlu0 %129 }
 0x122   :  { %288 = vrot.lane.b32.xlu2 %v9355_v22, %s9215_s26  ;;  %356 = vrot.lane.b32.xlu1 %v9353_v21, %s9215_s26 }
 0x123   :  { %321 = vrot.lane.b32.xlu0 %v9339_v17, %s9215_s26 }
 0x12a   :  { %391 = vrot.lane.b32.xlu2 %v9363_v23, %s9215_s26  ;;  %286 = vrot.lane.b32.xlu1 %v9365_v24, %s9215_s26 }
 0x12b   :  { %393 = vrot.lane.b32.xlu0 %v9351_v20, %s9215_s26 }
 0x132   :  { %8495 = vrot.lane.b32.xlu2 %v8494_v25, %s9216_s27  ;;  %8505 = vrot.lane.b32.xlu1 %v8504_v26, %s9216_s27 }
 0x133   :  { %8500 = vrot.lane.b32.xlu0 %v8499_v27, %s9216_s27 }
 0x13a   :  { %8510 = vrot.lane.b32.xlu1 %v8509_v28, %s9216_s27 }
 0x164   :  { %v217_v29 = vpop.permute.xlu2 %216 }
 0x16c   :  { %v252_v31 = vpop.permute.xlu2 %251 }
 0x174   :  { %v184_v30 = vpop.permute.xlu1 %183  ;;  %v359_v34 = vpop.permute.xlu2 %358 }
 0x175   :  { %7995 = vmatpush.xpose.msk.msra.mxu2 %vm149_vm1, %v184_v30 }
 0x17c   :  { %v219_v32 = vpop.permute.xlu1 %218  ;;  %v289_v39 = vpop.permute.xlu2 %288 }
 0x17d   :  { %v182_v33 = vpop.permute.xlu0 %181  ;;  %7999 = vmatpush.xpose.msk.msrb.mxu3 %vm149_vm1, %v219_v32 }
 0x17e   :  { %7996 = vmatpush.xpose.msk.msra.mxu2 %vm149_vm1, %v182_v33 }
 0x181   :  { %7997 = vmatmul.msk.f32.vlgmr.msra.gmra.mxu2 %vm149_vm1, %v118_v15  ;;  %8000 = vmatpush.xpose.msk.msrb.mxu3 %vm149_vm1, %v217_v29 }
 0x184   :  { %8001 = vmatmul.msk.f32.vlgmr.msrb.gmra.mxu3 %vm149_vm1, %v122_v14  ;;  %v148_v35 = vpop.permute.xlu1 %147  ;;  %v392_v42 = vpop.permute.xlu2 %391 }
 0x185   :  { %8015 = vmatpush.xpose.msk.msra.mxu3 %vm149_vm1, %v359_v34  ;;  %v254_v36 = vpop.permute.xlu0 %253  ;;  %7991 = vmatpush.xpose.msk.msrb.mxu1 %vm149_vm1, %v148_v35 }
 0x186   :  { %8003 = vmatpush.xpose.msk.msra.mxu0 %vm149_vm1, %v254_v36  ;;  %8472 = vmatpush.xpose.msk.msrb.mxu2 %vm149_vm1, %v254_v36 }
 0x189   :  { %7998 = vmatmul.msk.f32.gmra.mxu2 %vm149_vm1, %v120_v13 }
 0x18a   :  { %8004 = vmatpush.xpose.msk.msra.mxu0 %vm149_vm1, %v252_v31  ;;  %8473 = vmatpush.xpose.msk.msrb.mxu2 %vm149_vm1, %v252_v31 }
 0x18c   :  { %8002 = vmatmul.msk.f32.gmra.mxu3 %vm149_vm1, %v124_v12  ;;  %v324_v37 = vpop.permute.xlu1 %323  ;;  %v8496_v45 = vpop.permute.xlu2 %8495 }
 0x18d   :  { %8005 = vmatmul.msk.f32.vlgmr.msra.gmra.mxu0 %vm149_vm1, %v9328_v11  ;;  %v146_v38 = vpop.permute.xlu0 %145  ;;  %v8497_v51 = vunpack.i.l.bf16 %v8496_v45  ;;  %v8498_v52 = vunpack.i.h.bf16 %v8496_v45 }
 0x18e   :  { %8011 = vmatpush.xpose.msk.msra.mxu2 %vm149_vm1, %v324_v37  ;;  %7992 = vmatpush.xpose.msk.msrb.mxu1 %vm149_vm1, %v146_v38 }
 0x191   :  { %7993 = vmatmul.msk.f32.vlgmr.msrb.gmra.mxu1 %vm149_vm1, %v9296_v8  ;;  %8006 = vmatmul.msk.f32.vlgmr.msrb.gmra.mxu2 %vm149_vm1, %v128_v16  ;;  %v44_v8 = vand.u32 1, %v32_v5 }
 0x192   :  { %8007 = vmatpush.xpose.msk.msra.mxu1 %vm149_vm1, %v289_v39 }
 0x193   :  { %vm72_vm4 = vcmp.eq.s32.totalorder %v44_v8, %v63_v61 }
 0x194   :  { %v357_v40 = vpop.permute.xlu1 %356  ;;  %v9433_v12 = vsel %vm72_vm4, 0.0, %v9217_v62 }
 0x195   :  { %v322_v41 = vpop.permute.xlu0 %321  ;;  %8016 = vmatpush.xpose.msk.msra.mxu3 %vm149_vm1, %v357_v40 }
 0x196   :  { %8012 = vmatpush.xpose.msk.msra.mxu2 %vm149_vm1, %v322_v41 }
 0x198   :  { %8017 = vmatmul.msk.f32.vlgmr.msra.gmra.mxu3 %vm149_vm1, %v9353_v21 }
 0x199   :  { %7994 = vmatmul.msk.f32.gmra.mxu1 %vm149_vm1, %v9300_v10  ;;  %8013 = vmatmul.msk.f32.vlgmr.msra.gmra.mxu2 %vm149_vm1, %v9339_v17 }
 0x19c   :  { %v287_v43 = vpop.permute.xlu1 %286 }
 0x19d   :  { %v394_v44 = vpop.permute.xlu0 %393  ;;  %8008 = vmatpush.xpose.msk.msra.mxu1 %vm149_vm1, %v287_v43 }
 0x19e   :  { %8019 = vmatpush.xpose.msk.msrb.mxu0 %vm149_vm1, %v394_v44 }
 0x1a0   :  { %8018 = vmatmul.msk.f32.gmra.mxu3 %vm149_vm1, %v9343_v19 }
 0x1a1   :  { %8009 = vmatmul.msk.f32.vlgmr.msra.gmra.mxu1 %vm149_vm1, %v9365_v24  ;;  %8014 = vmatmul.msk.f32.gmra.mxu2 %vm149_vm1, %v9341_v18 }
 0x1a2   :  { %8020 = vmatpush.xpose.msk.msrb.mxu0 %vm149_vm1, %v392_v42 }
 0x1a4   :  { %v8506_v46 = vpop.permute.xlu1 %8505 }
 0x1a5   :  { %v8508_v47 = vunpack.i.h.bf16 %v8506_v46  ;;  %v8507_v48 = vunpack.i.l.bf16 %v8506_v46  ;;  %8021 = vmatmul.msk.f32.vlgmr.msrb.gmra.mxu0 %vm149_vm1, %v9363_v23  ;;  %v8501_v49 = vpop.permute.xlu0 %8500 }
 0x1a6   :  { %v8502_v50 = vunpack.i.l.bf16 %v8501_v49  ;;  %v8503_v53 = vunpack.i.h.bf16 %v8501_v49 }
 0x1a7   :  { %872 = vmatpush.msrb.mxu2 %v8507_v48  ;;  %907 = vmatpush.msrb.mxu3 %v8508_v47 }
 0x1a8   :  { %837 = vmatpush.msrb.mxu1 %v8502_v50 }
 0x1a9   :  { %8010 = vmatmul.msk.f32.gmra.mxu1 %vm149_vm1, %v9355_v22  ;;  %873 = vmatpush.msrb.mxu2 %v8497_v51 }
 0x1aa   :  { %838 = vmatpush.msrb.mxu1 %v8503_v53  ;;  %908 = vmatpush.msrb.mxu3 %v8498_v52 }
 0x1ac   :  { %v8511_v54 = vpop.permute.xlu1 %8510 }
 0x1ad   :  { %v8512_v55 = vunpack.i.l.bf16 %v8511_v54  ;;  %8022 = vmatmul.msk.f32.gmra.mxu0 %vm149_vm1, %v9351_v20  ;;  %v8513_v56 = vunpack.i.h.bf16 %v8511_v54 }
 0x1af   :  { %942 = vmatpush.msra.mxu0 %v8512_v55 }
 0x1b1   :  { %943 = vmatpush.msra.mxu0 %v8513_v56 }
 0x204   :  { %v210_v11 = vpop.f32.mrf.mxu2 }
 0x205   :  { %v9446_v30 = vadd.f32 %v210_v11, %v9425_v63 }
 0x207   :  { %v245_v0 = vpop.f32.mrf.mxu3  ;;  %v433_v35 = vsel %vm426_vm3, %v9446_v30, -inf }
 0x208   :  { %v246_v1 = vadd.f32 %v245_v0, %v9425_v63 }
 0x20a   :  { %v280_v2 = vpop.f32.mrf.mxu0  ;;  %v439_v3 = vsel %vm426_vm3, %v246_v1, -inf }
 0x20b   :  { %v281_v4 = vadd.f32 %v280_v2, %v9425_v63  ;;  %440 = vmax.xlane.f32.xlu1 %v439_v3 }
 0x20c   :  { %v213_v16 = vpop.f32.mrf.mxu2 }
 0x20d   :  { %v445_v6 = vsel %vm426_vm3, %v281_v4, -inf  ;;  %v9483_v0 = vadd.f32 %v213_v16, %v9433_v12 }
 0x20e   :  { %v175_v7 = vpop.f32.mrf.mxu1  ;;  %446 = vmax.xlane.f32.xlu0 %v445_v6 }
 0x20f   :  { %v176_v9 = vadd.f32 %v175_v7, %v9425_v63  ;;  %v248_v37 = vpop.f32.mrf.mxu3 }
 0x210   :  { %v9458_v38 = vadd.f32 %v248_v37, %v9433_v12 }
 0x211   :  { %v427_v10 = vsel %vm426_vm3, %v176_v9, -inf }
 0x212   :  { %428 = vmax.xlane.f32.xlu2 %v427_v10  ;;  %v442_v40 = vsel %vm426_vm3, %v9458_v38, -inf }
 0x214   :  { %v283_v32 = vpop.f32.mrf.mxu2 }
 0x215   :  { %v9494_v8 = vadd.f32 %v283_v32, %v9433_v12 }
 0x216   :  { %v178_v13 = vpop.f32.mrf.mxu1 }
 0x217   :  { %v179_v14 = vadd.f32 %v178_v13, %v9433_v12  ;;  %v448_v16 = vsel %vm426_vm3, %v9494_v8, -inf }
 0x219   :  { %v430_v15 = vsel %vm426_vm3, %v179_v14, -inf }
 0x21a   :  { %431 = vmax.xlane.f32.xlu2 %v430_v15 }
 0x21b   :  { %v385_v3 = vpop.f32.mrf.mxu3 }
 0x21c   :  { %v350_v39 = vpop.f32.mrf.mxu2  ;;  %v9506_v32 = vadd.f32 %v385_v3, %v9425_v63 }
 0x21d   :  { %v9463_v41 = vadd.f32 %v350_v39, %v9425_v63 }
 0x21e   :  { %v315_v25 = vpop.f32.mrf.mxu1 }
 0x21f   :  { %v9438_v26 = vadd.f32 %v315_v25, %v9425_v63  ;;  %v457_v42 = vsel %vm426_vm3, %v9463_v41, -inf }
 0x221   :  { %v451_v27 = vsel %vm426_vm3, %v9438_v26, -inf }
 0x222   :  { %v420_v28 = vpop.f32.mrf.mxu0  ;;  %452 = vmax.xlane.f32.xlu0 %v451_v27 }
 0x223   :  { %v9443_v29 = vadd.f32 %v420_v28, %v9425_v63  ;;  %v388_v25 = vpop.f32.mrf.mxu3 }
 0x224   :  { %v353_v43 = vpop.f32.mrf.mxu2 }
 0x225   :  { %v469_v31 = vsel %vm426_vm3, %v9443_v29, -inf  ;;  %v9468_v44 = vadd.f32 %v353_v43, %v9433_v12 }
 0x226   :  { %v318_v33 = vpop.f32.mrf.mxu1  ;;  %470 = vmax.xlane.f32.xlu2 %v469_v31 }
 0x227   :  { %v9451_v34 = vadd.f32 %v318_v33, %v9433_v12  ;;  %v460_v45 = vsel %vm426_vm3, %v9468_v44, -inf }
 0x229   :  { %v454_v36 = vsel %vm426_vm3, %v9451_v34, -inf }
 0x22a   :  { %434 = vmax.xlane.f32.xlu0 %v433_v35  ;;  %455 = vmax.xlane.f32.xlu1 %v454_v36  ;;  %v423_v6 = vpop.f32.mrf.mxu0  ;;  %v463_v35 = vsel %vm426_vm3, %v9506_v32, -inf }
 0x232   :  { %443 = vmax.xlane.f32.xlu1 %v442_v40 }
 0x23a   :  { %458 = vmax.xlane.f32.xlu1 %v457_v42 }
 0x242   :  { %461 = vmax.xlane.f32.xlu1 %v460_v45 }
 0x27e   :  { %v441_v46 = vpop.xlane.xlu1 %440 }
 0x27f   :  { %v479_v49 = vsub.f32 %v246_v1, %v441_v46 }
 0x281   :  { %v447_v47 = vpop.xlane.xlu0 %446  ;;  %v499_v53 = vmul.f32 1.442695, %v479_v49 }
 0x282   :  { %v481_v48 = vsub.f32 %v281_v4, %v447_v47  ;;  %v436_v4 = vsel %vm426_vm3, %v9483_v0, -inf }
 0x284   :  { %v503_v50 = vmul.f32 1.442695, %v481_v48 }
 0x285   :  { %v429_v51 = vpop.xlane.xlu2 %428 }
 0x286   :  { %8746 = vpow2.f32 %v503_v50  ;;  %v475_v52 = vsub.f32 %v176_v9, %v429_v51  ;;  %v9497_v9 = vadd.f32 %v423_v6, %v9433_v12 }
 0x288   :  { %v491_v54 = vmul.f32 1.442695, %v475_v52  ;;  %v472_v15 = vsel %vm426_vm3, %v9497_v9, -inf }
 0x28a   :  { %8748 = vpow2.f32 %v491_v54 }
 0x28b   :  { %8750 = vpow2.f32 %v499_v53 }
 0x28c   :  { %v9472_v55 = vpop.eup %8746 }
 0x28d   :  { %v432_v56 = vpop.xlane.xlu2 %431  ;;  %v541_v57 = vsel %vm426_vm3, %v9472_v55, 0.0 }
 0x28e   :  { %v476_v58 = vsub.f32 %v179_v14, %v432_v56  ;;  %542 = vadd.xlane.f32.xlu1 %v541_v57  ;;  %v8514_v57 = vpack.i.bf16 %v9343_v19, %v9341_v18 }
 0x290   :  { %v9476_v59 = vpop.eup %8748  ;;  %v493_v60 = vmul.f32 1.442695, %v476_v58 }
 0x291   :  { %v523_v61 = vsel %vm426_vm3, %v9476_v59, 0.0  ;;  %v9480_v62 = vpop.eup %8750 }
 0x292   :  { %8752 = vpow2.f32 %v493_v60  ;;  %524 = vadd.xlane.f32.xlu2 %v523_v61  ;;  %v535_v1 = vsel %vm426_vm3, %v9480_v62, 0.0 }
 0x295   :  { %v453_v7 = vpop.xlane.xlu0 %452 }
 0x296   :  { %536 = vadd.xlane.f32.xlu1 %v535_v1  ;;  %v483_v11 = vsub.f32 %v9438_v26, %v453_v7  ;;  %v9509_v26 = vadd.f32 %v388_v25, %v9433_v12 }
 0x298   :  { %v9487_v2 = vpop.eup %8752  ;;  %v507_v27 = vmul.f32 1.442695, %v483_v11  ;;  %v466_v36 = vsel %vm426_vm3, %v9509_v26, -inf }
 0x299   :  { %v526_v5 = vsel %vm426_vm3, %v9487_v2, 0.0  ;;  %v471_v10 = vpop.xlane.xlu2 %470 }
 0x29a   :  { %437 = vmax.xlane.f32.xlu2 %v436_v4  ;;  %527 = vadd.xlane.f32.xlu0 %v526_v5  ;;  %v489_v13 = vsub.f32 %v9443_v29, %v471_v10  ;;  %8754 = vpow2.f32 %v507_v27 }
 0x29c   :  { %v519_v28 = vmul.f32 1.442695, %v489_v13 }
 0x29d   :  { %v456_v14 = vpop.xlane.xlu1 %455  ;;  %v435_v31 = vpop.xlane.xlu0 %434 }
 0x29e   :  { %v477_v29 = vsub.f32 %v9446_v30, %v435_v31  ;;  %8756 = vpow2.f32 %v519_v28  ;;  %v484_v33 = vsub.f32 %v9451_v34, %v456_v14 }
 0x2a0   :  { %v495_v37 = vmul.f32 1.442695, %v477_v29  ;;  %v509_v40 = vmul.f32 1.442695, %v484_v33  ;;  %v9517_v42 = vpop.eup %8754 }
 0x2a1   :  { %v547_v34 = vsel %vm426_vm3, %v9517_v42, 0.0 }
 0x2a2   :  { %473 = vmax.xlane.f32.xlu2 %v472_v15  ;;  %449 = vmax.xlane.f32.xlu0 %v448_v16  ;;  %8758 = vpow2.f32 %v495_v37 }
 0x2a3   :  { %8760 = vpow2.f32 %v509_v40 }
 0x2a4   :  { %v9519_v43 = vpop.eup %8756 }
 0x2a5   :  { %v444_v39 = vpop.xlane.xlu1 %443  ;;  %v565_v45 = vsel %vm426_vm3, %v9519_v43, 0.0 }
 0x2a6   :  { %v480_v30 = vsub.f32 %v9458_v38, %v444_v39 }
 0x2a8   :  { %v501_v46 = vmul.f32 1.442695, %v480_v30  ;;  %v9526_v47 = vpop.eup %8758 }
 0x2a9   :  { %v9528_v49 = vpop.eup %8760  ;;  %v529_v38 = vsel %vm426_vm3, %v9526_v47, 0.0 }
 0x2aa   :  { %464 = vmax.xlane.f32.xlu2 %v463_v35  ;;  %467 = vmax.xlane.f32.xlu0 %v466_v36  ;;  %8762 = vpow2.f32 %v501_v46  ;;  %v550_v51 = vsel %vm426_vm3, %v9528_v49, 0.0 }
 0x2ad   :  { %v459_v48 = vpop.xlane.xlu1 %458 }
 0x2ae   :  { %v485_v50 = vsub.f32 %v9463_v41, %v459_v48 }
 0x2b0   :  { %v511_v52 = vmul.f32 1.442695, %v485_v50  ;;  %v9535_v53 = vpop.eup %8762 }
 0x2b1   :  { %v538_v54 = vsel %vm426_vm3, %v9535_v53, 0.0 }
 0x2b2   :  { %548 = vadd.xlane.f32.xlu0 %v547_v34  ;;  %566 = vadd.xlane.f32.xlu2 %v565_v45  ;;  %8764 = vpow2.f32 %v511_v52 }
 0x2b5   :  { %v9546_v58 = vpop.xlane.xlu1 %461 }
 0x2b8   :  { %v9539_v56 = vpop.eup %8764 }
 0x2b9   :  { %v553_v41 = vsel %vm426_vm3, %v9539_v56, 0.0 }
 0x2ba   :  { %530 = vadd.xlane.f32.xlu0 %v529_v38  ;;  %551 = vadd.xlane.f32.xlu2 %v550_v51 }
 0x2c2   :  { %539 = vadd.xlane.f32.xlu2 %v538_v54 }
 0x2ca   :  { %554 = vadd.xlane.f32.xlu2 %v553_v41 }
 0x2e2   :  { %8515 = vrot.lane.b32.xlu2 %v8514_v57, %s9216_s27 }
 0x301   :  { %v543_v60 = vpop.xlane.xlu1 %542 }
 0x302   :  { %8766 = vrcp.f32 %v543_v60  ;;  %v664_v6 = vand.u32 2147483647, %v543_v60  ;;  %v666_v10 = vand.u32 2147483648, %v543_v60  ;;  %vm660_vm6 = vweird.f32 %v543_v60 }
 0x304   :  { %vm665_vm7 = vcmp.eq.f32.partialorder %v664_v6, 8.507059e+37  ;;  %v667_v27 = vor.u32 1.1754944e-38, %v666_v10 }
 0x305   :  { %v525_v61 = vpop.xlane.xlu2 %524 }
 0x306   :  { %8768 = vrcp.f32 %v525_v61  ;;  %v580_v28 = vand.u32 2147483647, %v525_v61  ;;  %v582_v31 = vand.u32 2147483648, %v525_v61  ;;  %vm576_vm10 = vweird.f32 %v525_v61 }
 0x308   :  { %v8767_v1 = vpop.eup %8766  ;;  %vm581_vm12 = vcmp.eq.f32.partialorder %v580_v28, 8.507059e+37  ;;  %v583_v46 = vor.u32 1.1754944e-38, %v582_v31 }
 0x309   :  { %v656_v3 = vmul.f32 %v8767_v1, %v543_v60  ;;  %v537_v4 = vpop.xlane.xlu1 %536  ;;  %vm661_vm5 = vweird.f32 %v8767_v1 }
 0x30a   :  { %8770 = vrcp.f32 %v537_v4  ;;  %vm662_vm8 = vmor %vm660_vm6, %vm661_vm5  ;;  %v636_v37 = vand.u32 2147483647, %v537_v4  ;;  %vm632_vm13 = vweird.f32 %v537_v4  ;;  %v638_v48 = vand.u32 2147483648, %v537_v4 }
 0x30b   :  { %v657_v5 = vsub.f32 1.0, %v656_v3 }
 0x30c   :  { %v8769_v7 = vpop.eup %8768  ;;  %vm9561_vm15 = vcmp.eq.f32.partialorder %v636_v37, 8.507059e+37 }
 0x30d   :  { %v658_v11 = vmul.f32 %v8767_v1, %v657_v5  ;;  %v572_v13 = vmul.f32 %v8769_v7, %v525_v61  ;;  %v9548_v18 = vpop.xlane.xlu0 %527  ;;  %v438_v19 = vpop.xlane.xlu2 %437  ;;  %vm577_vm9 = vweird.f32 %v8769_v7 }
 0x30e   :  { %8772 = vrcp.f32 %v9548_v18  ;;  %v478_v14 = vsub.f32 %v9483_v0, %v438_v19  ;;  %vm9553_vm11 = vmor %vm576_vm10, %vm577_vm9  ;;  %v594_v5 = vand.u32 2147483647, %v9548_v18  ;;  %vm590_vm5 = vweird.f32 %v9548_v18 }
 0x30f   :  { %v659_v15 = vadd.f32 %v8767_v1, %v658_v11  ;;  %v573_v16 = vsub.f32 1.0, %v572_v13  ;;  %v596_v13 = vand.u32 2147483648, %v9548_v18 }
 0x310   :  { %v8771_v25 = vpop.eup %8770  ;;  %v497_v29 = vmul.f32 1.442695, %v478_v14 }
 0x311   :  { %v663_v33 = vsel %vm662_vm8, %v8767_v1, %v659_v15  ;;  %v574_v35 = vmul.f32 %v8769_v7, %v573_v16  ;;  %v628_v36 = vmul.f32 %v8771_v25, %v537_v4  ;;  %vm633_vm14 = vweird.f32 %v8771_v25 }
 0x312   :  { %8774 = vpow2.f32 %v497_v29  ;;  %v668_v39 = vsel %vm665_vm7, %v667_v27, %v663_v33  ;;  %vm634_vm2 = vmor %vm632_vm13, %vm633_vm14  ;;  %v597_v15 = vor.u32 1.1754944e-38, %v596_v13  ;;  %vm595_vm7 = vcmp.eq.f32.partialorder %v594_v5, 8.507059e+37 }
 0x313   :  { %v575_v40 = vadd.f32 %v8769_v7, %v574_v35  ;;  %v629_v0 = vsub.f32 1.0, %v628_v36  ;;  %v801_v30 = vmul.f32 %v9472_v55, %v668_v39 }
 0x314   :  { %v8773_v34 = vpop.eup %8772 }
 0x315   :  { %v579_v50 = vsel %vm9553_vm11, %v8769_v7, %v575_v40  ;;  %v630_v38 = vmul.f32 %v8771_v25, %v629_v0  ;;  %v586_v51 = vmul.f32 %v8773_v34, %v9548_v18  ;;  %8029 = vmatmul.msk.f32.vlgmr.msra.gmra.mxu0 %vm426_vm3, %v801_v30  ;;  %v450_v52 = vpop.xlane.xlu0 %449  ;;  %v474_v55 = vpop.xlane.xlu2 %473  ;;  %v639_v7 = vor.u32 1.1754944e-38, %v638_v48 }
 0x316   :  { %v482_v41 = vsub.f32 %v9494_v8, %v450_v52  ;;  %v490_v57 = vsub.f32 %v9497_v9, %v474_v55  ;;  %v584_v60 = vsel %vm581_vm12, %v583_v46, %v579_v50  ;;  %vm591_vm4 = vweird.f32 %v8773_v34 }
 0x317   :  { %v631_v61 = vadd.f32 %v8771_v25, %v630_v38  ;;  %v587_v1 = vsub.f32 1.0, %v586_v51  ;;  %v795_v3 = vmul.f32 %v9476_v59, %v584_v60  ;;  %vm592_vm6 = vmor %vm590_vm5, %vm591_vm4  ;;  %v8524_v55 = vpack.i.bf16 %v9365_v24, %v9355_v22 }
 0x318   :  { %v9569_v6 = vpop.eup %8774  ;;  %v505_v10 = vmul.f32 1.442695, %v482_v41  ;;  %v521_v11 = vmul.f32 1.442695, %v490_v57 }
 0x319   :  { %v635_v19 = vsel %vm634_vm2, %v8771_v25, %v631_v61  ;;  %8023 = vmatmul.msk.f32.vlgmr.msrb.gmra.mxu1 %vm426_vm3, %v795_v3  ;;  %v532_v8 = vsel %vm426_vm3, %v9569_v6, 0.0  ;;  %v588_v9 = vmul.f32 %v8773_v34, %v587_v1 }
 0x31a   :  { %8776 = vpow2.f32 %v505_v10  ;;  %533 = vadd.xlane.f32.xlu0 %v532_v8  ;;  %v640_v59 = vsel %vm9561_vm15, %v639_v7, %v635_v19 }
 0x31b   :  { %8778 = vpow2.f32 %v521_v11  ;;  %v799_v4 = vmul.f32 %v9480_v62, %v640_v59  ;;  %v589_v14 = vadd.f32 %v8773_v34, %v588_v9  ;;  %v8519_v9 = vpack.i.bf16 %v9353_v21, %v9339_v17 }
 0x31c   :  { %v8529_v21 = vpack.i.bf16 %v9363_v23, %v9351_v20 }
 0x31d   :  { %8027 = vmatmul.msk.f32.vlgmr.msrb.gmra.mxu3 %vm426_vm3, %v799_v4  ;;  %v468_v16 = vpop.xlane.xlu0 %467  ;;  %v465_v25 = vpop.xlane.xlu2 %464  ;;  %v593_v27 = vsel %vm592_vm6, %v8773_v34, %v589_v14 }
 0x31e   :  { %v487_v28 = vsub.f32 %v9506_v32, %v465_v25  ;;  %v598_v31 = vsel %vm595_vm7, %v597_v15, %v593_v27  ;;  %v488_v18 = vsub.f32 %v9509_v26, %v468_v16  ;;  %v486_v16 = vsub.f32 %v9468_v44, %v9546_v58 }
 0x31f   :  { %v796_v29 = vmul.f32 %v9487_v2, %v598_v31 }
 0x320   :  { %v9583_v33 = vpop.eup %8776  ;;  %v515_v35 = vmul.f32 1.442695, %v487_v28  ;;  %v517_v32 = vmul.f32 1.442695, %v488_v18  ;;  %v513_v25 = vmul.f32 1.442695, %v486_v16 }
 0x321   :  { %v9585_v62 = vpop.eup %8778  ;;  %8024 = vmatmul.msk.f32.gmra.mxu1 %vm426_vm3, %v796_v29  ;;  %v544_v36 = vsel %vm426_vm3, %v9583_v33, 0.0 }
 0x322   :  { %545 = vadd.xlane.f32.xlu1 %v544_v36  ;;  %v568_v37 = vsel %vm426_vm3, %v9585_v62, 0.0  ;;  %8780 = vpow2.f32 %v515_v35 }
 0x323   :  { %569 = vadd.xlane.f32.xlu0 %v568_v37  ;;  %8782 = vpow2.f32 %v517_v32 }
 0x325   :  { %v9593_v2 = vpop.xlane.xlu0 %548  ;;  %v9595_v39 = vpop.xlane.xlu2 %566 }
 0x328   :  { %v9597_v40 = vpop.eup %8780 }
 0x329   :  { %v559_v26 = vsel %vm426_vm3, %v9597_v40, 0.0  ;;  %v9603_v34 = vpop.eup %8782 }
 0x32a   :  { %v562_v45 = vsel %vm426_vm3, %v9603_v34, 0.0 }
 0x32b   :  { %560 = vadd.xlane.f32.xlu0 %v559_v26 }
 0x32d   :  { %v531_v0 = vpop.xlane.xlu0 %530  ;;  %v9601_v30 = vpop.xlane.xlu2 %551 }
 0x32e   :  { %8784 = vrcp.f32 %v531_v0  ;;  %v610_v52 = vand.u32 2147483648, %v531_v0  ;;  %v608_v54 = vand.u32 2147483647, %v531_v0  ;;  %vm604_vm9 = vweird.f32 %v531_v0 }
 0x330   :  { %v611_v61 = vor.u32 1.1754944e-38, %v610_v52  ;;  %vm609_vm11 = vcmp.eq.f32.partialorder %v608_v54, 8.507059e+37 }
 0x333   :  { %563 = vadd.xlane.f32.xlu0 %v562_v45 }
 0x334   :  { %v8785_v46 = vpop.eup %8784 }
 0x335   :  { %v600_v48 = vmul.f32 %v8785_v46, %v531_v0  ;;  %v540_v50 = vpop.xlane.xlu2 %539  ;;  %vm605_vm8 = vweird.f32 %v8785_v46 }
 0x336   :  { %8786 = vrcp.f32 %v540_v50  ;;  %vm606_vm10 = vmor %vm604_vm9, %vm605_vm8  ;;  %v652_v11 = vand.u32 2147483648, %v540_v50  ;;  %v650_v22 = vand.u32 2147483647, %v540_v50  ;;  %vm646_vm13 = vweird.f32 %v540_v50 }
 0x337   :  { %v601_v38 = vsub.f32 1.0, %v600_v48  ;;  %8788 = vpow2.f32 %v513_v25 }
 0x338   :  { %v653_v19 = vor.u32 1.1754944e-38, %v652_v11  ;;  %vm651_vm15 = vcmp.eq.f32.partialorder %v650_v22, 8.507059e+37 }
 0x339   :  { %v602_v51 = vmul.f32 %v8785_v46, %v601_v38 }
 0x33b   :  { %v603_v41 = vadd.f32 %v8785_v46, %v602_v51  ;;  %8525 = vrot.lane.b32.xlu1 %v8524_v55, %s9216_s27 }
 0x33c   :  { %v8787_v57 = vpop.eup %8786 }
 0x33d   :  { %v607_v60 = vsel %vm606_vm10, %v8785_v46, %v603_v41  ;;  %v642_v1 = vmul.f32 %v8787_v57, %v540_v50  ;;  %v9610_v3 = vpop.xlane.xlu2 %554  ;;  %vm647_vm12 = vweird.f32 %v8787_v57  ;;  %v9621_v27 = vpop.eup %8788 }
 0x33e   :  { %v612_v7 = vsel %vm609_vm11, %v611_v61, %v607_v60  ;;  %vm648_vm14 = vmor %vm646_vm13, %vm647_vm12  ;;  %v556_v17 = vsel %vm426_vm3, %v9621_v27, 0.0  ;;  %vm688_vm12 = vweird.f32 %v9593_v2 }
 0x33f   :  { %v643_v5 = vsub.f32 1.0, %v642_v1  ;;  %v797_v10 = vmul.f32 %v9526_v47, %v612_v7 }
 0x341   :  { %v644_v13 = vmul.f32 %v8787_v57, %v643_v5  ;;  %8025 = vmatmul.msk.f32.vlgmr.msrb.gmra.mxu2 %vm426_vm3, %v797_v10 }
 0x343   :  { %v645_v24 = vadd.f32 %v8787_v57, %v644_v13 }
 0x345   :  { %v8516_v8 = vpop.permute.xlu2 %8515  ;;  %v649_v59 = vsel %vm648_vm14, %v8787_v57, %v645_v24 }
 0x346   :  { %v8518_v4 = vunpack.i.h.bf16 %v8516_v8  ;;  %v8517_v14 = vunpack.i.l.bf16 %v8516_v8  ;;  %v654_v15 = vsel %vm651_vm15, %v653_v19, %v649_v59  ;;  %vm702_vm15 = vweird.f32 %v9601_v30 }
 0x347   :  { %8520 = vrot.lane.b32.xlu0 %v8519_v9, %s9216_s27  ;;  %v800_v47 = vmul.f32 %v9535_v53, %v654_v15  ;;  %v694_v9 = vand.u32 2147483648, %v9593_v2 }
 0x348   :  { %1012 = vmatpush.msra.mxu2 %v8517_v14  ;;  %1047 = vmatpush.msra.mxu3 %v8518_v4  ;;  %v692_v14 = vand.u32 2147483647, %v9593_v2 }
 0x349   :  { %8028 = vmatmul.msk.f32.gmra.mxu3 %vm426_vm3, %v800_v47  ;;  %v695_v25 = vor.u32 1.1754944e-38, %v694_v9 }
 0x34a   :  { %vm693_vm14 = vcmp.eq.f32.partialorder %v692_v14, 8.507059e+37 }
 0x365   :  { %557 = vadd.xlane.f32.xlu1 %v556_v17 }
 0x37e   :  { %8530 = vrot.lane.b32.xlu1 %v8529_v21, %s9216_s27 }
 0x38d   :  { %v534_v53 = vpop.xlane.xlu0 %533 }
 0x38e   :  { %8790 = vrcp.f32 %v534_v53  ;;  %v624_v20 = vand.u32 2147483648, %v534_v53  ;;  %v622_v36 = vand.u32 2147483647, %v534_v53  ;;  %vm618_vm4 = vweird.f32 %v534_v53 }
 0x38f   :  { %8792 = vrcp.f32 %v9593_v2 }
 0x390   :  { %v625_v0 = vor.u32 1.1754944e-38, %v624_v20  ;;  %vm623_vm6 = vcmp.eq.f32.partialorder %v622_v36, 8.507059e+37 }
 0x392   :  { %v945_v28 = vpop.f32.mrf.mxu0 }
 0x393   :  { %1109 = vrot.lane.b32.xlu1 %v945_v28, %s13157_s28 }
 0x394   :  { %v8791_v44 = vpop.eup %8790 }
 0x395   :  { %v614_v58 = vmul.f32 %v8791_v44, %v534_v53  ;;  %v546_v31 = vpop.xlane.xlu1 %545  ;;  %v9632_v35 = vpop.eup %8792  ;;  %vm619_vm2 = vweird.f32 %v8791_v44 }
 0x396   :  { %8794 = vrcp.f32 %v546_v31  ;;  %v9630_v29 = vpop.xlane.xlu0 %569  ;;  %v684_v37 = vmul.f32 %v9632_v35, %v9593_v2  ;;  %vm620_vm5 = vmor %vm618_vm4, %vm619_vm2  ;;  %v680_v41 = vand.u32 2147483648, %v546_v31  ;;  %v678_v60 = vand.u32 2147483647, %v546_v31 }
 0x397   :  { %v615_v18 = vsub.f32 1.0, %v614_v58  ;;  %8796 = vrcp.f32 %v9601_v30  ;;  %vm674_vm8 = vweird.f32 %v546_v31  ;;  %vm689_vm11 = vweird.f32 %v9632_v35 }
 0x398   :  { %8798 = vrcp.f32 %v9610_v3  ;;  %v685_v48 = vsub.f32 1.0, %v684_v37  ;;  %vm679_vm10 = vcmp.eq.f32.partialorder %v678_v60, 8.507059e+37  ;;  %vm690_vm13 = vmor %vm688_vm12, %vm689_vm11 }
 0x399   :  { %v616_v23 = vmul.f32 %v8791_v44, %v615_v18 }
 0x39a   :  { %v686_v1 = vmul.f32 %v9632_v35, %v685_v48 }
 0x39b   :  { %v617_v32 = vadd.f32 %v8791_v44, %v616_v23  ;;  %v708_v23 = vand.u32 2147483648, %v9601_v30 }
 0x39c   :  { %v8795_v26 = vpop.eup %8794  ;;  %v687_v22 = vadd.f32 %v9632_v35, %v686_v1 }
 0x39d   :  { %v670_v45 = vmul.f32 %v8795_v26, %v546_v31  ;;  %v621_v46 = vsel %vm620_vm5, %v8791_v44, %v617_v32  ;;  %v9641_v52 = vpop.eup %8796  ;;  %vm675_vm7 = vweird.f32 %v8795_v26 }
 0x39e   :  { %v9638_v50 = vpop.xlane.xlu0 %560  ;;  %v626_v38 = vsel %vm623_vm6, %v625_v0, %v621_v46  ;;  %v9645_v61 = vpop.eup %8798  ;;  %v698_v5 = vmul.f32 %v9641_v52, %v9601_v30  ;;  %vm676_vm9 = vmor %vm674_vm8, %vm675_vm7  ;;  %v691_v16 = vsel %vm690_vm13, %v9632_v35, %v687_v22  ;;  %vm703_vm2 = vweird.f32 %v9641_v52 }
 0x39f   :  { %v671_v51 = vsub.f32 1.0, %v670_v45  ;;  %8800 = vrcp.f32 %v9638_v50  ;;  %v798_v54 = vmul.f32 %v9569_v6, %v626_v38  ;;  %v681_v6 = vor.u32 1.1754944e-38, %v680_v41  ;;  %vm9692_vm7 = vmor %vm702_vm15, %vm703_vm2 }
 0x3a0   :  { %v910_v55 = vpop.f32.mrf.mxu3  ;;  %v712_v11 = vmul.f32 %v9645_v61, %v9610_v3  ;;  %v699_v59 = vsub.f32 1.0, %v698_v5  ;;  %v696_v44 = vsel %vm693_vm14, %v695_v25, %v691_v16  ;;  %v706_v35 = vand.u32 2147483647, %v9601_v30 }
 0x3a1   :  { %1101 = vrot.lane.b32.xlu0 %v910_v55, %s13152_s29  ;;  %v672_v57 = vmul.f32 %v8795_v26, %v671_v51  ;;  %8026 = vmatmul.msk.f32.gmra.mxu2 %vm426_vm3, %v798_v54  ;;  %vm717_vm4 = vweird.f32 %v9645_v61  ;;  %v803_v20 = vmul.f32 %v9517_v42, %v696_v44  ;;  %vm716_vm6 = vweird.f32 %v9610_v3 }
 0x3a2   :  { %v713_v15 = vsub.f32 1.0, %v712_v11  ;;  %v700_v17 = vmul.f32 %v9641_v52, %v699_v59  ;;  %v750_v0 = vand.u32 2147483648, %v9638_v50  ;;  %vm9696_vm8 = vmor %vm716_vm6, %vm717_vm4  ;;  %v720_v46 = vand.u32 2147483647, %v9610_v3 }
 0x3a3   :  { %v673_v7 = vadd.f32 %v8795_v26, %v672_v57  ;;  %v748_v48 = vand.u32 2147483647, %v9638_v50  ;;  %v709_v38 = vor.u32 1.1754944e-38, %v708_v23  ;;  %vm707_vm11 = vcmp.eq.f32.partialorder %v706_v35, 8.507059e+37 }
 0x3a4   :  { %v714_v53 = vmul.f32 %v9645_v61, %v713_v15  ;;  %v701_v31 = vadd.f32 %v9641_v52, %v700_v17  ;;  %v751_v41 = vor.u32 1.1754944e-38, %v750_v0  ;;  %vm721_vm12 = vcmp.eq.f32.partialorder %v720_v46, 8.507059e+37 }
 0x3a5   :  { %v9651_v10 = vpop.eup %8800  ;;  %v677_v13 = vsel %vm676_vm9, %v8795_v26, %v673_v7  ;;  %v722_v26 = vand.u32 2147483648, %v9610_v3  ;;  %vm744_vm9 = vweird.f32 %v9638_v50  ;;  %vm749_vm13 = vcmp.eq.f32.partialorder %v748_v48, 8.507059e+37 }
 0x3a6   :  { %v740_v24 = vmul.f32 %v9651_v10, %v9638_v50  ;;  %v9659_v19 = vpop.xlane.xlu0 %563  ;;  %v682_v8 = vsel %vm679_vm10, %v681_v6, %v677_v13  ;;  %v715_v36 = vadd.f32 %v9645_v61, %v714_v53  ;;  %vm745_vm5 = vweird.f32 %v9651_v10 }
 0x3a7   :  { %8802 = vrcp.f32 %v9659_v19  ;;  %v802_v4 = vmul.f32 %v9583_v33, %v682_v8  ;;  %v705_v30 = vsel %vm9692_vm7, %v9641_v52, %v701_v31  ;;  %vm746_vm10 = vmor %vm744_vm9, %vm745_vm5  ;;  %v723_v54 = vor.u32 1.1754944e-38, %v722_v26 }
 0x3a8   :  { %v741_v47 = vsub.f32 1.0, %v740_v24  ;;  %v719_v51 = vsel %vm9696_vm8, %v9645_v61, %v715_v36  ;;  %v710_v50 = vsel %vm707_vm11, %v709_v38, %v705_v30  ;;  %v764_v6 = vand.u32 2147483648, %v9659_v19 }
 0x3a9   :  { %8030 = vmatmul.msk.f32.gmra.mxu0 %vm426_vm3, %v802_v4  ;;  %v724_v57 = vsel %vm721_vm12, %v723_v54, %v719_v51  ;;  %v804_v52 = vmul.f32 %v9528_v49, %v710_v50  ;;  %vm758_vm15 = vweird.f32 %v9659_v19  ;;  %v762_v13 = vand.u32 2147483647, %v9659_v19 }
 0x3aa   :  { %v742_v33 = vmul.f32 %v9651_v10, %v741_v47  ;;  %v765_v22 = vor.u32 1.1754944e-38, %v764_v6  ;;  %8804 = vrcp.f32 %v9595_v39  ;;  %v778_v35 = vand.u32 2147483648, %v9595_v39  ;;  %v1167_v6 = vld [vmem:[%s13139_s3] sm:$0xff] }
 0x3ab   :  { %vm763_vm4 = vcmp.eq.f32.partialorder %v762_v13, 8.507059e+37 }
 0x3ac   :  { %v743_v37 = vadd.f32 %v9651_v10, %v742_v33  ;;  %v779_v36 = vor.u32 1.1754944e-38, %v778_v35  ;;  %v9785_v35 = vld [vmem:[%s13143_s7] sm:$0x3f] }
 0x3ad   :  { %v9669_v21 = vpop.eup %8802  ;;  %v8526_v28 = vpop.permute.xlu1 %8525 }
 0x3ae   :  { %v754_v2 = vmul.f32 %v9669_v21, %v9659_v19  ;;  %v8527_v58 = vunpack.i.l.bf16 %v8526_v28  ;;  %v8528_v18 = vunpack.i.h.bf16 %v8526_v28  ;;  %v747_v55 = vsel %vm746_vm10, %v9651_v10, %v743_v37 }
 0x3af   :  { %v752_v60 = vsel %vm749_vm13, %v751_v41, %v747_v55  ;;  %vm759_vm14 = vweird.f32 %v9669_v21  ;;  %v805_v10 = vmul.f32 %v9539_v56, %v724_v57  ;;  %vm772_vm10 = vweird.f32 %v9595_v39  ;;  %v840_v55 = vpop.f32.mrf.mxu1 }
 0x3b0   :  { %977 = vmatpush.msra.mxu1 %v8527_v58  ;;  %v755_v32 = vsub.f32 1.0, %v754_v2  ;;  %v807_v11 = vmul.f32 %v9597_v40, %v752_v60  ;;  %vm760_vm2 = vmor %vm758_vm15, %vm759_vm14  ;;  %v8805_v8 = vpop.eup %8804  ;;  %vm786_vm14 = vweird.f32 %v9630_v29 }
 0x3b1   :  { %v768_v9 = vmul.f32 %v8805_v8, %v9595_v39  ;;  %vm773_vm9 = vweird.f32 %v8805_v8 }
 0x3b2   :  { %978 = vmatpush.msra.mxu1 %v8528_v18  ;;  %v756_v3 = vmul.f32 %v9669_v21, %v755_v32  ;;  %v776_v18 = vand.u32 2147483647, %v9595_v39  ;;  %vm774_vm11 = vmor %vm772_vm10, %vm773_vm9  ;;  %v790_v39 = vand.u32 2147483647, %v9630_v29 }
 0x3b3   :  { %8031 = vmatmul.msk.f32.vlgmr.msra.gmra.mxu1 %vm426_vm3, %v803_v20  ;;  %v769_v14 = vsub.f32 1.0, %v768_v9 }
 0x3b4   :  { %v757_v5 = vadd.f32 %v9669_v21, %v756_v3  ;;  %vm777_vm12 = vcmp.eq.f32.partialorder %v776_v18, 8.507059e+37  ;;  %v1171_v18 = vperm.slane %v9785_v35, 0 }
 0x3b5   :  { %v770_v17 = vmul.f32 %v8805_v8, %v769_v14 }
 0x3b6   :  { %v761_v49 = vsel %vm760_vm2, %v9669_v21, %v757_v5  ;;  %vm791_vm2 = vcmp.eq.f32.partialorder %v790_v39, 8.507059e+37  ;;  %v1170_v5 = vld [vmem:[%s13139_s3 + $0x18] sm:$0xff] }
 0x3b7   :  { %v766_v24 = vsel %vm763_vm4, %v765_v22, %v761_v49  ;;  %v771_v2 = vadd.f32 %v8805_v8, %v770_v17  ;;  %1190 = vmatpush.msrb.mxu1 %v1170_v5  ;;  %vm1149_vm4 = vcmask 64512  }
 0x3b8   :  { %v808_v56 = vmul.f32 %v9603_v34, %v766_v24 }
 0x3b9   :  { %v8521_v1 = vpop.permute.xlu0 %8520  ;;  %v775_v20 = vsel %vm774_vm11, %v8805_v8, %v771_v2 }
 0x3ba   :  { %v8523_v61 = vunpack.i.h.bf16 %v8521_v1  ;;  %v8522_v7 = vunpack.i.l.bf16 %v8521_v1  ;;  %v780_v26 = vsel %vm777_vm12, %v779_v36, %v775_v20  ;;  %v9180_v36 = vld [vmem:[%s13136_s0] sm:$0xff] }
 0x3bb   :  { %8032 = vmatmul.msk.f32.gmra.mxu1 %vm426_vm3, %v804_v52  ;;  %v809_v45 = vmul.f32 %v9519_v43, %v780_v26  ;;  %v843_v43 = vpop.f32.mrf.mxu1 }
 0x3bc   :  { %1013 = vmatpush.msra.mxu2 %v8522_v7  ;;  %1048 = vmatpush.msra.mxu3 %v8523_v61  ;;  %v1169_v61 = vld [vmem:[%s13139_s3 + $0x10] sm:$0xff]  ;;  %v1168_v7 = vld [vmem:[%s13139_s3 + $0x8] sm:$0xff] }
 0x3bd   :  { %8033 = vmatmul.msk.f32.vlgmr.msra.gmra.mxu2 %vm426_vm3, %v805_v10  ;;  %8035 = vmatmul.msk.f32.vlgmr.msra.gmra.mxu3 %vm426_vm3, %v807_v11 }
 0x3be   :  { %1191 = vmatpush.msrb.mxu1 %v1169_v61 }
 0x3c0   :  { %1192 = vmatpush.msrb.mxu1 %v1168_v7 }
 0x3c2   :  { %1193 = vmatpush.msrb.mxu1 %v1167_v6 }
 0x3c4   :  { %v875_v51 = vpop.f32.mrf.mxu2 }
 0x3c5   :  { %8036 = vmatmul.msk.f32.gmra.mxu3 %vm426_vm3, %v808_v56 }
 0x3cc   :  { %v913_v40 = vpop.f32.mrf.mxu3 }
 0x3cd   :  { %1103 = vrot.lane.b32.xlu1 %v913_v40, %s13152_s29 }
 0x3d8   :  { %v558_v19 = vpop.xlane.xlu1 %557 }
 0x3d9   :  { %8806 = vrcp.f32 %v558_v19  ;;  %v736_v34 = vand.u32 2147483648, %v558_v19  ;;  %v734_v25 = vand.u32 2147483647, %v558_v19  ;;  %vm730_vm6 = vweird.f32 %v558_v19 }
 0x3da   :  { %8808 = vrcp.f32 %v9630_v29 }
 0x3db   :  { %v737_v33 = vor.u32 1.1754944e-38, %v736_v34  ;;  %vm735_vm8 = vcmp.eq.f32.partialorder %v734_v25, 8.507059e+37 }
 0x3df   :  { %v8807_v59 = vpop.eup %8806 }
 0x3e0   :  { %v726_v4 = vmul.f32 %v8807_v59, %v558_v19  ;;  %v8809_v47 = vpop.eup %8808  ;;  %vm731_vm5 = vweird.f32 %v8807_v59 }
 0x3e1   :  { %v782_v21 = vmul.f32 %v8809_v47, %v9630_v29  ;;  %vm732_vm7 = vmor %vm730_vm6, %vm731_vm5  ;;  %vm787_vm13 = vweird.f32 %v8809_v47  ;;  %vm1152_vm5 = vcmask 97280   ;;  %vm1157_vm6 = vcmask 162816  }
 0x3e2   :  { %v727_v15 = vsub.f32 1.0, %v726_v4  ;;  %vm788_vm15 = vmor %vm786_vm14, %vm787_vm13 }
 0x3e3   :  { %v783_v58 = vsub.f32 1.0, %v782_v21 }
 0x3e4   :  { %v728_v16 = vmul.f32 %v8807_v59, %v727_v15 }
 0x3e5   :  { %v784_v23 = vmul.f32 %v8809_v47, %v783_v58 }
 0x3e6   :  { %v729_v53 = vadd.f32 %v8807_v59, %v728_v16 }
 0x3e7   :  { %v785_v0 = vadd.f32 %v8809_v47, %v784_v23 }
 0x3e8   :  { %v733_v28 = vsel %vm732_vm7, %v8807_v59, %v729_v53  ;;  %vm1160_vm7 = vcmask 195584  }
 0x3e9   :  { %v738_v44 = vsel %vm735_vm8, %v737_v33, %v733_v28  ;;  %v789_v46 = vsel %vm788_vm15, %v8809_v47, %v785_v0  ;;  %vm13154_vm8 = vcmask 228352  }
 0x3ea   :  { %v806_v31 = vmul.f32 %v9621_v27, %v738_v44  ;;  %v792_v27 = vand.u32 2147483648, %v9630_v29 }
 0x3ec   :  { %8034 = vmatmul.msk.f32.gmra.mxu2 %vm426_vm3, %v806_v31  ;;  %v793_v48 = vor.u32 1.1754944e-38, %v792_v27 }
 0x3ee   :  { %v794_v30 = vsel %vm791_vm2, %v793_v48, %v789_v46 }
 0x3ef   :  { %v810_v38 = vmul.f32 %v9585_v62, %v794_v30 }
 0x3f0   :  { %v8531_v37 = vpop.permute.xlu1 %8530 }
 0x3f1   :  { %v8532_v32 = vunpack.i.l.bf16 %v8531_v37  ;;  %v8533_v42 = vunpack.i.h.bf16 %v8531_v37 }
 0x3f3   :  { %1082 = vmatpush.msrb.mxu0 %v8532_v32 }
 0x3f5   :  { %1083 = vmatpush.msrb.mxu0 %v8533_v42 }
 0x3f6   :  { %8037 = vmatmul.msk.f32.vlgmr.msrb.gmra.mxu0 %vm426_vm3, %v809_v45  ;;  %v9181_v45 = vld [vmem:[%s13136_s0 + $0x8] sm:$0xff] }
 0x3fe   :  { %8038 = vmatmul.msk.f32.gmra.mxu0 %vm426_vm3, %v810_v38  ;;  %v9225_v38 = vmov 32.0  }
 0x3ff   :  { %8810 = vrcp.f32 %v9225_v38 }
 0x405   :  { %v1110_v13 = vpop.permute.xlu1 %1109 }
 0x413   :  { %v1102_v11 = vpop.permute.xlu0 %1101 }
 0x424   :  { %v878_v3 = vpop.f32.mrf.mxu2 }
 0x425   :  { %1095 = vrot.lane.b32.xlu0 %v878_v3, %s9220_s30 }
 0x426   :  { %v948_v50 = vpop.f32.mrf.mxu0 }
 0x430   :  { %v980_v29 = vpop.f32.mrf.mxu1 }
 0x431   :  { %1117 = vrot.lane.b32.xlu2 %v980_v29, %s13145_s9 }
 0x438   :  { %v983_v62 = vpop.f32.mrf.mxu1 }
 0x439   :  { %1093 = vrot.lane.b32.xlu2 %v875_v51, %s9220_s30  ;;  %v8811_v51 = vpop.eup %8810 }
 0x43a   :  { %vm1214_vm9 = vweird.f32 %v8811_v51 }
 0x43f   :  { %v1104_v56 = vpop.permute.xlu1 %1103 }
 0x440   :  { %v1015_v54 = vpop.f32.mrf.mxu2  ;;  %v1050_v41 = vpop.f32.mrf.mxu3 }
 0x441   :  { %1133 = vrot.lane.b32.xlu1 %v1050_v41, %s13150_s10  ;;  %1125 = vrot.lane.b32.xlu0 %v1015_v54, %s13147_s11  ;;  %v1267_v54 = vld [vmem:[%s13140_s4 + $0x18] sm:$0xff]  ;;  %v1266_v41 = vld [vmem:[%s13140_s4 + $0x10] sm:$0xff] }
 0x442   :  { %1111 = vrot.lane.b32.xlu2 %v948_v50, %s13157_s28  ;;  %1290 = vmatpush.msrb.mxu2 %v1267_v54  ;;  %v1265_v50 = vld [vmem:[%s13140_s4 + $0x8] sm:$0xff] }
 0x444   :  { %1291 = vmatpush.msrb.mxu2 %v1266_v41 }
 0x446   :  { %1292 = vmatpush.msrb.mxu2 %v1265_v50 }
 0x448   :  { %v1053_v1 = vpop.f32.mrf.mxu3 }
 0x449   :  { %1119 = vrot.lane.b32.xlu0 %v983_v62, %s13145_s9  ;;  %s13250_s9 = smov 8  }
 0x46f   :  { %v1018_v57 = vpop.f32.mrf.mxu2 }
 0x470   :  { %1127 = vrot.lane.b32.xlu1 %v1018_v57, %s13147_s11  ;;  %v1264_v57 = vld [vmem:[%s13140_s4] sm:$0xff] }
 0x471   :  { %1293 = vmatpush.msrb.mxu2 %v1264_v57 }
 0x473   :  { %v1085_v60 = vpop.f32.mrf.mxu0 }
 0x474   :  { %1141 = vrot.lane.b32.xlu2 %v1085_v60, %s13155_s12 }
 0x47b   :  { %v1088_v52 = vpop.f32.mrf.mxu0 }
 0x47c   :  { %1135 = vrot.lane.b32.xlu2 %v1053_v1, %s13150_s10  ;;  %1143 = vrot.lane.b32.xlu0 %v1088_v52, %s13155_s12 }
 0x48b   :  { %v1118_v10 = vpop.permute.xlu2 %1117 }
 0x493   :  { %v1094_v49 = vpop.permute.xlu2 %1093 }
 0x494   :  { %v1147_v24 = vsel %vm149_vm1, %v840_v55, %v1094_v49  ;;  %v1210_v55 = vmul.f32 32.0, %v8811_v51 }
 0x495   :  { %v1150_v40 = vsel %vm1149_vm4, %v1147_v24, %v1102_v11  ;;  %v1256_v24 = vperm.slane %v9785_v35, 2 }
 0x496   :  { %v1153_v8 = vsel %vm1152_vm5, %v1150_v40, %v1110_v13  ;;  %v1211_v3 = vsub.f32 1.0, %v1210_v55  ;;  %v1305_v55 = vld [vmem:[%s13142_s6 + $0x10] sm:$0xff] }
 0x497   :  { %v1096_v22 = vpop.permute.xlu0 %1095  ;;  %v1155_v59 = vsel %vm426_vm3, %v1153_v8, %v1118_v10 }
 0x498   :  { %v1148_v16 = vsel %vm149_vm1, %v843_v43, %v1096_v22  ;;  %v1212_v43 = vmul.f32 %v8811_v51, %v1211_v3  ;;  %v1304_v3 = vld [vmem:[%s13142_s6 + $0x8] sm:$0xff] }
 0x499   :  { %v1151_v17 = vsel %vm1149_vm4, %v1148_v16, %v1104_v56 }
 0x49a   :  { %v1213_v29 = vadd.f32 %v8811_v51, %v1212_v43  ;;  %v1303_v43 = vld [vmem:[%s13142_s6] sm:$0xff] }
 0x49c   :  { %v1112_v19 = vpop.permute.xlu2 %1111  ;;  %v9812_v62 = vsel %vm1214_vm9, %v8811_v51, %v1213_v29 }
 0x49d   :  { %v1154_v53 = vsel %vm1152_vm5, %v1151_v17, %v1112_v19 }
 0x4b3   :  { %v1126_v9 = vpop.permute.xlu0 %1125  ;;  %v1134_v4 = vpop.permute.xlu1 %1133 }
 0x4b4   :  { %v1158_v14 = vsel %vm1157_vm6, %v1155_v59, %v1126_v9  ;;  %v1261_v9 = vperm.slane %v9785_v35, 3 }
 0x4b5   :  { %v1161_v47 = vsel %vm1160_vm7, %v1158_v14, %v1134_v4 }
 0x4bb   :  { %v1120_v25 = vpop.permute.xlu0 %1119 }
 0x4bc   :  { %v1156_v33 = vsel %vm426_vm3, %v1154_v53, %v1120_v25 }
 0x4ce   :  { %v1142_v15 = vpop.permute.xlu2 %1141 }
 0x4cf   :  { %v1164_v34 = vsel %vm13154_vm8, %v1161_v47, %v1142_v15  ;;  %v1318_v47 = vld [vmem:[%s13142_s6 + $0x78] sm:$0xff] }
 0x4d0   :  { %8039 = vmatmul.msk.f32.vlgmr.msrb.gmra.mxu1 %vm13149_vm0, %v1164_v34  ;;  %v1317_v34 = vld [vmem:[%s13142_s6 + $0x70] sm:$0xff]  ;;  %1320 = vmatpush.msrb.mxu3 %v1318_v47 }
 0x4d2   :  { %1321 = vmatpush.msrb.mxu3 %v1317_v34 }
 0x4d6   :  { %v1136_v44 = vpop.permute.xlu2 %1135 }
 0x4e2   :  { %v1128_v21 = vpop.permute.xlu1 %1127 }
 0x4e3   :  { %v1159_v28 = vsel %vm1157_vm6, %v1156_v33, %v1128_v21  ;;  %v1316_v21 = vld [vmem:[%s13142_s6 + $0x68] sm:$0xff]  ;;  %v1315_v33 = vld [vmem:[%s13142_s6 + $0x60] sm:$0xff] }
 0x4e4   :  { %v1162_v58 = vsel %vm1160_vm7, %v1159_v28, %v1136_v44  ;;  %1322 = vmatpush.msrb.mxu3 %v1316_v21  ;;  %v1314_v44 = vld [vmem:[%s13142_s6 + $0x58] sm:$0xff] }
 0x4e6   :  { %1323 = vmatpush.msrb.mxu3 %v1315_v33 }
 0x4e8   :  { %1324 = vmatpush.msrb.mxu3 %v1314_v44 }
 0x4ee   :  { %v1144_v2 = vpop.permute.xlu0 %1143 }
 0x4ef   :  { %v1165_v31 = vsel %vm13154_vm8, %v1162_v58, %v1144_v2  ;;  %v1313_v2 = vld [vmem:[%s13142_s6 + $0x50] sm:$0xff]  ;;  %v1312_v58 = vld [vmem:[%s13142_s6 + $0x48] sm:$0xff] }
 0x4f0   :  { %8040 = vmatmul.msk.f32.gmra.mxu1 %vm13149_vm0, %v1165_v31  ;;  %1325 = vmatpush.msrb.mxu3 %v1313_v2  ;;  %v1311_v31 = vld [vmem:[%s13142_s6 + $0x40] sm:$0xff] }
 0x4f2   :  { %1326 = vmatpush.msrb.mxu3 %v1312_v58 }
 0x4f4   :  { %1327 = vmatpush.msrb.mxu3 %v1311_v31 }
 0x54d   :  { %v1195_v20 = vpop.f32.mrf.mxu1 }
 0x54e   :  { %v1196_v23 = vadd.f32 %v1195_v20, %v1171_v18  ;;  %v1310_v20 = vld [vmem:[%s13142_s6 + $0x38] sm:$0xff] }
 0x54f   :  { %1328 = vmatpush.msrb.mxu3 %v1310_v20 }
 0x550   :  { %v1201_v37 = vadd.f32 %v9180_v36, %v1196_v23  ;;  %v1309_v36 = vld [vmem:[%s13142_s6 + $0x30] sm:$0xff] }
 0x551   :  { %1329 = vmatpush.msrb.mxu3 %v1309_v36 }
 0x552   :  { %v1203_v32 = vsel %vm13149_vm0, %v1201_v37, 0.0  ;;  %v1218_v26 = vmul.f32 %v1201_v37, %v1201_v37 }
 0x553   :  { %1204 = vadd.xlane.f32.xlu1 %v1203_v32  ;;  %v1308_v32 = vld [vmem:[%s13142_s6 + $0x28] sm:$0xff] }
 0x554   :  { %v1220_v0 = vsel %vm13149_vm0, %v1218_v26, 0.0  ;;  %1330 = vmatpush.msrb.mxu3 %v1308_v32 }
 0x555   :  { %1221 = vadd.xlane.f32.xlu2 %v1220_v0  ;;  %v1307_v0 = vld [vmem:[%s13142_s6 + $0x20] sm:$0xff] }
 0x556   :  { %1331 = vmatpush.msrb.mxu3 %v1307_v0 }
 0x56d   :  { %v1198_v42 = vpop.f32.mrf.mxu1 }
 0x56e   :  { %v1199_v27 = vadd.f32 %v1198_v42, %v1171_v18 }
 0x570   :  { %v9796_v39 = vadd.f32 %v9181_v45, %v1199_v27  ;;  %v1306_v27 = vld [vmem:[%s13142_s6 + $0x18] sm:$0xff] }
 0x571   :  { %1332 = vmatpush.msrb.mxu3 %v1306_v27 }
 0x572   :  { %v1206_v46 = vsel %vm13149_vm0, %v9796_v39, 0.0  ;;  %v1219_v48 = vmul.f32 %v9796_v39, %v9796_v39 }
 0x573   :  { %1207 = vadd.xlane.f32.xlu0 %v1206_v46  ;;  %1333 = vmatpush.msrb.mxu3 %v1305_v55 }
 0x574   :  { %v1223_v30 = vsel %vm13149_vm0, %v1219_v48, 0.0 }
 0x575   :  { %1224 = vadd.xlane.f32.xlu1 %v1223_v30  ;;  %1334 = vmatpush.msrb.mxu3 %v1304_v3 }
 0x577   :  { %1335 = vmatpush.msrb.mxu3 %v1303_v43 }
 0x5c6   :  { %v1205_v60 = vpop.xlane.xlu1 %1204 }
 0x5c7   :  { %v1216_v1 = vmul.f32 %v9812_v62, %v1205_v60 }
 0x5c8   :  { %v1222_v52 = vpop.xlane.xlu2 %1221 }
 0x5c9   :  { %v1228_v5 = vmul.f32 %v1216_v1, %v1216_v1  ;;  %v1226_v61 = vmul.f32 %v1222_v52, %v9812_v62  ;;  %v1232_v19 = vsub.f32 %v1201_v37, %v1216_v1  ;;  %v1319_v1 = vperm.slane %v9785_v35, 1 }
 0x5cb   :  { %v1230_v7 = vsub.f32 %v1226_v61, %v1228_v5 }
 0x5cd   :  { %v1234_v6 = vadd.f32 1e-05, %v1230_v7 }
 0x5cf   :  { %8812 = vrsqrt.f32 %v1234_v6  ;;  %vm1242_vm11 = vweird.f32 %v1234_v6 }
 0x5d5   :  { %v8813_v10 = vpop.eup %8812 }
 0x5d6   :  { %v1237_v11 = vmul.f32 %v8813_v10, %v1234_v6  ;;  %vm1243_vm10 = vweird.f32 %v8813_v10 }
 0x5d7   :  { %vm1244_vm12 = vmor %vm1242_vm11, %vm1243_vm10 }
 0x5d8   :  { %v1238_v13 = vmul.f32 %v8813_v10, %v1237_v11 }
 0x5da   :  { %v1239_v49 = vmul.f32 0.5, %v1238_v13 }
 0x5dc   :  { %v1240_v22 = vsub.f32 1.5, %v1239_v49 }
 0x5de   :  { %v1241_v56 = vmul.f32 %v8813_v10, %v1240_v22 }
 0x5e0   :  { %v1245_v40 = vsel %vm1244_vm12, %v8813_v10, %v1241_v56 }
 0x5e1   :  { %v1257_v8 = vmul.f32 %v1256_v24, %v1245_v40  ;;  %v8046_v40 = vld [vmem:[%s13137_s1 + $0x38] sm:$0xff] }
 0x5e2   :  { %1427 = vmatpush.msra.mxu0 %v8046_v40 }
 0x5e3   :  { %v1259_v59 = vmul.f32 %v1257_v8, %v1232_v19  ;;  %v8045_v19 = vld [vmem:[%s13137_s1 + $0x30] sm:$0xff]  ;;  %v8044_v8 = vld [vmem:[%s13137_s1 + $0x28] sm:$0xff] }
 0x5e4   :  { %1428 = vmatpush.msra.mxu0 %v8045_v19 }
 0x5e5   :  { %v9821_v4 = vadd.f32 %v1261_v9, %v1259_v59 }
 0x5e6   :  { %v1208_v14 = vpop.xlane.xlu0 %1207  ;;  %1429 = vmatpush.msra.mxu0 %v8044_v8 }
 0x5e7   :  { %v1217_v15 = vmul.f32 %v9812_v62, %v1208_v14  ;;  %8041 = vmatmul.msk.f32.vlgmr.msrb.gmra.mxu2 %vm13149_vm0, %v9821_v4 }
 0x5e8   :  { %v1225_v16 = vpop.xlane.xlu1 %1224 }
 0x5e9   :  { %v1229_v25 = vmul.f32 %v1217_v15, %v1217_v15  ;;  %v1227_v17 = vmul.f32 %v1225_v16, %v9812_v62  ;;  %v1233_v48 = vsub.f32 %v9796_v39, %v1217_v15  ;;  %v8735_v39 = vld [vmem:[%s13141_s5] ss:$0 sm:$0xff] }
 0x5eb   :  { %v1231_v53 = vsub.f32 %v1227_v17, %v1229_v25 }
 0x5ed   :  { %v1235_v28 = vadd.f32 1e-05, %v1231_v53 }
 0x5ef   :  { %8814 = vrsqrt.f32 %v1235_v28  ;;  %vm1252_vm14 = vweird.f32 %v1235_v28 }
 0x5f5   :  { %v8815_v18 = vpop.eup %8814 }
 0x5f6   :  { %v1247_v23 = vmul.f32 %v8815_v18, %v1235_v28  ;;  %vm1253_vm13 = vweird.f32 %v8815_v18  ;;  %v1391_v28 = vperm.slane %v9785_v35, 4 }
 0x5f7   :  { %vm1254_vm15 = vmor %vm1252_vm14, %vm1253_vm13 }
 0x5f8   :  { %v1248_v37 = vmul.f32 %v8815_v18, %v1247_v23 }
 0x5fa   :  { %v1249_v26 = vmul.f32 0.5, %v1248_v37 }
 0x5fc   :  { %v1250_v42 = vsub.f32 1.5, %v1249_v26 }
 0x5fe   :  { %v1251_v45 = vmul.f32 %v8815_v18, %v1250_v42 }
 0x600   :  { %v1255_v46 = vsel %vm1254_vm15, %v8815_v18, %v1251_v45  ;;  %v1396_v18 = vperm.slane %v9785_v35, 5 }
 0x601   :  { %v1258_v30 = vmul.f32 %v1256_v24, %v1255_v46 }
 0x603   :  { %v1260_v38 = vmul.f32 %v1258_v30, %v1233_v48 }
 0x605   :  { %v1263_v51 = vadd.f32 %v1261_v9, %v1260_v38  ;;  %v8043_v9 = vld [vmem:[%s13137_s1 + $0x20] sm:$0xff] }
 0x606   :  { %1430 = vmatpush.msra.mxu0 %v8043_v9 }
 0x607   :  { %8042 = vmatmul.msk.f32.gmra.mxu2 %vm13149_vm0, %v1263_v51 }
 0x66a   :  { %v1295_v29 = vpop.f32.mrf.mxu2 }
 0x66b   :  { %v1296_v54 = vadd.f32 %v8735_v39, %v1295_v29  ;;  %v8736_v29 = vld [vmem:[%s13138_s2 + $0x1] ss:$0 sm:$0xff] }
 0x66d   :  { %v1301_v41 = vmax.f32 %v1296_v54, 0.0 }
 0x66f   :  { %1336 = vmatmul.f32.vlgmr.msrb.gmra.mxu3 %v1301_v41 }
 0x68a   :  { %v1298_v50 = vpop.f32.mrf.mxu2 }
 0x68b   :  { %v1299_v57 = vadd.f32 %v8735_v39, %v1298_v50 }
 0x68d   :  { %v1302_v60 = vmax.f32 %v1299_v57, 0.0 }
 0x68f   :  { %1339 = vmatmul.f32.gmra.mxu3 %v1302_v60 }
 0x6f2   :  { %v1337_v52 = vpop.f32.mrf.mxu3 }
 0x6f3   :  { %v1338_v5 = vadd.f32 %v1337_v52, %v1319_v1 }
 0x6f5   :  { %v1343_v61 = vadd.f32 %v1338_v5, %v9821_v4 }
 0x6f7   :  { %v1345_v7 = vsel %vm13149_vm0, %v1343_v61, 0.0  ;;  %v1353_v6 = vmul.f32 %v1343_v61, %v1343_v61 }
 0x6f8   :  { %1346 = vadd.xlane.f32.xlu2 %v1345_v7 }
 0x6f9   :  { %v1355_v10 = vsel %vm13149_vm0, %v1353_v6, 0.0 }
 0x6fa   :  { %1356 = vadd.xlane.f32.xlu0 %v1355_v10 }
 0x712   :  { %v1340_v11 = vpop.f32.mrf.mxu3 }
 0x713   :  { %v1341_v13 = vadd.f32 %v1340_v11, %v1319_v1 }
 0x715   :  { %v1344_v49 = vadd.f32 %v1341_v13, %v1263_v51 }
 0x717   :  { %v1348_v22 = vsel %vm13149_vm0, %v1344_v49, 0.0  ;;  %v1354_v24 = vmul.f32 %v1344_v49, %v1344_v49 }
 0x718   :  { %1349 = vadd.xlane.f32.xlu1 %v1348_v22 }
 0x719   :  { %v1358_v56 = vsel %vm13149_vm0, %v1354_v24, 0.0 }
 0x71a   :  { %1359 = vadd.xlane.f32.xlu2 %v1358_v56 }
 0x76b   :  { %v1347_v59 = vpop.xlane.xlu2 %1346 }
 0x76c   :  { %v1351_v4 = vmul.f32 %v1347_v59, %v9812_v62 }
 0x76d   :  { %v1357_v14 = vpop.xlane.xlu0 %1356 }
 0x76e   :  { %v1363_v15 = vmul.f32 %v1351_v4, %v1351_v4  ;;  %v1361_v47 = vmul.f32 %v1357_v14, %v9812_v62  ;;  %v1367_v58 = vsub.f32 %v1343_v61, %v1351_v4 }
 0x770   :  { %v1365_v34 = vsub.f32 %v1361_v47, %v1363_v15 }
 0x772   :  { %v1369_v16 = vadd.f32 1e-05, %v1365_v34 }
 0x774   :  { %8816 = vrsqrt.f32 %v1369_v16  ;;  %vm1377_vm9 = vweird.f32 %v1369_v16 }
 0x77a   :  { %v8817_v25 = vpop.eup %8816 }
 0x77b   :  { %v1372_v17 = vmul.f32 %v8817_v25, %v1369_v16  ;;  %vm1378_vm2 = vweird.f32 %v8817_v25 }
 0x77c   :  { %vm1379_vm10 = vmor %vm1377_vm9, %vm1378_vm2 }
 0x77d   :  { %v1373_v21 = vmul.f32 %v8817_v25, %v1372_v17 }
 0x77f   :  { %v1374_v53 = vmul.f32 0.5, %v1373_v21 }
 0x781   :  { %v1375_v33 = vsub.f32 1.5, %v1374_v53 }
 0x783   :  { %v1376_v44 = vmul.f32 %v8817_v25, %v1375_v33 }
 0x785   :  { %v1380_v2 = vsel %vm1379_vm10, %v8817_v25, %v1376_v44 }
 0x786   :  { %v1392_v31 = vmul.f32 %v1391_v28, %v1380_v2 }
 0x788   :  { %v1394_v20 = vmul.f32 %v1392_v31, %v1367_v58 }
 0x78a   :  { %v9902_v23 = vadd.f32 %v1396_v18, %v1394_v20 }
 0x78b   :  { %v1350_v36 = vpop.xlane.xlu1 %1349 }
 0x78c   :  { %v1352_v37 = vmul.f32 %v1350_v36, %v9812_v62  ;;  %8048 = vmatmul.msk.f32.vlgmr.msra.gmra.mxu0 %vm13149_vm0, %v9902_v23 }
 0x78d   :  { %v1360_v32 = vpop.xlane.xlu2 %1359 }
 0x78e   :  { %v1364_v26 = vmul.f32 %v1352_v37, %v1352_v37  ;;  %v1362_v0 = vmul.f32 %v1360_v32, %v9812_v62  ;;  %v1368_v55 = vsub.f32 %v1344_v49, %v1352_v37 }
 0x790   :  { %v1366_v42 = vsub.f32 %v1362_v0, %v1364_v26 }
 0x792   :  { %v1370_v27 = vadd.f32 1e-05, %v1366_v42 }
 0x794   :  { %8818 = vrsqrt.f32 %v1370_v27  ;;  %vm1387_vm12 = vweird.f32 %v1370_v27 }
 0x79a   :  { %v8819_v45 = vpop.eup %8818 }
 0x79b   :  { %v1382_v46 = vmul.f32 %v8819_v45, %v1370_v27  ;;  %vm1388_vm11 = vweird.f32 %v8819_v45 }
 0x79c   :  { %vm1389_vm13 = vmor %vm1387_vm12, %vm1388_vm11 }
 0x79d   :  { %v1383_v48 = vmul.f32 %v8819_v45, %v1382_v46 }
 0x79f   :  { %v1384_v35 = vmul.f32 0.5, %v1383_v48 }
 0x7a1   :  { %v1385_v30 = vsub.f32 1.5, %v1384_v35 }
 0x7a3   :  { %v1386_v38 = vmul.f32 %v8819_v45, %v1385_v30 }
 0x7a5   :  { %v1390_v51 = vsel %vm1389_vm13, %v8819_v45, %v1386_v38 }
 0x7a6   :  { %v1393_v3 = vmul.f32 %v1391_v28, %v1390_v51 }
 0x7a8   :  { %v1395_v43 = vmul.f32 %v1393_v3, %v1368_v55 }
 0x7aa   :  { %v9908_v39 = vadd.f32 %v1396_v18, %v1395_v43 }
 0x7ac   :  { %8049 = vmatmul.msk.f32.gmra.mxu0 %vm13149_vm0, %v9908_v39 }
 0x809   :  { %v1432_v54 = vpop.f32.mrf.mxu0 }
 0x80a   :  { %v1433_v41 = vadd.f32 %v8736_v29, %v1432_v54 }
 0x80c   :  { %1444 = vrot.lane.b32.xlu2 %v1433_v41, %s9209_s20  ;;  %1440 = vrot.lane.b32.xlu1 %v1433_v41, %s9210_s21 }
 0x814   :  { %1448 = vrot.lane.b32.xlu1 %v1433_v41, %s9208_s19 }
 0x829   :  { %v1435_v50 = vpop.f32.mrf.mxu0 }
 0x82a   :  { %v1436_v57 = vadd.f32 %v8736_v29, %v1435_v50 }
 0x82c   :  { %1454 = vrot.lane.b32.xlu1 %v1436_v57, %s9214_s25  ;;  %1446 = vrot.lane.b32.xlu2 %v1436_v57, %s9209_s20 }
 0x82d   :  { %1442 = vrot.lane.b32.xlu0 %v1436_v57, %s9210_s21 }
 0x834   :  { %1464 = vrot.lane.b32.xlu1 %v1433_v41, %s9213_s24  ;;  %1456 = vrot.lane.b32.xlu2 %v1433_v41, %s9211_s22 }
 0x835   :  { %1450 = vrot.lane.b32.xlu0 %v1436_v57, %s9208_s19 }
 0x83c   :  { %1462 = vrot.lane.b32.xlu1 %v1436_v57, %s9212_s23  ;;  %1460 = vrot.lane.b32.xlu2 %v1433_v41, %s9212_s23 }
 0x83d   :  { %1458 = vrot.lane.b32.xlu0 %v1436_v57, %s9211_s22 }
 0x844   :  { %1468 = vrot.lane.b32.xlu1 %v1433_v41, %s9215_s26 }
 0x845   :  { %1452 = vrot.lane.b32.xlu0 %v1433_v41, %s9214_s25 }
 0x84d   :  { %1466 = vrot.lane.b32.xlu0 %v1436_v57, %s9213_s24 }
 0x855   :  { %1470 = vrot.lane.b32.xlu0 %v1436_v57, %s9215_s26 }
 0x866   :  { %v9931_v60 = vpop.permute.xlu2 %1444 }
 0x867   :  { %1538 = vrot.lane.b32.xlu1 %v9931_v60, %s9215_s26 }
 0x87e   :  { %v1441_v1 = vpop.permute.xlu1 %1440 }
 0x87f   :  { %1503 = vrot.lane.b32.xlu0 %v1441_v1, %s9215_s26  ;;  %v8534_v19 = vpack.i.bf16 %v1441_v1, %v1433_v41 }
 0x886   :  { %v9936_v52 = vpop.permute.xlu1 %1448  ;;  %v1447_v7 = vpop.permute.xlu2 %1446 }
 0x88e   :  { %v9952_v11 = vpop.permute.xlu2 %1456 }
 0x896   :  { %v9964_v22 = vpop.permute.xlu2 %1460 }
 0x89e   :  { %v9938_v5 = vpop.permute.xlu1 %1454 }
 0x89f   :  { %v1443_v61 = vpop.permute.xlu0 %1442  ;;  %1610 = vrot.lane.b32.xlu0 %v9938_v5, %s9215_s26 }
 0x8a0   :  { %1505 = vrot.lane.b32.xlu2 %v1443_v61, %s9215_s26  ;;  %v8539_v56 = vpack.i.bf16 %v1443_v61, %v1436_v57 }
 0x8a6   :  { %v9943_v6 = vpop.permute.xlu1 %1464 }
 0x8a7   :  { %v9945_v10 = vpop.permute.xlu0 %1450  ;;  %1573 = vrot.lane.b32.xlu0 %v9936_v52, %s9215_s26 }
 0x8a8   :  { %1540 = vrot.lane.b32.xlu2 %v1447_v7, %s9215_s26  ;;  %1575 = vrot.lane.b32.xlu1 %v9945_v10, %s9215_s26  ;;  %v8544_v59 = vpack.i.bf16 %v9945_v10, %v1447_v7 }
 0x8ae   :  { %v9954_v13 = vpop.permute.xlu1 %1462 }
 0x8af   :  { %v9956_v49 = vpop.permute.xlu0 %1458  ;;  %1680 = vrot.lane.b32.xlu0 %v9954_v13, %s9215_s26 }
 0x8b0   :  { %1643 = vrot.lane.b32.xlu1 %v9952_v11, %s9215_s26  ;;  %1645 = vrot.lane.b32.xlu2 %v9956_v49, %s9215_s26 }
 0x8b6   :  { %v1469_v9 = vpop.permute.xlu1 %1468 }
 0x8b7   :  { %v9966_v24 = vpop.permute.xlu0 %1452  ;;  %1713 = vrot.lane.b32.xlu0 %v9943_v6, %s9215_s26 }
 0x8b8   :  { %1678 = vrot.lane.b32.xlu1 %v9964_v22, %s9215_s26  ;;  %1608 = vrot.lane.b32.xlu2 %v9966_v24, %s9215_s26 }
 0x8bf   :  { %v9974_v40 = vpop.permute.xlu0 %1466  ;;  %8540 = vrot.lane.b32.xlu0 %v8539_v56, %s9216_s27 }
 0x8c0   :  { %1715 = vrot.lane.b32.xlu2 %v9974_v40, %s9215_s26 }
 0x8c7   :  { %v1471_v8 = vpop.permute.xlu0 %1470 }
 0x8c8   :  { %8050 = vmatpush.xpose.msk.msra.mxu1 %vm149_vm1, %v1471_v8  ;;  %8535 = vrot.lane.b32.xlu2 %v8534_v19, %s9216_s27 }
 0x8cc   :  { %8051 = vmatpush.xpose.msk.msra.mxu1 %vm149_vm1, %v1469_v9 }
 0x8cf   :  { %8052 = vmatmul.msk.f32.vlgmr.msra.gmra.mxu1 %vm149_vm1, %v1433_v41 }
 0x8d0   :  { %8545 = vrot.lane.b32.xlu2 %v8544_v59, %s9216_s27 }
 0x8d7   :  { %8053 = vmatmul.msk.f32.gmra.mxu1 %vm149_vm1, %v1436_v57 }
 0x8d9   :  { %v1539_v47 = vpop.permute.xlu1 %1538 }
 0x8f1   :  { %v1504_v14 = vpop.permute.xlu0 %1503 }
 0x8fa   :  { %v1506_v4 = vpop.permute.xlu2 %1505 }
 0x8fb   :  { %8054 = vmatpush.xpose.msk.msra.mxu2 %vm149_vm1, %v1506_v4 }
 0x8ff   :  { %8055 = vmatpush.xpose.msk.msra.mxu2 %vm149_vm1, %v1504_v14 }
 0x902   :  { %v1541_v15 = vpop.permute.xlu2 %1540  ;;  %8056 = vmatmul.msk.f32.vlgmr.msra.gmra.mxu2 %vm149_vm1, %v1441_v1 }
 0x903   :  { %8058 = vmatpush.xpose.msk.msrb.mxu0 %vm149_vm1, %v1541_v15 }
 0x907   :  { %8059 = vmatpush.xpose.msk.msrb.mxu0 %vm149_vm1, %v1539_v47 }
 0x90a   :  { %v1646_v34 = vpop.permute.xlu2 %1645  ;;  %8057 = vmatmul.msk.f32.gmra.mxu2 %vm149_vm1, %v1443_v61  ;;  %8060 = vmatmul.msk.f32.vlgmr.msrb.gmra.mxu0 %vm149_vm1, %v9931_v60 }
 0x90b   :  { %8070 = vmatpush.xpose.msk.msra.mxu3 %vm149_vm1, %v1646_v34 }
 0x911   :  { %v1611_v16 = vpop.permute.xlu0 %1610 }
 0x912   :  { %v1609_v25 = vpop.permute.xlu2 %1608  ;;  %8061 = vmatmul.msk.f32.gmra.mxu0 %vm149_vm1, %v1447_v7  ;;  %8066 = vmatpush.xpose.msk.msrb.mxu2 %vm149_vm1, %v1611_v16 }
 0x916   :  { %8067 = vmatpush.xpose.msk.msrb.mxu2 %vm149_vm1, %v1609_v25 }
 0x919   :  { %8068 = vmatmul.msk.f32.vlgmr.msrb.gmra.mxu2 %vm149_vm1, %v9966_v24  ;;  %v1574_v17 = vpop.permute.xlu0 %1573 }
 0x91a   :  { %v1716_v21 = vpop.permute.xlu2 %1715  ;;  %v1576_v53 = vpop.permute.xlu1 %1575 }
 0x91b   :  { %8062 = vmatpush.xpose.msk.msrb.mxu1 %vm149_vm1, %v1576_v53 }
 0x91f   :  { %8063 = vmatpush.xpose.msk.msrb.mxu1 %vm149_vm1, %v1574_v17 }
 0x921   :  { %8069 = vmatmul.msk.f32.gmra.mxu2 %vm149_vm1, %v9938_v5  ;;  %v1681_v33 = vpop.permute.xlu0 %1680 }
 0x922   :  { %v8536_v28 = vpop.permute.xlu2 %8535  ;;  %8064 = vmatmul.msk.f32.vlgmr.msrb.gmra.mxu1 %vm149_vm1, %v9936_v52  ;;  %v1644_v44 = vpop.permute.xlu1 %1643  ;;  %8074 = vmatpush.xpose.msk.msra.mxu0 %vm149_vm1, %v1681_v33 }
 0x923   :  { %8078 = vmatpush.xpose.msk.msra.mxu1 %vm149_vm1, %v1716_v21  ;;  %8071 = vmatpush.xpose.msk.msra.mxu3 %vm149_vm1, %v1644_v44  ;;  %v8537_v26 = vunpack.i.l.bf16 %v8536_v28  ;;  %v8538_v0 = vunpack.i.h.bf16 %v8536_v28 }
 0x926   :  { %8072 = vmatmul.msk.f32.vlgmr.msra.gmra.mxu3 %vm149_vm1, %v9952_v11 }
 0x929   :  { %v1714_v2 = vpop.permute.xlu0 %1713 }
 0x92a   :  { %v8546_v58 = vpop.permute.xlu2 %8545  ;;  %8065 = vmatmul.msk.f32.gmra.mxu1 %vm149_vm1, %v9945_v10  ;;  %v1679_v31 = vpop.permute.xlu1 %1678 }
 0x92b   :  { %v8548_v18 = vunpack.i.h.bf16 %v8546_v58  ;;  %v8547_v20 = vunpack.i.l.bf16 %v8546_v58  ;;  %8075 = vmatpush.xpose.msk.msra.mxu0 %vm149_vm1, %v1679_v31  ;;  %8079 = vmatpush.xpose.msk.msra.mxu1 %vm149_vm1, %v1714_v2 }
 0x92e   :  { %8073 = vmatmul.msk.f32.gmra.mxu3 %vm149_vm1, %v9956_v49  ;;  %8076 = vmatmul.msk.f32.vlgmr.msra.gmra.mxu0 %vm149_vm1, %v9964_v22 }
 0x92f   :  { %2228 = vmatpush.msrb.mxu0 %v8547_v20  ;;  %2263 = vmatpush.msrb.mxu1 %v8548_v18 }
 0x931   :  { %v8541_v36 = vpop.permute.xlu0 %8540 }
 0x932   :  { %v8543_v37 = vunpack.i.h.bf16 %v8541_v36  ;;  %v8542_v32 = vunpack.i.l.bf16 %v8541_v36  ;;  %8080 = vmatmul.msk.f32.vlgmr.msra.gmra.mxu1 %vm149_vm1, %v9943_v6 }
 0x934   :  { %2158 = vmatpush.msra.mxu2 %v8542_v32  ;;  %2193 = vmatpush.msrb.mxu3 %v8543_v37 }
 0x936   :  { %8077 = vmatmul.msk.f32.gmra.mxu0 %vm149_vm1, %v9954_v13  ;;  %2159 = vmatpush.msra.mxu2 %v8537_v26 }
 0x937   :  { %2194 = vmatpush.msrb.mxu3 %v8538_v0 }
 0x93a   :  { %8081 = vmatmul.msk.f32.gmra.mxu1 %vm149_vm1, %v9974_v40 }
 0x94c   :  { %v1497_v42 = vpop.f32.mrf.mxu1 }
 0x94d   :  { %v1498_v27 = vadd.f32 %v1497_v42, %v9425_v63 }
 0x94f   :  { %v1748_v45 = vsel %vm426_vm3, %v1498_v27, -inf }
 0x950   :  { %1749 = vmax.xlane.f32.xlu2 %v1748_v45 }
 0x954   :  { %v1500_v46 = vpop.f32.mrf.mxu1 }
 0x955   :  { %v1501_v48 = vadd.f32 %v1500_v46, %v9433_v12 }
 0x957   :  { %v1751_v35 = vsel %vm426_vm3, %v1501_v48, -inf }
 0x958   :  { %1752 = vmax.xlane.f32.xlu0 %v1751_v35 }
 0x985   :  { %v1532_v30 = vpop.f32.mrf.mxu2 }
 0x986   :  { %v10030_v38 = vadd.f32 %v1532_v30, %v9425_v63 }
 0x987   :  { %v1567_v51 = vpop.f32.mrf.mxu0 }
 0x988   :  { %v10033_v55 = vadd.f32 %v1567_v51, %v9425_v63  ;;  %v1754_v3 = vsel %vm426_vm3, %v10030_v38, -inf }
 0x989   :  { %1755 = vmax.xlane.f32.xlu1 %v1754_v3 }
 0x98a   :  { %v1760_v43 = vsel %vm426_vm3, %v10033_v55, -inf }
 0x98b   :  { %1761 = vmax.xlane.f32.xlu2 %v1760_v43 }
 0x98d   :  { %v1535_v18 = vpop.f32.mrf.mxu2 }
 0x98e   :  { %v10079_v20 = vadd.f32 %v1535_v18, %v9433_v12 }
 0x98f   :  { %v1570_v50 = vpop.f32.mrf.mxu0 }
 0x990   :  { %v10058_v9 = vadd.f32 %v1570_v50, %v9433_v12  ;;  %v1757_v37 = vsel %vm426_vm3, %v10079_v20, -inf }
 0x992   :  { %v1763_v14 = vsel %vm426_vm3, %v10058_v9, -inf }
 0x99f   :  { %v1602_v29 = vpop.f32.mrf.mxu1 }
 0x9a0   :  { %v10040_v54 = vadd.f32 %v1602_v29, %v9425_v63 }
 0x9a2   :  { %v1766_v41 = vsel %vm426_vm3, %v10040_v54, -inf }
 0x9a3   :  { %1767 = vmax.xlane.f32.xlu0 %v1766_v41 }
 0x9a7   :  { %v1605_v57 = vpop.f32.mrf.mxu1 }
 0x9a8   :  { %v10045_v1 = vadd.f32 %v1605_v57, %v9433_v12 }
 0x9a9   :  { %v1672_v61 = vpop.f32.mrf.mxu3 }
 0x9aa   :  { %v10048_v7 = vadd.f32 %v1672_v61, %v9425_v63  ;;  %v1769_v10 = vsel %vm426_vm3, %v10045_v1, -inf }
 0x9ab   :  { %1770 = vmax.xlane.f32.xlu0 %v1769_v10  ;;  %v1707_v56 = vpop.f32.mrf.mxu0 }
 0x9ac   :  { %v1778_v19 = vsel %vm426_vm3, %v10048_v7, -inf  ;;  %v10055_v8 = vadd.f32 %v1707_v56, %v9425_v63 }
 0x9ad   :  { %1779 = vmax.xlane.f32.xlu2 %v1778_v19 }
 0x9ae   :  { %v1784_v59 = vsel %vm426_vm3, %v10055_v8, -inf }
 0x9af   :  { %v1742_v2 = vpop.f32.mrf.mxu1 }
 0x9b0   :  { %v10088_v0 = vadd.f32 %v1742_v2, %v9425_v63 }
 0x9b1   :  { %v1675_v15 = vpop.f32.mrf.mxu3 }
 0x9b2   :  { %v10068_v34 = vadd.f32 %v1675_v15, %v9433_v12  ;;  %v1790_v45 = vsel %vm426_vm3, %v10088_v0, -inf }
 0x9b3   :  { %v1710_v4 = vpop.f32.mrf.mxu0  ;;  %1785 = vmax.xlane.f32.xlu0 %v1784_v59 }
 0x9b4   :  { %v10065_v47 = vadd.f32 %v1710_v4, %v9433_v12  ;;  %v1781_v25 = vsel %vm426_vm3, %v10068_v34, -inf }
 0x9b5   :  { %1764 = vmax.xlane.f32.xlu2 %v1763_v14 }
 0x9b6   :  { %v1787_v16 = vsel %vm426_vm3, %v10065_v47, -inf }
 0x9b7   :  { %v1745_v26 = vpop.f32.mrf.mxu1 }
 0x9b8   :  { %v10091_v42 = vadd.f32 %v1745_v26, %v9433_v12 }
 0x9ba   :  { %v1793_v46 = vsel %vm426_vm3, %v10091_v42, -inf }
 0x9bb   :  { %1788 = vmax.xlane.f32.xlu0 %v1787_v16 }
 0x9bd   :  { %1782 = vmax.xlane.f32.xlu2 %v1781_v25 }
 0x9c3   :  { %v1750_v17 = vpop.xlane.xlu2 %1749 }
 0x9c4   :  { %v1796_v21 = vsub.f32 %v1498_v27, %v1750_v17  ;;  %v1637_v27 = vpop.f32.mrf.mxu2 }
 0x9c6   :  { %v1812_v53 = vmul.f32 1.442695, %v1796_v21 }
 0x9c8   :  { %8820 = vpow2.f32 %v1812_v53 }
 0x9cb   :  { %v1753_v33 = vpop.xlane.xlu0 %1752 }
 0x9cc   :  { %v1797_v28 = vsub.f32 %v1501_v48, %v1753_v33  ;;  %v10098_v48 = vadd.f32 %v1637_v27, %v9425_v63  ;;  %v1640_v30 = vpop.f32.mrf.mxu2 }
 0x9cd   :  { %v10103_v51 = vadd.f32 %v1640_v30, %v9433_v12 }
 0x9ce   :  { %v10074_v44 = vpop.eup %8820  ;;  %v1814_v58 = vmul.f32 1.442695, %v1797_v28  ;;  %v1772_v35 = vsel %vm426_vm3, %v10098_v48, -inf }
 0x9cf   :  { %v1844_v31 = vsel %vm426_vm3, %v10074_v44, 0.0  ;;  %v1775_v3 = vsel %vm426_vm3, %v10103_v51, -inf }
 0x9d0   :  { %8822 = vpow2.f32 %v1814_v58  ;;  %1845 = vadd.xlane.f32.xlu1 %v1844_v31 }
 0x9d6   :  { %v10081_v36 = vpop.eup %8822 }
 0x9d7   :  { %v1847_v32 = vsel %vm426_vm3, %v10081_v36, 0.0 }
 0x9d8   :  { %1758 = vmax.xlane.f32.xlu1 %v1757_v37  ;;  %1848 = vadd.xlane.f32.xlu2 %v1847_v32 }
 0x9e0   :  { %1791 = vmax.xlane.f32.xlu1 %v1790_v45  ;;  %1794 = vmax.xlane.f32.xlu2 %v1793_v46 }
 0x9e8   :  { %1773 = vmax.xlane.f32.xlu1 %v1772_v35 }
 0x9f0   :  { %1776 = vmax.xlane.f32.xlu1 %v1775_v3 }
 0x9fc   :  { %v1756_v43 = vpop.xlane.xlu1 %1755 }
 0x9fd   :  { %v1798_v29 = vsub.f32 %v10030_v38, %v1756_v43 }
 0x9fe   :  { %v1762_v41 = vpop.xlane.xlu2 %1761 }
 0x9ff   :  { %v1816_v50 = vmul.f32 1.442695, %v1798_v29  ;;  %v1800_v57 = vsub.f32 %v10033_v55, %v1762_v41 }
 0xa01   :  { %8824 = vpow2.f32 %v1816_v50  ;;  %v1820_v61 = vmul.f32 1.442695, %v1800_v57 }
 0xa03   :  { %8826 = vpow2.f32 %v1820_v61 }
 0xa07   :  { %v10109_v10 = vpop.eup %8824 }
 0xa08   :  { %v1850_v56 = vsel %vm426_vm3, %v10109_v10, 0.0 }
 0xa09   :  { %v10113_v19 = vpop.eup %8826  ;;  %1851 = vadd.xlane.f32.xlu0 %v1850_v56 }
 0xa0a   :  { %v1856_v59 = vsel %vm426_vm3, %v10113_v19, 0.0 }
 0xa0b   :  { %1857 = vadd.xlane.f32.xlu1 %v1856_v59 }
 0xa16   :  { %v1768_v38 = vpop.xlane.xlu0 %1767 }
 0xa17   :  { %v1802_v4 = vsub.f32 %v10040_v54, %v1768_v38 }
 0xa19   :  { %v1824_v14 = vmul.f32 1.442695, %v1802_v4 }
 0xa1b   :  { %8828 = vpow2.f32 %v1824_v14 }
 0xa1e   :  { %v1771_v55 = vpop.xlane.xlu0 %1770 }
 0xa1f   :  { %v1803_v15 = vsub.f32 %v10045_v1, %v1771_v55 }
 0xa20   :  { %v1780_v16 = vpop.xlane.xlu2 %1779 }
 0xa21   :  { %v10119_v25 = vpop.eup %8828  ;;  %v1826_v17 = vmul.f32 1.442695, %v1803_v15  ;;  %v1806_v21 = vsub.f32 %v10048_v7, %v1780_v16  ;;  %v8559_v15 = vpack.i.bf16 %v9952_v11, %v9966_v24 }
 0xa22   :  { %v1862_v53 = vsel %vm426_vm3, %v10119_v25, 0.0 }
 0xa23   :  { %8830 = vpow2.f32 %v1826_v17  ;;  %v1832_v33 = vmul.f32 1.442695, %v1806_v21  ;;  %1863 = vadd.xlane.f32.xlu2 %v1862_v53 }
 0xa25   :  { %8832 = vpow2.f32 %v1832_v33 }
 0xa26   :  { %v1786_v28 = vpop.xlane.xlu0 %1785 }
 0xa27   :  { %v1808_v1 = vsub.f32 %v10055_v8, %v1786_v28 }
 0xa28   :  { %v1765_v54 = vpop.xlane.xlu2 %1764 }
 0xa29   :  { %v10124_v2 = vpop.eup %8830  ;;  %v1801_v58 = vsub.f32 %v10058_v9, %v1765_v54  ;;  %v1836_v32 = vmul.f32 1.442695, %v1808_v1 }
 0xa2a   :  { %v1865_v31 = vsel %vm426_vm3, %v10124_v2, 0.0 }
 0xa2b   :  { %v10130_v18 = vpop.eup %8832  ;;  %v1822_v7 = vmul.f32 1.442695, %v1801_v58  ;;  %1866 = vadd.xlane.f32.xlu2 %v1865_v31 }
 0xa2c   :  { %v1874_v37 = vsel %vm426_vm3, %v10130_v18, 0.0 }
 0xa2d   :  { %8834 = vpow2.f32 %v1822_v7  ;;  %1875 = vadd.xlane.f32.xlu1 %v1874_v37 }
 0xa2e   :  { %v1789_v26 = vpop.xlane.xlu0 %1788  ;;  %8836 = vpow2.f32 %v1836_v32 }
 0xa2f   :  { %v1809_v27 = vsub.f32 %v10065_v47, %v1789_v26 }
 0xa30   :  { %v1783_v3 = vpop.xlane.xlu2 %1782 }
 0xa31   :  { %v1838_v45 = vmul.f32 1.442695, %v1809_v27  ;;  %v1807_v59 = vsub.f32 %v10068_v34, %v1783_v3 }
 0xa33   :  { %v10135_v9 = vpop.eup %8834  ;;  %8838 = vpow2.f32 %v1838_v45  ;;  %v1834_v21 = vmul.f32 1.442695, %v1807_v59 }
 0xa34   :  { %v1859_v8 = vsel %vm426_vm3, %v10135_v9, 0.0  ;;  %v10139_v46 = vpop.eup %8836 }
 0xa35   :  { %1860 = vadd.xlane.f32.xlu1 %v1859_v8  ;;  %v1880_v47 = vsel %vm426_vm3, %v10139_v46, 0.0 }
 0xa39   :  { %v10141_v35 = vpop.eup %8838 }
 0xa3a   :  { %v1883_v30 = vsel %vm426_vm3, %v10141_v35, 0.0 }
 0xa3b   :  { %1884 = vadd.xlane.f32.xlu2 %v1883_v30 }
 0xa3d   :  { %1881 = vadd.xlane.f32.xlu1 %v1880_v47 }
 0xa43   :  { %v1846_v43 = vpop.xlane.xlu1 %1845 }
 0xa44   :  { %8840 = vrcp.f32 %v1846_v43  ;;  %v1903_v38 = vand.u32 2147483648, %v1846_v43  ;;  %v1901_v55 = vand.u32 2147483647, %v1846_v43  ;;  %vm1897_vm15 = vweird.f32 %v1846_v43 }
 0xa46   :  { %v1904_v53 = vor.u32 1.1754944e-38, %v1903_v38  ;;  %vm1902_vm9 = vcmp.eq.f32.partialorder %v1901_v55, 8.507059e+37  ;;  %v8554_v38 = vpack.i.bf16 %v9956_v49, %v9938_v5  ;;  %v8569_v5 = vpack.i.bf16 %v9943_v6, %v9964_v22 }
 0xa4a   :  { %v8841_v29 = vpop.eup %8840 }
 0xa4b   :  { %v1893_v41 = vmul.f32 %v8841_v29, %v1846_v43  ;;  %v1849_v50 = vpop.xlane.xlu2 %1848  ;;  %v1759_v57 = vpop.xlane.xlu1 %1758  ;;  %vm1898_vm14 = vweird.f32 %v8841_v29 }
 0xa4c   :  { %8842 = vrcp.f32 %v1849_v50  ;;  %v1799_v61 = vsub.f32 %v10079_v20, %v1759_v57  ;;  %vm1899_vm2 = vmor %vm1897_vm15, %vm1898_vm14  ;;  %v1917_v24 = vand.u32 2147483648, %v1849_v50  ;;  %v1915_v32 = vand.u32 2147483647, %v1849_v50 }
 0xa4d   :  { %v1894_v56 = vsub.f32 1.0, %v1893_v41  ;;  %vm1911_vm11 = vweird.f32 %v1849_v50 }
 0xa4e   :  { %v1818_v4 = vmul.f32 1.442695, %v1799_v61  ;;  %v1918_v26 = vor.u32 1.1754944e-38, %v1917_v24  ;;  %vm1916_vm13 = vcmp.eq.f32.partialorder %v1915_v32, 8.507059e+37 }
 0xa4f   :  { %v1895_v14 = vmul.f32 %v8841_v29, %v1894_v56 }
 0xa50   :  { %8844 = vpow2.f32 %v1818_v4 }
 0xa51   :  { %v1896_v16 = vadd.f32 %v8841_v29, %v1895_v14  ;;  %8846 = vpow2.f32 %v1834_v21 }
 0xa52   :  { %v8843_v17 = vpop.eup %8842 }
 0xa53   :  { %v1900_v33 = vsel %vm1899_vm2, %v8841_v29, %v1896_v16  ;;  %v1907_v20 = vmul.f32 %v8843_v17, %v1849_v50  ;;  %8560 = vrot.lane.b32.xlu2 %v8559_v15, %s9216_s27  ;;  %v1792_v34 = vpop.xlane.xlu1 %1791  ;;  %vm1912_vm10 = vweird.f32 %v8843_v17  ;;  %v8549_v16 = vpack.i.bf16 %v9936_v52, %v9931_v60  ;;  %v1795_v52 = vpop.xlane.xlu2 %1794 }
 0xa54   :  { %v1810_v28 = vsub.f32 %v10088_v0, %v1792_v34  ;;  %v1905_v54 = vsel %vm1902_vm9, %v1904_v53, %v1900_v33  ;;  %vm1913_vm12 = vmor %vm1911_vm11, %vm1912_vm10 }
 0xa55   :  { %v1908_v58 = vsub.f32 1.0, %v1907_v20  ;;  %v2116_v1 = vmul.f32 %v10074_v44, %v1905_v54  ;;  %v1811_v20 = vsub.f32 %v10091_v42, %v1795_v52 }
 0xa56   :  { %v10154_v31 = vpop.eup %8844  ;;  %v1840_v11 = vmul.f32 1.442695, %v1810_v28 }
 0xa57   :  { %8082 = vmatmul.msk.f32.vlgmr.msra.gmra.mxu2 %vm426_vm3, %v2116_v1  ;;  %v1853_v7 = vsel %vm426_vm3, %v10154_v31, 0.0  ;;  %v1909_v37 = vmul.f32 %v8843_v17, %v1908_v58  ;;  %v10159_v45 = vpop.eup %8846  ;;  %v1842_v34 = vmul.f32 1.442695, %v1811_v20 }
 0xa58   :  { %1854 = vadd.xlane.f32.xlu0 %v1853_v7  ;;  %8848 = vpow2.f32 %v1840_v11  ;;  %v1877_v29 = vsel %vm426_vm3, %v10159_v45, 0.0 }
 0xa59   :  { %v1910_v0 = vadd.f32 %v8843_v17, %v1909_v37 }
 0xa5b   :  { %v1774_v44 = vpop.xlane.xlu1 %1773  ;;  %v1914_v27 = vsel %vm1913_vm12, %v8843_v17, %v1910_v0 }
 0xa5c   :  { %v1804_v8 = vsub.f32 %v10098_v48, %v1774_v44  ;;  %v1919_v30 = vsel %vm1916_vm13, %v1918_v26, %v1914_v27 }
 0xa5d   :  { %v2117_v47 = vmul.f32 %v10081_v36, %v1919_v30 }
 0xa5e   :  { %v1828_v3 = vmul.f32 1.442695, %v1804_v8  ;;  %v10163_v43 = vpop.eup %8848 }
 0xa5f   :  { %8083 = vmatmul.msk.f32.gmra.mxu2 %vm426_vm3, %v2117_v47  ;;  %v1886_v41 = vsel %vm426_vm3, %v10163_v43, 0.0 }
 0xa60   :  { %8850 = vpow2.f32 %v1828_v3  ;;  %1878 = vadd.xlane.f32.xlu0 %v1877_v29  ;;  %1887 = vadd.xlane.f32.xlu1 %v1886_v41 }
 0xa63   :  { %v1777_v50 = vpop.xlane.xlu1 %1776 }
 0xa64   :  { %v1805_v48 = vsub.f32 %v10103_v51, %v1777_v50  ;;  %v8564_v51 = vpack.i.bf16 %v9974_v40, %v9954_v13 }
 0xa66   :  { %v10171_v57 = vpop.eup %8850  ;;  %v1830_v36 = vmul.f32 1.442695, %v1805_v48 }
 0xa67   :  { %v1868_v61 = vsel %vm426_vm3, %v10171_v57, 0.0 }
 0xa68   :  { %8852 = vpow2.f32 %v1830_v36  ;;  %1869 = vadd.xlane.f32.xlu0 %v1868_v61 }
 0xa6e   :  { %v10175_v56 = vpop.eup %8852 }
 0xa6f   :  { %v1871_v59 = vsel %vm426_vm3, %v10175_v56, 0.0 }
 0xa70   :  { %1872 = vadd.xlane.f32.xlu1 %v1871_v59 }
 0xa7c   :  { %v1852_v4 = vpop.xlane.xlu0 %1851  ;;  %8555 = vrot.lane.b32.xlu0 %v8554_v38, %s9216_s27 }
 0xa7d   :  { %8854 = vrcp.f32 %v1852_v4  ;;  %v1931_v17 = vand.u32 2147483648, %v1852_v4  ;;  %v1929_v53 = vand.u32 2147483647, %v1852_v4  ;;  %vm1925_vm15 = vweird.f32 %v1852_v4 }
 0xa7e   :  { %8856 = vpow2.f32 %v1842_v34  ;;  %v10198_v22 = vpop.xlane.xlu1 %1857 }
 0xa7f   :  { %v1932_v13 = vor.u32 1.1754944e-38, %v1931_v17  ;;  %vm1930_vm9 = vcmp.eq.f32.partialorder %v1929_v53, 8.507059e+37  ;;  %v1959_v17 = vand.u32 2147483648, %v10198_v22 }
 0xa83   :  { %v8855_v14 = vpop.eup %8854 }
 0xa84   :  { %v1921_v55 = vmul.f32 %v8855_v14, %v1852_v4  ;;  %8565 = vrot.lane.b32.xlu0 %v8564_v51, %s9216_s27  ;;  %vm1926_vm14 = vweird.f32 %v8855_v14  ;;  %v10194_v28 = vpop.eup %8856 }
 0xa85   :  { %vm1927_vm2 = vmor %vm1925_vm15, %vm1926_vm14  ;;  %v1889_v6 = vsel %vm426_vm3, %v10194_v28, 0.0 }
 0xa86   :  { %v1922_v15 = vsub.f32 1.0, %v1921_v55 }
 0xa88   :  { %v1923_v21 = vmul.f32 %v8855_v14, %v1922_v15 }
 0xa89   :  { %8550 = vrot.lane.b32.xlu1 %v8549_v16, %s9216_s27 }
 0xa8a   :  { %v1924_v49 = vadd.f32 %v8855_v14, %v1923_v21 }
 0xa8c   :  { %v1928_v40 = vsel %vm1927_vm2, %v8855_v14, %v1924_v49  ;;  %8570 = vrot.lane.b32.xlu0 %v8569_v5, %s9216_s27 }
 0xa8d   :  { %v1933_v33 = vsel %vm1930_vm9, %v1932_v13, %v1928_v40  ;;  %vm1953_vm9 = vweird.f32 %v10198_v22 }
 0xa8e   :  { %v2118_v60 = vmul.f32 %v10109_v10, %v1933_v33  ;;  %v1957_v33 = vand.u32 2147483647, %v10198_v22 }
 0xa90   :  { %8084 = vmatmul.msk.f32.vlgmr.msrb.gmra.mxu3 %vm426_vm3, %v2118_v60 }
 0xa96   :  { %v10205_v1 = vpop.xlane.xlu2 %1863 }
 0xa9e   :  { %v10221_v3 = vpop.xlane.xlu2 %1866 }
 0xaa0   :  { %v10200_v54 = vpop.xlane.xlu1 %1875 }
 0xaa1   :  { %v2043_v60 = vand.u32 2147483648, %v10200_v54  ;;  %vm2037_vm2 = vweird.f32 %v10200_v54 }
 0xaa8   :  { %v10202_v58 = vpop.xlane.xlu1 %1860 }
 0xaae   :  { %v10244_v21 = vpop.xlane.xlu2 %1884 }
 0xab0   :  { %v10208_v11 = vpop.xlane.xlu1 %1881 }
 0xab3   :  { %1890 = vadd.xlane.f32.xlu1 %v1889_v6  ;;  %v2041_v6 = vand.u32 2147483647, %v10200_v54 }
 0xacb   :  { %v1855_v10 = vpop.xlane.xlu0 %1854 }
 0xacc   :  { %8858 = vrcp.f32 %v1855_v10  ;;  %v1945_v44 = vand.u32 2147483648, %v1855_v10  ;;  %v1943_v8 = vand.u32 2147483647, %v1855_v10  ;;  %vm1939_vm11 = vweird.f32 %v1855_v10 }
 0xacd   :  { %8860 = vrcp.f32 %v10200_v54 }
 0xace   :  { %8862 = vrcp.f32 %v10198_v22  ;;  %v1946_v48 = vor.u32 1.1754944e-38, %v1945_v44  ;;  %vm1944_vm13 = vcmp.eq.f32.partialorder %v1943_v8, 8.507059e+37 }
 0xacf   :  { %8864 = vrcp.f32 %v10205_v1 }
 0xad2   :  { %v8859_v42 = vpop.eup %8858 }
 0xad3   :  { %v1935_v24 = vmul.f32 %v8859_v42, %v1855_v10  ;;  %v10210_v7 = vpop.xlane.xlu0 %1878  ;;  %v10212_v37 = vpop.eup %8860  ;;  %vm1940_vm10 = vweird.f32 %v8859_v42  ;;  %v10268_v10 = vor.u32 1.1754944e-38, %v1959_v17 }
 0xad4   :  { %v10215_v0 = vpop.eup %8862  ;;  %v2033_v27 = vmul.f32 %v10212_v37, %v10200_v54  ;;  %vm1941_vm12 = vmor %vm1939_vm11, %vm1940_vm10  ;;  %8866 = vrcp.f32 %v10210_v7  ;;  %v10224_v29 = vpop.xlane.xlu1 %1887  ;;  %vm2038_vm14 = vweird.f32 %v10212_v37 }
 0xad5   :  { %v1936_v32 = vsub.f32 1.0, %v1935_v24  ;;  %v1949_v47 = vmul.f32 %v10215_v0, %v10198_v22  ;;  %v10228_v36 = vpop.eup %8864  ;;  %vm1954_vm15 = vweird.f32 %v10215_v0  ;;  %vm10273_vm10 = vmor %vm2037_vm2, %vm2038_vm14  ;;  %vm2042_vm14 = vcmp.eq.f32.partialorder %v2041_v6, 8.507059e+37 }
 0xad6   :  { %v2034_v61 = vsub.f32 1.0, %v2033_v27  ;;  %v1977_v51 = vmul.f32 %v10228_v36, %v10205_v1  ;;  %v2044_v27 = vor.u32 1.1754944e-38, %v2043_v60  ;;  %vm1982_vm2 = vweird.f32 %v10228_v36 }
 0xad7   :  { %v1937_v26 = vmul.f32 %v8859_v42, %v1936_v32  ;;  %v1950_v38 = vsub.f32 1.0, %v1949_v47 }
 0xad8   :  { %v2035_v14 = vmul.f32 %v10212_v37, %v2034_v61 }
 0xad9   :  { %v1938_v30 = vadd.f32 %v8859_v42, %v1937_v26  ;;  %v1951_v16 = vmul.f32 %v10215_v0, %v1950_v38 }
 0xada   :  { %v10238_v55 = vpop.eup %8866  ;;  %v2036_v49 = vadd.f32 %v10212_v37, %v2035_v14 }
 0xadb   :  { %v10226_v41 = vpop.xlane.xlu0 %1869  ;;  %v1942_v50 = vsel %vm1941_vm12, %v8859_v42, %v1938_v30  ;;  %v2047_v13 = vmul.f32 %v10238_v55, %v10210_v7  ;;  %v10262_v34 = vadd.f32 %v10215_v0, %v1951_v16  ;;  %vm10286_vm12 = vmor %vm1953_vm9, %vm1954_vm15 }
 0xadc   :  { %8868 = vrcp.f32 %v10226_v41  ;;  %v1947_v59 = vsel %vm1944_vm13, %v1946_v48, %v1942_v50  ;;  %v2040_v22 = vsel %vm10273_vm10, %v10212_v37, %v2036_v49  ;;  %v2015_v47 = vand.u32 2147483648, %v10226_v41 }
 0xadd   :  { %v2119_v4 = vmul.f32 %v10154_v31, %v1947_v59  ;;  %8870 = vrcp.f32 %v10221_v3  ;;  %v1978_v31 = vsub.f32 1.0, %v1977_v51  ;;  %v2048_v54 = vsub.f32 1.0, %v2047_v13 }
 0xade   :  { %8872 = vrcp.f32 %v10202_v58  ;;  %v1956_v37 = vsel %vm10286_vm12, %v10215_v0, %v10262_v34  ;;  %vm10302_vm13 = vcmp.eq.f32.partialorder %v1957_v33, 8.507059e+37  ;;  %vm2009_vm15 = vweird.f32 %v10226_v41 }
 0xadf   :  { %8085 = vmatmul.msk.f32.gmra.mxu3 %vm426_vm3, %v2119_v4  ;;  %v1979_v42 = vmul.f32 %v10228_v36, %v1978_v31  ;;  %v2013_v61 = vand.u32 2147483647, %v10226_v41  ;;  %v1987_v59 = vand.u32 2147483648, %v10205_v1  ;;  %v2045_v4 = vsel %vm2042_vm14, %v2044_v27, %v2040_v22  ;;  %v8561_v31 = vpop.permute.xlu2 %8560 }
 0xae0   :  { %v2049_v16 = vmul.f32 %v10238_v55, %v2048_v54  ;;  %v2126_v33 = vmul.f32 %v10130_v18, %v2045_v4  ;;  %v8563_v6 = vunpack.i.h.bf16 %v8561_v31  ;;  %vm2051_vm14 = vweird.f32 %v10210_v7 }
 0xae1   :  { %v10317_v51 = vadd.f32 %v10228_v36, %v1979_v42  ;;  %vm2014_vm10 = vcmp.eq.f32.partialorder %v2013_v61, 8.507059e+37  ;;  %v8562_v42 = vunpack.i.l.bf16 %v8561_v31  ;;  %v2057_v18 = vand.u32 2147483648, %v10210_v7 }
 0xae2   :  { %v10240_v15 = vpop.eup %8868  ;;  %v2050_v24 = vadd.f32 %v10238_v55, %v2049_v16  ;;  %v2055_v27 = vand.u32 2147483647, %v10210_v7  ;;  %v1985_v7 = vand.u32 2147483647, %v10205_v1 }
 0xae3   :  { %v2005_v53 = vmul.f32 %v10240_v15, %v10226_v41  ;;  %v10248_v5 = vpop.xlane.xlu1 %1872  ;;  %v10255_v40 = vpop.eup %8870  ;;  %vm2010_vm11 = vweird.f32 %v10240_v15 }
 0xae4   :  { %8874 = vrcp.f32 %v10248_v5  ;;  %v10259_v20 = vpop.eup %8872  ;;  %v10280_v26 = vmul.f32 %v10255_v40, %v10221_v3  ;;  %vm10310_vm9 = vmor %vm2009_vm15, %vm2010_vm11  ;;  %vm2052_vm11 = vweird.f32 %v10238_v55  ;;  %vm2023_vm15 = vweird.f32 %v10248_v5 }
 0xae5   :  { %v2006_v52 = vsub.f32 1.0, %v2005_v53  ;;  %v10292_v8 = vmul.f32 %v10259_v20, %v10202_v58  ;;  %8876 = vrcp.f32 %v10208_v11  ;;  %v2016_v53 = vor.u32 1.1754944e-38, %v2015_v47 }
 0xae6   :  { %v1992_v14 = vsub.f32 1.0, %v10280_v26  ;;  %8878 = vrcp.f32 %v10224_v29  ;;  %v2029_v26 = vand.u32 2147483648, %v10248_v5  ;;  %v2027_v54 = vand.u32 2147483647, %v10248_v5 }
 0xae7   :  { %v2007_v32 = vmul.f32 %v10240_v15, %v2006_v52  ;;  %v1964_v17 = vsub.f32 1.0, %v10292_v8  ;;  %v1988_v47 = vor.u32 1.1754944e-38, %v1987_v59  ;;  %8880 = vrcp.f32 %v10244_v21 }
 0xae8   :  { %v1993_v48 = vmul.f32 %v10255_v40, %v1992_v14 }
 0xae9   :  { %v2008_v30 = vadd.f32 %v10240_v15, %v2007_v32 }
 0xaea   :  { %v10296_v50 = vpop.eup %8874 }
 0xaeb   :  { %v2019_v0 = vmul.f32 %v10296_v50, %v10248_v5  ;;  %v2012_v41 = vsel %vm10310_vm9, %v10240_v15, %v2008_v30  ;;  %vm2024_vm12 = vweird.f32 %v10296_v50  ;;  %vm10341_vm9 = vmor %vm2051_vm14, %vm2052_vm11  ;;  %v10346_v8 = vpop.eup %8876  ;;  %v1961_v5 = vsel %vm10302_vm13, %v10268_v10, %v1956_v37 }
 0xaec   :  { %v2017_v15 = vsel %vm2014_vm10, %v2016_v53, %v2012_v41  ;;  %vm1981_vm10 = vweird.f32 %v10205_v1  ;;  %vm10351_vm0 = vmor %vm2023_vm15, %vm2024_vm12  ;;  %v10358_v30 = vpop.eup %8878  ;;  %v2054_v38 = vsel %vm10341_vm9, %v10238_v55, %v2050_v24  ;;  %v2030_v1 = vor.u32 1.1754944e-38, %v2029_v26 }
 0xaed   :  { %v2020_v49 = vsub.f32 1.0, %v2019_v0  ;;  %v2124_v22 = vmul.f32 %v10171_v57, %v2017_v15  ;;  %vm10371_vm13 = vmor %vm1981_vm10, %vm1982_vm2  ;;  %v2058_v37 = vor.u32 1.1754944e-38, %v2057_v18  ;;  %vm2056_vm11 = vcmp.eq.f32.partialorder %v2055_v27, 8.507059e+37 }
 0xaee   :  { %v8556_v13 = vpop.permute.xlu0 %8555  ;;  %v1965_v55 = vmul.f32 %v10259_v20, %v1964_v17  ;;  %v2061_v0 = vmul.f32 %v10346_v8, %v10208_v11  ;;  %v2089_v4 = vmul.f32 %v10358_v30, %v10224_v29  ;;  %vm1986_vm2 = vcmp.eq.f32.partialorder %v1985_v7, 8.507059e+37 }
 0xaef   :  { %v8558_v60 = vunpack.i.h.bf16 %v8556_v13  ;;  %v8557_v52 = vunpack.i.l.bf16 %v8556_v13  ;;  %v2021_v34 = vmul.f32 %v10296_v50, %v2020_v49  ;;  %v2059_v16 = vsel %vm2056_vm11, %v2058_v37, %v2054_v38  ;;  %v10394_v13 = vpop.eup %8880 }
 0xaf0   :  { %v2120_v14 = vmul.f32 %v10113_v19, %v1961_v5  ;;  %v1994_v53 = vadd.f32 %v10255_v40, %v1993_v48  ;;  %vm1996_vm12 = vweird.f32 %v10255_v40  ;;  %v2127_v17 = vmul.f32 %v10159_v45, %v2059_v16 }
 0xaf1   :  { %2298 = vmatpush.msrb.mxu2 %v8557_v52  ;;  %2333 = vmatpush.msra.mxu3 %v8558_v60  ;;  %v2022_v32 = vadd.f32 %v10296_v50, %v2021_v34  ;;  %v1966_v49 = vadd.f32 %v10259_v20, %v1965_v55  ;;  %vm1968_vm14 = vweird.f32 %v10259_v20  ;;  %v2090_v60 = vsub.f32 1.0, %v2089_v4 }
 0xaf2   :  { %vm1995_vm15 = vweird.f32 %v10221_v3  ;;  %v1999_v52 = vand.u32 2147483647, %v10221_v3  ;;  %vm1967_vm9 = vweird.f32 %v10202_v58  ;;  %v1973_v45 = vand.u32 2147483648, %v10202_v58 }
 0xaf3   :  { %2299 = vmatpush.msrb.mxu2 %v8562_v42  ;;  %2334 = vmatpush.msra.mxu3 %v8563_v6  ;;  %v2026_v61 = vsel %vm10351_vm0, %v10296_v50, %v2022_v32  ;;  %v1984_v50 = vsel %vm10371_vm13, %v10228_v36, %v10317_v51  ;;  %vm2028_vm0 = vcmp.eq.f32.partialorder %v2027_v54, 8.507059e+37  ;;  %v2001_v36 = vand.u32 2147483648, %v10221_v3  ;;  %vm10404_vm10 = vmor %vm1995_vm15, %vm1996_vm12 }
 0xaf4   :  { %8090 = vmatmul.msk.f32.vlgmr.msrb.gmra.mxu2 %vm426_vm3, %v2124_v22  ;;  %8092 = vmatmul.msk.f32.vlgmr.msra.gmra.mxu3 %vm426_vm3, %v2126_v33  ;;  %v2031_v41 = vsel %vm2028_vm0, %v2030_v1, %v2026_v61  ;;  %v1989_v31 = vsel %vm1986_vm2, %v1988_v47, %v1984_v50  ;;  %v2062_v33 = vsub.f32 1.0, %v2061_v0  ;;  %vm10411_vm13 = vmor %vm1967_vm9, %vm1968_vm14  ;;  %v1971_v42 = vand.u32 2147483647, %v10202_v58 }
 0xaf5   :  { %v2125_v51 = vmul.f32 %v10175_v56, %v2031_v41  ;;  %v2122_v6 = vmul.f32 %v10119_v25, %v1989_v31  ;;  %v1998_v24 = vsel %vm10404_vm10, %v10255_v40, %v1994_v53  ;;  %v2002_v32 = vor.u32 1.1754944e-38, %v2001_v36 }
 0xaf6   :  { %v8566_v59 = vpop.permute.xlu0 %8565  ;;  %v2075_v26 = vmul.f32 %v10394_v13, %v10244_v21  ;;  %v1970_v25 = vsel %vm10411_vm13, %v10259_v20, %v1966_v49  ;;  %v2063_v44 = vmul.f32 %v10346_v8, %v2062_v33  ;;  %v2091_v58 = vmul.f32 %v10358_v30, %v2090_v60 }
 0xaf7   :  { %v8568_v18 = vunpack.i.h.bf16 %v8566_v59  ;;  %v8567_v22 = vunpack.i.l.bf16 %v8566_v59  ;;  %v1974_v40 = vor.u32 1.1754944e-38, %v1973_v45  ;;  %vm2000_vm0 = vcmp.eq.f32.partialorder %v1999_v52, 8.507059e+37 }
 0xaf8   :  { %vm1972_vm11 = vcmp.eq.f32.partialorder %v1971_v42, 8.507059e+37  ;;  %v2003_v5 = vsel %vm2000_vm0, %v2002_v32, %v1998_v24  ;;  %vm2066_vm2 = vweird.f32 %v10346_v8  ;;  %v2076_v7 = vsub.f32 1.0, %v2075_v26  ;;  %v2161_v42 = vpop.f32.mrf.mxu2 }
 0xaf9   :  { %v1975_v20 = vsel %vm1972_vm11, %v1974_v40, %v1970_v25  ;;  %v2064_v47 = vadd.f32 %v10346_v8, %v2063_v44  ;;  %v2092_v61 = vadd.f32 %v10358_v30, %v2091_v58  ;;  %vm2094_vm12 = vweird.f32 %v10358_v30 }
 0xafa   :  { %vm2065_vm14 = vweird.f32 %v10208_v11  ;;  %v2071_v38 = vand.u32 2147483648, %v10208_v11  ;;  %v2099_v10 = vand.u32 2147483648, %v10224_v29  ;;  %v2123_v1 = vmul.f32 %v10124_v2, %v2003_v5  ;;  %v8100_v5 = vld [vmem:[%s13139_s3 + $0x28] sm:$0xff] }
 0xafb   :  { %v8551_v19 = vpop.permute.xlu1 %8550  ;;  %vm10436_vm15 = vmor %vm2065_vm14, %vm2066_vm2  ;;  %v2069_v48 = vand.u32 2147483647, %v10208_v11  ;;  %vm2093_vm9 = vweird.f32 %v10224_v29  ;;  %v2097_v50 = vand.u32 2147483647, %v10224_v29  ;;  %v2121_v59 = vmul.f32 %v10135_v9, %v1975_v20  ;;  %v8099_v20 = vld [vmem:[%s13139_s3 + $0x20] sm:$0xff] }
 0xafc   :  { %v8553_v15 = vunpack.i.h.bf16 %v8551_v19  ;;  %v8552_v34 = vunpack.i.l.bf16 %v8551_v19  ;;  %8091 = vmatmul.msk.f32.gmra.mxu2 %vm426_vm3, %v2125_v51  ;;  %8093 = vmatmul.msk.f32.gmra.mxu3 %vm426_vm3, %v2127_v17  ;;  %vm2095_vm10 = vmor %vm2093_vm9, %vm2094_vm12  ;;  %v2068_v55 = vsel %vm10436_vm15, %v10346_v8, %v2064_v47  ;;  %v2077_v2 = vmul.f32 %v10394_v13, %v2076_v7 }
 0xafd   :  { %v2096_v0 = vsel %vm2095_vm10, %v10358_v30, %v2092_v61  ;;  %v2072_v11 = vor.u32 1.1754944e-38, %v2071_v38  ;;  %v2100_v4 = vor.u32 1.1754944e-38, %v2099_v10  ;;  %vm2070_vm13 = vcmp.eq.f32.partialorder %v2069_v48, 8.507059e+37 }
 0xafe   :  { %v8571_v54 = vpop.permute.xlu0 %8570  ;;  %2229 = vmatpush.msrb.mxu0 %v8552_v34  ;;  %2264 = vmatpush.msrb.mxu1 %v8553_v15  ;;  %vm2098_vm0 = vcmp.eq.f32.partialorder %v2097_v50, 8.507059e+37  ;;  %v2078_v9 = vadd.f32 %v10394_v13, %v2077_v2  ;;  %vm2080_vm11 = vweird.f32 %v10394_v13  ;;  %v2085_v8 = vand.u32 2147483648, %v10244_v21 }
 0xaff   :  { %v8573_v27 = vunpack.i.h.bf16 %v8571_v54  ;;  %v8572_v57 = vunpack.i.l.bf16 %v8571_v54  ;;  %8086 = vmatmul.msk.f32.vlgmr.msrb.gmra.mxu0 %vm426_vm3, %v2120_v14  ;;  %8088 = vmatmul.msk.f32.vlgmr.msrb.gmra.mxu1 %vm426_vm3, %v2122_v6  ;;  %v2073_v29 = vsel %vm2070_vm13, %v2072_v11, %v2068_v55  ;;  %v2101_v41 = vsel %vm2098_vm0, %v2100_v4, %v2096_v0 }
 0xb00   :  { %2368 = vmatpush.msra.mxu0 %v8567_v22  ;;  %2403 = vmatpush.msra.mxu1 %v8568_v18  ;;  %v2128_v30 = vmul.f32 %v10139_v46, %v2073_v29  ;;  %v2130_v16 = vmul.f32 %v10163_v43, %v2101_v41  ;;  %vm2079_vm2 = vweird.f32 %v10244_v21  ;;  %v2083_v14 = vand.u32 2147483647, %v10244_v21 }
 0xb01   :  { %vm2081_vm12 = vmor %vm2079_vm2, %vm2080_vm11  ;;  %v2086_v53 = vor.u32 1.1754944e-38, %v2085_v8  ;;  %vm13189_vm0 = vcmask 261120  }
 0xb02   :  { %2369 = vmatpush.msra.mxu0 %v8572_v57  ;;  %2404 = vmatpush.msra.mxu1 %v8573_v27  ;;  %v2082_v31 = vsel %vm2081_vm12, %v10394_v13, %v2078_v9  ;;  %vm2084_vm14 = vcmp.eq.f32.partialorder %v2083_v14, 8.507059e+37  ;;  %v8102_v27 = vld [vmem:[%s13139_s3 + $0x38] sm:$0xff]  ;;  %v8101_v57 = vld [vmem:[%s13139_s3 + $0x30] sm:$0xff]  ;;  %vm13190_vm11 = vmmov %vm13189_vm0 }
 0xb03   :  { %v2087_v36 = vsel %vm2084_vm14, %v2086_v53, %v2082_v31  ;;  %2508 = vmatpush.msra.mxu2 %v8102_v27  ;;  %vm13191_vm2 = vmmov %vm13189_vm0 }
 0xb04   :  { %v2129_v46 = vmul.f32 %v10141_v35, %v2087_v36  ;;  %vm13192_vm12 = vmmov %vm13189_vm0 }
 0xb05   :  { %2509 = vmatpush.msra.mxu2 %v8101_v57  ;;  %vm13193_vm14 = vmmov %vm13189_vm0 }
 0xb07   :  { %8087 = vmatmul.msk.f32.gmra.mxu0 %vm426_vm3, %v2121_v59  ;;  %8089 = vmatmul.msk.f32.gmra.mxu1 %vm426_vm3, %v2123_v1 }
 0xb08   :  { %2510 = vmatpush.msra.mxu2 %v8100_v5  ;;  %v8125_v5 = vld [vmem:[%s13142_s6 + $0xe8] sm:$0xff] }
 0xb0a   :  { %2511 = vmatpush.msra.mxu2 %v8099_v20 }
 0xb0f   :  { %8094 = vmatmul.msk.f32.vlgmr.msra.gmra.mxu0 %vm426_vm3, %v2128_v30  ;;  %8096 = vmatmul.msk.f32.vlgmr.msra.gmra.mxu1 %vm426_vm3, %v2130_v16 }
 0xb13   :  { %v2196_v51 = vpop.f32.mrf.mxu3 }
 0xb14   :  { %2414 = vrot.lane.b32.xlu2 %v2196_v51, %s9220_s30 }
 0xb17   :  { %8095 = vmatmul.msk.f32.gmra.mxu0 %vm426_vm3, %v2129_v46 }
 0xb26   :  { %v1891_v43 = vpop.xlane.xlu1 %1890 }
 0xb27   :  { %8882 = vrcp.f32 %v1891_v43  ;;  %v2113_v33 = vand.u32 2147483648, %v1891_v43  ;;  %v2111_v19 = vand.u32 2147483647, %v1891_v43  ;;  %vm2107_vm9 = vweird.f32 %v1891_v43 }
 0xb29   :  { %v2114_v52 = vor.u32 1.1754944e-38, %v2113_v33  ;;  %vm2112_vm13 = vcmp.eq.f32.partialorder %v2111_v19, 8.507059e+37 }
 0xb2d   :  { %v8883_v21 = vpop.eup %8882 }
 0xb2e   :  { %v2103_v17 = vmul.f32 %v8883_v21, %v1891_v43  ;;  %vm2108_vm15 = vweird.f32 %v8883_v21  ;;  %v10510_v43 = vld [vmem:[%s13143_s7 + $0x8] sm:$0x3f] }
 0xb2f   :  { %vm2109_vm10 = vmor %vm2107_vm9, %vm2108_vm15 }
 0xb30   :  { %v2104_v49 = vsub.f32 1.0, %v2103_v17  ;;  %vm13194_vm15 = vmmov %vm13189_vm0 }
 0xb32   :  { %v2105_v60 = vmul.f32 %v8883_v21, %v2104_v49 }
 0xb34   :  { %v2106_v13 = vadd.f32 %v8883_v21, %v2105_v60 }
 0xb36   :  { %v2110_v15 = vsel %vm2109_vm10, %v8883_v21, %v2106_v13  ;;  %v2489_v21 = vperm.slane %v10510_v43, 0 }
 0xb37   :  { %v2115_v34 = vsel %vm2112_vm13, %v2114_v52, %v2110_v15 }
 0xb38   :  { %v2131_v35 = vmul.f32 %v10194_v28, %v2115_v34  ;;  %v2164_v28 = vpop.f32.mrf.mxu2 }
 0xb3a   :  { %8097 = vmatmul.msk.f32.gmra.mxu1 %vm426_vm3, %v2131_v35 }
 0xb62   :  { %v2199_v24 = vpop.f32.mrf.mxu3 }
 0xb6e   :  { %v2415_v40 = vpop.permute.xlu2 %2414 }
 0xb6f   :  { %v2468_v48 = vsel %vm149_vm1, %v2161_v42, %v2415_v40  ;;  %v8105_v42 = vld [vmem:[%s13140_s4 + $0x20] sm:$0xff] }
 0xb77   :  { %v2336_v18 = vpop.f32.mrf.mxu3  ;;  %v2301_v54 = vpop.f32.mrf.mxu2 }
 0xb7c   :  { %v2231_v45 = vpop.f32.mrf.mxu0  ;;  %v2266_v56 = vpop.f32.mrf.mxu1 }
 0xb7d   :  { %2430 = vrot.lane.b32.xlu1 %v2266_v56, %s13157_s28  ;;  %2422 = vrot.lane.b32.xlu0 %v2231_v45, %s13152_s29  ;;  %v8108_v56 = vld [vmem:[%s13140_s4 + $0x38] sm:$0xff] }
 0xb7e   :  { %2603 = vmatpush.msrb.mxu3 %v8108_v56 }
 0xb7f   :  { %v2339_v25 = vpop.f32.mrf.mxu3  ;;  %v2304_v44 = vpop.f32.mrf.mxu2 }
 0xb84   :  { %v2234_v6 = vpop.f32.mrf.mxu0  ;;  %v2269_v3 = vpop.f32.mrf.mxu1 }
 0xb85   :  { %2432 = vrot.lane.b32.xlu1 %v2269_v3, %s13157_s28  ;;  %2424 = vrot.lane.b32.xlu0 %v2234_v6, %s13152_s29  ;;  %v8106_v6 = vld [vmem:[%s13140_s4 + $0x28] sm:$0xff] }
 0xb8c   :  { %v2371_v32 = vpop.f32.mrf.mxu0  ;;  %v2406_v26 = vpop.f32.mrf.mxu1 }
 0xb8d   :  { %2462 = vrot.lane.b32.xlu0 %v2406_v26, %s13155_s12  ;;  %2454 = vrot.lane.b32.xlu2 %v2371_v32, %s13150_s10 }
 0xb94   :  { %v2374_v22 = vpop.f32.mrf.mxu0 }
 0xb95   :  { %2446 = vrot.lane.b32.xlu0 %v2336_v18, %s13187_s15  ;;  %2416 = vrot.lane.b32.xlu2 %v2199_v24, %s9220_s30 }
 0xb96   :  { %2456 = vrot.lane.b32.xlu1 %v2374_v22, %s13150_s10 }
 0xb9d   :  { %2448 = vrot.lane.b32.xlu0 %v2339_v25, %s13187_s15  ;;  %2438 = vrot.lane.b32.xlu2 %v2301_v54, %s13188_s16 }
 0xba5   :  { %2440 = vrot.lane.b32.xlu2 %v2304_v44, %s13188_s16  ;;  %v8127_v44 = vld [vmem:[%s13142_s6 + $0xf8] sm:$0xff] }
 0xba6   :  { %2634 = vmatpush.msrb.mxu0 %v8127_v44 }
 0xbb7   :  { %v2409_v58 = vpop.f32.mrf.mxu1 }
 0xbb8   :  { %2464 = vrot.lane.b32.xlu2 %v2409_v58, %s13155_s12  ;;  %v8126_v58 = vld [vmem:[%s13142_s6 + $0xf0] sm:$0xff] }
 0xbb9   :  { %2635 = vmatpush.msrb.mxu0 %v8126_v58 }
 0xbbb   :  { %2636 = vmatpush.msrb.mxu0 %v8125_v5  ;;  %v8131_v5 = vld [vmem:[%s13137_s1 + $0x58] sm:$0xff] }
 0xbbc   :  { %2741 = vmatpush.msrb.mxu1 %v8131_v5 }
 0xbe7   :  { %v2455_v7 = vpop.permute.xlu2 %2454 }
 0xbef   :  { %v2423_v47 = vpop.permute.xlu0 %2422  ;;  %v2417_v61 = vpop.permute.xlu2 %2416 }
 0xbf0   :  { %v2431_v10 = vpop.permute.xlu1 %2430  ;;  %v2470_v50 = vsel %vm1149_vm4, %v2468_v48, %v2423_v47  ;;  %v2469_v29 = vsel %vm149_vm1, %v2164_v28, %v2417_v61 }
 0xbf1   :  { %v2472_v59 = vsel %vm1152_vm5, %v2470_v50, %v2431_v10  ;;  %v8123_v10 = vld [vmem:[%s13142_s6 + $0xd8] sm:$0xff]  ;;  %v8121_v50 = vld [vmem:[%s13142_s6 + $0xc8] sm:$0xff] }
 0xbf7   :  { %v2425_v38 = vpop.permute.xlu0 %2424  ;;  %v2439_v37 = vpop.permute.xlu2 %2438 }
 0xbf8   :  { %v2474_v55 = vsel %vm426_vm3, %v2472_v59, %v2439_v37  ;;  %v2433_v2 = vpop.permute.xlu1 %2432  ;;  %v2471_v8 = vsel %vm1149_vm4, %v2469_v29, %v2425_v38  ;;  %v8122_v37 = vld [vmem:[%s13142_s6 + $0xd0] sm:$0xff] }
 0xbf9   :  { %v2473_v30 = vsel %vm1152_vm5, %v2471_v8, %v2433_v2 }
 0xbff   :  { %v2463_v1 = vpop.permute.xlu0 %2462  ;;  %v2441_v41 = vpop.permute.xlu2 %2440 }
 0xc00   :  { %v2475_v16 = vsel %vm426_vm3, %v2473_v30, %v2441_v41 }
 0xc07   :  { %v2447_v0 = vpop.permute.xlu0 %2446 }
 0xc08   :  { %v2476_v11 = vsel %vm1157_vm6, %v2474_v55, %v2447_v0  ;;  %v2457_v31 = vpop.permute.xlu1 %2456  ;;  %v8120_v55 = vld [vmem:[%s13142_s6 + $0xc0] sm:$0xff]  ;;  %v2567_v0 = vperm.slane %v10510_v43, 2 }
 0xc09   :  { %v2478_v4 = vsel %vm1160_vm7, %v2476_v11, %v2455_v7  ;;  %v8124_v7 = vld [vmem:[%s13142_s6 + $0xe0] sm:$0xff] }
 0xc0a   :  { %v2480_v9 = vsel %vm13154_vm8, %v2478_v4, %v2463_v1  ;;  %2637 = vmatpush.msrb.mxu0 %v8124_v7  ;;  %v8119_v4 = vld [vmem:[%s13142_s6 + $0xb8] sm:$0xff]  ;;  %v8129_v7 = vld [vmem:[%s13137_s1 + $0x48] sm:$0xff] }
 0xc0b   :  { %8103 = vmatmul.msk.f32.vlgmr.msra.gmra.mxu2 %vm13189_vm0, %v2480_v9  ;;  %v8118_v9 = vld [vmem:[%s13142_s6 + $0xb0] sm:$0xff] }
 0xc0c   :  { %2638 = vmatpush.msrb.mxu0 %v8123_v10 }
 0xc0e   :  { %2639 = vmatpush.msrb.mxu0 %v8122_v37 }
 0xc0f   :  { %v2449_v14 = vpop.permute.xlu0 %2448 }
 0xc10   :  { %v2477_v53 = vsel %vm1157_vm6, %v2475_v16, %v2449_v14  ;;  %2640 = vmatpush.msrb.mxu0 %v8121_v50  ;;  %v2572_v14 = vperm.slane %v10510_v43, 3 }
 0xc11   :  { %v2479_v36 = vsel %vm1160_vm7, %v2477_v53, %v2457_v31  ;;  %v8117_v31 = vld [vmem:[%s13142_s6 + $0xa8] sm:$0xff] }
 0xc12   :  { %v2465_v51 = vpop.permute.xlu2 %2464  ;;  %2641 = vmatpush.msrb.mxu0 %v8120_v55 }
 0xc13   :  { %v2481_v46 = vsel %vm13154_vm8, %v2479_v36, %v2465_v51  ;;  %v8116_v51 = vld [vmem:[%s13142_s6 + $0xa0] sm:$0xff] }
 0xc14   :  { %8104 = vmatmul.msk.f32.gmra.mxu2 %vm13190_vm11, %v2481_v46  ;;  %2642 = vmatpush.msrb.mxu0 %v8119_v4 }
 0xc16   :  { %2643 = vmatpush.msrb.mxu0 %v8118_v9 }
 0xc18   :  { %2644 = vmatpush.msrb.mxu0 %v8117_v31 }
 0xc1a   :  { %2645 = vmatpush.msrb.mxu0 %v8116_v51 }
 0xc8e   :  { %v2513_v17 = vpop.f32.mrf.mxu2 }
 0xc8f   :  { %v2514_v49 = vadd.f32 %v2513_v17, %v2489_v21  ;;  %v8115_v17 = vld [vmem:[%s13142_s6 + $0x98] sm:$0xff] }
 0xc90   :  { %2646 = vmatpush.msrb.mxu0 %v8115_v17 }
 0xc91   :  { %v10514_v33 = vadd.f32 %v2514_v49, %v9902_v23 }
 0xc93   :  { %v2521_v60 = vsel %vm13191_vm2, %v10514_v33, 0.0  ;;  %v2529_v19 = vmul.f32 %v10514_v33, %v10514_v33 }
 0xc94   :  { %2522 = vadd.xlane.f32.xlu0 %v2521_v60 }
 0xc95   :  { %v2531_v13 = vsel %vm13192_vm12, %v2529_v19, 0.0 }
 0xc96   :  { %2532 = vadd.xlane.f32.xlu1 %v2531_v13 }
 0xc97   :  { %v2516_v52 = vpop.f32.mrf.mxu2 }
 0xc98   :  { %v2517_v15 = vadd.f32 %v2516_v52, %v2489_v21 }
 0xc9a   :  { %v10522_v34 = vadd.f32 %v2517_v15, %v9908_v39  ;;  %v8107_v39 = vld [vmem:[%s13140_s4 + $0x30] sm:$0xff] }
 0xc9b   :  { %2604 = vmatpush.msrb.mxu3 %v8107_v39  ;;  %v8114_v15 = vld [vmem:[%s13142_s6 + $0x90] sm:$0xff] }
 0xc9c   :  { %v2524_v35 = vsel %vm13193_vm14, %v10522_v34, 0.0  ;;  %v2530_v23 = vmul.f32 %v10522_v34, %v10522_v34  ;;  %vm13195_vm14 = vmmov %vm13191_vm2  ;;  %2647 = vmatpush.msrb.mxu0 %v8114_v15 }
 0xc9d   :  { %2525 = vadd.xlane.f32.xlu2 %v2524_v35  ;;  %2605 = vmatpush.msrb.mxu3 %v8106_v6  ;;  %v8113_v35 = vld [vmem:[%s13142_s6 + $0x88] sm:$0xff] }
 0xc9e   :  { %v2534_v45 = vsel %vm13194_vm15, %v2530_v23, 0.0  ;;  %v8112_v23 = vld [vmem:[%s13142_s6 + $0x80] sm:$0xff]  ;;  %2648 = vmatpush.msrb.mxu0 %v8113_v35  ;;  %vm13196_vm15 = vmmov %vm13191_vm2 }
 0xc9f   :  { %2535 = vadd.xlane.f32.xlu0 %v2534_v45  ;;  %2606 = vmatpush.msrb.mxu3 %v8105_v42 }
 0xca0   :  { %2649 = vmatpush.msrb.mxu0 %v8112_v23 }
 0xd07   :  { %v2523_v3 = vpop.xlane.xlu0 %2522 }
 0xd08   :  { %v2527_v24 = vmul.f32 %v2523_v3, %v9812_v62 }
 0xd09   :  { %v2533_v32 = vpop.xlane.xlu1 %2532 }
 0xd0a   :  { %v2539_v26 = vmul.f32 %v2527_v24, %v2527_v24  ;;  %v2537_v28 = vmul.f32 %v2533_v32, %v9812_v62  ;;  %v2543_v8 = vsub.f32 %v10514_v33, %v2527_v24  ;;  %v2633_v24 = vperm.slane %v10510_v43, 1 }
 0xd0c   :  { %v2541_v18 = vsub.f32 %v2537_v28, %v2539_v26 }
 0xd0e   :  { %v2545_v22 = vadd.f32 1e-05, %v2541_v18 }
 0xd10   :  { %8884 = vrsqrt.f32 %v2545_v22  ;;  %v2526_v54 = vpop.xlane.xlu2 %2525  ;;  %vm2553_vm10 = vweird.f32 %v2545_v22 }
 0xd11   :  { %v10544_v25 = vmul.f32 %v2526_v54, %v9812_v62 }
 0xd12   :  { %v2536_v27 = vpop.xlane.xlu0 %2535 }
 0xd13   :  { %v2540_v57 = vmul.f32 %v10544_v25, %v10544_v25  ;;  %v2538_v40 = vmul.f32 %v2536_v27, %v9812_v62  ;;  %v2544_v60 = vsub.f32 %v10522_v34, %v10544_v25  ;;  %v8737_v34 = vld [vmem:[%s13141_s5 + $0x1] ss:$0 sm:$0xff] }
 0xd15   :  { %v2542_v20 = vsub.f32 %v2538_v40, %v2540_v57 }
 0xd16   :  { %v8885_v47 = vpop.eup %8884 }
 0xd17   :  { %v2548_v61 = vmul.f32 %v8885_v47, %v2545_v22  ;;  %v2546_v38 = vadd.f32 1e-05, %v2542_v20  ;;  %vm2554_vm9 = vweird.f32 %v8885_v47  ;;  %v8130_v20 = vld [vmem:[%s13137_s1 + $0x50] sm:$0xff] }
 0xd18   :  { %vm2555_vm13 = vmor %vm2553_vm10, %vm2554_vm9  ;;  %2742 = vmatpush.msrb.mxu1 %v8130_v20 }
 0xd19   :  { %v2549_v1 = vmul.f32 %v8885_v47, %v2548_v61  ;;  %8886 = vrsqrt.f32 %v2546_v38  ;;  %vm2563_vm11 = vweird.f32 %v2546_v38  ;;  %vm13197_vm9 = vmmov %vm13191_vm2  ;;  %v8128_v61 = vld [vmem:[%s13137_s1 + $0x40] sm:$0xff] }
 0xd1a   :  { %vm13198_vm10 = vmmov %vm13191_vm2  ;;  %2743 = vmatpush.msrb.mxu1 %v8129_v7 }
 0xd1b   :  { %v2550_v48 = vmul.f32 0.5, %v2549_v1 }
 0xd1c   :  { %2744 = vmatpush.msrb.mxu1 %v8128_v61 }
 0xd1d   :  { %v2551_v59 = vsub.f32 1.5, %v2550_v48 }
 0xd1f   :  { %v8887_v2 = vpop.eup %8886  ;;  %v2552_v11 = vmul.f32 %v8885_v47, %v2551_v59 }
 0xd20   :  { %v2558_v29 = vmul.f32 %v8887_v2, %v2546_v38  ;;  %vm2564_vm0 = vweird.f32 %v8887_v2 }
 0xd21   :  { %v2556_v41 = vsel %vm2555_vm13, %v8885_v47, %v2552_v11  ;;  %vm2565_vm12 = vmor %vm2563_vm11, %vm2564_vm0 }
 0xd22   :  { %v2568_v30 = vmul.f32 %v2567_v0, %v2556_v41  ;;  %v2559_v16 = vmul.f32 %v8887_v2, %v2558_v29  ;;  %vm13199_vm13 = vmmov %vm13191_vm2 }
 0xd24   :  { %v2560_v53 = vmul.f32 0.5, %v2559_v16  ;;  %v2570_v36 = vmul.f32 %v2568_v30, %v2543_v8 }
 0xd26   :  { %v2561_v46 = vsub.f32 1.5, %v2560_v53  ;;  %v2573_v21 = vadd.f32 %v2572_v14, %v2570_v36 }
 0xd28   :  { %8110 = vmatmul.msk.f32.vlgmr.msrb.gmra.mxu3 %vm13191_vm2, %v2573_v21  ;;  %v2562_v49 = vmul.f32 %v8887_v2, %v2561_v46 }
 0xd2a   :  { %v2566_v33 = vsel %vm2565_vm12, %v8887_v2, %v2562_v49  ;;  %v2710_v49 = vperm.slane %v10510_v43, 5 }
 0xd2b   :  { %v2569_v19 = vmul.f32 %v2567_v0, %v2566_v33 }
 0xd2d   :  { %v2571_v13 = vmul.f32 %v2569_v19, %v2544_v60 }
 0xd2f   :  { %v2574_v52 = vadd.f32 %v2572_v14, %v2571_v13  ;;  %v2705_v14 = vperm.slane %v10510_v43, 4  ;;  %v8738_v43 = vld [vmem:[%s13138_s2 + $0x2] ss:$0 sm:$0xff] }
 0xd31   :  { %8111 = vmatmul.msk.f32.gmra.mxu3 %vm13195_vm14, %v2574_v52 }
 0xdab   :  { %v2608_v45 = vpop.f32.mrf.mxu3 }
 0xdac   :  { %v2609_v56 = vadd.f32 %v8737_v34, %v2608_v45 }
 0xdae   :  { %v2614_v39 = vmax.f32 %v2609_v56, 0.0 }
 0xdb0   :  { %2650 = vmatmul.f32.vlgmr.msrb.gmra.mxu0 %v2614_v39 }
 0xdb4   :  { %v2611_v6 = vpop.f32.mrf.mxu3 }
 0xdb5   :  { %v2612_v3 = vadd.f32 %v8737_v34, %v2611_v6 }
 0xdb7   :  { %v2615_v42 = vmax.f32 %v2612_v3, 0.0 }
 0xdb9   :  { %2653 = vmatmul.f32.gmra.mxu0 %v2615_v42 }
 0xe2d   :  { %v2651_v32 = vpop.f32.mrf.mxu0 }
 0xe2e   :  { %v2652_v26 = vadd.f32 %v2651_v32, %v2633_v24 }
 0xe30   :  { %v2657_v28 = vadd.f32 %v2652_v26, %v2573_v21 }
 0xe32   :  { %v2659_v18 = vsel %vm13196_vm15, %v2657_v28, 0.0  ;;  %v2667_v22 = vmul.f32 %v2657_v28, %v2657_v28  ;;  %vm13200_vm15 = vmmov %vm13197_vm9 }
 0xe33   :  { %2660 = vadd.xlane.f32.xlu1 %v2659_v18 }
 0xe34   :  { %v2669_v54 = vsel %vm13197_vm9, %v2667_v22, 0.0 }
 0xe35   :  { %2670 = vadd.xlane.f32.xlu2 %v2669_v54 }
 0xe36   :  { %v2654_v25 = vpop.f32.mrf.mxu0 }
 0xe37   :  { %v2655_v44 = vadd.f32 %v2654_v25, %v2633_v24 }
 0xe39   :  { %v2658_v58 = vadd.f32 %v2655_v44, %v2574_v52 }
 0xe3b   :  { %v2662_v27 = vsel %vm13198_vm10, %v2658_v58, 0.0  ;;  %v2668_v57 = vmul.f32 %v2658_v58, %v2658_v58 }
 0xe3c   :  { %2663 = vadd.xlane.f32.xlu0 %v2662_v27 }
 0xe3d   :  { %v2672_v40 = vsel %vm13199_vm13, %v2668_v57, 0.0 }
 0xe3e   :  { %2673 = vadd.xlane.f32.xlu1 %v2672_v40 }
 0xea6   :  { %v2661_v47 = vpop.xlane.xlu1 %2660 }
 0xea7   :  { %v2665_v38 = vmul.f32 %v2661_v47, %v9812_v62 }
 0xea8   :  { %v2671_v10 = vpop.xlane.xlu2 %2670 }
 0xea9   :  { %v2677_v1 = vmul.f32 %v2665_v38, %v2665_v38  ;;  %v2675_v37 = vmul.f32 %v2671_v10, %v9812_v62  ;;  %v2681_v46 = vsub.f32 %v2657_v28, %v2665_v38 }
 0xeab   :  { %v2679_v48 = vsub.f32 %v2675_v37, %v2677_v1 }
 0xead   :  { %v2683_v50 = vadd.f32 1e-05, %v2679_v48 }
 0xeaf   :  { %8888 = vrsqrt.f32 %v2683_v50  ;;  %v2664_v59 = vpop.xlane.xlu0 %2663  ;;  %vm2691_vm11 = vweird.f32 %v2683_v50 }
 0xeb0   :  { %v2666_v55 = vmul.f32 %v2664_v59, %v9812_v62 }
 0xeb1   :  { %v2674_v0 = vpop.xlane.xlu1 %2673 }
 0xeb2   :  { %v2678_v2 = vmul.f32 %v2666_v55, %v2666_v55  ;;  %v2676_v11 = vmul.f32 %v2674_v0, %v9812_v62  ;;  %v2682_v35 = vsub.f32 %v2658_v58, %v2666_v55 }
 0xeb4   :  { %v2680_v4 = vsub.f32 %v2676_v11, %v2678_v2 }
 0xeb5   :  { %v8889_v29 = vpop.eup %8888 }
 0xeb6   :  { %v2686_v41 = vmul.f32 %v8889_v29, %v2683_v50  ;;  %v2684_v9 = vadd.f32 1e-05, %v2680_v4  ;;  %vm2692_vm0 = vweird.f32 %v8889_v29 }
 0xeb7   :  { %vm2693_vm2 = vmor %vm2691_vm11, %vm2692_vm0 }
 0xeb8   :  { %v2687_v8 = vmul.f32 %v8889_v29, %v2686_v41  ;;  %8890 = vrsqrt.f32 %v2684_v9  ;;  %vm2701_vm14 = vweird.f32 %v2684_v9 }
 0xeba   :  { %v2688_v30 = vmul.f32 0.5, %v2687_v8 }
 0xebc   :  { %v2689_v16 = vsub.f32 1.5, %v2688_v30 }
 0xebe   :  { %v8891_v31 = vpop.eup %8890  ;;  %v2690_v53 = vmul.f32 %v8889_v29, %v2689_v16 }
 0xebf   :  { %v2696_v36 = vmul.f32 %v8891_v31, %v2684_v9  ;;  %vm2702_vm12 = vweird.f32 %v8891_v31 }
 0xec0   :  { %v2694_v51 = vsel %vm2693_vm2, %v8889_v29, %v2690_v53  ;;  %vm2703_vm9 = vmor %vm2701_vm14, %vm2702_vm12 }
 0xec1   :  { %v2706_v21 = vmul.f32 %v2705_v14, %v2694_v51  ;;  %v2697_v17 = vmul.f32 %v8891_v31, %v2696_v36 }
 0xec3   :  { %v2698_v33 = vmul.f32 0.5, %v2697_v17  ;;  %v2708_v60 = vmul.f32 %v2706_v21, %v2681_v46 }
 0xec5   :  { %v2699_v19 = vsub.f32 1.5, %v2698_v33  ;;  %v10630_v13 = vadd.f32 %v2710_v49, %v2708_v60 }
 0xec7   :  { %8133 = vmatmul.msk.f32.vlgmr.msrb.gmra.mxu1 %vm13200_vm15, %v10630_v13  ;;  %v2700_v52 = vmul.f32 %v8891_v31, %v2699_v19 }
 0xec9   :  { %v2704_v15 = vsel %vm2703_vm9, %v8891_v31, %v2700_v52 }
 0xeca   :  { %v2707_v23 = vmul.f32 %v2705_v14, %v2704_v15 }
 0xecc   :  { %v2709_v34 = vmul.f32 %v2707_v23, %v2682_v35 }
 0xece   :  { %v10634_v45 = vadd.f32 %v2710_v49, %v2709_v34 }
 0xed0   :  { %8134 = vmatmul.msk.f32.gmra.mxu1 %vm13198_vm10, %v10634_v45 }
 0xf44   :  { %v2746_v56 = vpop.f32.mrf.mxu1 }
 0xf45   :  { %v2747_v39 = vadd.f32 %v8738_v43, %v2746_v56 }
 0xf47   :  { %2762 = vrot.lane.b32.xlu0 %v2747_v39, %s9208_s19  ;;  %2754 = vrot.lane.b32.xlu1 %v2747_v39, %s9210_s21 }
 0xf4d   :  { %v2749_v6 = vpop.f32.mrf.mxu1 }
 0xf4e   :  { %v2750_v3 = vadd.f32 %v8738_v43, %v2749_v6 }
 0xf50   :  { %2768 = vrot.lane.b32.xlu1 %v2750_v3, %s9214_s25  ;;  %2764 = vrot.lane.b32.xlu0 %v2750_v3, %s9208_s19  ;;  %v8574_v47 = vpack.i.bf16 %v2747_v39, %v2750_v3 }
 0xf51   :  { %2756 = vrot.lane.b32.xlu2 %v2750_v3, %s9210_s21 }
 0xf58   :  { %2766 = vrot.lane.b32.xlu1 %v2747_v39, %s9214_s25  ;;  %2758 = vrot.lane.b32.xlu0 %v2747_v39, %s9209_s20 }
 0xf59   :  { %2760 = vrot.lane.b32.xlu2 %v2750_v3, %s9209_s20 }
 0xf60   :  { %2772 = vrot.lane.b32.xlu1 %v2750_v3, %s9211_s22  ;;  %2778 = vrot.lane.b32.xlu0 %v2747_v39, %s9213_s24 }
 0xf61   :  { %2780 = vrot.lane.b32.xlu2 %v2750_v3, %s9213_s24 }
 0xf68   :  { %2770 = vrot.lane.b32.xlu1 %v2747_v39, %s9211_s22  ;;  %2776 = vrot.lane.b32.xlu0 %v2750_v3, %s9212_s23 }
 0xf69   :  { %2784 = vrot.lane.b32.xlu2 %v2750_v3, %s9215_s26 }
 0xf70   :  { %2774 = vrot.lane.b32.xlu0 %v2747_v39, %s9212_s23 }
 0xf71   :  { %2782 = vrot.lane.b32.xlu2 %v2747_v39, %s9215_s26 }
 0xfab   :  { %v2757_v42 = vpop.permute.xlu2 %2756 }
 0xfac   :  { %2819 = vrot.lane.b32.xlu2 %v2757_v42, %s9215_s26 }
 0xfb3   :  { %v10658_v24 = vpop.permute.xlu2 %2760 }
 0xfb4   :  { %v8589_v61 = vpack.i.bf16 %v10658_v24, %v2757_v42 }
 0xfb9   :  { %v2763_v32 = vpop.permute.xlu0 %2762  ;;  %v2755_v26 = vpop.permute.xlu1 %2754 }
 0xfba   :  { %2887 = vrot.lane.b32.xlu2 %v2763_v32, %s9215_s26  ;;  %2817 = vrot.lane.b32.xlu0 %v2755_v26, %s9215_s26 }
 0xfbb   :  { %v10662_v28 = vpop.permute.xlu2 %2780 }
 0xfc2   :  { %v2765_v18 = vpop.permute.xlu0 %2764  ;;  %v10664_v22 = vpop.permute.xlu1 %2768 }
 0xfc3   :  { %v2785_v54 = vpop.permute.xlu2 %2784  ;;  %2889 = vrot.lane.b32.xlu1 %v2765_v18, %s9215_s26  ;;  %2924 = vrot.lane.b32.xlu0 %v10664_v22, %s9215_s26  ;;  %v8584_v20 = vpack.i.bf16 %v2763_v32, %v2765_v18 }
 0xfc4   :  { %8135 = vmatpush.xpose.msk.msrb.mxu2 %vm149_vm1, %v2785_v54 }
 0xfca   :  { %v2759_v25 = vpop.permute.xlu0 %2758  ;;  %v10670_v44 = vpop.permute.xlu1 %2766 }
 0xfcb   :  { %v2783_v58 = vpop.permute.xlu2 %2782  ;;  %2852 = vrot.lane.b32.xlu2 %v2759_v25, %s9215_s26  ;;  %2854 = vrot.lane.b32.xlu1 %v10658_v24, %s9215_s26  ;;  %v8579_v38 = vpack.i.bf16 %v2759_v25, %v2755_v26 }
 0xfcc   :  { %8136 = vmatpush.xpose.msk.msrb.mxu2 %vm149_vm1, %v2783_v58  ;;  %2922 = vrot.lane.b32.xlu0 %v10670_v44, %s9215_s26 }
 0xfcf   :  { %8137 = vmatmul.msk.f32.vlgmr.msrb.gmra.mxu2 %vm149_vm1, %v2747_v39 }
 0xfd2   :  { %v10679_v27 = vpop.permute.xlu0 %2778  ;;  %v10681_v57 = vpop.permute.xlu1 %2772 }
 0xfd3   :  { %3027 = vrot.lane.b32.xlu2 %v10679_v27, %s9215_s26  ;;  %3029 = vrot.lane.b32.xlu1 %v10662_v28, %s9215_s26 }
 0xfd7   :  { %8138 = vmatmul.msk.f32.gmra.mxu2 %vm149_vm1, %v2750_v3 }
 0xfda   :  { %v10688_v40 = vpop.permute.xlu0 %2776  ;;  %v10690_v5 = vpop.permute.xlu1 %2770 }
 0xfdb   :  { %2994 = vrot.lane.b32.xlu0 %v10688_v40, %s9215_s26  ;;  %2959 = vrot.lane.b32.xlu1 %v10681_v57, %s9215_s26 }
 0xfdc   :  { %2957 = vrot.lane.b32.xlu2 %v10690_v5, %s9215_s26 }
 0xfe2   :  { %v10698_v7 = vpop.permute.xlu0 %2774 }
 0xfe3   :  { %8585 = vrot.lane.b32.xlu0 %v8584_v20, %s9216_s27  ;;  %2992 = vrot.lane.b32.xlu1 %v10698_v7, %s9215_s26 }
 0xfe4   :  { %8575 = vrot.lane.b32.xlu2 %v8574_v47, %s9216_s27 }
 0xfeb   :  { %8590 = vrot.lane.b32.xlu0 %v8589_v61, %s9216_s27  ;;  %8580 = vrot.lane.b32.xlu1 %v8579_v38, %s9216_s27 }
0x1006   :  { %v2820_v10 = vpop.permute.xlu2 %2819 }
0x1007   :  { %8139 = vmatpush.xpose.msk.msra.mxu3 %vm149_vm1, %v2820_v10 }
0x1014   :  { %v2888_v1 = vpop.permute.xlu2 %2887 }
0x1025   :  { %v2853_v37 = vpop.permute.xlu2 %2852 }
0x102c   :  { %v2818_v48 = vpop.permute.xlu0 %2817 }
0x102d   :  { %v3028_v50 = vpop.permute.xlu2 %3027  ;;  %8140 = vmatpush.xpose.msk.msra.mxu3 %vm149_vm1, %v2818_v48 }
0x1030   :  { %8141 = vmatmul.msk.f32.vlgmr.msra.gmra.mxu3 %vm149_vm1, %v2755_v26 }
0x1035   :  { %v2925_v59 = vpop.permute.xlu0 %2924  ;;  %v2890_v55 = vpop.permute.xlu1 %2889 }
0x1036   :  { %v2958_v0 = vpop.permute.xlu2 %2957  ;;  %8147 = vmatpush.xpose.msk.msra.mxu2 %vm149_vm1, %v2890_v55  ;;  %8151 = vmatpush.xpose.msk.msrb.mxu3 %vm149_vm1, %v2925_v59 }
0x1038   :  { %8142 = vmatmul.msk.f32.gmra.mxu3 %vm149_vm1, %v2757_v42 }
0x103a   :  { %8148 = vmatpush.xpose.msk.msra.mxu2 %vm149_vm1, %v2888_v1 }
0x103d   :  { %8149 = vmatmul.msk.f32.vlgmr.msra.gmra.mxu2 %vm149_vm1, %v2763_v32  ;;  %v2855_v2 = vpop.permute.xlu1 %2854 }
0x103e   :  { %v2923_v11 = vpop.permute.xlu0 %2922  ;;  %v8576_v4 = vpop.permute.xlu2 %8575  ;;  %8143 = vmatpush.xpose.msk.msra.mxu1 %vm149_vm1, %v2855_v2 }
0x103f   :  { %v8577_v29 = vunpack.i.l.bf16 %v8576_v4  ;;  %8152 = vmatpush.xpose.msk.msrb.mxu3 %vm149_vm1, %v2923_v11  ;;  %v8578_v41 = vunpack.i.h.bf16 %v8576_v4 }
0x1042   :  { %8153 = vmatmul.msk.f32.vlgmr.msrb.gmra.mxu3 %vm149_vm1, %v10670_v44  ;;  %8144 = vmatpush.xpose.msk.msra.mxu1 %vm149_vm1, %v2853_v37 }
0x1043   :  { %3472 = vmatpush.msra.mxu3 %v8577_v29 }
0x1045   :  { %3473 = vmatpush.msra.mxu3 %v8578_v41  ;;  %8145 = vmatmul.msk.f32.vlgmr.msra.gmra.mxu1 %vm149_vm1, %v2759_v25  ;;  %v3030_v9 = vpop.permute.xlu1 %3029 }
0x1046   :  { %8150 = vmatmul.msk.f32.gmra.mxu2 %vm149_vm1, %v2765_v18 }
0x1047   :  { %8163 = vmatpush.xpose.msk.msrb.mxu2 %vm149_vm1, %v3030_v9 }
0x104a   :  { %8154 = vmatmul.msk.f32.gmra.mxu3 %vm149_vm1, %v10664_v22 }
0x104b   :  { %8164 = vmatpush.xpose.msk.msrb.mxu2 %vm149_vm1, %v3028_v50 }
0x104d   :  { %v2995_v8 = vpop.permute.xlu0 %2994  ;;  %8146 = vmatmul.msk.f32.gmra.mxu1 %vm149_vm1, %v10658_v24  ;;  %v2960_v30 = vpop.permute.xlu1 %2959 }
0x104e   :  { %8165 = vmatmul.msk.f32.vlgmr.msrb.gmra.mxu2 %vm149_vm1, %v10679_v27  ;;  %8155 = vmatpush.xpose.msk.msra.mxu0 %vm149_vm1, %v2960_v30 }
0x104f   :  { %8159 = vmatpush.xpose.msk.msrb.mxu1 %vm149_vm1, %v2995_v8 }
0x1052   :  { %v2811_v16 = vpop.f32.mrf.mxu2  ;;  %8156 = vmatpush.xpose.msk.msra.mxu0 %vm149_vm1, %v2958_v0 }
0x1053   :  { %v10734_v14 = vadd.f32 %v2811_v16, %v9425_v63 }
0x1055   :  { %v3062_v31 = vsel %vm426_vm3, %v10734_v14, -inf  ;;  %v8586_v53 = vpop.permute.xlu0 %8585  ;;  %8157 = vmatmul.msk.f32.vlgmr.msra.gmra.mxu0 %vm149_vm1, %v10690_v5  ;;  %v2993_v36 = vpop.permute.xlu1 %2992 }
0x1056   :  { %8166 = vmatmul.msk.f32.gmra.mxu2 %vm149_vm1, %v10662_v28  ;;  %3063 = vmax.xlane.f32.xlu0 %v3062_v31  ;;  %v8587_v51 = vunpack.i.l.bf16 %v8586_v53  ;;  %v8588_v46 = vunpack.i.h.bf16 %v8586_v53 }
0x1057   :  { %8160 = vmatpush.xpose.msk.msrb.mxu1 %vm149_vm1, %v2993_v36 }
0x1058   :  { %3577 = vmatpush.msra.mxu2 %v8587_v51 }
0x105a   :  { %8161 = vmatmul.msk.f32.vlgmr.msrb.gmra.mxu1 %vm149_vm1, %v10698_v7  ;;  %v2814_v21 = vpop.f32.mrf.mxu2  ;;  %3578 = vmatpush.msra.mxu2 %v8588_v46 }
0x105b   :  { %v10746_v17 = vadd.f32 %v2814_v21, %v9433_v12 }
0x105d   :  { %v3065_v49 = vsel %vm426_vm3, %v10746_v17, -inf  ;;  %v8591_v33 = vpop.permute.xlu0 %8590  ;;  %8158 = vmatmul.msk.f32.gmra.mxu0 %vm149_vm1, %v10681_v57  ;;  %v8581_v60 = vpop.permute.xlu1 %8580 }
0x105e   :  { %3066 = vmax.xlane.f32.xlu0 %v3065_v49  ;;  %v8593_v19 = vunpack.i.h.bf16 %v8591_v33  ;;  %v8592_v52 = vunpack.i.l.bf16 %v8591_v33  ;;  %v8583_v15 = vunpack.i.h.bf16 %v8581_v60  ;;  %v8582_v35 = vunpack.i.l.bf16 %v8581_v60 }
0x1060   :  { %3507 = vmatpush.msrb.mxu0 %v8592_v52  ;;  %3542 = vmatpush.msra.mxu1 %v8593_v19 }
0x1062   :  { %8162 = vmatmul.msk.f32.gmra.mxu1 %vm149_vm1, %v10688_v40  ;;  %3508 = vmatpush.msrb.mxu0 %v8582_v35 }
0x1063   :  { %3543 = vmatpush.msra.mxu1 %v8583_v15 }
0x10b3   :  { %v2846_v23 = vpop.f32.mrf.mxu3 }
0x10b4   :  { %v10755_v34 = vadd.f32 %v2846_v23, %v9425_v63 }
0x10b6   :  { %v3068_v43 = vsel %vm426_vm3, %v10755_v34, -inf }
0x10b7   :  { %3069 = vmax.xlane.f32.xlu1 %v3068_v43 }
0x10bb   :  { %v2849_v56 = vpop.f32.mrf.mxu3 }
0x10bc   :  { %v10760_v39 = vadd.f32 %v2849_v56, %v9433_v12 }
0x10be   :  { %v3071_v6 = vsel %vm426_vm3, %v10760_v39, -inf }
0x10bf   :  { %3072 = vmax.xlane.f32.xlu0 %v3071_v6 }
0x10c0   :  { %v2916_v32 = vpop.f32.mrf.mxu2 }
0x10c1   :  { %v10778_v38 = vadd.f32 %v2916_v32, %v9425_v63 }
0x10c2   :  { %v2881_v3 = vpop.f32.mrf.mxu1 }
0x10c3   :  { %v10765_v42 = vadd.f32 %v2881_v3, %v9425_v63  ;;  %v3080_v0 = vsel %vm426_vm3, %v10778_v38, -inf }
0x10c5   :  { %v3074_v24 = vsel %vm426_vm3, %v10765_v42, -inf  ;;  %v2951_v8 = vpop.f32.mrf.mxu3 }
0x10c6   :  { %3075 = vmax.xlane.f32.xlu2 %v3074_v24  ;;  %v10810_v36 = vadd.f32 %v2951_v8, %v9425_v63 }
0x10c8   :  { %v3086_v21 = vsel %vm426_vm3, %v10810_v36, -inf }
0x10c9   :  { %v2919_v18 = vpop.f32.mrf.mxu2  ;;  %v3064_v47 = vpop.xlane.xlu0 %3063 }
0x10ca   :  { %v2884_v26 = vpop.f32.mrf.mxu1  ;;  %v3110_v50 = vsub.f32 %v10734_v14, %v3064_v47  ;;  %v10794_v11 = vadd.f32 %v2919_v18, %v9433_v12 }
0x10cb   :  { %v10797_v4 = vadd.f32 %v2884_v26, %v9433_v12 }
0x10cc   :  { %v3126_v2 = vmul.f32 1.442695, %v3110_v50  ;;  %v3083_v14 = vsel %vm426_vm3, %v10794_v11, -inf }
0x10cd   :  { %v3077_v31 = vsel %vm426_vm3, %v10797_v4, -inf  ;;  %v2954_v49 = vpop.f32.mrf.mxu3 }
0x10ce   :  { %8892 = vpow2.f32 %v3126_v2  ;;  %v10821_v33 = vadd.f32 %v2954_v49, %v9433_v12 }
0x10d0   :  { %v3089_v19 = vsel %vm426_vm3, %v10821_v33, -inf }
0x10d1   :  { %v3056_v1 = vpop.f32.mrf.mxu2  ;;  %v3067_v29 = vpop.xlane.xlu0 %3066 }
0x10d2   :  { %v2986_v54 = vpop.f32.mrf.mxu0  ;;  %v10787_v59 = vadd.f32 %v3056_v1, %v9425_v63  ;;  %v3111_v30 = vsub.f32 %v10746_v17, %v3067_v29 }
0x10d3   :  { %v10770_v25 = vadd.f32 %v2986_v54, %v9425_v63 }
0x10d4   :  { %v3104_v41 = vsel %vm426_vm3, %v10787_v59, -inf  ;;  %v3128_v53 = vmul.f32 1.442695, %v3111_v30  ;;  %v10814_v46 = vpop.eup %8892 }
0x10d5   :  { %v3092_v58 = vsel %vm426_vm3, %v10770_v25, -inf  ;;  %v3158_v17 = vsel %vm426_vm3, %v10814_v46, 0.0 }
0x10d6   :  { %3093 = vmax.xlane.f32.xlu2 %v3092_v58  ;;  %8894 = vpow2.f32 %v3128_v53 }
0x10d7   :  { %v3021_v20 = vpop.f32.mrf.mxu1 }
0x10d8   :  { %v10775_v61 = vadd.f32 %v3021_v20, %v9425_v63 }
0x10d9   :  { %v3059_v15 = vpop.f32.mrf.mxu2 }
0x10da   :  { %v3098_v10 = vsel %vm426_vm3, %v10775_v61, -inf  ;;  %v2989_v37 = vpop.f32.mrf.mxu0  ;;  %v10830_v35 = vadd.f32 %v3059_v15, %v9433_v12 }
0x10db   :  { %3099 = vmax.xlane.f32.xlu0 %v3098_v10  ;;  %v10783_v48 = vadd.f32 %v2989_v37, %v9433_v12 }
0x10dc   :  { %v10823_v60 = vpop.eup %8894  ;;  %v3107_v23 = vsel %vm426_vm3, %v10830_v35, -inf }
0x10dd   :  { %v3095_v55 = vsel %vm426_vm3, %v10783_v48, -inf  ;;  %v3161_v52 = vsel %vm426_vm3, %v10823_v60, 0.0 }
0x10de   :  { %3096 = vmax.xlane.f32.xlu1 %v3095_v55  ;;  %3081 = vmax.xlane.f32.xlu2 %v3080_v0 }
0x10df   :  { %v3024_v9 = vpop.f32.mrf.mxu1 }
0x10e0   :  { %v10803_v16 = vadd.f32 %v3024_v9, %v9433_v12 }
0x10e2   :  { %v3101_v51 = vsel %vm426_vm3, %v10803_v16, -inf }
0x10e3   :  { %3105 = vmax.xlane.f32.xlu0 %v3104_v41 }
0x10e6   :  { %3084 = vmax.xlane.f32.xlu1 %v3083_v14  ;;  %3078 = vmax.xlane.f32.xlu2 %v3077_v31 }
0x10eb   :  { %3102 = vmax.xlane.f32.xlu0 %v3101_v51 }
0x10ee   :  { %3087 = vmax.xlane.f32.xlu1 %v3086_v21  ;;  %3159 = vadd.xlane.f32.xlu2 %v3158_v17 }
0x10f6   :  { %3090 = vmax.xlane.f32.xlu1 %v3089_v19  ;;  %3162 = vadd.xlane.f32.xlu2 %v3161_v52 }
0x10fe   :  { %3108 = vmax.xlane.f32.xlu2 %v3107_v23 }
0x112a   :  { %v3070_v43 = vpop.xlane.xlu1 %3069 }
0x112b   :  { %v3112_v56 = vsub.f32 %v10755_v34, %v3070_v43 }
0x112d   :  { %v3130_v6 = vmul.f32 1.442695, %v3112_v56 }
0x112f   :  { %8896 = vpow2.f32 %v3130_v6 }
0x1132   :  { %v3073_v3 = vpop.xlane.xlu0 %3072 }
0x1133   :  { %v3113_v24 = vsub.f32 %v10760_v39, %v3073_v3 }
0x1135   :  { %v10836_v32 = vpop.eup %8896  ;;  %v3132_v26 = vmul.f32 1.442695, %v3113_v24 }
0x1136   :  { %v3164_v18 = vsel %vm426_vm3, %v10836_v32, 0.0 }
0x1137   :  { %8898 = vpow2.f32 %v3132_v26  ;;  %3165 = vadd.xlane.f32.xlu0 %v3164_v18 }
0x1139   :  { %v3076_v54 = vpop.xlane.xlu2 %3075 }
0x113a   :  { %v3114_v58 = vsub.f32 %v10765_v42, %v3076_v54 }
0x113c   :  { %v3134_v20 = vmul.f32 1.442695, %v3114_v58 }
0x113d   :  { %v10841_v47 = vpop.eup %8898 }
0x113e   :  { %8900 = vpow2.f32 %v3134_v20  ;;  %v3167_v34 = vsel %vm426_vm3, %v10841_v47, 0.0 }
0x113f   :  { %3168 = vadd.xlane.f32.xlu2 %v3167_v34 }
0x1144   :  { %v10845_v39 = vpop.eup %8900 }
0x1145   :  { %v3170_v10 = vsel %vm426_vm3, %v10845_v39, 0.0 }
0x1146   :  { %3171 = vadd.xlane.f32.xlu1 %v3170_v10 }
0x1149   :  { %v3094_v1 = vpop.xlane.xlu2 %3093 }
0x114a   :  { %v3120_v37 = vsub.f32 %v10770_v25, %v3094_v1 }
0x114c   :  { %v3146_v50 = vmul.f32 1.442695, %v3120_v37 }
0x114e   :  { %v3100_v55 = vpop.xlane.xlu0 %3099  ;;  %8902 = vpow2.f32 %v3146_v50 }
0x114f   :  { %v3122_v42 = vsub.f32 %v10775_v61, %v3100_v55 }
0x1151   :  { %v3150_v0 = vmul.f32 1.442695, %v3122_v42  ;;  %v3082_v2 = vpop.xlane.xlu2 %3081  ;;  %v3097_v29 = vpop.xlane.xlu1 %3096 }
0x1152   :  { %v3116_v41 = vsub.f32 %v10778_v38, %v3082_v2  ;;  %v3121_v17 = vsub.f32 %v10783_v48, %v3097_v29 }
0x1153   :  { %8904 = vpow2.f32 %v3150_v0 }
0x1154   :  { %v10852_v9 = vpop.eup %8902  ;;  %v3138_v8 = vmul.f32 1.442695, %v3116_v41  ;;  %v3148_v43 = vmul.f32 1.442695, %v3121_v17 }
0x1155   :  { %v3188_v14 = vsel %vm426_vm3, %v10852_v9, 0.0 }
0x1156   :  { %v3106_v30 = vpop.xlane.xlu0 %3105  ;;  %8906 = vpow2.f32 %v3138_v8  ;;  %3189 = vadd.xlane.f32.xlu1 %v3188_v14 }
0x1157   :  { %v3124_v3 = vsub.f32 %v10787_v59, %v3106_v30 }
0x1159   :  { %v10856_v25 = vpop.eup %8904  ;;  %v3079_v31 = vpop.xlane.xlu2 %3078 }
0x115a   :  { %v3085_v53 = vpop.xlane.xlu1 %3084  ;;  %v3194_v61 = vsel %vm426_vm3, %v10856_v25, 0.0  ;;  %v3115_v51 = vsub.f32 %v10797_v4, %v3079_v31 }
0x115b   :  { %v3117_v38 = vsub.f32 %v10794_v11, %v3085_v53  ;;  %3195 = vadd.xlane.f32.xlu2 %v3194_v61 }
0x115c   :  { %v10862_v21 = vpop.eup %8906  ;;  %v3136_v49 = vmul.f32 1.442695, %v3115_v51 }
0x115d   :  { %v3140_v19 = vmul.f32 1.442695, %v3117_v38  ;;  %v3176_v15 = vsel %vm426_vm3, %v10862_v21, 0.0 }
0x115e   :  { %v3103_v52 = vpop.xlane.xlu0 %3102  ;;  %8908 = vpow2.f32 %v3136_v49  ;;  %3177 = vadd.xlane.f32.xlu1 %v3176_v15 }
0x115f   :  { %v3123_v23 = vsub.f32 %v10803_v16, %v3103_v52  ;;  %8910 = vpow2.f32 %v3140_v19 }
0x1161   :  { %v3152_v4 = vmul.f32 1.442695, %v3123_v23  ;;  %v3160_v56 = vpop.xlane.xlu2 %3159 }
0x1162   :  { %v3088_v11 = vpop.xlane.xlu1 %3087  ;;  %v3217_v42 = vand.u32 2147483648, %v3160_v56  ;;  %v3215_v29 = vand.u32 2147483647, %v3160_v56  ;;  %vm3211_vm0 = vweird.f32 %v3160_v56 }
0x1163   :  { %8912 = vpow2.f32 %v3152_v4  ;;  %v3118_v6 = vsub.f32 %v10810_v36, %v3088_v11  ;;  %v3154_v36 = vmul.f32 1.442695, %v3124_v3  ;;  %v8594_v3 = vpack.i.bf16 %v10670_v44, %v10664_v22 }
0x1164   :  { %8914 = vrcp.f32 %v3160_v56  ;;  %v10869_v48 = vpop.eup %8908  ;;  %vm3216_vm2 = vcmp.eq.f32.partialorder %v3215_v29, 8.507059e+37 }
0x1165   :  { %8916 = vpow2.f32 %v3148_v43  ;;  %v10872_v24 = vpop.eup %8910  ;;  %v3142_v26 = vmul.f32 1.442695, %v3118_v6  ;;  %v3173_v16 = vsel %vm426_vm3, %v10869_v48, 0.0 }
0x1166   :  { %3174 = vadd.xlane.f32.xlu1 %v3173_v16  ;;  %v3179_v18 = vsel %vm426_vm3, %v10872_v24, 0.0  ;;  %v8604_v16 = vpack.i.bf16 %v10688_v40, %v10681_v57 }
0x1167   :  { %8918 = vpow2.f32 %v3142_v26  ;;  %3180 = vadd.xlane.f32.xlu0 %v3179_v18  ;;  %v8599_v26 = vpack.i.bf16 %v10679_v27, %v10662_v28 }
0x1169   :  { %v10878_v54 = vpop.eup %8912  ;;  %v3163_v20 = vpop.xlane.xlu2 %3162 }
0x116a   :  { %v8915_v58 = vpop.eup %8914  ;;  %v3091_v34 = vpop.xlane.xlu1 %3090  ;;  %v3197_v59 = vsel %vm426_vm3, %v10878_v54, 0.0  ;;  %8920 = vrcp.f32 %v3163_v20  ;;  %v3231_v17 = vand.u32 2147483648, %v3163_v20  ;;  %v3229_v15 = vand.u32 2147483647, %v3163_v20 }
0x116b   :  { %v10882_v10 = vpop.eup %8916  ;;  %v3207_v1 = vmul.f32 %v8915_v58, %v3160_v56  ;;  %3198 = vadd.xlane.f32.xlu2 %v3197_v59  ;;  %8922 = vpow2.f32 %v3154_v36  ;;  %v3119_v50 = vsub.f32 %v10821_v33, %v3091_v34  ;;  %vm3212_vm13 = vweird.f32 %v8915_v58 }
0x116c   :  { %v3191_v0 = vsel %vm426_vm3, %v10882_v10, 0.0  ;;  %vm3213_vm11 = vmor %vm3211_vm0, %vm3212_vm13  ;;  %v3218_v33 = vor.u32 1.1754944e-38, %v3217_v42  ;;  %vm3225_vm14 = vweird.f32 %v3163_v20  ;;  %v3232_v43 = vor.u32 1.1754944e-38, %v3231_v17 }
0x116d   :  { %v3208_v37 = vsub.f32 1.0, %v3207_v1  ;;  %v10885_v55 = vpop.eup %8918  ;;  %v3144_v14 = vmul.f32 1.442695, %v3119_v50  ;;  %vm3230_vm9 = vcmp.eq.f32.partialorder %v3229_v15, 8.507059e+37 }
0x116e   :  { %3192 = vadd.xlane.f32.xlu1 %v3191_v0  ;;  %v3182_v41 = vsel %vm426_vm3, %v10885_v55, 0.0 }
0x116f   :  { %v3209_v2 = vmul.f32 %v8915_v58, %v3208_v37  ;;  %3183 = vadd.xlane.f32.xlu0 %v3182_v41  ;;  %8924 = vpow2.f32 %v3144_v14 }
0x1170   :  { %v8921_v8 = vpop.eup %8920 }
0x1171   :  { %v3210_v30 = vadd.f32 %v8915_v58, %v3209_v2  ;;  %v3221_v31 = vmul.f32 %v8921_v8, %v3163_v20  ;;  %v10891_v53 = vpop.eup %8922  ;;  %vm3226_vm12 = vweird.f32 %v8921_v8 }
0x1172   :  { %v3200_v52 = vsel %vm426_vm3, %v10891_v53, 0.0  ;;  %vm3227_vm15 = vmor %vm3225_vm14, %vm3226_vm12 }
0x1173   :  { %v3214_v61 = vsel %vm3213_vm11, %v8915_v58, %v3210_v30  ;;  %v3222_v51 = vsub.f32 1.0, %v3221_v31 }
0x1174   :  { %v3219_v38 = vsel %vm3216_vm2, %v3218_v33, %v3214_v61  ;;  %v8609_v33 = vpack.i.bf16 %v10698_v7, %v10690_v5 }
0x1175   :  { %v3430_v49 = vmul.f32 %v10814_v46, %v3219_v38  ;;  %v3223_v19 = vmul.f32 %v8921_v8, %v3222_v51  ;;  %v10897_v56 = vpop.eup %8924 }
0x1176   :  { %3201 = vadd.xlane.f32.xlu1 %v3200_v52  ;;  %v3185_v6 = vsel %vm426_vm3, %v10897_v56, 0.0 }
0x1177   :  { %8167 = vmatmul.msk.f32.vlgmr.msra.gmra.mxu3 %vm426_vm3, %v3430_v49  ;;  %v3224_v23 = vadd.f32 %v8921_v8, %v3223_v19 }
0x1179   :  { %v3228_v4 = vsel %vm3227_vm15, %v8921_v8, %v3224_v23 }
0x117a   :  { %v3233_v11 = vsel %vm3230_vm9, %v3232_v43, %v3228_v4 }
0x117b   :  { %v3431_v46 = vmul.f32 %v10823_v60, %v3233_v11  ;;  %v3109_v60 = vpop.xlane.xlu2 %3108 }
0x117c   :  { %v3125_v18 = vsub.f32 %v10830_v35, %v3109_v60 }
0x117e   :  { %3186 = vadd.xlane.f32.xlu1 %v3185_v6  ;;  %v3156_v36 = vmul.f32 1.442695, %v3125_v18 }
0x117f   :  { %8168 = vmatmul.msk.f32.gmra.mxu3 %vm426_vm3, %v3431_v46 }
0x1180   :  { %8926 = vpow2.f32 %v3156_v36 }
0x1183   :  { %8595 = vrot.lane.b32.xlu2 %v8594_v3, %s9216_s27  ;;  %8600 = vrot.lane.b32.xlu0 %v8599_v26, %s9216_s27 }
0x1186   :  { %v10913_v58 = vpop.eup %8926 }
0x1187   :  { %v3203_v28 = vsel %vm426_vm3, %v10913_v58, 0.0 }
0x1197   :  { %8605 = vrot.lane.b32.xlu1 %v8604_v16, %s9216_s27 }
0x11aa   :  { %v3166_v22 = vpop.xlane.xlu0 %3165 }
0x11ab   :  { %8928 = vrcp.f32 %v3166_v22  ;;  %v3245_v40 = vand.u32 2147483648, %v3166_v22  ;;  %v3243_v59 = vand.u32 2147483647, %v3166_v22  ;;  %vm3239_vm13 = vweird.f32 %v3166_v22 }
0x11ad   :  { %3204 = vadd.xlane.f32.xlu0 %v3203_v28  ;;  %v3246_v37 = vor.u32 1.1754944e-38, %v3245_v40  ;;  %vm3244_vm11 = vcmp.eq.f32.partialorder %v3243_v59, 8.507059e+37 }
0x11b1   :  { %v8929_v44 = vpop.eup %8928 }
0x11b2   :  { %v3235_v27 = vmul.f32 %v8929_v44, %v3166_v22  ;;  %v3169_v20 = vpop.xlane.xlu2 %3168  ;;  %vm3240_vm10 = vweird.f32 %v8929_v44 }
0x11b3   :  { %8930 = vrcp.f32 %v3169_v20  ;;  %vm3241_vm0 = vmor %vm3239_vm13, %vm3240_vm10  ;;  %v3259_v8 = vand.u32 2147483648, %v3169_v20  ;;  %v3257_v14 = vand.u32 2147483647, %v3169_v20  ;;  %vm3253_vm12 = vweird.f32 %v3169_v20 }
0x11b4   :  { %v3236_v57 = vsub.f32 1.0, %v3235_v27 }
0x11b5   :  { %v3260_v38 = vor.u32 1.1754944e-38, %v3259_v8  ;;  %vm3258_vm15 = vcmp.eq.f32.partialorder %v3257_v14, 8.507059e+37 }
0x11b6   :  { %v3237_v34 = vmul.f32 %v8929_v44, %v3236_v57 }
0x11b8   :  { %v3238_v35 = vadd.f32 %v8929_v44, %v3237_v34 }
0x11b9   :  { %v8931_v1 = vpop.eup %8930  ;;  %v3172_v50 = vpop.xlane.xlu1 %3171 }
0x11ba   :  { %v3242_v42 = vsel %vm3241_vm0, %v8929_v44, %v3238_v35  ;;  %v3249_v0 = vmul.f32 %v8931_v1, %v3169_v20  ;;  %8932 = vrcp.f32 %v3172_v50  ;;  %vm3254_vm2 = vweird.f32 %v8931_v1 }
0x11bb   :  { %v3247_v2 = vsel %vm3244_vm11, %v3246_v37, %v3242_v42  ;;  %vm3255_vm14 = vmor %vm3253_vm12, %vm3254_vm2  ;;  %v3273_v19 = vand.u32 2147483648, %v3172_v50  ;;  %v3271_v23 = vand.u32 2147483647, %v3172_v50  ;;  %vm3267_vm10 = vweird.f32 %v3172_v50 }
0x11bc   :  { %v3250_v29 = vsub.f32 1.0, %v3249_v0  ;;  %v3432_v41 = vmul.f32 %v10836_v32, %v3247_v2 }
0x11bd   :  { %v3274_v7 = vor.u32 1.1754944e-38, %v3273_v19  ;;  %vm3272_vm0 = vcmp.eq.f32.partialorder %v3271_v23, 8.507059e+37 }
0x11be   :  { %8169 = vmatmul.msk.f32.vlgmr.msrb.gmra.mxu0 %vm426_vm3, %v3432_v41  ;;  %v3251_v30 = vmul.f32 %v8931_v1, %v3250_v29 }
0x11c0   :  { %v8933_v31 = vpop.eup %8932  ;;  %v3252_v61 = vadd.f32 %v8931_v1, %v3251_v30 }
0x11c1   :  { %v3263_v51 = vmul.f32 %v8933_v31, %v3172_v50  ;;  %8610 = vrot.lane.b32.xlu0 %v8609_v33, %s9216_s27  ;;  %vm3268_vm9 = vweird.f32 %v8933_v31 }
0x11c2   :  { %v3256_v17 = vsel %vm3255_vm14, %v8931_v1, %v3252_v61  ;;  %vm3269_vm13 = vmor %vm3267_vm10, %vm3268_vm9 }
0x11c3   :  { %v3264_v32 = vsub.f32 1.0, %v3263_v51  ;;  %v3261_v49 = vsel %vm3258_vm15, %v3260_v38, %v3256_v17 }
0x11c4   :  { %v3433_v52 = vmul.f32 %v10841_v47, %v3261_v49 }
0x11c5   :  { %v3265_v15 = vmul.f32 %v8933_v31, %v3264_v32 }
0x11c6   :  { %8170 = vmatmul.msk.f32.gmra.mxu0 %vm426_vm3, %v3433_v52 }
0x11c7   :  { %v3266_v5 = vadd.f32 %v8933_v31, %v3265_v15 }
0x11c9   :  { %v3270_v43 = vsel %vm3269_vm13, %v8933_v31, %v3266_v5  ;;  %v10924_v4 = vpop.xlane.xlu1 %3189 }
0x11ca   :  { %v3275_v11 = vsel %vm3272_vm0, %v3274_v7, %v3270_v43 }
0x11cb   :  { %v3434_v46 = vmul.f32 %v10845_v39, %v3275_v11 }
0x11cd   :  { %8171 = vmatmul.msk.f32.vlgmr.msra.gmra.mxu1 %vm426_vm3, %v3434_v46 }
0x11ce   :  { %v10928_v47 = vpop.xlane.xlu2 %3195 }
0x11d1   :  { %v3178_v6 = vpop.xlane.xlu1 %3177 }
0x11d2   :  { %8934 = vrcp.f32 %v3178_v6  ;;  %v3301_v36 = vand.u32 2147483648, %v3178_v6  ;;  %v3299_v28 = vand.u32 2147483647, %v3178_v6  ;;  %vm3295_vm2 = vweird.f32 %v3178_v6 }
0x11d4   :  { %v3302_v20 = vor.u32 1.1754944e-38, %v3301_v36  ;;  %vm3300_vm14 = vcmp.eq.f32.partialorder %v3299_v28, 8.507059e+37 }
0x11d8   :  { %v8935_v3 = vpop.eup %8934 }
0x11d9   :  { %v3291_v26 = vmul.f32 %v8935_v3, %v3178_v6  ;;  %v3175_v16 = vpop.xlane.xlu1 %3174  ;;  %vm3296_vm11 = vweird.f32 %v8935_v3 }
0x11da   :  { %v3181_v60 = vpop.xlane.xlu0 %3180  ;;  %8936 = vrcp.f32 %v3175_v16  ;;  %vm3297_vm12 = vmor %vm3295_vm2, %vm3296_vm11  ;;  %v3287_v29 = vand.u32 2147483648, %v3175_v16  ;;  %v3285_v30 = vand.u32 2147483647, %v3175_v16  ;;  %vm3281_vm9 = vweird.f32 %v3175_v16 }
0x11db   :  { %v3292_v18 = vsub.f32 1.0, %v3291_v26  ;;  %8938 = vrcp.f32 %v3181_v60  ;;  %v3315_v14 = vand.u32 2147483648, %v3181_v60  ;;  %v3313_v51 = vand.u32 2147483647, %v3181_v60 }
0x11dc   :  { %v3288_v17 = vor.u32 1.1754944e-38, %v3287_v29  ;;  %vm3309_vm0 = vweird.f32 %v3181_v60  ;;  %vm3286_vm11 = vcmp.eq.f32.partialorder %v3285_v30, 8.507059e+37 }
0x11dd   :  { %v3293_v22 = vmul.f32 %v8935_v3, %v3292_v18  ;;  %v3316_v15 = vor.u32 1.1754944e-38, %v3315_v14 }
0x11de   :  { %v10930_v44 = vpop.xlane.xlu2 %3198 }
0x11df   :  { %v3294_v39 = vadd.f32 %v8935_v3, %v3293_v22 }
0x11e0   :  { %v8937_v27 = vpop.eup %8936 }
0x11e1   :  { %v8939_v57 = vpop.eup %8938  ;;  %v3298_v40 = vsel %vm3297_vm12, %v8935_v3, %v3294_v39  ;;  %v3277_v34 = vmul.f32 %v8937_v27, %v3175_v16  ;;  %v10932_v59 = vpop.xlane.xlu1 %3192  ;;  %vm3282_vm15 = vweird.f32 %v8937_v27  ;;  %vm3314_vm12 = vcmp.eq.f32.partialorder %v3313_v51, 8.507059e+37 }
0x11e2   :  { %v3303_v35 = vsel %vm3300_vm14, %v3302_v20, %v3298_v40  ;;  %v3305_v1 = vmul.f32 %v8939_v57, %v3181_v60  ;;  %v3184_v37 = vpop.xlane.xlu0 %3183  ;;  %vm3310_vm10 = vweird.f32 %v8939_v57  ;;  %vm10936_vm13 = vmor %vm3281_vm9, %vm3282_vm15 }
0x11e3   :  { %v3436_v50 = vmul.f32 %v10862_v21, %v3303_v35  ;;  %v3278_v42 = vsub.f32 1.0, %v3277_v34  ;;  %8940 = vrcp.f32 %v3184_v37  ;;  %vm3311_vm2 = vmor %vm3309_vm0, %vm3310_vm10  ;;  %v3329_v11 = vand.u32 2147483648, %v3184_v37 }
0x11e4   :  { %v3306_v0 = vsub.f32 1.0, %v3305_v1  ;;  %v3327_v3 = vand.u32 2147483647, %v3184_v37  ;;  %vm3323_vm15 = vweird.f32 %v3184_v37 }
0x11e5   :  { %v3279_v2 = vmul.f32 %v8937_v27, %v3278_v42  ;;  %8173 = vmatmul.msk.f32.vlgmr.msra.gmra.mxu2 %vm426_vm3, %v3436_v50  ;;  %v3330_v18 = vor.u32 1.1754944e-38, %v3329_v11 }
0x11e6   :  { %v8596_v41 = vpop.permute.xlu2 %8595  ;;  %v3307_v8 = vmul.f32 %v8939_v57, %v3306_v0  ;;  %vm3328_vm10 = vcmp.eq.f32.partialorder %v3327_v3, 8.507059e+37 }
0x11e7   :  { %v8597_v33 = vunpack.i.l.bf16 %v8596_v41  ;;  %v3280_v31 = vadd.f32 %v8937_v27, %v3279_v2  ;;  %v8598_v32 = vunpack.i.h.bf16 %v8596_v41 }
0x11e8   :  { %v3308_v21 = vadd.f32 %v8939_v57, %v3307_v8 }
0x11e9   :  { %v8941_v38 = vpop.eup %8940  ;;  %3612 = vmatpush.msrb.mxu3 %v8597_v33  ;;  %v3202_v49 = vpop.xlane.xlu1 %3201  ;;  %v3284_v19 = vsel %vm10936_vm13, %v8937_v27, %v3280_v31 }
0x11ea   :  { %v3319_v52 = vmul.f32 %v8941_v38, %v3184_v37  ;;  %8942 = vrcp.f32 %v3202_v49  ;;  %v3289_v23 = vsel %vm3286_vm11, %v3288_v17, %v3284_v19  ;;  %v3312_v43 = vsel %vm3311_vm2, %v8939_v57, %v3308_v21 }
0x11eb   :  { %3613 = vmatpush.msrb.mxu3 %v8598_v32  ;;  %v3435_v7 = vmul.f32 %v10869_v48, %v3289_v23  ;;  %v3317_v46 = vsel %vm3314_vm12, %v3316_v15, %v3312_v43  ;;  %vm3324_vm14 = vweird.f32 %v8941_v38  ;;  %v3413_v20 = vand.u32 2147483648, %v3202_v49 }
0x11ec   :  { %v3320_v5 = vsub.f32 1.0, %v3319_v52  ;;  %v3437_v26 = vmul.f32 %v10872_v24, %v3317_v46  ;;  %vm3325_vm9 = vmor %vm3323_vm15, %vm3324_vm14  ;;  %v3411_v24 = vand.u32 2147483647, %v3202_v49  ;;  %vm3407_vm0 = vweird.f32 %v3202_v49 }
0x11ed   :  { %8172 = vmatmul.msk.f32.gmra.mxu1 %vm426_vm3, %v3435_v7  ;;  %v3414_v37 = vor.u32 1.1754944e-38, %v3413_v20 }
0x11ee   :  { %v3321_v6 = vmul.f32 %v8941_v38, %v3320_v5  ;;  %8174 = vmatmul.msk.f32.gmra.mxu2 %vm426_vm3, %v3437_v26  ;;  %vm3412_vm2 = vcmp.eq.f32.partialorder %v3411_v24, 8.507059e+37  ;;  %v3355_v24 = vand.u32 2147483647, %v10924_v4 }
0x11f0   :  { %v8943_v16 = vpop.eup %8942  ;;  %v3322_v60 = vadd.f32 %v8941_v38, %v3321_v6 }
0x11f1   :  { %v3403_v36 = vmul.f32 %v8943_v16, %v3202_v49  ;;  %v3187_v48 = vpop.xlane.xlu1 %3186  ;;  %vm3408_vm13 = vweird.f32 %v8943_v16 }
0x11f2   :  { %v3326_v22 = vsel %vm3325_vm9, %v8941_v38, %v3322_v60  ;;  %8944 = vrcp.f32 %v3187_v48  ;;  %vm3409_vm11 = vmor %vm3407_vm0, %vm3408_vm13  ;;  %v3343_v41 = vand.u32 2147483648, %v3187_v48  ;;  %v3341_v30 = vand.u32 2147483647, %v3187_v48 }
0x11f3   :  { %v3331_v28 = vsel %vm3328_vm10, %v3330_v18, %v3326_v22  ;;  %v3404_v39 = vsub.f32 1.0, %v3403_v36  ;;  %vm3337_vm14 = vweird.f32 %v3187_v48  ;;  %8946 = vrcp.f32 %v10928_v47 }
0x11f4   :  { %v3438_v27 = vmul.f32 %v10885_v55, %v3331_v28  ;;  %v3344_v33 = vor.u32 1.1754944e-38, %v3343_v41  ;;  %vm3342_vm9 = vcmp.eq.f32.partialorder %v3341_v30, 8.507059e+37  ;;  %8948 = vrcp.f32 %v10924_v4 }
0x11f5   :  { %v3405_v57 = vmul.f32 %v8943_v16, %v3404_v39  ;;  %v8601_v40 = vpop.permute.xlu0 %8600  ;;  %8950 = vrcp.f32 %v10930_v44  ;;  %vm3379_vm10 = vweird.f32 %v10928_v47  ;;  %v3385_v60 = vand.u32 2147483648, %v10928_v47 }
0x11f6   :  { %v8602_v34 = vunpack.i.l.bf16 %v8601_v40  ;;  %8175 = vmatmul.msk.f32.vlgmr.msrb.gmra.mxu3 %vm426_vm3, %v3438_v27  ;;  %v8603_v50 = vunpack.i.h.bf16 %v8601_v40  ;;  %8952 = vrcp.f32 %v10932_v59  ;;  %v3357_v39 = vand.u32 2147483648, %v10924_v4 }
0x11f7   :  { %v3406_v35 = vadd.f32 %v8943_v16, %v3405_v57 }
0x11f8   :  { %v8945_v1 = vpop.eup %8944  ;;  %3717 = vmatpush.msrb.mxu2 %v8602_v34  ;;  %v3386_v34 = vor.u32 1.1754944e-38, %v3385_v60 }
0x11f9   :  { %v3410_v42 = vsel %vm3409_vm11, %v8943_v16, %v3406_v35  ;;  %v3333_v0 = vmul.f32 %v8945_v1, %v3187_v48  ;;  %vm3338_vm12 = vweird.f32 %v8945_v1  ;;  %v8947_v17 = vpop.eup %8946  ;;  %v3383_v16 = vand.u32 2147483647, %v10928_v47 }
0x11fa   :  { %v3415_v2 = vsel %vm3412_vm2, %v3414_v37, %v3410_v42  ;;  %3718 = vmatpush.msrb.mxu2 %v8603_v50  ;;  %vm3339_vm15 = vmor %vm3337_vm14, %vm3338_vm12  ;;  %v8949_v32 = vpop.eup %8948  ;;  %v3375_v49 = vmul.f32 %v8947_v17, %v10928_v47  ;;  %vm3380_vm13 = vweird.f32 %v8947_v17  ;;  %vm3351_vm12 = vweird.f32 %v10924_v4 }
0x11fb   :  { %v3444_v55 = vmul.f32 %v10891_v53, %v3415_v2  ;;  %v3334_v29 = vsub.f32 1.0, %v3333_v0  ;;  %v10958_v15 = vpop.eup %8950  ;;  %vm3352_vm0 = vweird.f32 %v8949_v32  ;;  %vm10970_vm11 = vmor %vm3379_vm10, %vm3380_vm13  ;;  %v3358_v42 = vor.u32 1.1754944e-38, %v3357_v39 }
0x11fc   :  { %v3376_v52 = vsub.f32 1.0, %v3375_v49  ;;  %v10960_v5 = vpop.eup %8952  ;;  %v3389_v46 = vmul.f32 %v10958_v15, %v10930_v44  ;;  %vm10979_vm14 = vmor %vm3351_vm12, %vm3352_vm0  ;;  %vm3356_vm0 = vcmp.eq.f32.partialorder %v3355_v24, 8.507059e+37  ;;  %vm3394_vm12 = vweird.f32 %v10958_v15 }
0x11fd   :  { %v3335_v8 = vmul.f32 %v8945_v1, %v3334_v29  ;;  %8181 = vmatmul.msk.f32.vlgmr.msrb.gmra.mxu2 %vm426_vm3, %v3444_v55  ;;  %v3361_v6 = vmul.f32 %v10960_v5, %v10932_v59 }
0x11fe   :  { %v3377_v7 = vmul.f32 %v8947_v17, %v3376_v52  ;;  %v3390_v48 = vsub.f32 1.0, %v3389_v46 }
0x11ff   :  { %v3336_v14 = vadd.f32 %v8945_v1, %v3335_v8  ;;  %v3362_v22 = vsub.f32 1.0, %v3361_v6 }
0x1200   :  { %v3378_v26 = vadd.f32 %v8947_v17, %v3377_v7  ;;  %v3391_v37 = vmul.f32 %v10958_v15, %v3390_v48  ;;  %v8186_v48 = vld [vmem:[%s13139_s3 + $0x50] sm:$0xff] }
0x1201   :  { %v3340_v31 = vsel %vm3339_vm15, %v8945_v1, %v3336_v14  ;;  %vm3384_vm15 = vcmp.eq.f32.partialorder %v3383_v16, 8.507059e+37  ;;  %v3363_v50 = vmul.f32 %v10960_v5, %v3362_v22  ;;  %v8185_v22 = vld [vmem:[%s13139_s3 + $0x48] sm:$0xff] }
0x1202   :  { %v3345_v61 = vsel %vm3342_vm9, %v3344_v33, %v3340_v31  ;;  %v3382_v47 = vsel %vm10970_vm11, %v8947_v17, %v3378_v26  ;;  %vm3393_vm11 = vweird.f32 %v10930_v44  ;;  %v3392_v33 = vadd.f32 %v10958_v15, %v3391_v37 }
0x1203   :  { %v3439_v21 = vmul.f32 %v10897_v56, %v3345_v61  ;;  %v3347_v56 = vmul.f32 %v8949_v32, %v10924_v4  ;;  %v3387_v0 = vsel %vm3384_vm15, %v3386_v34, %v3382_v47  ;;  %v3364_v14 = vadd.f32 %v10960_v5, %v3363_v50 }
0x1204   :  { %v3442_v8 = vmul.f32 %v10856_v25, %v3387_v0  ;;  %v3399_v31 = vand.u32 2147483648, %v10930_v44  ;;  %v3371_v61 = vand.u32 2147483648, %v10932_v59  ;;  %vm3365_vm15 = vweird.f32 %v10932_v59 }
0x1205   :  { %8176 = vmatmul.msk.f32.gmra.mxu3 %vm426_vm3, %v3439_v21  ;;  %v3348_v23 = vsub.f32 1.0, %v3347_v56 }
0x1206   :  { %v3400_v49 = vor.u32 1.1754944e-38, %v3399_v31  ;;  %v3372_v56 = vor.u32 1.1754944e-38, %v3371_v61 }
0x1207   :  { %v3349_v11 = vmul.f32 %v8949_v32, %v3348_v23 }
0x1209   :  { %v8606_v51 = vpop.permute.xlu1 %8605  ;;  %v3350_v36 = vadd.f32 %v8949_v32, %v3349_v11 }
0x120a   :  { %v8608_v53 = vunpack.i.h.bf16 %v8606_v51  ;;  %v8607_v38 = vunpack.i.l.bf16 %v8606_v51 }
0x120b   :  { %v3354_v1 = vsel %vm10979_vm14, %v8949_v32, %v3350_v36  ;;  %vm3366_vm14 = vweird.f32 %v10960_v5  ;;  %v8187_v36 = vld [vmem:[%s13139_s3 + $0x58] sm:$0xff] }
0x120c   :  { %3647 = vmatpush.msra.mxu0 %v8607_v38  ;;  %3682 = vmatpush.msrb.mxu1 %v8608_v53  ;;  %v3359_v41 = vsel %vm3356_vm0, %v3358_v42, %v3354_v1  ;;  %v3369_v53 = vand.u32 2147483647, %v10932_v59  ;;  %v3397_v38 = vand.u32 2147483647, %v10930_v44  ;;  %vm13210_vm0 = vcmask 261120  }
0x120d   :  { %v3440_v25 = vmul.f32 %v10852_v9, %v3359_v41  ;;  %3822 = vmatpush.msra.mxu3 %v8187_v36 }
0x120f   :  { %3823 = vmatpush.msra.mxu3 %v8186_v48 }
0x1211   :  { %3824 = vmatpush.msra.mxu3 %v8185_v22 }
0x1220   :  { %v3205_v19 = vpop.xlane.xlu0 %3204 }
0x1221   :  { %8954 = vrcp.f32 %v3205_v19  ;;  %v3427_v28 = vand.u32 2147483648, %v3205_v19  ;;  %v3425_v57 = vand.u32 2147483647, %v3205_v19  ;;  %vm3421_vm9 = vweird.f32 %v3205_v19 }
0x1223   :  { %v3428_v4 = vor.u32 1.1754944e-38, %v3427_v28  ;;  %vm3426_vm13 = vcmp.eq.f32.partialorder %v3425_v57, 8.507059e+37  ;;  %v8184_v28 = vld [vmem:[%s13139_s3 + $0x40] sm:$0xff] }
0x1224   :  { %3825 = vmatpush.msra.mxu3 %v8184_v28  ;;  %v8212_v28 = vld [vmem:[%s13142_s6 + $0x178] sm:$0xff] }
0x1227   :  { %v8955_v43 = vpop.eup %8954 }
0x1228   :  { %v3417_v3 = vmul.f32 %v8955_v43, %v3205_v19  ;;  %vm3422_vm2 = vweird.f32 %v8955_v43 }
0x1229   :  { %vm3423_vm10 = vmor %vm3421_vm9, %vm3422_vm2 }
0x122a   :  { %v3418_v18 = vsub.f32 1.0, %v3417_v3  ;;  %vm10997_vm2 = vmor %vm3393_vm11, %vm3394_vm12 }
0x122b   :  { %vm3367_vm9 = vmor %vm3365_vm15, %vm3366_vm14  ;;  %v3396_v32 = vsel %vm10997_vm2, %v10958_v15, %v3392_v33 }
0x122c   :  { %v3419_v20 = vmul.f32 %v8955_v43, %v3418_v18  ;;  %v3368_v17 = vsel %vm3367_vm9, %v10960_v5, %v3364_v14  ;;  %vm13211_vm11 = vmmov %vm13210_vm0 }
0x122d   :  { %vm13212_vm12 = vmmov %vm13210_vm0 }
0x122e   :  { %v3420_v35 = vadd.f32 %v8955_v43, %v3419_v20  ;;  %vm13213_vm14 = vmmov %vm13210_vm0 }
0x122f   :  { %vm13214_vm2 = vmmov %vm13210_vm0 }
0x1230   :  { %v3424_v2 = vsel %vm3423_vm10, %v8955_v43, %v3420_v35  ;;  %vm3370_vm10 = vcmp.eq.f32.partialorder %v3369_v53, 8.507059e+37  ;;  %vm13215_vm15 = vmmov %vm13210_vm0 }
0x1231   :  { %v3429_v55 = vsel %vm3426_vm13, %v3428_v4, %v3424_v2  ;;  %vm3398_vm13 = vcmp.eq.f32.partialorder %v3397_v38, 8.507059e+37  ;;  %v3373_v9 = vsel %vm3370_vm10, %v3372_v56, %v3368_v17 }
0x1232   :  { %v3445_v29 = vmul.f32 %v10913_v58, %v3429_v55  ;;  %v3401_v59 = vsel %vm3398_vm13, %v3400_v49, %v3396_v32  ;;  %v3441_v19 = vmul.f32 %v10882_v10, %v3373_v9 }
0x1233   :  { %v8611_v30 = vpop.permute.xlu0 %8610  ;;  %v3443_v52 = vmul.f32 %v10878_v54, %v3401_v59  ;;  %v3475_v54 = vpop.f32.mrf.mxu3 }
0x1234   :  { %v8613_v21 = vunpack.i.h.bf16 %v8611_v30  ;;  %v8612_v51 = vunpack.i.l.bf16 %v8611_v30  ;;  %8182 = vmatmul.msk.f32.gmra.mxu2 %vm426_vm3, %v3445_v29 }
0x1236   :  { %3648 = vmatpush.msra.mxu0 %v8612_v51  ;;  %3683 = vmatpush.msrb.mxu1 %v8613_v21 }
0x1237   :  { %8177 = vmatmul.msk.f32.vlgmr.msra.gmra.mxu0 %vm426_vm3, %v3440_v25  ;;  %8179 = vmatmul.msk.f32.vlgmr.msrb.gmra.mxu1 %vm426_vm3, %v3442_v8  ;;  %v11060_v25 = vld [vmem:[%s13143_s7 + $0x10] sm:$0x3f] }
0x1238   :  { %v3803_v53 = vperm.slane %v11060_v25, 0  ;;  %3948 = vmatpush.msra.mxu1 %v8212_v28 }
0x123b   :  { %v3510_v44 = vpop.f32.mrf.mxu0  ;;  %v3478_v11 = vpop.f32.mrf.mxu3 }
0x123c   :  { %3728 = vrot.lane.b32.xlu2 %v3510_v44, %s9220_s30 }
0x123f   :  { %8178 = vmatmul.msk.f32.gmra.mxu0 %vm426_vm3, %v3441_v19  ;;  %8180 = vmatmul.msk.f32.gmra.mxu1 %vm426_vm3, %v3443_v52 }
0x1243   :  { %v3513_v5 = vpop.f32.mrf.mxu0 }
0x124a   :  { %v3545_v23 = vpop.f32.mrf.mxu1 }
0x124b   :  { %3736 = vrot.lane.b32.xlu0 %v3545_v23, %s13152_s29 }
0x1268   :  { %v3580_v15 = vpop.f32.mrf.mxu2 }
0x1269   :  { %3744 = vrot.lane.b32.xlu2 %v3580_v15, %s13157_s28 }
0x126a   :  { %v3548_v10 = vpop.f32.mrf.mxu1 }
0x1271   :  { %3730 = vrot.lane.b32.xlu2 %v3513_v5, %s9220_s30  ;;  %v3583_v7 = vpop.f32.mrf.mxu2  ;;  %v8193_v5 = vld [vmem:[%s13140_s4 + $0x58] sm:$0xff] }
0x1272   :  { %3746 = vrot.lane.b32.xlu1 %v3583_v7, %s13157_s28  ;;  %3917 = vmatpush.msrb.mxu0 %v8193_v5 }
0x1279   :  { %v3615_v3 = vpop.f32.mrf.mxu3 }
0x1280   :  { %v3720_v43 = vpop.f32.mrf.mxu2 }
0x1281   :  { %3776 = vrot.lane.b32.xlu1 %v3720_v43, %s13155_s12  ;;  %v8192_v43 = vld [vmem:[%s13140_s4 + $0x50] sm:$0xff] }
0x1282   :  { %3918 = vmatpush.msrb.mxu0 %v8192_v43 }
0x1288   :  { %v3618_v16 = vpop.f32.mrf.mxu3 }
0x1296   :  { %v3729_v39 = vpop.permute.xlu2 %3728 }
0x1297   :  { %v3782_v40 = vsel %vm149_vm1, %v3475_v54, %v3729_v39  ;;  %v8211_v39 = vld [vmem:[%s13142_s6 + $0x170] sm:$0xff] }
0x1298   :  { %3949 = vmatpush.msra.mxu1 %v8211_v39  ;;  %v8216_v39 = vld [vmem:[%s13137_s1 + $0x78] sm:$0xff] }
0x1299   :  { %4055 = vmatpush.msra.mxu2 %v8216_v39 }
0x12b4   :  { %v3650_v46 = vpop.f32.mrf.mxu0  ;;  %v3685_v6 = vpop.f32.mrf.mxu1 }
0x12b5   :  { %3768 = vrot.lane.b32.xlu0 %v3685_v6, %s13209_s13  ;;  %3760 = vrot.lane.b32.xlu2 %v3650_v46, %s13187_s15  ;;  %v8190_v6 = vld [vmem:[%s13140_s4 + $0x40] sm:$0xff] }
0x12b7   :  { %v3723_v60 = vpop.f32.mrf.mxu2 }
0x12bc   :  { %v3688_v26 = vpop.f32.mrf.mxu1  ;;  %v3653_v18 = vpop.f32.mrf.mxu0 }
0x12bd   :  { %3752 = vrot.lane.b32.xlu0 %v3615_v3, %s13188_s16  ;;  %3770 = vrot.lane.b32.xlu1 %v3688_v26, %s13209_s13  ;;  %v3737_v20 = vpop.permute.xlu0 %3736 }
0x12be   :  { %3754 = vrot.lane.b32.xlu2 %v3618_v16, %s13188_s16  ;;  %v3784_v35 = vsel %vm1149_vm4, %v3782_v40, %v3737_v20  ;;  %v8210_v40 = vld [vmem:[%s13142_s6 + $0x168] sm:$0xff] }
0x12bf   :  { %3950 = vmatpush.msra.mxu1 %v8210_v40  ;;  %v8214_v40 = vld [vmem:[%s13137_s1 + $0x68] sm:$0xff] }
0x12c3   :  { %v3745_v27 = vpop.permute.xlu2 %3744 }
0x12c4   :  { %v3786_v1 = vsel %vm1152_vm5, %v3784_v35, %v3745_v27  ;;  %v3881_v27 = vperm.slane %v11060_v25, 2 }
0x12c5   :  { %3738 = vrot.lane.b32.xlu0 %v3548_v10, %s13152_s29  ;;  %s7977_s29 = sshll.u32 %s13144_s8, 4  ;;  %s7978_s29 = int_to_ptr.hbm [resolvable:$true] %s7977_s29 }
0x12c6   :  { %3778 = vrot.lane.b32.xlu2 %v3723_v60, %s13155_s12 }
0x12cb   :  { %v3731_v57 = vpop.permute.xlu2 %3730 }
0x12cc   :  { %v3783_v41 = vsel %vm149_vm1, %v3478_v11, %v3731_v57  ;;  %v8191_v11 = vld [vmem:[%s13140_s4 + $0x48] sm:$0xff] }
0x12cd   :  { %3762 = vrot.lane.b32.xlu0 %v3653_v18, %s13187_s15  ;;  %3919 = vmatpush.msrb.mxu0 %v8191_v11 }
0x12cf   :  { %3920 = vmatpush.msrb.mxu0 %v8190_v6 }
0x12e4   :  { %v3747_v47 = vpop.permute.xlu1 %3746 }
0x12f3   :  { %v3777_v42 = vpop.permute.xlu1 %3776 }
0x130f   :  { %v3761_v34 = vpop.permute.xlu2 %3760 }
0x1318   :  { %v3755_v55 = vpop.permute.xlu2 %3754 }
0x1320   :  { %v3779_v21 = vpop.permute.xlu2 %3778 }
0x1327   :  { %v3769_v24 = vpop.permute.xlu0 %3768 }
0x132f   :  { %v3753_v37 = vpop.permute.xlu0 %3752  ;;  %v3771_v31 = vpop.permute.xlu1 %3770 }
0x1330   :  { %v3788_v50 = vsel %vm426_vm3, %v3786_v1, %v3753_v37  ;;  %v8209_v1 = vld [vmem:[%s13142_s6 + $0x160] sm:$0xff] }
0x1331   :  { %v3790_v4 = vsel %vm1157_vm6, %v3788_v50, %v3761_v34  ;;  %v3886_v50 = vperm.slane %v11060_v25, 3  ;;  %3951 = vmatpush.msra.mxu1 %v8209_v1 }
0x1332   :  { %v3792_v0 = vsel %vm1160_vm7, %v3790_v4, %v3769_v24 }
0x1333   :  { %v3794_v2 = vsel %vm13154_vm8, %v3792_v0, %v3777_v42  ;;  %v8208_v0 = vld [vmem:[%s13142_s6 + $0x158] sm:$0xff] }
0x1334   :  { %8188 = vmatmul.msk.f32.vlgmr.msra.gmra.mxu3 %vm13210_vm0, %v3794_v2  ;;  %3952 = vmatpush.msra.mxu1 %v8208_v0 }
0x1337   :  { %v3739_v29 = vpop.permute.xlu0 %3738 }
0x1338   :  { %v3785_v8 = vsel %vm1149_vm4, %v3783_v41, %v3739_v29  ;;  %v8206_v41 = vld [vmem:[%s13142_s6 + $0x148] sm:$0xff] }
0x1339   :  { %v3787_v30 = vsel %vm1152_vm5, %v3785_v8, %v3747_v47  ;;  %v8205_v8 = vld [vmem:[%s13142_s6 + $0x140] sm:$0xff] }
0x133a   :  { %v3789_v14 = vsel %vm426_vm3, %v3787_v30, %v3755_v55  ;;  %v8207_v55 = vld [vmem:[%s13142_s6 + $0x150] sm:$0xff] }
0x133b   :  { %3953 = vmatpush.msra.mxu1 %v8207_v55 }
0x133d   :  { %3954 = vmatpush.msra.mxu1 %v8206_v41 }
0x133f   :  { %v3763_v33 = vpop.permute.xlu0 %3762  ;;  %3955 = vmatpush.msra.mxu1 %v8205_v8 }
0x1340   :  { %v3791_v61 = vsel %vm1157_vm6, %v3789_v14, %v3763_v33  ;;  %v8204_v14 = vld [vmem:[%s13142_s6 + $0x138] sm:$0xff] }
0x1341   :  { %v3793_v51 = vsel %vm1160_vm7, %v3791_v61, %v3771_v31  ;;  %v8203_v31 = vld [vmem:[%s13142_s6 + $0x130] sm:$0xff]  ;;  %3956 = vmatpush.msra.mxu1 %v8204_v14 }
0x1342   :  { %v3795_v58 = vsel %vm13154_vm8, %v3793_v51, %v3779_v21  ;;  %v8202_v21 = vld [vmem:[%s13142_s6 + $0x128] sm:$0xff] }
0x1343   :  { %8189 = vmatmul.msk.f32.gmra.mxu3 %vm13211_vm11, %v3795_v58  ;;  %3957 = vmatpush.msra.mxu1 %v8203_v31  ;;  %v8201_v58 = vld [vmem:[%s13142_s6 + $0x120] sm:$0xff] }
0x1345   :  { %3958 = vmatpush.msra.mxu1 %v8202_v21  ;;  %v4024_v21 = vperm.slane %v11060_v25, 5 }
0x1347   :  { %3959 = vmatpush.msra.mxu1 %v8201_v58 }
0x13b7   :  { %v3827_v38 = vpop.f32.mrf.mxu3 }
0x13b8   :  { %v3828_v17 = vadd.f32 %v3827_v38, %v3803_v53  ;;  %v8200_v38 = vld [vmem:[%s13142_s6 + $0x118] sm:$0xff] }
0x13b9   :  { %3960 = vmatpush.msra.mxu1 %v8200_v38 }
0x13ba   :  { %v3833_v32 = vadd.f32 %v3828_v17, %v10630_v13 }
0x13bc   :  { %v3835_v49 = vsel %vm13212_vm12, %v3833_v32, 0.0  ;;  %v3843_v56 = vmul.f32 %v3833_v32, %v3833_v32 }
0x13bd   :  { %3836 = vadd.xlane.f32.xlu0 %v3835_v49 }
0x13be   :  { %v3845_v9 = vsel %vm13213_vm14, %v3843_v56, 0.0 }
0x13bf   :  { %3846 = vadd.xlane.f32.xlu1 %v3845_v9 }
0x13c6   :  { %v3830_v59 = vpop.f32.mrf.mxu3 }
0x13c7   :  { %v3831_v44 = vadd.f32 %v3830_v59, %v3803_v53 }
0x13c9   :  { %v11067_v19 = vadd.f32 %v3831_v44, %v10634_v45  ;;  %v8199_v44 = vld [vmem:[%s13142_s6 + $0x110] sm:$0xff] }
0x13ca   :  { %3961 = vmatpush.msra.mxu1 %v8199_v44 }
0x13cb   :  { %v3838_v52 = vsel %vm13214_vm2, %v11067_v19, 0.0  ;;  %v3844_v23 = vmul.f32 %v11067_v19, %v11067_v19  ;;  %vm13216_vm2 = vmmov %vm13210_vm0 }
0x13cc   :  { %3839 = vadd.xlane.f32.xlu2 %v3838_v52  ;;  %v8198_v52 = vld [vmem:[%s13142_s6 + $0x108] sm:$0xff] }
0x13cd   :  { %v3848_v13 = vsel %vm13215_vm15, %v3844_v23, 0.0  ;;  %v8197_v23 = vld [vmem:[%s13142_s6 + $0x100] sm:$0xff]  ;;  %3962 = vmatpush.msra.mxu1 %v8198_v52  ;;  %vm13217_vm15 = vmmov %vm13210_vm0 }
0x13cf   :  { %3963 = vmatpush.msra.mxu1 %v8197_v23 }
0x13d4   :  { %3849 = vadd.xlane.f32.xlu2 %v3848_v13 }
0x1430   :  { %v3837_v15 = vpop.xlane.xlu0 %3836 }
0x1431   :  { %v3841_v7 = vmul.f32 %v3837_v15, %v9812_v62 }
0x1432   :  { %v3847_v45 = vpop.xlane.xlu1 %3846 }
0x1433   :  { %v3853_v54 = vmul.f32 %v3841_v7, %v3841_v7  ;;  %v3851_v10 = vmul.f32 %v3847_v45, %v9812_v62  ;;  %v3857_v37 = vsub.f32 %v3833_v32, %v3841_v7 }
0x1435   :  { %v3855_v46 = vsub.f32 %v3851_v10, %v3853_v54  ;;  %v3947_v54 = vperm.slane %v11060_v25, 1 }
0x1437   :  { %v3859_v3 = vadd.f32 1e-05, %v3855_v46 }
0x1439   :  { %8956 = vrsqrt.f32 %v3859_v3  ;;  %vm3867_vm10 = vweird.f32 %v3859_v3 }
0x143f   :  { %v8957_v26 = vpop.eup %8956  ;;  %v3840_v16 = vpop.xlane.xlu2 %3839 }
0x1440   :  { %v3862_v60 = vmul.f32 %v8957_v26, %v3859_v3  ;;  %v3842_v48 = vmul.f32 %v3840_v16, %v9812_v62  ;;  %vm3868_vm9 = vweird.f32 %v8957_v26 }
0x1441   :  { %vm3869_vm13 = vmor %vm3867_vm10, %vm3868_vm9 }
0x1442   :  { %v3863_v18 = vmul.f32 %v8957_v26, %v3862_v60  ;;  %v3854_v24 = vmul.f32 %v3842_v48, %v3842_v48  ;;  %v3858_v49 = vsub.f32 %v11067_v19, %v3842_v48  ;;  %v8739_v19 = vld [vmem:[%s13141_s5 + $0x2] ss:$0 sm:$0xff]  ;;  %vm13218_vm9 = vmmov %vm13210_vm0 }
0x1443   :  { %vm13219_vm10 = vmmov %vm13210_vm0 }
0x1444   :  { %v3864_v36 = vmul.f32 0.5, %v3863_v18 }
0x1446   :  { %v3865_v22 = vsub.f32 1.5, %v3864_v36 }
0x1447   :  { %v3850_v20 = vpop.xlane.xlu2 %3849 }
0x1448   :  { %v3866_v57 = vmul.f32 %v8957_v26, %v3865_v22  ;;  %v3852_v47 = vmul.f32 %v3850_v20, %v9812_v62 }
0x144a   :  { %v3870_v34 = vsel %vm3869_vm13, %v8957_v26, %v3866_v57  ;;  %v3856_v35 = vsub.f32 %v3852_v47, %v3854_v24  ;;  %vm13220_vm13 = vmmov %vm13210_vm0  ;;  %v8215_v57 = vld [vmem:[%s13137_s1 + $0x70] sm:$0xff] }
0x144b   :  { %v3882_v4 = vmul.f32 %v3881_v27, %v3870_v34  ;;  %4056 = vmatpush.msra.mxu2 %v8215_v57 }
0x144c   :  { %v3860_v42 = vadd.f32 1e-05, %v3856_v35  ;;  %v8213_v35 = vld [vmem:[%s13137_s1 + $0x60] sm:$0xff] }
0x144d   :  { %v3884_v2 = vmul.f32 %v3882_v4, %v3857_v37  ;;  %4057 = vmatpush.msra.mxu2 %v8214_v40 }
0x144e   :  { %8958 = vrsqrt.f32 %v3860_v42  ;;  %vm3877_vm12 = vweird.f32 %v3860_v42 }
0x144f   :  { %v3887_v29 = vadd.f32 %v3886_v50, %v3884_v2  ;;  %4058 = vmatpush.msra.mxu2 %v8213_v35 }
0x1451   :  { %8195 = vmatmul.msk.f32.vlgmr.msrb.gmra.mxu0 %vm13210_vm0, %v3887_v29 }
0x1454   :  { %v8959_v30 = vpop.eup %8958 }
0x1455   :  { %v3872_v33 = vmul.f32 %v8959_v30, %v3860_v42  ;;  %vm3878_vm11 = vweird.f32 %v8959_v30 }
0x1456   :  { %vm3879_vm14 = vmor %vm3877_vm12, %vm3878_vm11 }
0x1457   :  { %v3873_v61 = vmul.f32 %v8959_v30, %v3872_v33 }
0x1459   :  { %v3874_v51 = vmul.f32 0.5, %v3873_v61 }
0x145b   :  { %v3875_v53 = vsub.f32 1.5, %v3874_v51 }
0x145d   :  { %v3876_v17 = vmul.f32 %v8959_v30, %v3875_v53 }
0x145f   :  { %v3880_v32 = vsel %vm3879_vm14, %v8959_v30, %v3876_v17  ;;  %vm13221_vm14 = vmmov %vm13216_vm2 }
0x1460   :  { %v3883_v56 = vmul.f32 %v3881_v27, %v3880_v32 }
0x1462   :  { %v3885_v9 = vmul.f32 %v3883_v56, %v3858_v49 }
0x1464   :  { %v3888_v59 = vadd.f32 %v3886_v50, %v3885_v9 }
0x1466   :  { %8196 = vmatmul.msk.f32.gmra.mxu0 %vm13216_vm2, %v3888_v59 }
0x14ce   :  { %v3922_v13 = vpop.f32.mrf.mxu0 }
0x14cf   :  { %v3923_v15 = vadd.f32 %v8739_v19, %v3922_v13  ;;  %v8740_v13 = vld [vmem:[%s13138_s2 + $0x3] ss:$0 sm:$0xff] }
0x14d1   :  { %v3928_v5 = vmax.f32 %v3923_v15, 0.0 }
0x14d3   :  { %3964 = vmatmul.f32.vlgmr.msra.gmra.mxu1 %v3928_v5 }
0x14e3   :  { %v3925_v7 = vpop.f32.mrf.mxu0 }
0x14e4   :  { %v3926_v45 = vadd.f32 %v8739_v19, %v3925_v7 }
0x14e6   :  { %v3929_v43 = vmax.f32 %v3926_v45, 0.0 }
0x14e8   :  { %3967 = vmatmul.f32.gmra.mxu1 %v3929_v43 }
0x1550   :  { %v3965_v10 = vpop.f32.mrf.mxu1 }
0x1551   :  { %v3966_v11 = vadd.f32 %v3965_v10, %v3947_v54 }
0x1553   :  { %v3971_v46 = vadd.f32 %v3966_v11, %v3887_v29  ;;  %v4019_v29 = vperm.slane %v11060_v25, 4 }
0x1555   :  { %v3973_v6 = vsel %vm13217_vm15, %v3971_v46, 0.0  ;;  %v3981_v3 = vmul.f32 %v3971_v46, %v3971_v46 }
0x1556   :  { %3974 = vadd.xlane.f32.xlu0 %v3973_v6 }
0x1557   :  { %v3983_v26 = vsel %vm13218_vm9, %v3981_v3, 0.0 }
0x1558   :  { %3984 = vadd.xlane.f32.xlu1 %v3983_v26 }
0x1565   :  { %v3968_v16 = vpop.f32.mrf.mxu1 }
0x1566   :  { %v3969_v60 = vadd.f32 %v3968_v16, %v3947_v54 }
0x1568   :  { %v3972_v18 = vadd.f32 %v3969_v60, %v3888_v59 }
0x156a   :  { %v3976_v36 = vsel %vm13219_vm10, %v3972_v18, 0.0  ;;  %v3982_v48 = vmul.f32 %v3972_v18, %v3972_v18 }
0x156b   :  { %3977 = vadd.xlane.f32.xlu2 %v3976_v36 }
0x156c   :  { %v3986_v22 = vsel %vm13220_vm13, %v3982_v48, 0.0 }
0x156d   :  { %3987 = vadd.xlane.f32.xlu0 %v3986_v22 }
0x15c9   :  { %v3975_v28 = vpop.xlane.xlu0 %3974 }
0x15ca   :  { %v3979_v27 = vmul.f32 %v3975_v28, %v9812_v62 }
0x15cb   :  { %v3985_v20 = vpop.xlane.xlu1 %3984 }
0x15cc   :  { %v3991_v24 = vmul.f32 %v3979_v27, %v3979_v27  ;;  %v3989_v47 = vmul.f32 %v3985_v20, %v9812_v62  ;;  %v3995_v61 = vsub.f32 %v3971_v46, %v3979_v27 }
0x15ce   :  { %v3993_v34 = vsub.f32 %v3989_v47, %v3991_v24 }
0x15d0   :  { %v3997_v1 = vadd.f32 1e-05, %v3993_v34 }
0x15d2   :  { %8960 = vrsqrt.f32 %v3997_v1  ;;  %vm4005_vm11 = vweird.f32 %v3997_v1 }
0x15d8   :  { %v8961_v37 = vpop.eup %8960 }
0x15d9   :  { %v4000_v50 = vmul.f32 %v8961_v37, %v3997_v1  ;;  %vm4006_vm0 = vweird.f32 %v8961_v37 }
0x15da   :  { %vm4007_vm12 = vmor %vm4005_vm11, %vm4006_vm0 }
0x15db   :  { %v4001_v4 = vmul.f32 %v8961_v37, %v4000_v50 }
0x15dd   :  { %v4002_v42 = vmul.f32 0.5, %v4001_v4 }
0x15de   :  { %v3978_v0 = vpop.xlane.xlu2 %3977 }
0x15df   :  { %v4003_v2 = vsub.f32 1.5, %v4002_v42  ;;  %v3980_v55 = vmul.f32 %v3978_v0, %v9812_v62 }
0x15e0   :  { %v3988_v41 = vpop.xlane.xlu0 %3987 }
0x15e1   :  { %v4004_v8 = vmul.f32 %v8961_v37, %v4003_v2  ;;  %v3992_v30 = vmul.f32 %v3980_v55, %v3980_v55  ;;  %v3990_v14 = vmul.f32 %v3988_v41, %v9812_v62  ;;  %v3996_v25 = vsub.f32 %v3972_v18, %v3980_v55 }
0x15e3   :  { %v4008_v33 = vsel %vm4007_vm12, %v8961_v37, %v4004_v8  ;;  %v3994_v31 = vsub.f32 %v3990_v14, %v3992_v30 }
0x15e4   :  { %v4020_v51 = vmul.f32 %v4019_v29, %v4008_v33 }
0x15e5   :  { %v3998_v58 = vadd.f32 1e-05, %v3994_v31 }
0x15e6   :  { %v4022_v53 = vmul.f32 %v4020_v51, %v3995_v61 }
0x15e7   :  { %8962 = vrsqrt.f32 %v3998_v58  ;;  %vm4015_vm15 = vweird.f32 %v3998_v58 }
0x15e8   :  { %v11169_v38 = vadd.f32 %v4024_v21, %v4022_v53 }
0x15ea   :  { %8218 = vmatmul.msk.f32.vlgmr.msra.gmra.mxu2 %vm13221_vm14, %v11169_v38 }
0x15ed   :  { %v8963_v17 = vpop.eup %8962 }
0x15ee   :  { %v4010_v32 = vmul.f32 %v8963_v17, %v3998_v58  ;;  %vm4016_vm2 = vweird.f32 %v8963_v17 }
0x15ef   :  { %vm4017_vm9 = vmor %vm4015_vm15, %vm4016_vm2 }
0x15f0   :  { %v4011_v49 = vmul.f32 %v8963_v17, %v4010_v32 }
0x15f2   :  { %v4012_v56 = vmul.f32 0.5, %v4011_v49 }
0x15f4   :  { %v4013_v9 = vsub.f32 1.5, %v4012_v56 }
0x15f6   :  { %v4014_v59 = vmul.f32 %v8963_v17, %v4013_v9 }
0x15f8   :  { %v4018_v44 = vsel %vm4017_vm9, %v8963_v17, %v4014_v59 }
0x15f9   :  { %v4021_v52 = vmul.f32 %v4019_v29, %v4018_v44 }
0x15fb   :  { %v4023_v23 = vmul.f32 %v4021_v52, %v3996_v25 }
0x15fd   :  { %v11173_v19 = vadd.f32 %v4024_v21, %v4023_v23 }
0x15ff   :  { %8219 = vmatmul.msk.f32.gmra.mxu2 %vm13219_vm10, %v11173_v19 }
0x166d   :  { %v4060_v15 = vpop.f32.mrf.mxu2 }
0x166e   :  { %v4061_v5 = vadd.f32 %v8740_v13, %v4060_v15 }
0x1670   :  { %4076 = vrot.lane.b32.xlu1 %v4061_v5, %s9208_s19  ;;  %4072 = vrot.lane.b32.xlu0 %v4061_v5, %s9209_s20 }
0x1682   :  { %v4063_v7 = vpop.f32.mrf.mxu2 }
0x1683   :  { %v4064_v45 = vadd.f32 %v8740_v13, %v4063_v7 }
0x1685   :  { %4070 = vrot.lane.b32.xlu0 %v4064_v45, %s9210_s21  ;;  %4078 = vrot.lane.b32.xlu2 %v4064_v45, %s9208_s19 }
0x1686   :  { %4074 = vrot.lane.b32.xlu1 %v4064_v45, %s9209_s20 }
0x168d   :  { %4094 = vrot.lane.b32.xlu0 %v4064_v45, %s9213_s24  ;;  %4068 = vrot.lane.b32.xlu2 %v4061_v5, %s9210_s21 }
0x168e   :  { %4092 = vrot.lane.b32.xlu1 %v4061_v5, %s9213_s24 }
0x1695   :  { %4098 = vrot.lane.b32.xlu0 %v4064_v45, %s9215_s26  ;;  %4088 = vrot.lane.b32.xlu2 %v4061_v5, %s9212_s23 }
0x1696   :  { %4090 = vrot.lane.b32.xlu1 %v4064_v45, %s9212_s23 }
0x169d   :  { %4096 = vrot.lane.b32.xlu0 %v4061_v5, %s9215_s26  ;;  %4082 = vrot.lane.b32.xlu2 %v4064_v45, %s9214_s25 }
0x169e   :  { %4086 = vrot.lane.b32.xlu1 %v4064_v45, %s9211_s22 }
0x16a5   :  { %4080 = vrot.lane.b32.xlu2 %v4061_v5, %s9214_s25 }
0x16a6   :  { %4084 = vrot.lane.b32.xlu1 %v4061_v5, %s9211_s22 }
0x16df   :  { %v11196_v43 = vpop.permute.xlu2 %4078 }
0x16e0   :  { %4203 = vrot.lane.b32.xlu2 %v11196_v43, %s9215_s26 }
0x16e2   :  { %v4073_v54 = vpop.permute.xlu0 %4072  ;;  %v4077_v11 = vpop.permute.xlu1 %4076 }
0x16e3   :  { %4166 = vrot.lane.b32.xlu1 %v4073_v54, %s9215_s26  ;;  %v8614_v28 = vpack.i.bf16 %v4077_v11, %v4073_v54 }
0x16e7   :  { %v4069_v10 = vpop.permute.xlu2 %4068 }
0x16e8   :  { %v8619_v57 = vpack.i.bf16 %v4069_v10, %v4061_v5 }
0x16eb   :  { %4131 = vrot.lane.b32.xlu1 %v4069_v10, %s9215_s26 }
0x16ef   :  { %v11202_v46 = vpop.permute.xlu2 %4088 }
0x16f3   :  { %4306 = vrot.lane.b32.xlu1 %v11202_v46, %s9215_s26 }
0x16f7   :  { %v4071_v6 = vpop.permute.xlu0 %4070  ;;  %v11215_v60 = vpop.permute.xlu2 %4082 }
0x16f8   :  { %v4075_v3 = vpop.permute.xlu1 %4074  ;;  %4133 = vrot.lane.b32.xlu2 %v4071_v6, %s9215_s26  ;;  %v8629_v20 = vpack.i.bf16 %v4071_v6, %v4064_v45 }
0x16f9   :  { %4168 = vrot.lane.b32.xlu0 %v4075_v3, %s9215_s26  ;;  %v8624_v24 = vpack.i.bf16 %v11196_v43, %v4075_v3 }
0x16ff   :  { %v11208_v26 = vpop.permute.xlu0 %4094  ;;  %v11232_v39 = vpop.permute.xlu2 %4080 }
0x1700   :  { %v11210_v16 = vpop.permute.xlu1 %4092  ;;  %4343 = vrot.lane.b32.xlu2 %v11208_v26, %s9215_s26 }
0x1701   :  { %4201 = vrot.lane.b32.xlu0 %v4077_v11, %s9215_s26 }
0x1707   :  { %v4099_v18 = vpop.permute.xlu0 %4098 }
0x1708   :  { %v11217_v36 = vpop.permute.xlu1 %4090  ;;  %4238 = vrot.lane.b32.xlu2 %v11215_v60, %s9215_s26  ;;  %8220 = vmatpush.xpose.msk.msrb.mxu3 %vm149_vm1, %v4099_v18 }
0x1709   :  { %4308 = vrot.lane.b32.xlu0 %v11217_v36, %s9215_s26  ;;  %v8634_v47 = vpack.i.bf16 %v11208_v26, %v11217_v36 }
0x170f   :  { %v4097_v48 = vpop.permute.xlu0 %4096 }
0x1710   :  { %v11224_v22 = vpop.permute.xlu1 %4086  ;;  %8221 = vmatpush.xpose.msk.msrb.mxu3 %vm149_vm1, %v4097_v48 }
0x1711   :  { %4341 = vrot.lane.b32.xlu0 %v11210_v16, %s9215_s26  ;;  %4273 = vrot.lane.b32.xlu1 %v11224_v22, %s9215_s26 }
0x1713   :  { %8222 = vmatmul.msk.f32.vlgmr.msrb.gmra.mxu3 %vm149_vm1, %v4061_v5 }
0x1718   :  { %v11234_v27 = vpop.permute.xlu1 %4084 }
0x1719   :  { %4236 = vrot.lane.b32.xlu0 %v11232_v39, %s9215_s26  ;;  %8615 = vrot.lane.b32.xlu1 %v8614_v28, %s9216_s27 }
0x171a   :  { %4271 = vrot.lane.b32.xlu2 %v11234_v27, %s9215_s26 }
0x171b   :  { %8223 = vmatmul.msk.f32.gmra.mxu3 %vm149_vm1, %v4064_v45 }
0x1721   :  { %8630 = vrot.lane.b32.xlu0 %v8629_v20, %s9216_s27 }
0x1722   :  { %8620 = vrot.lane.b32.xlu2 %v8619_v57, %s9216_s27 }
0x172a   :  { %8625 = vrot.lane.b32.xlu2 %v8624_v24, %s9216_s27 }
0x1732   :  { %8635 = vrot.lane.b32.xlu2 %v8634_v47, %s9216_s27 }
0x173a   :  { %v4204_v40 = vpop.permute.xlu2 %4203 }
0x173b   :  { %8232 = vmatpush.xpose.msk.msra.mxu3 %vm149_vm1, %v4204_v40 }
0x1752   :  { %v4134_v34 = vpop.permute.xlu2 %4133 }
0x1753   :  { %8224 = vmatpush.xpose.msk.msra.mxu0 %vm149_vm1, %v4134_v34 }
0x1755   :  { %v4167_v35 = vpop.permute.xlu1 %4166 }
0x175a   :  { %v4344_v1 = vpop.permute.xlu2 %4343 }
0x175d   :  { %v4132_v37 = vpop.permute.xlu1 %4131 }
0x175e   :  { %8225 = vmatpush.xpose.msk.msra.mxu0 %vm149_vm1, %v4132_v37 }
0x1761   :  { %8226 = vmatmul.msk.f32.vlgmr.msra.gmra.mxu0 %vm149_vm1, %v4069_v10 }
0x1762   :  { %v4239_v50 = vpop.permute.xlu2 %4238 }
0x1763   :  { %8236 = vmatpush.xpose.msk.msrb.mxu0 %vm149_vm1, %v4239_v50 }
0x1765   :  { %v4307_v2 = vpop.permute.xlu1 %4306 }
0x1769   :  { %8227 = vmatmul.msk.f32.gmra.mxu0 %vm149_vm1, %v4071_v6 }
0x176b   :  { %v4169_v4 = vpop.permute.xlu0 %4168 }
0x176c   :  { %8228 = vmatpush.xpose.msk.msrb.mxu2 %vm149_vm1, %v4169_v4 }
0x1770   :  { %8229 = vmatpush.xpose.msk.msrb.mxu2 %vm149_vm1, %v4167_v35 }
0x1773   :  { %8230 = vmatmul.msk.f32.vlgmr.msrb.gmra.mxu2 %vm149_vm1, %v4073_v54  ;;  %v4202_v42 = vpop.permute.xlu0 %4201 }
0x1774   :  { %v4272_v0 = vpop.permute.xlu2 %4271  ;;  %8233 = vmatpush.xpose.msk.msra.mxu3 %vm149_vm1, %v4202_v42 }
0x1777   :  { %8234 = vmatmul.msk.f32.vlgmr.msra.gmra.mxu3 %vm149_vm1, %v4077_v11 }
0x1778   :  { %8248 = vmatpush.xpose.msk.msrb.mxu3 %vm149_vm1, %v4344_v1 }
0x177b   :  { %8231 = vmatmul.msk.f32.gmra.mxu2 %vm149_vm1, %v4075_v3  ;;  %v4309_v55 = vpop.permute.xlu0 %4308 }
0x177c   :  { %v8621_v29 = vpop.permute.xlu2 %8620  ;;  %8244 = vmatpush.xpose.msk.msra.mxu2 %vm149_vm1, %v4309_v55 }
0x177d   :  { %v8623_v9 = vunpack.i.h.bf16 %v8621_v29  ;;  %v8622_v59 = vunpack.i.l.bf16 %v8621_v29 }
0x177f   :  { %8235 = vmatmul.msk.f32.gmra.mxu3 %vm149_vm1, %v11196_v43 }
0x1780   :  { %8245 = vmatpush.xpose.msk.msra.mxu2 %vm149_vm1, %v4307_v2 }
0x1783   :  { %v4274_v41 = vpop.permute.xlu1 %4273  ;;  %8246 = vmatmul.msk.f32.vlgmr.msra.gmra.mxu2 %vm149_vm1, %v11202_v46  ;;  %v4342_v8 = vpop.permute.xlu0 %4341 }
0x1784   :  { %v8626_v30 = vpop.permute.xlu2 %8625  ;;  %8240 = vmatpush.xpose.msk.msrb.mxu1 %vm149_vm1, %v4274_v41  ;;  %8249 = vmatpush.xpose.msk.msrb.mxu3 %vm149_vm1, %v4342_v8 }
0x1785   :  { %v8628_v14 = vunpack.i.h.bf16 %v8626_v30  ;;  %v8627_v33 = vunpack.i.l.bf16 %v8626_v30 }
0x1787   :  { %4856 = vmatpush.msrb.mxu2 %v8627_v33  ;;  %8250 = vmatmul.msk.f32.vlgmr.msrb.gmra.mxu3 %vm149_vm1, %v11210_v16 }
0x1788   :  { %4891 = vmatpush.msra.mxu3 %v8628_v14  ;;  %8241 = vmatpush.xpose.msk.msrb.mxu1 %vm149_vm1, %v4272_v0 }
0x178b   :  { %v8616_v31 = vpop.permute.xlu1 %8615  ;;  %8242 = vmatmul.msk.f32.vlgmr.msrb.gmra.mxu1 %vm149_vm1, %v11234_v27  ;;  %8247 = vmatmul.msk.f32.gmra.mxu2 %vm149_vm1, %v11217_v36  ;;  %v4237_v61 = vpop.permute.xlu0 %4236 }
0x178c   :  { %v8618_v21 = vunpack.i.h.bf16 %v8616_v31  ;;  %v8617_v51 = vunpack.i.l.bf16 %v8616_v31  ;;  %v8636_v58 = vpop.permute.xlu2 %8635  ;;  %8237 = vmatpush.xpose.msk.msrb.mxu0 %vm149_vm1, %v4237_v61 }
0x178d   :  { %v8638_v53 = vunpack.i.h.bf16 %v8636_v58  ;;  %v8637_v17 = vunpack.i.l.bf16 %v8636_v58 }
0x178e   :  { %4857 = vmatpush.msrb.mxu2 %v8617_v51  ;;  %4892 = vmatpush.msra.mxu3 %v8618_v21 }
0x178f   :  { %8238 = vmatmul.msk.f32.vlgmr.msrb.gmra.mxu0 %vm149_vm1, %v11232_v39  ;;  %8251 = vmatmul.msk.f32.gmra.mxu3 %vm149_vm1, %v11208_v26 }
0x1790   :  { %4996 = vmatpush.msra.mxu2 %v8637_v17  ;;  %5031 = vmatpush.msrb.mxu3 %v8638_v53 }
0x1793   :  { %8243 = vmatmul.msk.f32.gmra.mxu1 %vm149_vm1, %v11224_v22  ;;  %v8631_v32 = vpop.permute.xlu0 %8630 }
0x1794   :  { %v8633_v49 = vunpack.i.h.bf16 %v8631_v32  ;;  %v8632_v56 = vunpack.i.l.bf16 %v8631_v32 }
0x1796   :  { %4786 = vmatpush.msra.mxu0 %v8632_v56  ;;  %4821 = vmatpush.msra.mxu1 %v8633_v49  ;;  %v4125_v44 = vpop.f32.mrf.mxu3 }
0x1797   :  { %v4126_v25 = vadd.f32 %v4125_v44, %v9425_v63  ;;  %8239 = vmatmul.msk.f32.gmra.mxu0 %vm149_vm1, %v11215_v60 }
0x1798   :  { %4787 = vmatpush.msra.mxu0 %v8622_v59  ;;  %4822 = vmatpush.msra.mxu1 %v8623_v9 }
0x1799   :  { %v4376_v52 = vsel %vm426_vm3, %v4126_v25, -inf }
0x179a   :  { %4377 = vmax.xlane.f32.xlu2 %v4376_v52 }
0x179e   :  { %v4128_v23 = vpop.f32.mrf.mxu3 }
0x179f   :  { %v4129_v13 = vadd.f32 %v4128_v23, %v9433_v12 }
0x17a1   :  { %v4379_v15 = vsel %vm426_vm3, %v4129_v13, -inf }
0x17a2   :  { %4380 = vmax.xlane.f32.xlu1 %v4379_v15 }
0x17de   :  { %v4160_v5 = vpop.f32.mrf.mxu0 }
0x17df   :  { %v11291_v7 = vadd.f32 %v4160_v5, %v9425_v63 }
0x17e1   :  { %v4382_v45 = vsel %vm426_vm3, %v11291_v7, -inf }
0x17e2   :  { %4383 = vmax.xlane.f32.xlu1 %v4382_v45 }
0x17e6   :  { %v4163_v26 = vpop.f32.mrf.mxu0 }
0x17e7   :  { %v11306_v18 = vadd.f32 %v4163_v26, %v9433_v12 }
0x17e9   :  { %v4385_v36 = vsel %vm426_vm3, %v11306_v18, -inf }
0x17f6   :  { %v4195_v43 = vpop.f32.mrf.mxu2 }
0x17f7   :  { %v11296_v54 = vadd.f32 %v4195_v43, %v9425_v63 }
0x17f9   :  { %v4388_v10 = vsel %vm426_vm3, %v11296_v54, -inf }
0x17fa   :  { %4389 = vmax.xlane.f32.xlu1 %v4388_v10  ;;  %v4230_v11 = vpop.f32.mrf.mxu3 }
0x17fb   :  { %v11301_v6 = vadd.f32 %v4230_v11, %v9425_v63 }
0x17fd   :  { %v4394_v3 = vsel %vm426_vm3, %v11301_v6, -inf }
0x17fe   :  { %4395 = vmax.xlane.f32.xlu0 %v4394_v3  ;;  %v4198_v48 = vpop.f32.mrf.mxu2 }
0x17ff   :  { %v11311_v20 = vadd.f32 %v4198_v48, %v9433_v12 }
0x1801   :  { %v4391_v34 = vsel %vm426_vm3, %v11311_v20, -inf }
0x1802   :  { %v4233_v47 = vpop.f32.mrf.mxu3 }
0x1803   :  { %v11321_v37 = vadd.f32 %v4233_v47, %v9433_v12 }
0x1805   :  { %v4397_v55 = vsel %vm426_vm3, %v11321_v37, -inf }
0x1806   :  { %4386 = vmax.xlane.f32.xlu0 %v4385_v36  ;;  %v4335_v29 = vpop.f32.mrf.mxu2 }
0x1807   :  { %v11336_v14 = vadd.f32 %v4335_v29, %v9425_v63 }
0x1808   :  { %v4300_v28 = vpop.f32.mrf.mxu1 }
0x1809   :  { %v11314_v57 = vadd.f32 %v4300_v28, %v9425_v63  ;;  %v4412_v51 = vsel %vm426_vm3, %v11336_v14, -inf }
0x180a   :  { %v4370_v31 = vpop.f32.mrf.mxu3 }
0x180b   :  { %v4406_v24 = vsel %vm426_vm3, %v11314_v57, -inf  ;;  %v11345_v53 = vadd.f32 %v4370_v31, %v9425_v63 }
0x180c   :  { %4407 = vmax.xlane.f32.xlu2 %v4406_v24  ;;  %v4265_v35 = vpop.f32.mrf.mxu0 }
0x180d   :  { %v4378_v40 = vpop.xlane.xlu2 %4377  ;;  %v11324_v42 = vadd.f32 %v4265_v35, %v9425_v63  ;;  %v4418_v9 = vsel %vm426_vm3, %v11345_v53, -inf }
0x180e   :  { %v4424_v1 = vsub.f32 %v4126_v25, %v4378_v40  ;;  %4392 = vmax.xlane.f32.xlu0 %v4391_v34  ;;  %v4338_v44 = vpop.f32.mrf.mxu2 }
0x180f   :  { %v4400_v8 = vsel %vm426_vm3, %v11324_v42, -inf  ;;  %v11362_v52 = vadd.f32 %v4338_v44, %v9433_v12 }
0x1810   :  { %v4440_v50 = vmul.f32 1.442695, %v4424_v1  ;;  %v4303_v4 = vpop.f32.mrf.mxu1 }
0x1811   :  { %v11327_v0 = vadd.f32 %v4303_v4, %v9433_v12 }
0x1812   :  { %8964 = vpow2.f32 %v4440_v50  ;;  %v4373_v56 = vpop.f32.mrf.mxu3 }
0x1813   :  { %v4409_v2 = vsel %vm426_vm3, %v11327_v0, -inf  ;;  %v11359_v25 = vadd.f32 %v4373_v56, %v9433_v12 }
0x1814   :  { %4410 = vmax.xlane.f32.xlu1 %v4409_v2  ;;  %4398 = vmax.xlane.f32.xlu2 %v4397_v55  ;;  %v4268_v58 = vpop.f32.mrf.mxu0 }
0x1815   :  { %v4381_v41 = vpop.xlane.xlu1 %4380  ;;  %v11348_v17 = vadd.f32 %v4268_v58, %v9433_v12  ;;  %v4421_v23 = vsel %vm426_vm3, %v11359_v25, -inf }
0x1816   :  { %v4425_v30 = vsub.f32 %v4129_v13, %v4381_v41  ;;  %4401 = vmax.xlane.f32.xlu0 %v4400_v8  ;;  %v4415_v13 = vsel %vm426_vm3, %v11362_v52, -inf }
0x1817   :  { %v4403_v59 = vsel %vm426_vm3, %v11348_v17, -inf }
0x1818   :  { %v11338_v33 = vpop.eup %8964  ;;  %v4442_v61 = vmul.f32 1.442695, %v4425_v30 }
0x1819   :  { %v4472_v21 = vsel %vm426_vm3, %v11338_v33, 0.0 }
0x181a   :  { %8966 = vpow2.f32 %v4442_v61 }
0x181c   :  { %4473 = vadd.xlane.f32.xlu1 %v4472_v21  ;;  %4413 = vmax.xlane.f32.xlu2 %v4412_v51 }
0x1820   :  { %v11350_v32 = vpop.eup %8966 }
0x1821   :  { %v4475_v49 = vsel %vm426_vm3, %v11350_v32, 0.0 }
0x1822   :  { %4476 = vadd.xlane.f32.xlu0 %v4475_v49 }
0x1824   :  { %4419 = vmax.xlane.f32.xlu1 %v4418_v9  ;;  %4404 = vmax.xlane.f32.xlu2 %v4403_v59 }
0x182a   :  { %4422 = vmax.xlane.f32.xlu0 %v4421_v23 }
0x182c   :  { %4416 = vmax.xlane.f32.xlu1 %v4415_v13 }
0x1855   :  { %v4384_v15 = vpop.xlane.xlu1 %4383 }
0x1856   :  { %v4426_v5 = vsub.f32 %v11291_v7, %v4384_v15 }
0x1858   :  { %v4444_v45 = vmul.f32 1.442695, %v4426_v5 }
0x185a   :  { %8968 = vpow2.f32 %v4444_v45 }
0x1860   :  { %v11369_v43 = vpop.eup %8968 }
0x1861   :  { %v4478_v10 = vsel %vm426_vm3, %v11369_v43, 0.0 }
0x1862   :  { %4479 = vadd.xlane.f32.xlu0 %v4478_v10 }
0x186d   :  { %v4390_v47 = vpop.xlane.xlu1 %4389 }
0x1871   :  { %v4396_v11 = vpop.xlane.xlu0 %4395 }
0x1872   :  { %v4430_v3 = vsub.f32 %v11301_v6, %v4396_v11  ;;  %v4428_v6 = vsub.f32 %v11296_v54, %v4390_v47 }
0x1874   :  { %v4452_v26 = vmul.f32 1.442695, %v4430_v3  ;;  %v4448_v55 = vmul.f32 1.442695, %v4428_v6 }
0x1876   :  { %8970 = vpow2.f32 %v4452_v26 }
0x1879   :  { %v4387_v36 = vpop.xlane.xlu0 %4386 }
0x187a   :  { %v4427_v48 = vsub.f32 %v11306_v18, %v4387_v36 }
0x187c   :  { %v11375_v28 = vpop.eup %8970  ;;  %v4446_v24 = vmul.f32 1.442695, %v4427_v48 }
0x187d   :  { %v4490_v7 = vsel %vm426_vm3, %v11375_v28, 0.0 }
0x187e   :  { %8972 = vpow2.f32 %v4446_v24  ;;  %4491 = vadd.xlane.f32.xlu2 %v4490_v7 }
0x187f   :  { %v4408_v40 = vpop.xlane.xlu2 %4407 }
0x1880   :  { %v4434_v34 = vsub.f32 %v11314_v57, %v4408_v40 }
0x1881   :  { %v4393_v35 = vpop.xlane.xlu0 %4392 }
0x1882   :  { %v4460_v1 = vmul.f32 1.442695, %v4434_v34  ;;  %v4429_v50 = vsub.f32 %v11311_v20, %v4393_v35 }
0x1884   :  { %v11382_v4 = vpop.eup %8972  ;;  %8974 = vpow2.f32 %v4460_v1  ;;  %v4450_v18 = vmul.f32 1.442695, %v4429_v50 }
0x1885   :  { %v4481_v2 = vsel %vm426_vm3, %v11382_v4, 0.0 }
0x1886   :  { %8976 = vpow2.f32 %v4450_v18  ;;  %4482 = vadd.xlane.f32.xlu2 %v4481_v2 }
0x1887   :  { %v4411_v29 = vpop.xlane.xlu1 %4410  ;;  %v4399_v41 = vpop.xlane.xlu2 %4398  ;;  %8978 = vpow2.f32 %v4448_v55 }
0x1888   :  { %v4435_v57 = vsub.f32 %v11327_v0, %v4411_v29  ;;  %v4431_v8 = vsub.f32 %v11321_v37, %v4399_v41 }
0x1889   :  { %v4402_v54 = vpop.xlane.xlu0 %4401 }
0x188a   :  { %v11388_v30 = vpop.eup %8974  ;;  %v4462_v20 = vmul.f32 1.442695, %v4435_v57  ;;  %v4432_v31 = vsub.f32 %v11324_v42, %v4402_v54  ;;  %v4454_v51 = vmul.f32 1.442695, %v4431_v8 }
0x188b   :  { %v4502_v61 = vsel %vm426_vm3, %v11388_v30, 0.0 }
0x188c   :  { %v11393_v21 = vpop.eup %8976  ;;  %8980 = vpow2.f32 %v4462_v20  ;;  %4503 = vadd.xlane.f32.xlu0 %v4502_v61  ;;  %v4456_v58 = vmul.f32 1.442695, %v4432_v31 }
0x188d   :  { %v4487_v0 = vsel %vm426_vm3, %v11393_v21, 0.0  ;;  %v11397_v56 = vpop.eup %8978 }
0x188e   :  { %4488 = vadd.xlane.f32.xlu2 %v4487_v0  ;;  %v4484_v44 = vsel %vm426_vm3, %v11397_v56, 0.0 }
0x188f   :  { %v4474_v37 = vpop.xlane.xlu1 %4473  ;;  %v4414_v49 = vpop.xlane.xlu2 %4413 }
0x1890   :  { %8982 = vrcp.f32 %v4474_v37  ;;  %v4436_v9 = vsub.f32 %v11336_v14, %v4414_v49  ;;  %v4529_v48 = vand.u32 2147483647, %v4474_v37  ;;  %v4531_v24 = vand.u32 2147483648, %v4474_v37 }
0x1891   :  { %8984 = vpow2.f32 %v4454_v51  ;;  %vm4525_vm0 = vweird.f32 %v4474_v37 }
0x1892   :  { %v11399_v42 = vpop.eup %8980  ;;  %8986 = vpow2.f32 %v4456_v58  ;;  %v4464_v15 = vmul.f32 1.442695, %v4436_v9  ;;  %v4532_v50 = vor.u32 1.1754944e-38, %v4531_v24  ;;  %vm4530_vm12 = vcmp.eq.f32.partialorder %v4529_v48, 8.507059e+37 }
0x1893   :  { %v4505_v59 = vsel %vm426_vm3, %v11399_v42, 0.0 }
0x1894   :  { %4506 = vadd.xlane.f32.xlu1 %v4505_v59  ;;  %4485 = vadd.xlane.f32.xlu0 %v4484_v44 }
0x1895   :  { %v4477_v23 = vpop.xlane.xlu0 %4476 }
0x1896   :  { %v8983_v13 = vpop.eup %8982  ;;  %8988 = vrcp.f32 %v4477_v23  ;;  %v4545_v29 = vand.u32 2147483648, %v4477_v23  ;;  %v4543_v31 = vand.u32 2147483647, %v4477_v23  ;;  %vm4539_vm2 = vweird.f32 %v4477_v23 }
0x1897   :  { %v11406_v5 = vpop.eup %8984  ;;  %v4521_v45 = vmul.f32 %v8983_v13, %v4474_v37  ;;  %v4420_v10 = vpop.xlane.xlu1 %4419  ;;  %8990 = vpow2.f32 %v4464_v15  ;;  %vm4526_vm13 = vweird.f32 %v8983_v13 }
0x1898   :  { %v4405_v11 = vpop.xlane.xlu2 %4404  ;;  %v11408_v3 = vpop.eup %8986  ;;  %v4438_v14 = vsub.f32 %v11345_v53, %v4420_v10  ;;  %v4493_v40 = vsel %vm426_vm3, %v11406_v5, 0.0  ;;  %vm4527_vm11 = vmor %vm4525_vm0, %vm4526_vm13  ;;  %v4546_v49 = vor.u32 1.1754944e-38, %v4545_v29  ;;  %vm4544_vm9 = vcmp.eq.f32.partialorder %v4543_v31, 8.507059e+37 }
0x1899   :  { %v4522_v26 = vsub.f32 1.0, %v4521_v45  ;;  %v4433_v36 = vsub.f32 %v11348_v17, %v4405_v11  ;;  %v4496_v34 = vsel %vm426_vm3, %v11408_v3, 0.0  ;;  %v8649_v11 = vpack.i.bf16 %v11234_v27, %v11232_v39 }
0x189a   :  { %v4468_v7 = vmul.f32 1.442695, %v4438_v14  ;;  %v8639_v14 = vpack.i.bf16 %v11210_v16, %v11202_v46 }
0x189b   :  { %v4523_v47 = vmul.f32 %v8983_v13, %v4522_v26  ;;  %v4458_v17 = vmul.f32 1.442695, %v4433_v36 }
0x189c   :  { %v8989_v35 = vpop.eup %8988  ;;  %8992 = vpow2.f32 %v4468_v7  ;;  %4494 = vadd.xlane.f32.xlu1 %v4493_v40  ;;  %4497 = vadd.xlane.f32.xlu0 %v4496_v34 }
0x189d   :  { %v4524_v53 = vadd.f32 %v8983_v13, %v4523_v47  ;;  %v4535_v6 = vmul.f32 %v8989_v35, %v4477_v23  ;;  %v4423_v1 = vpop.xlane.xlu0 %4422  ;;  %v11417_v57 = vpop.eup %8990  ;;  %vm4540_vm14 = vweird.f32 %v8989_v35  ;;  %8994 = vpow2.f32 %v4458_v17 }
0x189e   :  { %v4439_v18 = vsub.f32 %v11359_v25, %v4423_v1  ;;  %v4508_v58 = vsel %vm426_vm3, %v11417_v57, 0.0  ;;  %vm4541_vm15 = vmor %vm4539_vm2, %vm4540_vm14 }
0x189f   :  { %v4528_v2 = vsel %vm4527_vm11, %v8983_v13, %v4524_v53  ;;  %v4536_v55 = vsub.f32 1.0, %v4535_v6  ;;  %v4417_v41 = vpop.xlane.xlu1 %4416 }
0x18a0   :  { %v4533_v8 = vsel %vm4530_vm12, %v4532_v50, %v4528_v2  ;;  %v4470_v54 = vmul.f32 1.442695, %v4439_v18  ;;  %v4437_v20 = vsub.f32 %v11362_v52, %v4417_v41 }
0x18a1   :  { %v4744_v61 = vmul.f32 %v11338_v33, %v4533_v8  ;;  %v4537_v51 = vmul.f32 %v8989_v35, %v4536_v55 }
0x18a2   :  { %v11421_v0 = vpop.eup %8992  ;;  %8996 = vpow2.f32 %v4470_v54  ;;  %v4466_v25 = vmul.f32 1.442695, %v4437_v20 }
0x18a3   :  { %8252 = vmatmul.msk.f32.vlgmr.msra.gmra.mxu0 %vm426_vm3, %v4744_v61  ;;  %v4514_v37 = vsel %vm426_vm3, %v11421_v0, 0.0  ;;  %v4538_v52 = vadd.f32 %v8989_v35, %v4537_v51  ;;  %v11428_v59 = vpop.eup %8994 }
0x18a4   :  { %8998 = vpow2.f32 %v4466_v25  ;;  %4509 = vadd.xlane.f32.xlu1 %v4508_v58  ;;  %4515 = vadd.xlane.f32.xlu0 %v4514_v37  ;;  %v4499_v10 = vsel %vm426_vm3, %v11428_v59, 0.0 }
0x18a5   :  { %v4542_v33 = vsel %vm4541_vm15, %v8989_v35, %v4538_v52 }
0x18a6   :  { %v4547_v9 = vsel %vm4544_vm9, %v4546_v49, %v4542_v33 }
0x18a7   :  { %v4745_v44 = vmul.f32 %v11350_v32, %v4547_v9  ;;  %v8644_v32 = vpack.i.bf16 %v11224_v22, %v11215_v60 }
0x18a8   :  { %v11431_v23 = vpop.eup %8996 }
0x18a9   :  { %v4517_v13 = vsel %vm426_vm3, %v11431_v23, 0.0 }
0x18aa   :  { %v11435_v15 = vpop.eup %8998  ;;  %4518 = vadd.xlane.f32.xlu2 %v4517_v13 }
0x18ab   :  { %8253 = vmatmul.msk.f32.gmra.mxu0 %vm426_vm3, %v4745_v44  ;;  %v4511_v45 = vsel %vm426_vm3, %v11435_v15, 0.0 }
0x18ac   :  { %4512 = vadd.xlane.f32.xlu1 %v4511_v45  ;;  %4500 = vadd.xlane.f32.xlu0 %v4499_v10 }
0x18c0   :  { %8645 = vrot.lane.b32.xlu0 %v8644_v32, %s9216_s27 }
0x18c2   :  { %8650 = vrot.lane.b32.xlu2 %v8649_v11, %s9216_s27 }
0x18c5   :  { %8640 = vrot.lane.b32.xlu1 %v8639_v14, %s9216_s27 }
0x18d5   :  { %v4480_v26 = vpop.xlane.xlu0 %4479 }
0x18d6   :  { %9000 = vrcp.f32 %v4480_v26  ;;  %v4559_v7 = vand.u32 2147483648, %v4480_v26  ;;  %v4557_v60 = vand.u32 2147483647, %v4480_v26  ;;  %vm4553_vm13 = vweird.f32 %v4480_v26 }
0x18d8   :  { %v4560_v39 = vor.u32 1.1754944e-38, %v4559_v7  ;;  %vm4558_vm11 = vcmp.eq.f32.partialorder %v4557_v60, 8.507059e+37 }
0x18dc   :  { %v9001_v36 = vpop.eup %9000 }
0x18dd   :  { %v4549_v48 = vmul.f32 %v9001_v36, %v4480_v26  ;;  %vm4554_vm10 = vweird.f32 %v9001_v36 }
0x18de   :  { %vm4555_vm0 = vmor %vm4553_vm13, %vm4554_vm10 }
0x18df   :  { %v4550_v24 = vsub.f32 1.0, %v4549_v48 }
0x18e1   :  { %v4551_v47 = vmul.f32 %v9001_v36, %v4550_v24 }
0x18e3   :  { %v4552_v22 = vadd.f32 %v9001_v36, %v4551_v47 }
0x18e5   :  { %v4556_v27 = vsel %vm4555_vm0, %v9001_v36, %v4552_v22 }
0x18e6   :  { %v4561_v40 = vsel %vm4558_vm11, %v4560_v39, %v4556_v27 }
0x18e7   :  { %v4746_v46 = vmul.f32 %v11369_v43, %v4561_v40 }
0x18e9   :  { %8254 = vmatmul.msk.f32.vlgmr.msra.gmra.mxu1 %vm426_vm3, %v4746_v46 }
0x18f1   :  { %v4492_v16 = vpop.xlane.xlu2 %4491 }
0x18f2   :  { %9002 = vrcp.f32 %v4492_v16  ;;  %v4615_v17 = vand.u32 2147483648, %v4492_v16  ;;  %v4613_v50 = vand.u32 2147483647, %v4492_v16  ;;  %vm4609_vm14 = vweird.f32 %v4492_v16 }
0x18f4   :  { %v4616_v43 = vor.u32 1.1754944e-38, %v4615_v17  ;;  %vm4614_vm15 = vcmp.eq.f32.partialorder %v4613_v50, 8.507059e+37 }
0x18f8   :  { %v9003_v34 = vpop.eup %9002 }
0x18f9   :  { %v4605_v35 = vmul.f32 %v9003_v34, %v4492_v16  ;;  %v4483_v53 = vpop.xlane.xlu2 %4482  ;;  %vm4610_vm12 = vweird.f32 %v9003_v34 }
0x18fa   :  { %9004 = vrcp.f32 %v4483_v53  ;;  %vm4611_vm2 = vmor %vm4609_vm14, %vm4610_vm12  ;;  %v4573_v51 = vand.u32 2147483648, %v4483_v53  ;;  %v4571_v25 = vand.u32 2147483647, %v4483_v53  ;;  %vm4567_vm10 = vweird.f32 %v4483_v53 }
0x18fb   :  { %v4606_v6 = vsub.f32 1.0, %v4605_v35 }
0x18fc   :  { %vm4572_vm0 = vcmp.eq.f32.partialorder %v4571_v25, 8.507059e+37 }
0x18fd   :  { %v4607_v1 = vmul.f32 %v9003_v34, %v4606_v6 }
0x18ff   :  { %v4608_v18 = vadd.f32 %v9003_v34, %v4607_v1  ;;  %v11453_v2 = vpop.xlane.xlu0 %4503 }
0x1900   :  { %v9005_v55 = vpop.eup %9004 }
0x1901   :  { %v4612_v29 = vsel %vm4611_vm2, %v9003_v34, %v4608_v18  ;;  %v4563_v41 = vmul.f32 %v9005_v55, %v4483_v53  ;;  %v11455_v8 = vpop.xlane.xlu2 %4488  ;;  %vm4568_vm9 = vweird.f32 %v9005_v55 }
0x1902   :  { %v4617_v54 = vsel %vm4614_vm15, %v4616_v43, %v4612_v29  ;;  %9006 = vrcp.f32 %v11455_v8  ;;  %vm4569_vm13 = vmor %vm4567_vm10, %vm4568_vm9  ;;  %vm4595_vm14 = vweird.f32 %v11455_v8  ;;  %v4601_v53 = vand.u32 2147483648, %v11455_v8 }
0x1903   :  { %v4750_v20 = vmul.f32 %v11375_v28, %v4617_v54  ;;  %v4564_v31 = vsub.f32 1.0, %v4563_v41  ;;  %9008 = vrcp.f32 %v11453_v2  ;;  %v4574_v28 = vor.u32 1.1754944e-38, %v4573_v51 }
0x1904   :  { %v4599_v18 = vand.u32 2147483647, %v11455_v8  ;;  %v4602_v54 = vor.u32 1.1754944e-38, %v4601_v53 }
0x1905   :  { %v4565_v61 = vmul.f32 %v9005_v55, %v4564_v31  ;;  %8258 = vmatmul.msk.f32.vlgmr.msra.gmra.mxu3 %vm426_vm3, %v4750_v20 }
0x1907   :  { %v11460_v58 = vpop.xlane.xlu1 %4506  ;;  %v4486_v37 = vpop.xlane.xlu0 %4485  ;;  %v4566_v52 = vadd.f32 %v9005_v55, %v4565_v61 }
0x1908   :  { %v11463_v49 = vpop.eup %9006  ;;  %9010 = vrcp.f32 %v4486_v37  ;;  %v4587_v24 = vand.u32 2147483648, %v4486_v37  ;;  %v4585_v47 = vand.u32 2147483647, %v4486_v37  ;;  %vm4581_vm12 = vweird.f32 %v4486_v37 }
0x1909   :  { %v4570_v33 = vsel %vm4569_vm13, %v9005_v55, %v4566_v52  ;;  %v4591_v44 = vmul.f32 %v11463_v49, %v11455_v8  ;;  %v11468_v45 = vpop.eup %9008  ;;  %vm4596_vm15 = vweird.f32 %v11463_v49 }
0x190a   :  { %v4575_v9 = vsel %vm4572_vm0, %v4574_v28, %v4570_v33  ;;  %v4661_v36 = vmul.f32 %v11468_v45, %v11453_v2  ;;  %v4588_v27 = vor.u32 1.1754944e-38, %v4587_v24  ;;  %vm4586_vm9 = vcmp.eq.f32.partialorder %v4585_v47, 8.507059e+37  ;;  %vm11500_vm10 = vmor %vm4595_vm14, %vm4596_vm15 }
0x190b   :  { %v4747_v13 = vmul.f32 %v11382_v4, %v4575_v9  ;;  %v4592_v14 = vsub.f32 1.0, %v4591_v44  ;;  %vm4666_vm0 = vweird.f32 %v11468_v45  ;;  %vm4665_vm14 = vweird.f32 %v11453_v2 }
0x190c   :  { %v4662_v22 = vsub.f32 1.0, %v4661_v36  ;;  %v4671_v9 = vand.u32 2147483648, %v11453_v2  ;;  %vm11550_vm15 = vmor %vm4665_vm14, %vm4666_vm0 }
0x190d   :  { %8255 = vmatmul.msk.f32.gmra.mxu1 %vm426_vm3, %v4747_v13  ;;  %v4593_v4 = vmul.f32 %v11463_v49, %v4592_v14 }
0x190e   :  { %v9011_v10 = vpop.eup %9010  ;;  %v4663_v1 = vmul.f32 %v11468_v45, %v4662_v22 }
0x190f   :  { %v11471_v32 = vpop.xlane.xlu1 %4494  ;;  %v11473_v11 = vpop.xlane.xlu0 %4497  ;;  %v4577_v26 = vmul.f32 %v9011_v10, %v4486_v37  ;;  %vm4582_vm11 = vweird.f32 %v9011_v10  ;;  %v4594_v35 = vadd.f32 %v11463_v49, %v4593_v4 }
0x1910   :  { %9012 = vrcp.f32 %v11471_v32  ;;  %vm4583_vm2 = vmor %vm4581_vm12, %vm4582_vm11  ;;  %v4629_v8 = vand.u32 2147483648, %v11471_v32  ;;  %v4664_v61 = vadd.f32 %v11468_v45, %v4663_v1  ;;  %vm4600_vm11 = vcmp.eq.f32.partialorder %v4599_v18, 8.507059e+37 }
0x1911   :  { %v4578_v48 = vsub.f32 1.0, %v4577_v26  ;;  %9014 = vrcp.f32 %v11473_v11  ;;  %vm4623_vm12 = vweird.f32 %v11471_v32  ;;  %v4627_v28 = vand.u32 2147483647, %v11471_v32 }
0x1912   :  { %9016 = vrcp.f32 %v11460_v58  ;;  %v4668_v24 = vsel %vm11550_vm15, %v11468_v45, %v4664_v61  ;;  %v4641_v1 = vand.u32 2147483647, %v11473_v11  ;;  %v4643_v18 = vand.u32 2147483648, %v11473_v11 }
0x1913   :  { %v4579_v7 = vmul.f32 %v9011_v10, %v4578_v48 }
0x1914   :  { %vm11596_vm14 = vcmp.eq.f32.partialorder %v4641_v1, 8.507059e+37 }
0x1915   :  { %v4580_v39 = vadd.f32 %v9011_v10, %v4579_v7  ;;  %v4672_v7 = vor.u32 1.1754944e-38, %v4671_v9 }
0x1916   :  { %v11479_v60 = vpop.eup %9012 }
0x1917   :  { %v4619_v40 = vmul.f32 %v11479_v60, %v11471_v32  ;;  %v11486_v46 = vpop.xlane.xlu1 %4509  ;;  %v11488_v16 = vpop.xlane.xlu0 %4515  ;;  %v4584_v34 = vsel %vm4583_vm2, %v9011_v10, %v4580_v39  ;;  %vm4624_vm13 = vweird.f32 %v11479_v60  ;;  %v4669_v10 = vand.u32 2147483647, %v11453_v2 }
0x1918   :  { %v4589_v6 = vsel %vm4586_vm9, %v4588_v27, %v4584_v34  ;;  %9018 = vrcp.f32 %v11486_v46  ;;  %v11505_v29 = vpop.eup %9014  ;;  %vm11538_vm2 = vmor %vm4623_vm12, %vm4624_vm13  ;;  %v4630_v32 = vor.u32 1.1754944e-38, %v4629_v8  ;;  %vm4628_vm9 = vcmp.eq.f32.partialorder %v4627_v28, 8.507059e+37 }
0x1919   :  { %v4620_v17 = vsub.f32 1.0, %v4619_v40  ;;  %v4748_v50 = vmul.f32 %v11397_v56, %v4589_v6  ;;  %9020 = vrcp.f32 %v11488_v16  ;;  %v4598_v56 = vsel %vm11500_vm10, %v11463_v49, %v4594_v35  ;;  %v11511_v41 = vpop.eup %9016 }
0x191a   :  { %v4633_v25 = vmul.f32 %v11505_v29, %v11473_v11  ;;  %v4603_v49 = vsel %vm4600_vm11, %v4602_v54, %v4598_v56  ;;  %v4675_v44 = vmul.f32 %v11511_v41, %v11460_v58  ;;  %vm4670_vm10 = vcmp.eq.f32.partialorder %v4669_v10, 8.507059e+37 }
0x191b   :  { %v4621_v43 = vmul.f32 %v11479_v60, %v4620_v17  ;;  %8256 = vmatmul.msk.f32.vlgmr.msrb.gmra.mxu2 %vm426_vm3, %v4748_v50  ;;  %v4749_v2 = vmul.f32 %v11393_v21, %v4603_v49  ;;  %v4673_v27 = vsel %vm4670_vm10, %v4672_v7, %v4668_v24  ;;  %vm4679_vm13 = vweird.f32 %v11460_v58 }
0x191c   :  { %v4634_v4 = vsub.f32 1.0, %v4633_v25  ;;  %v4676_v47 = vsub.f32 1.0, %v4675_v44  ;;  %v11580_v50 = vmul.f32 %v11388_v30, %v4673_v27  ;;  %vm4680_vm0 = vweird.f32 %v11511_v41 }
0x191d   :  { %v11515_v20 = vpop.xlane.xlu2 %4518  ;;  %v4622_v31 = vadd.f32 %v11479_v60, %v4621_v43  ;;  %vm4637_vm11 = vweird.f32 %v11473_v11  ;;  %vm4638_vm12 = vweird.f32 %v11505_v29  ;;  %v4697_v61 = vand.u32 2147483647, %v11486_v46  ;;  %vm11621_vm10 = vmor %vm4679_vm13, %vm4680_vm0 }
0x191e   :  { %v11520_v51 = vpop.eup %9018  ;;  %9022 = vrcp.f32 %v11515_v20  ;;  %v4635_v45 = vmul.f32 %v11505_v29, %v4634_v4  ;;  %v4677_v6 = vmul.f32 %v11511_v41, %v4676_v47  ;;  %v4699_v28 = vand.u32 2147483648, %v11486_v46  ;;  %vm11610_vm15 = vmor %vm4637_vm11, %vm4638_vm12 }
0x191f   :  { %v11525_v37 = vpop.xlane.xlu1 %4512  ;;  %v11527_v52 = vpop.xlane.xlu0 %4500  ;;  %v4626_v14 = vsel %vm11538_vm2, %v11479_v60, %v4622_v31  ;;  %v4689_v36 = vmul.f32 %v11520_v51, %v11486_v46  ;;  %v4685_v60 = vand.u32 2147483648, %v11460_v58  ;;  %vm4694_vm2 = vweird.f32 %v11520_v51 }
0x1920   :  { %v11530_v33 = vpop.eup %9020  ;;  %9024 = vrcp.f32 %v11525_v37  ;;  %v4631_v22 = vsel %vm4628_vm9, %v4630_v32, %v4626_v14  ;;  %v4636_v54 = vadd.f32 %v11505_v29, %v4635_v45  ;;  %v11602_v49 = vadd.f32 %v11511_v41, %v4677_v6  ;;  %v4789_v24 = vpop.f32.mrf.mxu0 }
0x1921   :  { %v4717_v48 = vmul.f32 %v11530_v33, %v11488_v16  ;;  %9026 = vrcp.f32 %v11527_v52  ;;  %v4690_v40 = vsub.f32 1.0, %v4689_v36  ;;  %v4751_v21 = vmul.f32 %v11406_v5, %v4631_v22 }
0x1922   :  { %v11575_v17 = vor.u32 1.1754944e-38, %v4685_v60  ;;  %v4683_v5 = vand.u32 2147483647, %v11460_v58  ;;  %v4725_v9 = vand.u32 2147483647, %v11488_v16  ;;  %v4727_v44 = vand.u32 2147483648, %v11488_v16 }
0x1923   :  { %8257 = vmatmul.msk.f32.gmra.mxu2 %vm426_vm3, %v4749_v2  ;;  %v4718_v34 = vsub.f32 1.0, %v4717_v48  ;;  %8259 = vmatmul.msk.f32.gmra.mxu3 %vm426_vm3, %v4751_v21  ;;  %v4691_v55 = vmul.f32 %v11520_v51, %v4690_v40  ;;  %v4644_v10 = vor.u32 1.1754944e-38, %v4643_v18  ;;  %vm4722_vm9 = vweird.f32 %v11530_v33 }
0x1924   :  { %v11565_v39 = vpop.eup %9022  ;;  %v4640_v11 = vsel %vm11610_vm15, %v11505_v29, %v4636_v54  ;;  %vm4693_vm11 = vweird.f32 %v11486_v46  ;;  %vm11633_vm8 = vcmp.eq.f32.partialorder %v4697_v61, 8.507059e+37  ;;  %vm4721_vm13 = vweird.f32 %v11488_v16 }
0x1925   :  { %v4719_v43 = vmul.f32 %v11530_v33, %v4718_v34  ;;  %v4731_v30 = vmul.f32 %v11565_v39, %v11515_v20  ;;  %v4692_v32 = vadd.f32 %v11520_v51, %v4691_v55  ;;  %vm11629_vm12 = vmor %vm4693_vm11, %vm4694_vm2  ;;  %v4682_v29 = vsel %vm11621_vm10, %v11511_v41, %v11602_v49  ;;  %v8651_v40 = vpop.permute.xlu2 %8650 }
0x1926   :  { %v11568_v35 = vpop.eup %9024  ;;  %v4700_v46 = vor.u32 1.1754944e-38, %v4699_v28  ;;  %vm11643_vm0 = vmor %vm4721_vm13, %vm4722_vm9  ;;  %vm11647_vm2 = vcmp.eq.f32.partialorder %v4725_v9, 8.507059e+37  ;;  %v4728_v47 = vor.u32 1.1754944e-38, %v4727_v44  ;;  %vm4735_vm15 = vweird.f32 %v11515_v20 }
0x1927   :  { %v11571_v53 = vpop.eup %9026  ;;  %v4703_v8 = vmul.f32 %v11568_v35, %v11525_v37  ;;  %v4720_v14 = vadd.f32 %v11530_v33, %v4719_v43  ;;  %v4732_v36 = vsub.f32 1.0, %v4731_v30  ;;  %vm11652_vm11 = vcmp.eq.f32.partialorder %v4683_v5, 8.507059e+37 }
0x1928   :  { %v4647_v56 = vmul.f32 %v11571_v53, %v11527_v52  ;;  %v4645_v60 = vsel %vm11596_vm14, %v4644_v10, %v4640_v11  ;;  %v4696_v41 = vsel %vm11629_vm12, %v11520_v51, %v4692_v32  ;;  %v4741_v27 = vand.u32 2147483648, %v11515_v20 }
0x1929   :  { %v4704_v48 = vsub.f32 1.0, %v4703_v8  ;;  %v4724_v22 = vsel %vm11643_vm0, %v11530_v33, %v4720_v14  ;;  %v4733_v21 = vmul.f32 %v11565_v39, %v4732_v36  ;;  %vm4707_vm14 = vweird.f32 %v11525_v37 }
0x192a   :  { %v4648_v25 = vsub.f32 1.0, %v4647_v56  ;;  %vm4651_vm9 = vweird.f32 %v11527_v52  ;;  %vm4652_vm10 = vweird.f32 %v11571_v53  ;;  %v4752_v33 = vmul.f32 %v11408_v3, %v4645_v60 }
0x192b   :  { %v4705_v45 = vmul.f32 %v11568_v35, %v4704_v48  ;;  %v4657_v5 = vand.u32 2147483648, %v11527_v52  ;;  %v8653_v18 = vunpack.i.h.bf16 %v8651_v40  ;;  %v8652_v55 = vunpack.i.l.bf16 %v8651_v40  ;;  %vm11683_vm0 = vmor %vm4651_vm9, %vm4652_vm10  ;;  %v8270_v40 = vld [vmem:[%s13139_s3 + $0x68] sm:$0xff] }
0x192c   :  { %v4649_v58 = vmul.f32 %v11571_v53, %v4648_v25  ;;  %v4701_v43 = vsel %vm11633_vm8, %v4700_v46, %v4696_v41  ;;  %v4729_v56 = vsel %vm11647_vm2, %v4728_v47, %v4724_v22  ;;  %vm4736_vm12 = vweird.f32 %v11565_v39  ;;  %v8272_v22 = vld [vmem:[%s13139_s3 + $0x78] sm:$0xff] }
0x192d   :  { %v4655_v54 = vand.u32 2147483647, %v11527_v52  ;;  %vm4708_vm13 = vweird.f32 %v11568_v35  ;;  %v4713_v3 = vand.u32 2147483648, %v11525_v37  ;;  %v4706_v31 = vadd.f32 %v11568_v35, %v4705_v45  ;;  %vm11702_vm8 = vmor %vm4735_vm15, %vm4736_vm12 }
0x192e   :  { %v4650_v51 = vadd.f32 %v11571_v53, %v4649_v58  ;;  %v4734_v61 = vadd.f32 %v11565_v39, %v4733_v21  ;;  %v4711_v28 = vand.u32 2147483647, %v11525_v37  ;;  %v4756_v9 = vmul.f32 %v11417_v57, %v4701_v43  ;;  %vm11711_vm2 = vmor %vm4707_vm14, %vm4708_vm13 }
0x192f   :  { %v4758_v44 = vmul.f32 %v11421_v0, %v4729_v56  ;;  %v4658_v10 = vor.u32 1.1754944e-38, %v4657_v5  ;;  %vm4656_vm9 = vcmp.eq.f32.partialorder %v4655_v54, 8.507059e+37  ;;  %v4687_v57 = vsel %vm11652_vm11, %v11575_v17, %v4682_v29 }
0x1930   :  { %v4654_v52 = vsel %vm11683_vm0, %v11571_v53, %v4650_v51  ;;  %v4738_v37 = vsel %vm11702_vm8, %v11565_v39, %v4734_v61  ;;  %v4742_v32 = vor.u32 1.1754944e-38, %v4741_v27  ;;  %v4714_v14 = vor.u32 1.1754944e-38, %v4713_v3  ;;  %v8271_v27 = vld [vmem:[%s13139_s3 + $0x70] sm:$0xff] }
0x1931   :  { %v4659_v0 = vsel %vm4656_vm9, %v4658_v10, %v4654_v52  ;;  %vm4712_vm15 = vcmp.eq.f32.partialorder %v4711_v28, 8.507059e+37  ;;  %v4755_v17 = vmul.f32 %v11399_v42, %v4687_v57  ;;  %vm13251_vm11 = vcmask 228352  }
0x1932   :  { %v8646_v34 = vpop.permute.xlu0 %8645  ;;  %v4753_v26 = vmul.f32 %v11428_v59, %v4659_v0  ;;  %vm13252_vm10 = vcmask 261120   ;;  %vm13253_vm12 = vmmov %vm13251_vm11  ;;  %v11779_v0 = vld [vmem:[%s13143_s7 + $0x18] sm:$0x3f] }
0x1933   :  { %v8648_v6 = vunpack.i.h.bf16 %v8646_v34  ;;  %v8647_v1 = vunpack.i.l.bf16 %v8646_v34  ;;  %v8269_v34 = vld [vmem:[%s13139_s3 + $0x60] sm:$0xff]  ;;  %vm13254_vm13 = vmmov %vm13252_vm10 }
0x1934   :  { %vm13255_vm0 = vmmov %vm13252_vm10 }
0x1935   :  { %4926 = vmatpush.msrb.mxu0 %v8647_v1  ;;  %4961 = vmatpush.msrb.mxu1 %v8648_v6  ;;  %vm13256_vm8 = vmmov %vm13255_vm0 }
0x1936   :  { %vm13258_vm9 = vmmov %vm13255_vm0 }
0x1937   :  { %v8641_v8 = vpop.permute.xlu1 %8640  ;;  %4927 = vmatpush.msrb.mxu0 %v8652_v55  ;;  %4962 = vmatpush.msrb.mxu1 %v8653_v18 }
0x1938   :  { %v8643_v25 = vunpack.i.h.bf16 %v8641_v8  ;;  %v8642_v49 = vunpack.i.l.bf16 %v8641_v8  ;;  %8260 = vmatmul.msk.f32.vlgmr.msrb.gmra.mxu0 %vm426_vm3, %v4752_v33  ;;  %8262 = vmatmul.msk.f32.vlgmr.msrb.gmra.mxu1 %vm426_vm3, %v11580_v50  ;;  %v4739_v50 = vand.u32 2147483647, %v11515_v20  ;;  %v4710_v20 = vsel %vm11711_vm2, %v11568_v35, %v4706_v31  ;;  %vm13257_vm2 = vmmov %vm13255_vm0 }
0x1939   :  { %v4715_v11 = vsel %vm4712_vm15, %v4714_v14, %v4710_v20  ;;  %5136 = vmatpush.msra.mxu0 %v8272_v22  ;;  %v5117_v20 = vperm.slane %v11779_v0, 0 }
0x193a   :  { %4997 = vmatpush.msra.mxu2 %v8642_v49  ;;  %5032 = vmatpush.msrb.mxu3 %v8643_v25  ;;  %vm4740_vm14 = vcmp.eq.f32.partialorder %v4739_v50, 8.507059e+37  ;;  %v4757_v35 = vmul.f32 %v11435_v15, %v4715_v11 }
0x193b   :  { %8264 = vmatmul.msk.f32.vlgmr.msra.gmra.mxu2 %vm426_vm3, %v4756_v9  ;;  %8266 = vmatmul.msk.f32.vlgmr.msrb.gmra.mxu3 %vm426_vm3, %v4758_v44  ;;  %v4743_v36 = vsel %vm4740_vm14, %v4742_v32, %v4738_v37 }
0x193c   :  { %v4759_v48 = vmul.f32 %v11431_v23, %v4743_v36  ;;  %v4792_v23 = vpop.f32.mrf.mxu0  ;;  %5137 = vmatpush.msra.mxu0 %v8271_v27 }
0x193e   :  { %5138 = vmatpush.msra.mxu0 %v8270_v40 }
0x1940   :  { %8261 = vmatmul.msk.f32.gmra.mxu0 %vm426_vm3, %v4753_v26  ;;  %8263 = vmatmul.msk.f32.gmra.mxu1 %vm426_vm3, %v4755_v17 }
0x1941   :  { %5139 = vmatpush.msra.mxu0 %v8269_v34  ;;  %v8295_v34 = vld [vmem:[%s13142_s6 + $0x1e8] sm:$0xff] }
0x1943   :  { %8265 = vmatmul.msk.f32.gmra.mxu2 %vm426_vm3, %v4757_v35  ;;  %8267 = vmatmul.msk.f32.gmra.mxu3 %vm426_vm3, %v4759_v48 }
0x1966   :  { %v4824_v39 = vpop.f32.mrf.mxu1 }
0x1967   :  { %5042 = vrot.lane.b32.xlu1 %v4824_v39, %s9220_s30 }
0x1988   :  { %v4894_v59 = vpop.f32.mrf.mxu3 }
0x1989   :  { %5058 = vrot.lane.b32.xlu2 %v4894_v59, %s13157_s28 }
0x198a   :  { %v4827_v42 = vpop.f32.mrf.mxu1 }
0x198b   :  { %5044 = vrot.lane.b32.xlu0 %v4827_v42, %s9220_s30 }
0x199e   :  { %v4859_v2 = vpop.f32.mrf.mxu2 }
0x199f   :  { %5050 = vrot.lane.b32.xlu0 %v4859_v2, %s13250_s9 }
0x19a6   :  { %v4862_v15 = vpop.f32.mrf.mxu2  ;;  %v4897_v46 = vpop.f32.mrf.mxu3 }
0x19a7   :  { %5052 = vrot.lane.b32.xlu2 %v4862_v15, %s13250_s9  ;;  %v8278_v15 = vld [vmem:[%s13140_s4 + $0x78] sm:$0xff] }
0x19a8   :  { %5231 = vmatpush.msra.mxu1 %v8278_v15 }
0x19b5   :  { %v4929_v58 = vpop.f32.mrf.mxu0  ;;  %v4964_v29 = vpop.f32.mrf.mxu1 }
0x19b6   :  { %5074 = vrot.lane.b32.xlu0 %v4964_v29, %s13187_s15  ;;  %5066 = vrot.lane.b32.xlu1 %v4929_v58, %s13188_s16  ;;  %v8277_v58 = vld [vmem:[%s13140_s4 + $0x70] sm:$0xff]  ;;  %v8276_v29 = vld [vmem:[%s13140_s4 + $0x68] sm:$0xff] }
0x19b7   :  { %5232 = vmatpush.msra.mxu1 %v8277_v58 }
0x19b9   :  { %5233 = vmatpush.msra.mxu1 %v8276_v29 }
0x19bd   :  { %v4932_v4 = vpop.f32.mrf.mxu0  ;;  %v4967_v16 = vpop.f32.mrf.mxu1 }
0x19be   :  { %v4999_v7 = vpop.f32.mrf.mxu2  ;;  %v5034_v47 = vpop.f32.mrf.mxu3  ;;  %5060 = vrot.lane.b32.xlu1 %v4897_v46, %s13157_s28  ;;  %5068 = vrot.lane.b32.xlu0 %v4932_v4, %s13188_s16  ;;  %v8275_v4 = vld [vmem:[%s13140_s4 + $0x60] sm:$0xff] }
0x19bf   :  { %5082 = vrot.lane.b32.xlu2 %v4999_v7, %s13209_s13  ;;  %5234 = vmatpush.msra.mxu1 %v8275_v4 }
0x19c6   :  { %v5037_v60 = vpop.f32.mrf.mxu3  ;;  %5090 = vrot.lane.b32.xlu1 %v5034_v47, %s13155_s12  ;;  %v5002_v41 = vpop.f32.mrf.mxu2 }
0x19c7   :  { %5076 = vrot.lane.b32.xlu2 %v4967_v16, %s13187_s15  ;;  %5092 = vrot.lane.b32.xlu0 %v5037_v60, %s13155_s12  ;;  %v8297_v60 = vld [vmem:[%s13142_s6 + $0x1f8] sm:$0xff] }
0x19c8   :  { %5262 = vmatpush.msrb.mxu2 %v8297_v60 }
0x19ce   :  { %5084 = vrot.lane.b32.xlu1 %v5002_v41, %s13209_s13  ;;  %v8296_v41 = vld [vmem:[%s13142_s6 + $0x1f0] sm:$0xff] }
0x19cf   :  { %5263 = vmatpush.msrb.mxu2 %v8296_v41 }
0x19d1   :  { %5264 = vmatpush.msrb.mxu2 %v8295_v34 }
0x19d9   :  { %v5043_v45 = vpop.permute.xlu1 %5042 }
0x19da   :  { %v5096_v33 = vsel %vm149_vm1, %v4789_v24, %v5043_v45  ;;  %v8294_v45 = vld [vmem:[%s13142_s6 + $0x1e0] sm:$0xff] }
0x19db   :  { %5265 = vmatpush.msrb.mxu2 %v8294_v45 }
0x19e3   :  { %v5059_v6 = vpop.permute.xlu2 %5058 }
0x19fd   :  { %v5045_v21 = vpop.permute.xlu0 %5044 }
0x19fe   :  { %v5097_v31 = vsel %vm149_vm1, %v4792_v23, %v5045_v21 }
0x1a01   :  { %v5053_v5 = vpop.permute.xlu2 %5052 }
0x1a02   :  { %v5099_v49 = vsel %vm1149_vm4, %v5097_v31, %v5053_v5  ;;  %v8289_v31 = vld [vmem:[%s13142_s6 + $0x1b8] sm:$0xff] }
0x1a11   :  { %v5051_v1 = vpop.permute.xlu0 %5050 }
0x1a12   :  { %v5098_v55 = vsel %vm1149_vm4, %v5096_v33, %v5051_v1  ;;  %v8293_v33 = vld [vmem:[%s13142_s6 + $0x1d8] sm:$0xff] }
0x1a13   :  { %v5100_v56 = vsel %vm1152_vm5, %v5098_v55, %v5059_v6  ;;  %5266 = vmatpush.msrb.mxu2 %v8293_v33  ;;  %v8300_v33 = vld [vmem:[%s13137_s1 + $0x90] sm:$0xff] }
0x1a19   :  { %v5083_v3 = vpop.permute.xlu2 %5082 }
0x1a21   :  { %v5077_v44 = vpop.permute.xlu2 %5076 }
0x1a28   :  { %v5067_v51 = vpop.permute.xlu1 %5066  ;;  %v5075_v18 = vpop.permute.xlu0 %5074 }
0x1a29   :  { %v5102_v54 = vsel %vm426_vm3, %v5100_v56, %v5067_v51 }
0x1a2a   :  { %v5104_v30 = vsel %vm1157_vm6, %v5102_v54, %v5075_v18  ;;  %v8292_v18 = vld [vmem:[%s13142_s6 + $0x1d0] sm:$0xff]  ;;  %v8290_v54 = vld [vmem:[%s13142_s6 + $0x1c0] sm:$0xff] }
0x1a2b   :  { %v5106_v61 = vsel %vm1160_vm7, %v5104_v30, %v5083_v3  ;;  %5267 = vmatpush.msrb.mxu2 %v8292_v18  ;;  %v5195_v3 = vperm.slane %v11779_v0, 2 }
0x1a30   :  { %v5061_v43 = vpop.permute.xlu1 %5060  ;;  %v5069_v8 = vpop.permute.xlu0 %5068 }
0x1a31   :  { %v5101_v28 = vsel %vm1152_vm5, %v5099_v49, %v5061_v43  ;;  %v8291_v43 = vld [vmem:[%s13142_s6 + $0x1c8] sm:$0xff]  ;;  %v8288_v49 = vld [vmem:[%s13142_s6 + $0x1b0] sm:$0xff] }
0x1a32   :  { %v5103_v9 = vsel %vm426_vm3, %v5101_v28, %v5069_v8  ;;  %5268 = vmatpush.msrb.mxu2 %v8291_v43  ;;  %v5200_v28 = vperm.slane %v11779_v0, 3 }
0x1a33   :  { %v5105_v10 = vsel %vm1157_vm6, %v5103_v9, %v5077_v44 }
0x1a34   :  { %5269 = vmatpush.msrb.mxu2 %v8290_v54 }
0x1a36   :  { %5270 = vmatpush.msrb.mxu2 %v8289_v31 }
0x1a38   :  { %v5091_v25 = vpop.permute.xlu1 %5090  ;;  %5271 = vmatpush.msrb.mxu2 %v8288_v49 }
0x1a39   :  { %v5108_v52 = vsel %vm13251_vm11, %v5106_v61, %v5091_v25  ;;  %v5093_v50 = vpop.permute.xlu0 %5092 }
0x1a3a   :  { %8273 = vmatmul.msk.f32.vlgmr.msra.gmra.mxu0 %vm13252_vm10, %v5108_v52 }
0x1a40   :  { %v5085_v13 = vpop.permute.xlu1 %5084 }
0x1a41   :  { %v5107_v53 = vsel %vm1160_vm7, %v5105_v10, %v5085_v13  ;;  %v8287_v13 = vld [vmem:[%s13142_s6 + $0x1a8] sm:$0xff] }
0x1a42   :  { %v5109_v57 = vsel %vm13253_vm12, %v5107_v53, %v5093_v50  ;;  %v8286_v53 = vld [vmem:[%s13142_s6 + $0x1a0] sm:$0xff]  ;;  %5272 = vmatpush.msrb.mxu2 %v8287_v13 }
0x1a43   :  { %8274 = vmatmul.msk.f32.gmra.mxu0 %vm13254_vm13, %v5109_v57  ;;  %vm13259_vm13 = vmmov %vm13255_vm0 }
0x1a44   :  { %5273 = vmatpush.msrb.mxu2 %v8286_v53 }
0x1ab7   :  { %v5141_v37 = vpop.f32.mrf.mxu0 }
0x1ab8   :  { %v5142_v32 = vadd.f32 %v5141_v37, %v5117_v20  ;;  %v8285_v37 = vld [vmem:[%s13142_s6 + $0x198] sm:$0xff] }
0x1ab9   :  { %5274 = vmatpush.msrb.mxu2 %v8285_v37 }
0x1aba   :  { %v11783_v14 = vadd.f32 %v5142_v32, %v11169_v38 }
0x1abc   :  { %v5149_v26 = vsel %vm13255_vm0, %v11783_v14, 0.0  ;;  %v5157_v17 = vmul.f32 %v11783_v14, %v11783_v14 }
0x1abd   :  { %5150 = vadd.xlane.f32.xlu2 %v5149_v26 }
0x1abe   :  { %v5159_v11 = vsel %vm13256_vm8, %v5157_v17, 0.0  ;;  %vm13260_vm8 = vmmov %vm13257_vm2 }
0x1abf   :  { %5160 = vadd.xlane.f32.xlu1 %v5159_v11 }
0x1ac0   :  { %v5144_v36 = vpop.f32.mrf.mxu0 }
0x1ac1   :  { %v5145_v35 = vadd.f32 %v5144_v36, %v5117_v20 }
0x1ac3   :  { %v11791_v48 = vadd.f32 %v5145_v35, %v11173_v19  ;;  %v8284_v35 = vld [vmem:[%s13142_s6 + $0x190] sm:$0xff] }
0x1ac4   :  { %5275 = vmatpush.msrb.mxu2 %v8284_v35 }
0x1ac5   :  { %v5152_v39 = vsel %vm13257_vm2, %v11791_v48, 0.0  ;;  %v5158_v38 = vmul.f32 %v11791_v48, %v11791_v48 }
0x1ac6   :  { %5153 = vadd.xlane.f32.xlu0 %v5152_v39  ;;  %v8283_v39 = vld [vmem:[%s13142_s6 + $0x188] sm:$0xff] }
0x1ac7   :  { %v5162_v59 = vsel %vm13258_vm9, %v5158_v38, 0.0  ;;  %v8282_v38 = vld [vmem:[%s13142_s6 + $0x180] sm:$0xff]  ;;  %5276 = vmatpush.msrb.mxu2 %v8283_v39  ;;  %vm13261_vm9 = vmmov %vm13257_vm2 }
0x1ac8   :  { %5163 = vadd.xlane.f32.xlu2 %v5162_v59 }
0x1ac9   :  { %5277 = vmatpush.msrb.mxu2 %v8282_v38 }
0x1b30   :  { %v5151_v42 = vpop.xlane.xlu2 %5150 }
0x1b31   :  { %v5155_v2 = vmul.f32 %v5151_v42, %v9812_v62 }
0x1b32   :  { %v5161_v24 = vpop.xlane.xlu1 %5160 }
0x1b33   :  { %v5167_v19 = vmul.f32 %v5155_v2, %v5155_v2  ;;  %v5165_v23 = vmul.f32 %v5161_v24, %v9812_v62  ;;  %v5171_v52 = vsub.f32 %v11783_v14, %v5155_v2 }
0x1b35   :  { %v5169_v46 = vsub.f32 %v5165_v23, %v5167_v19  ;;  %v5261_v23 = vperm.slane %v11779_v0, 1 }
0x1b37   :  { %v5173_v7 = vadd.f32 1e-05, %v5169_v46 }
0x1b39   :  { %9028 = vrsqrt.f32 %v5173_v7  ;;  %v5154_v47 = vpop.xlane.xlu0 %5153  ;;  %vm5181_vm14 = vweird.f32 %v5173_v7 }
0x1b3a   :  { %v11813_v16 = vmul.f32 %v5154_v47, %v9812_v62 }
0x1b3b   :  { %v5164_v22 = vpop.xlane.xlu2 %5163 }
0x1b3c   :  { %v5168_v27 = vmul.f32 %v11813_v16, %v11813_v16  ;;  %v5166_v40 = vmul.f32 %v5164_v22, %v9812_v62  ;;  %v5172_v26 = vsub.f32 %v11791_v48, %v11813_v16  ;;  %v8741_v48 = vld [vmem:[%s13141_s5 + $0x3] ss:$0 sm:$0xff] }
0x1b3e   :  { %v5170_v21 = vsub.f32 %v5166_v40, %v5168_v27 }
0x1b3f   :  { %v9029_v6 = vpop.eup %9028 }
0x1b40   :  { %v5176_v1 = vmul.f32 %v9029_v6, %v5173_v7  ;;  %v5174_v51 = vadd.f32 1e-05, %v5170_v21  ;;  %vm5182_vm15 = vweird.f32 %v9029_v6 }
0x1b41   :  { %vm5183_vm11 = vmor %vm5181_vm14, %vm5182_vm15 }
0x1b42   :  { %v5177_v5 = vmul.f32 %v9029_v6, %v5176_v1  ;;  %9030 = vrsqrt.f32 %v5174_v51  ;;  %vm5191_vm12 = vweird.f32 %v5174_v51  ;;  %vm13262_vm15 = vmmov %vm13257_vm2 }
0x1b43   :  { %vm13263_vm14 = vmmov %vm13257_vm2 }
0x1b44   :  { %v5178_v55 = vmul.f32 0.5, %v5177_v5  ;;  %v8299_v5 = vld [vmem:[%s13137_s1 + $0x88] sm:$0xff] }
0x1b46   :  { %v5179_v56 = vsub.f32 1.5, %v5178_v55  ;;  %v8298_v55 = vld [vmem:[%s13137_s1 + $0x80] sm:$0xff] }
0x1b48   :  { %v9031_v30 = vpop.eup %9030  ;;  %v5180_v8 = vmul.f32 %v9029_v6, %v5179_v56 }
0x1b49   :  { %v5186_v61 = vmul.f32 %v9031_v30, %v5174_v51  ;;  %vm5192_vm10 = vweird.f32 %v9031_v30 }
0x1b4a   :  { %v5184_v25 = vsel %vm5183_vm11, %v9029_v6, %v5180_v8  ;;  %vm5193_vm0 = vmor %vm5191_vm12, %vm5192_vm10  ;;  %v8301_v6 = vld [vmem:[%s13137_s1 + $0x98] sm:$0xff] }
0x1b4b   :  { %v5196_v9 = vmul.f32 %v5195_v3, %v5184_v25  ;;  %v5187_v44 = vmul.f32 %v9031_v30, %v5186_v61  ;;  %5369 = vmatpush.msra.mxu3 %v8301_v6 }
0x1b4d   :  { %v5198_v10 = vmul.f32 %v5196_v9, %v5171_v52  ;;  %v5188_v50 = vmul.f32 0.5, %v5187_v44  ;;  %5370 = vmatpush.msra.mxu3 %v8300_v33  ;;  %v5333_v44 = vperm.slane %v11779_v0, 4 }
0x1b4f   :  { %v5201_v57 = vadd.f32 %v5200_v28, %v5198_v10  ;;  %v5189_v20 = vsub.f32 1.5, %v5188_v50  ;;  %5371 = vmatpush.msra.mxu3 %v8299_v5 }
0x1b51   :  { %v5190_v32 = vmul.f32 %v9031_v30, %v5189_v20  ;;  %8280 = vmatmul.msk.f32.vlgmr.msra.gmra.mxu1 %vm13259_vm13, %v5201_v57  ;;  %5372 = vmatpush.msra.mxu3 %v8298_v55  ;;  %v5338_v20 = vperm.slane %v11779_v0, 5  ;;  %v8742_v0 = vld [vmem:[%s13138_s2 + $0x4] ss:$0 sm:$0xff] }
0x1b53   :  { %v5194_v14 = vsel %vm5193_vm0, %v9031_v30, %v5190_v32 }
0x1b54   :  { %v5197_v17 = vmul.f32 %v5195_v3, %v5194_v14 }
0x1b56   :  { %v5199_v11 = vmul.f32 %v5197_v17, %v5172_v26 }
0x1b58   :  { %v5202_v36 = vadd.f32 %v5200_v28, %v5199_v11 }
0x1b5a   :  { %8281 = vmatmul.msk.f32.gmra.mxu1 %vm13260_vm8, %v5202_v36  ;;  %vm13264_vm8 = vmmov %vm13257_vm2 }
0x1bce   :  { %v5236_v59 = vpop.f32.mrf.mxu1 }
0x1bcf   :  { %v5237_v42 = vadd.f32 %v8741_v48, %v5236_v59 }
0x1bd1   :  { %v5242_v2 = vmax.f32 %v5237_v42, 0.0 }
0x1bd3   :  { %5278 = vmatmul.f32.vlgmr.msrb.gmra.mxu2 %v5242_v2 }
0x1bd7   :  { %v5239_v24 = vpop.f32.mrf.mxu1 }
0x1bd8   :  { %v5240_v15 = vadd.f32 %v8741_v48, %v5239_v24 }
0x1bda   :  { %v5243_v19 = vmax.f32 %v5240_v15, 0.0 }
0x1bdc   :  { %5281 = vmatmul.f32.gmra.mxu2 %v5243_v19 }
0x1c56   :  { %v5279_v58 = vpop.f32.mrf.mxu2 }
0x1c57   :  { %v5280_v29 = vadd.f32 %v5279_v58, %v5261_v23 }
0x1c59   :  { %v5285_v46 = vadd.f32 %v5280_v29, %v5201_v57 }
0x1c5b   :  { %v5287_v4 = vsel %vm13257_vm2, %v5285_v46, 0.0  ;;  %v5295_v7 = vmul.f32 %v5285_v46, %v5285_v46 }
0x1c5c   :  { %5288 = vadd.xlane.f32.xlu1 %v5287_v4 }
0x1c5d   :  { %v5297_v47 = vsel %vm13261_vm9, %v5295_v7, 0.0  ;;  %vm13265_vm9 = vmmov %vm13264_vm8 }
0x1c5e   :  { %5298 = vadd.xlane.f32.xlu0 %v5297_v47 }
0x1c5f   :  { %v5282_v16 = vpop.f32.mrf.mxu2 }
0x1c60   :  { %v5283_v60 = vadd.f32 %v5282_v16, %v5261_v23 }
0x1c62   :  { %v5286_v41 = vadd.f32 %v5283_v60, %v5202_v36 }
0x1c64   :  { %v5290_v22 = vsel %vm13262_vm15, %v5286_v41, 0.0  ;;  %v5296_v27 = vmul.f32 %v5286_v41, %v5286_v41 }
0x1c65   :  { %5291 = vadd.xlane.f32.xlu2 %v5290_v22 }
0x1c66   :  { %v5300_v40 = vsel %vm13263_vm14, %v5296_v27, 0.0 }
0x1c67   :  { %5301 = vadd.xlane.f32.xlu1 %v5300_v40 }
0x1ccf   :  { %v5289_v34 = vpop.xlane.xlu1 %5288 }
0x1cd0   :  { %v5293_v21 = vmul.f32 %v5289_v34, %v9812_v62 }
0x1cd1   :  { %v5299_v45 = vpop.xlane.xlu0 %5298 }
0x1cd2   :  { %v5305_v1 = vmul.f32 %v5293_v21, %v5293_v21  ;;  %v5303_v51 = vmul.f32 %v5299_v45, %v9812_v62  ;;  %v5309_v57 = vsub.f32 %v5285_v46, %v5293_v21 }
0x1cd4   :  { %v5307_v18 = vsub.f32 %v5303_v51, %v5305_v1 }
0x1cd6   :  { %v5311_v43 = vadd.f32 1e-05, %v5307_v18 }
0x1cd8   :  { %9032 = vrsqrt.f32 %v5311_v43  ;;  %v5292_v56 = vpop.xlane.xlu2 %5291  ;;  %vm5319_vm10 = vweird.f32 %v5311_v43 }
0x1cd9   :  { %v5294_v54 = vmul.f32 %v5292_v56, %v9812_v62 }
0x1cda   :  { %v5302_v3 = vpop.xlane.xlu1 %5301 }
0x1cdb   :  { %v5306_v30 = vmul.f32 %v5294_v54, %v5294_v54  ;;  %v5304_v8 = vmul.f32 %v5302_v3, %v9812_v62  ;;  %v5310_v39 = vsub.f32 %v5286_v41, %v5294_v54 }
0x1cdd   :  { %v5308_v31 = vsub.f32 %v5304_v8, %v5306_v30 }
0x1cde   :  { %v9033_v61 = vpop.eup %9032 }
0x1cdf   :  { %v5314_v25 = vmul.f32 %v9033_v61, %v5311_v43  ;;  %v5312_v49 = vadd.f32 1e-05, %v5308_v31  ;;  %vm5320_vm11 = vweird.f32 %v9033_v61 }
0x1ce0   :  { %vm5321_vm12 = vmor %vm5319_vm10, %vm5320_vm11 }
0x1ce1   :  { %v5315_v52 = vmul.f32 %v9033_v61, %v5314_v25  ;;  %9034 = vrsqrt.f32 %v5312_v49  ;;  %vm5329_vm0 = vweird.f32 %v5312_v49 }
0x1ce3   :  { %v5316_v28 = vmul.f32 0.5, %v5315_v52 }
0x1ce5   :  { %v5317_v9 = vsub.f32 1.5, %v5316_v28 }
0x1ce7   :  { %v9035_v13 = vpop.eup %9034  ;;  %v5318_v10 = vmul.f32 %v9033_v61, %v5317_v9 }
0x1ce8   :  { %v5324_v50 = vmul.f32 %v9035_v13, %v5312_v49  ;;  %vm5330_vm13 = vweird.f32 %v9035_v13 }
0x1ce9   :  { %v5322_v53 = vsel %vm5321_vm12, %v9033_v61, %v5318_v10  ;;  %vm5331_vm2 = vmor %vm5329_vm0, %vm5330_vm13 }
0x1cea   :  { %v5334_v37 = vmul.f32 %v5333_v44, %v5322_v53  ;;  %v5325_v32 = vmul.f32 %v9035_v13, %v5324_v50 }
0x1cec   :  { %v5336_v14 = vmul.f32 %v5334_v37, %v5309_v57  ;;  %v5326_v26 = vmul.f32 0.5, %v5325_v32 }
0x1cee   :  { %v11899_v17 = vadd.f32 %v5338_v20, %v5336_v14  ;;  %v5327_v11 = vsub.f32 1.5, %v5326_v26 }
0x1cf0   :  { %v5328_v36 = vmul.f32 %v9035_v13, %v5327_v11  ;;  %8303 = vmatmul.msk.f32.vlgmr.msra.gmra.mxu3 %vm13264_vm8, %v11899_v17 }
0x1cf2   :  { %v5332_v35 = vsel %vm5331_vm2, %v9035_v13, %v5328_v36 }
0x1cf3   :  { %v5335_v38 = vmul.f32 %v5333_v44, %v5332_v35 }
0x1cf5   :  { %v5337_v48 = vmul.f32 %v5335_v38, %v5310_v39 }
0x1cf7   :  { %v11903_v59 = vadd.f32 %v5338_v20, %v5337_v48 }
0x1cf9   :  { %8304 = vmatmul.msk.f32.gmra.mxu3 %vm13265_vm9, %v11903_v59 }
0x1d73   :  { %v5374_v42 = vpop.f32.mrf.mxu3 }
0x1d74   :  { %v5375_v2 = vadd.f32 %v8742_v0, %v5374_v42 }
0x1d76   :  { %5382 = vrot.lane.b32.xlu0 %v5375_v2, %s9210_s21  ;;  %5386 = vrot.lane.b32.xlu2 %v5375_v2, %s9209_s20 }
0x1d7c   :  { %v5377_v24 = vpop.f32.mrf.mxu3 }
0x1d7d   :  { %v5378_v15 = vadd.f32 %v8742_v0, %v5377_v24 }
0x1d7e   :  { %5390 = vrot.lane.b32.xlu2 %v5375_v2, %s9208_s19 }
0x1d7f   :  { %5384 = vrot.lane.b32.xlu1 %v5378_v15, %s9210_s21  ;;  %5388 = vrot.lane.b32.xlu0 %v5378_v15, %s9209_s20  ;;  %v8659_v51 = vpack.i.bf16 %v5375_v2, %v5378_v15 }
0x1d86   :  { %5392 = vrot.lane.b32.xlu2 %v5378_v15, %s9208_s19 }
0x1d87   :  { %5404 = vrot.lane.b32.xlu1 %v5378_v15, %s9212_s23  ;;  %5400 = vrot.lane.b32.xlu0 %v5378_v15, %s9211_s22 }
0x1d8e   :  { %5396 = vrot.lane.b32.xlu2 %v5378_v15, %s9214_s25 }
0x1d8f   :  { %5402 = vrot.lane.b32.xlu1 %v5375_v2, %s9212_s23  ;;  %5398 = vrot.lane.b32.xlu0 %v5375_v2, %s9211_s22 }
0x1d96   :  { %5406 = vrot.lane.b32.xlu2 %v5375_v2, %s9213_s24 }
0x1d97   :  { %5394 = vrot.lane.b32.xlu1 %v5375_v2, %s9214_s25  ;;  %5408 = vrot.lane.b32.xlu0 %v5378_v15, %s9213_s24 }
0x1d9e   :  { %5410 = vrot.lane.b32.xlu2 %v5375_v2, %s9215_s26 }
0x1d9f   :  { %5412 = vrot.lane.b32.xlu0 %v5378_v15, %s9215_s26 }
0x1dd0   :  { %v5387_v19 = vpop.permute.xlu2 %5386 }
0x1dd1   :  { %5480 = vrot.lane.b32.xlu0 %v5387_v19, %s9215_s26 }
0x1dd8   :  { %v5391_v23 = vpop.permute.xlu2 %5390 }
0x1de0   :  { %v5393_v58 = vpop.permute.xlu2 %5392 }
0x1de1   :  { %5517 = vrot.lane.b32.xlu0 %v5393_v58, %s9215_s26  ;;  %v8669_v40 = vpack.i.bf16 %v5391_v23, %v5393_v58 }
0x1de8   :  { %v11928_v29 = vpop.permute.xlu0 %5382  ;;  %v11933_v46 = vpop.permute.xlu2 %5396 }
0x1de9   :  { %5445 = vrot.lane.b32.xlu2 %v11928_v29, %s9215_s26  ;;  %5515 = vrot.lane.b32.xlu0 %v5391_v23, %s9215_s26  ;;  %v8654_v45 = vpack.i.bf16 %v5387_v19, %v11928_v29 }
0x1df0   :  { %v11940_v47 = vpop.permute.xlu2 %5406 }
0x1df1   :  { %v11935_v4 = vpop.permute.xlu1 %5384  ;;  %v5389_v7 = vpop.permute.xlu0 %5388  ;;  %5552 = vrot.lane.b32.xlu0 %v11933_v46, %s9215_s26 }
0x1df2   :  { %5482 = vrot.lane.b32.xlu1 %v5389_v7, %s9215_s26  ;;  %v8664_v41 = vpack.i.bf16 %v5389_v7, %v11935_v4 }
0x1df8   :  { %v5411_v1 = vpop.permute.xlu2 %5410 }
0x1df9   :  { %v11942_v16 = vpop.permute.xlu1 %5404  ;;  %v11944_v60 = vpop.permute.xlu0 %5400  ;;  %5655 = vrot.lane.b32.xlu0 %v11940_v47, %s9215_s26 }
0x1dfa   :  { %5622 = vrot.lane.b32.xlu2 %v11942_v16, %s9215_s26  ;;  %5447 = vrot.lane.b32.xlu1 %v11935_v4, %s9215_s26 }
0x1e01   :  { %v11953_v22 = vpop.permute.xlu1 %5402  ;;  %v11955_v27 = vpop.permute.xlu0 %5398  ;;  %8665 = vrot.lane.b32.xlu0 %v8664_v41, %s9216_s27 }
0x1e02   :  { %5620 = vrot.lane.b32.xlu2 %v11953_v22, %s9215_s26  ;;  %5587 = vrot.lane.b32.xlu1 %v11944_v60, %s9215_s26 }
0x1e09   :  { %v11962_v34 = vpop.permute.xlu1 %5394  ;;  %v11964_v21 = vpop.permute.xlu0 %5408  ;;  %8670 = vrot.lane.b32.xlu0 %v8669_v40, %s9216_s27 }
0x1e0a   :  { %5550 = vrot.lane.b32.xlu2 %v11962_v34, %s9215_s26  ;;  %5585 = vrot.lane.b32.xlu1 %v11955_v27, %s9215_s26 }
0x1e11   :  { %v5413_v6 = vpop.permute.xlu0 %5412 }
0x1e12   :  { %5657 = vrot.lane.b32.xlu1 %v11964_v21, %s9215_s26  ;;  %8305 = vmatpush.xpose.msk.msrb.mxu0 %vm149_vm1, %v5413_v6 }
0x1e13   :  { %8655 = vrot.lane.b32.xlu2 %v8654_v45, %s9216_s27 }
0x1e16   :  { %8306 = vmatpush.xpose.msk.msrb.mxu0 %vm149_vm1, %v5411_v1 }
0x1e19   :  { %8307 = vmatmul.msk.f32.vlgmr.msrb.gmra.mxu0 %vm149_vm1, %v5375_v2 }
0x1e1a   :  { %8660 = vrot.lane.b32.xlu1 %v8659_v51, %s9216_s27 }
0x1e21   :  { %8308 = vmatmul.msk.f32.gmra.mxu0 %vm149_vm1, %v5378_v15 }
0x1e43   :  { %v5481_v33 = vpop.permute.xlu0 %5480  ;;  %v5446_v5 = vpop.permute.xlu2 %5445 }
0x1e53   :  { %v5518_v18 = vpop.permute.xlu0 %5517 }
0x1e54   :  { %8317 = vmatpush.xpose.msk.msra.mxu0 %vm149_vm1, %v5518_v18  ;;  %v5623_v55 = vpop.permute.xlu2 %5622 }
0x1e5b   :  { %v5516_v43 = vpop.permute.xlu0 %5515 }
0x1e5c   :  { %8318 = vmatpush.xpose.msk.msra.mxu0 %vm149_vm1, %v5516_v43  ;;  %v5621_v56 = vpop.permute.xlu2 %5620 }
0x1e5f   :  { %8319 = vmatmul.msk.f32.vlgmr.msra.gmra.mxu0 %vm149_vm1, %v5391_v23 }
0x1e63   :  { %v5553_v54 = vpop.permute.xlu0 %5552 }
0x1e64   :  { %v5483_v3 = vpop.permute.xlu1 %5482  ;;  %v5551_v30 = vpop.permute.xlu2 %5550 }
0x1e65   :  { %8313 = vmatpush.xpose.msk.msrb.mxu3 %vm149_vm1, %v5483_v3 }
0x1e67   :  { %8320 = vmatmul.msk.f32.gmra.mxu0 %vm149_vm1, %v5393_v58 }
0x1e69   :  { %8314 = vmatpush.xpose.msk.msrb.mxu3 %vm149_vm1, %v5481_v33 }
0x1e6b   :  { %v5656_v8 = vpop.permute.xlu0 %5655 }
0x1e6c   :  { %v5448_v31 = vpop.permute.xlu1 %5447  ;;  %8315 = vmatmul.msk.f32.vlgmr.msrb.gmra.mxu3 %vm149_vm1, %v5387_v19 }
0x1e6d   :  { %8329 = vmatpush.xpose.msk.msra.mxu3 %vm149_vm1, %v5623_v55  ;;  %8309 = vmatpush.xpose.msk.msrb.mxu1 %vm149_vm1, %v5448_v31  ;;  %v8656_v61 = vpop.permute.xlu2 %8655 }
0x1e6e   :  { %v8658_v28 = vunpack.i.h.bf16 %v8656_v61  ;;  %v8657_v13 = vunpack.i.l.bf16 %v8656_v61 }
0x1e71   :  { %8330 = vmatpush.xpose.msk.msra.mxu3 %vm149_vm1, %v5621_v56  ;;  %8310 = vmatpush.xpose.msk.msrb.mxu1 %vm149_vm1, %v5446_v5 }
0x1e73   :  { %v8666_v25 = vpop.permute.xlu0 %8665 }
0x1e74   :  { %v8668_v49 = vunpack.i.h.bf16 %v8666_v25  ;;  %v5588_v52 = vpop.permute.xlu1 %5587  ;;  %8311 = vmatmul.msk.f32.vlgmr.msrb.gmra.mxu1 %vm149_vm1, %v11928_v29  ;;  %8316 = vmatmul.msk.f32.gmra.mxu3 %vm149_vm1, %v5389_v7  ;;  %v8667_v9 = vunpack.i.l.bf16 %v8666_v25 }
0x1e75   :  { %8321 = vmatpush.xpose.msk.msra.mxu1 %vm149_vm1, %v5553_v54  ;;  %8325 = vmatpush.xpose.msk.msra.mxu2 %vm149_vm1, %v5588_v52 }
0x1e76   :  { %6170 = vmatpush.msrb.mxu3 %v8668_v49 }
0x1e78   :  { %6171 = vmatpush.msrb.mxu3 %v8658_v28 }
0x1e79   :  { %8322 = vmatpush.xpose.msk.msra.mxu1 %vm149_vm1, %v5551_v30 }
0x1e7b   :  { %v8671_v50 = vpop.permute.xlu0 %8670 }
0x1e7c   :  { %v5586_v44 = vpop.permute.xlu1 %5585  ;;  %8312 = vmatmul.msk.f32.gmra.mxu1 %vm149_vm1, %v11935_v4  ;;  %8331 = vmatmul.msk.f32.vlgmr.msra.gmra.mxu3 %vm149_vm1, %v11953_v22  ;;  %v8672_v53 = vunpack.i.l.bf16 %v8671_v50  ;;  %v8673_v57 = vunpack.i.h.bf16 %v8671_v50 }
0x1e7d   :  { %8326 = vmatpush.xpose.msk.msra.mxu2 %vm149_vm1, %v5586_v44 }
0x1e80   :  { %8327 = vmatmul.msk.f32.vlgmr.msra.gmra.mxu2 %vm149_vm1, %v11955_v27 }
0x1e81   :  { %6135 = vmatpush.msrb.mxu2 %v8667_v9 }
0x1e83   :  { %6136 = vmatpush.msrb.mxu2 %v8657_v13 }
0x1e84   :  { %v5658_v10 = vpop.permute.xlu1 %5657  ;;  %8323 = vmatmul.msk.f32.vlgmr.msra.gmra.mxu1 %vm149_vm1, %v11962_v34  ;;  %8332 = vmatmul.msk.f32.gmra.mxu3 %vm149_vm1, %v11942_v16 }
0x1e85   :  { %8333 = vmatpush.xpose.msk.msrb.mxu0 %vm149_vm1, %v5658_v10 }
0x1e88   :  { %8328 = vmatmul.msk.f32.gmra.mxu2 %vm149_vm1, %v11944_v60 }
0x1e89   :  { %8334 = vmatpush.xpose.msk.msrb.mxu0 %vm149_vm1, %v5656_v8 }
0x1e8c   :  { %v8661_v20 = vpop.permute.xlu1 %8660  ;;  %8324 = vmatmul.msk.f32.gmra.mxu1 %vm149_vm1, %v11933_v46  ;;  %8335 = vmatmul.msk.f32.vlgmr.msrb.gmra.mxu0 %vm149_vm1, %v11940_v47 }
0x1e8d   :  { %6205 = vmatpush.msra.mxu0 %v8672_v53  ;;  %v8662_v37 = vunpack.i.l.bf16 %v8661_v20  ;;  %v8663_v32 = vunpack.i.h.bf16 %v8661_v20 }
0x1e8f   :  { %6206 = vmatpush.msra.mxu0 %v8673_v57  ;;  %6100 = vmatpush.msrb.mxu1 %v8662_v37 }
0x1e91   :  { %6101 = vmatpush.msrb.mxu1 %v8663_v32 }
0x1e94   :  { %8336 = vmatmul.msk.f32.gmra.mxu0 %vm149_vm1, %v11964_v21 }
0x1e96   :  { %v5439_v14 = vpop.f32.mrf.mxu0 }
0x1e97   :  { %v5440_v26 = vadd.f32 %v5439_v14, %v9425_v63 }
0x1e99   :  { %v5690_v11 = vsel %vm426_vm3, %v5440_v26, -inf }
0x1e9a   :  { %5691 = vmax.xlane.f32.xlu0 %v5690_v11 }
0x1e9e   :  { %v5442_v36 = vpop.f32.mrf.mxu0 }
0x1e9f   :  { %v5443_v35 = vadd.f32 %v5442_v36, %v9433_v12 }
0x1ea1   :  { %v5693_v39 = vsel %vm426_vm3, %v5443_v35, -inf }
0x1ea2   :  { %5694 = vmax.xlane.f32.xlu2 %v5693_v39 }
0x1edc   :  { %v5544_v24 = vpop.f32.mrf.mxu0 }
0x1edd   :  { %v12033_v19 = vadd.f32 %v5544_v24, %v9425_v63 }
0x1edf   :  { %v5708_v4 = vsel %vm426_vm3, %v12033_v19, -inf }
0x1ee4   :  { %v5547_v7 = vpop.f32.mrf.mxu0 }
0x1ee5   :  { %v12043_v41 = vadd.f32 %v5547_v7, %v9433_v12 }
0x1ee7   :  { %v5711_v6 = vsel %vm426_vm3, %v12043_v41, -inf }
0x1eef   :  { %v5509_v38 = vpop.f32.mrf.mxu3 }
0x1ef0   :  { %v12023_v48 = vadd.f32 %v5509_v38, %v9425_v63 }
0x1ef1   :  { %v5474_v0 = vpop.f32.mrf.mxu1 }
0x1ef2   :  { %v12026_v42 = vadd.f32 %v5474_v0, %v9425_v63  ;;  %v5702_v2 = vsel %vm426_vm3, %v12023_v48, -inf }
0x1ef3   :  { %5703 = vmax.xlane.f32.xlu2 %v5702_v2 }
0x1ef4   :  { %v5696_v15 = vsel %vm426_vm3, %v12026_v42, -inf }
0x1ef5   :  { %5697 = vmax.xlane.f32.xlu1 %v5696_v15 }
0x1ef7   :  { %v5512_v33 = vpop.f32.mrf.mxu3 }
0x1ef8   :  { %v12056_v18 = vadd.f32 %v5512_v33, %v9433_v12 }
0x1ef9   :  { %v5477_v23 = vpop.f32.mrf.mxu1 }
0x1efa   :  { %v12036_v58 = vadd.f32 %v5477_v23, %v9433_v12  ;;  %v5705_v54 = vsel %vm426_vm3, %v12056_v18, -inf }
0x1efc   :  { %v5699_v29 = vsel %vm426_vm3, %v12036_v58, -inf }
0x1efd   :  { %5700 = vmax.xlane.f32.xlu2 %v5699_v29  ;;  %5709 = vmax.xlane.f32.xlu1 %v5708_v4 }
0x1eff   :  { %v5649_v28 = vpop.f32.mrf.mxu3 }
0x1f00   :  { %v12086_v14 = vadd.f32 %v5649_v28, %v9425_v63 }
0x1f01   :  { %v5579_v1 = vpop.f32.mrf.mxu1 }
0x1f02   :  { %v12053_v5 = vadd.f32 %v5579_v1, %v9425_v63  ;;  %v5726_v11 = vsel %vm426_vm3, %v12086_v14, -inf }
0x1f03   :  { %v5614_v40 = vpop.f32.mrf.mxu2 }
0x1f04   :  { %v12046_v45 = vadd.f32 %v5614_v40, %v9425_v63  ;;  %v5714_v55 = vsel %vm426_vm3, %v12053_v5, -inf }
0x1f05   :  { %5712 = vmax.xlane.f32.xlu1 %v5711_v6 }
0x1f06   :  { %v5720_v51 = vsel %vm426_vm3, %v12046_v45, -inf }
0x1f07   :  { %5721 = vmax.xlane.f32.xlu0 %v5720_v51  ;;  %v5652_v32 = vpop.f32.mrf.mxu3 }
0x1f09   :  { %v5582_v49 = vpop.f32.mrf.mxu1  ;;  %v5684_v10 = vpop.f32.mrf.mxu0 }
0x1f0a   :  { %v12072_v13 = vadd.f32 %v5582_v49, %v9433_v12  ;;  %v12075_v50 = vadd.f32 %v5684_v10, %v9425_v63 }
0x1f0b   :  { %v5617_v3 = vpop.f32.mrf.mxu2 }
0x1f0c   :  { %v12063_v8 = vadd.f32 %v5617_v3, %v9433_v12  ;;  %v5717_v53 = vsel %vm426_vm3, %v12072_v13, -inf  ;;  %v5732_v20 = vsel %vm426_vm3, %v12075_v50, -inf }
0x1f0d   :  { %v5692_v43 = vpop.xlane.xlu0 %5691  ;;  %5715 = vmax.xlane.f32.xlu1 %v5714_v55 }
0x1f0e   :  { %v5738_v56 = vsub.f32 %v5440_v26, %v5692_v43  ;;  %v5723_v25 = vsel %vm426_vm3, %v12063_v8, -inf  ;;  %v12089_v26 = vadd.f32 %v5652_v32, %v9433_v12 }
0x1f0f   :  { %5706 = vmax.xlane.f32.xlu0 %v5705_v54 }
0x1f10   :  { %v5754_v30 = vmul.f32 1.442695, %v5738_v56  ;;  %v5729_v36 = vsel %vm426_vm3, %v12089_v26, -inf }
0x1f12   :  { %9036 = vpow2.f32 %v5754_v30 }
0x1f15   :  { %v5695_v31 = vpop.xlane.xlu2 %5694 }
0x1f16   :  { %v5739_v61 = vsub.f32 %v5443_v35, %v5695_v31  ;;  %v5687_v35 = vpop.f32.mrf.mxu0 }
0x1f17   :  { %5724 = vmax.xlane.f32.xlu0 %v5723_v25  ;;  %v12096_v39 = vadd.f32 %v5687_v35, %v9433_v12 }
0x1f18   :  { %v12067_v52 = vpop.eup %9036  ;;  %v5756_v9 = vmul.f32 1.442695, %v5739_v61 }
0x1f19   :  { %v5786_v44 = vsel %vm426_vm3, %v12067_v52, 0.0  ;;  %v5735_v38 = vsel %vm426_vm3, %v12096_v39, -inf }
0x1f1a   :  { %9038 = vpow2.f32 %v5756_v9  ;;  %5787 = vadd.xlane.f32.xlu2 %v5786_v44 }
0x1f1f   :  { %5718 = vmax.xlane.f32.xlu0 %v5717_v53 }
0x1f20   :  { %v12079_v57 = vpop.eup %9038 }
0x1f21   :  { %v5789_v37 = vsel %vm426_vm3, %v12079_v57, 0.0 }
0x1f22   :  { %5733 = vmax.xlane.f32.xlu2 %v5732_v20  ;;  %5790 = vadd.xlane.f32.xlu1 %v5789_v37 }
0x1f2a   :  { %5727 = vmax.xlane.f32.xlu2 %v5726_v11  ;;  %5730 = vmax.xlane.f32.xlu1 %v5729_v36 }
0x1f32   :  { %5736 = vmax.xlane.f32.xlu2 %v5735_v38 }
0x1f66   :  { %v5704_v0 = vpop.xlane.xlu2 %5703 }
0x1f67   :  { %v5742_v6 = vsub.f32 %v12023_v48, %v5704_v0 }
0x1f68   :  { %v5698_v2 = vpop.xlane.xlu1 %5697 }
0x1f69   :  { %v5740_v24 = vsub.f32 %v12026_v42, %v5698_v2  ;;  %v5762_v42 = vmul.f32 1.442695, %v5742_v6 }
0x1f6b   :  { %v5758_v15 = vmul.f32 1.442695, %v5740_v24 }
0x1f6d   :  { %9040 = vpow2.f32 %v5758_v15 }
0x1f70   :  { %v5710_v23 = vpop.xlane.xlu1 %5709  ;;  %v5701_v29 = vpop.xlane.xlu2 %5700 }
0x1f71   :  { %v5744_v4 = vsub.f32 %v12033_v19, %v5710_v23  ;;  %v5741_v7 = vsub.f32 %v12036_v58, %v5701_v29 }
0x1f73   :  { %v12103_v40 = vpop.eup %9040  ;;  %v5766_v1 = vmul.f32 1.442695, %v5744_v4  ;;  %v5760_v51 = vmul.f32 1.442695, %v5741_v7 }
0x1f74   :  { %v5792_v33 = vsel %vm426_vm3, %v12103_v40, 0.0 }
0x1f75   :  { %9042 = vpow2.f32 %v5766_v1  ;;  %5793 = vadd.xlane.f32.xlu1 %v5792_v33 }
0x1f76   :  { %9044 = vpow2.f32 %v5760_v51 }
0x1f77   :  { %9046 = vpow2.f32 %v5762_v42 }
0x1f78   :  { %v5713_v55 = vpop.xlane.xlu1 %5712 }
0x1f79   :  { %v5745_v19 = vsub.f32 %v12043_v41, %v5713_v55 }
0x1f7a   :  { %v5722_v43 = vpop.xlane.xlu0 %5721 }
0x1f7b   :  { %v12108_v56 = vpop.eup %9042  ;;  %v5748_v58 = vsub.f32 %v12046_v45, %v5722_v43  ;;  %v5768_v31 = vmul.f32 1.442695, %v5745_v19 }
0x1f7c   :  { %v12112_v54 = vpop.eup %9044  ;;  %v5804_v48 = vsel %vm426_vm3, %v12108_v56, 0.0 }
0x1f7d   :  { %v5774_v3 = vmul.f32 1.442695, %v5748_v58  ;;  %5805 = vadd.xlane.f32.xlu0 %v5804_v48  ;;  %v5795_v30 = vsel %vm426_vm3, %v12112_v54, 0.0  ;;  %v12118_v25 = vpop.eup %9046 }
0x1f7e   :  { %5796 = vadd.xlane.f32.xlu1 %v5795_v30  ;;  %v5798_v9 = vsel %vm426_vm3, %v12118_v25, 0.0 }
0x1f7f   :  { %9048 = vpow2.f32 %v5774_v3 }
0x1f80   :  { %v5716_v61 = vpop.xlane.xlu1 %5715  ;;  %9050 = vpow2.f32 %v5768_v31 }
0x1f81   :  { %v5746_v41 = vsub.f32 %v12053_v5, %v5716_v61 }
0x1f82   :  { %v5707_v49 = vpop.xlane.xlu0 %5706 }
0x1f83   :  { %v5770_v45 = vmul.f32 1.442695, %v5746_v41  ;;  %v5743_v28 = vsub.f32 %v12056_v18, %v5707_v49 }
0x1f85   :  { %v12124_v44 = vpop.eup %9048  ;;  %9052 = vpow2.f32 %v5770_v45  ;;  %v5764_v10 = vmul.f32 1.442695, %v5743_v28  ;;  %5799 = vadd.xlane.f32.xlu0 %v5798_v9 }
0x1f86   :  { %v5816_v53 = vsel %vm426_vm3, %v12124_v44, 0.0  ;;  %v12128_v20 = vpop.eup %9050 }
0x1f87   :  { %9054 = vpow2.f32 %v5764_v10  ;;  %5817 = vadd.xlane.f32.xlu2 %v5816_v53  ;;  %v5807_v32 = vsel %vm426_vm3, %v12128_v20, 0.0 }
0x1f8a   :  { %v5725_v5 = vpop.xlane.xlu0 %5724 }
0x1f8b   :  { %v12130_v37 = vpop.eup %9052  ;;  %v5749_v18 = vsub.f32 %v12063_v8, %v5725_v5 }
0x1f8c   :  { %v5810_v11 = vsel %vm426_vm3, %v12130_v37, 0.0 }
0x1f8d   :  { %v12137_v36 = vpop.eup %9054  ;;  %v5776_v35 = vmul.f32 1.442695, %v5749_v18  ;;  %5808 = vadd.xlane.f32.xlu0 %v5807_v32  ;;  %5811 = vadd.xlane.f32.xlu1 %v5810_v11  ;;  %v5788_v38 = vpop.xlane.xlu2 %5787 }
0x1f8e   :  { %9056 = vrcp.f32 %v5788_v38  ;;  %v5801_v0 = vsel %vm426_vm3, %v12137_v36, 0.0  ;;  %v5843_v1 = vand.u32 2147483647, %v5788_v38  ;;  %v5845_v51 = vand.u32 2147483648, %v5788_v38 }
0x1f8f   :  { %9058 = vpow2.f32 %v5776_v35  ;;  %5802 = vadd.xlane.f32.xlu2 %v5801_v0  ;;  %vm5839_vm14 = vweird.f32 %v5788_v38 }
0x1f90   :  { %v5846_v58 = vor.u32 1.1754944e-38, %v5845_v51  ;;  %vm5844_vm10 = vcmp.eq.f32.partialorder %v5843_v1, 8.507059e+37  ;;  %v8674_v1 = vpack.i.bf16 %v11942_v16, %v11944_v60 }
0x1f92   :  { %v5719_v29 = vpop.xlane.xlu0 %5718 }
0x1f93   :  { %v5747_v42 = vsub.f32 %v12072_v13, %v5719_v29 }
0x1f94   :  { %v9057_v2 = vpop.eup %9056 }
0x1f95   :  { %v12141_v8 = vpop.eup %9058  ;;  %v5835_v24 = vmul.f32 %v9057_v2, %v5788_v38  ;;  %v5791_v15 = vpop.xlane.xlu1 %5790  ;;  %vm5840_vm15 = vweird.f32 %v9057_v2 }
0x1f96   :  { %v5734_v23 = vpop.xlane.xlu2 %5733  ;;  %9060 = vrcp.f32 %v5791_v15  ;;  %v5819_v6 = vsel %vm426_vm3, %v12141_v8, 0.0  ;;  %vm5841_vm11 = vmor %vm5839_vm14, %vm5840_vm15  ;;  %v5857_v13 = vand.u32 2147483647, %v5791_v15  ;;  %v5859_v28 = vand.u32 2147483648, %v5791_v15 }
0x1f97   :  { %v5836_v4 = vsub.f32 1.0, %v5835_v24  ;;  %v5752_v7 = vsub.f32 %v12075_v50, %v5734_v23  ;;  %5820 = vadd.xlane.f32.xlu0 %v5819_v6  ;;  %v5772_v50 = vmul.f32 1.442695, %v5747_v42  ;;  %vm5853_vm13 = vweird.f32 %v5791_v15 }
0x1f98   :  { %vm5858_vm8 = vcmp.eq.f32.partialorder %v5857_v13, 8.507059e+37  ;;  %v8684_v6 = vpack.i.bf16 %v11962_v34, %v11933_v46 }
0x1f99   :  { %v5837_v33 = vmul.f32 %v9057_v2, %v5836_v4  ;;  %v5782_v55 = vmul.f32 1.442695, %v5752_v7 }
0x1f9b   :  { %v5838_v43 = vadd.f32 %v9057_v2, %v5837_v33  ;;  %9062 = vpow2.f32 %v5782_v55 }
0x1f9c   :  { %v9061_v19 = vpop.eup %9060  ;;  %9064 = vpow2.f32 %v5772_v50 }
0x1f9d   :  { %v5842_v48 = vsel %vm5841_vm11, %v9057_v2, %v5838_v43  ;;  %v5849_v3 = vmul.f32 %v9061_v19, %v5791_v15  ;;  %v5731_v61 = vpop.xlane.xlu1 %5730  ;;  %vm5854_vm12 = vweird.f32 %v9061_v19  ;;  %v8679_v15 = vpack.i.bf16 %v11953_v22, %v11955_v27 }
0x1f9e   :  { %v5728_v30 = vpop.xlane.xlu2 %5727  ;;  %v5847_v31 = vsel %vm5844_vm10, %v5846_v58, %v5842_v48  ;;  %v5751_v5 = vsub.f32 %v12089_v26, %v5731_v61  ;;  %vm5855_vm0 = vmor %vm5853_vm13, %vm5854_vm12  ;;  %v8689_v22 = vpack.i.bf16 %v11940_v47, %v11964_v21 }
0x1f9f   :  { %v5750_v41 = vsub.f32 %v12086_v14, %v5728_v30  ;;  %v6058_v49 = vmul.f32 %v12067_v52, %v5847_v31  ;;  %v5850_v45 = vsub.f32 1.0, %v5849_v3  ;;  %v5860_v52 = vor.u32 1.1754944e-38, %v5859_v28 }
0x1fa0   :  { %v5780_v14 = vmul.f32 1.442695, %v5751_v5 }
0x1fa1   :  { %v5778_v9 = vmul.f32 1.442695, %v5750_v41  ;;  %v12149_v10 = vpop.eup %9062  ;;  %v5851_v53 = vmul.f32 %v9061_v19, %v5850_v45  ;;  %8337 = vmatmul.msk.f32.vlgmr.msrb.gmra.mxu1 %vm426_vm3, %v6058_v49 }
0x1fa2   :  { %v5828_v18 = vsel %vm426_vm3, %v12149_v10, 0.0  ;;  %v12156_v2 = vpop.eup %9064 }
0x1fa3   :  { %v5852_v32 = vadd.f32 %v9061_v19, %v5851_v53  ;;  %9066 = vpow2.f32 %v5778_v9  ;;  %5829 = vadd.xlane.f32.xlu2 %v5828_v18  ;;  %v5813_v29 = vsel %vm426_vm3, %v12156_v2, 0.0 }
0x1fa4   :  { %9068 = vpow2.f32 %v5780_v14 }
0x1fa5   :  { %v5856_v35 = vsel %vm5855_vm0, %v9061_v19, %v5852_v32 }
0x1fa6   :  { %v5737_v11 = vpop.xlane.xlu2 %5736  ;;  %v5861_v0 = vsel %vm5858_vm8, %v5860_v52, %v5856_v35 }
0x1fa7   :  { %v5753_v38 = vsub.f32 %v12096_v39, %v5737_v11  ;;  %v6059_v26 = vmul.f32 %v12079_v57, %v5861_v0 }
0x1fa9   :  { %v5784_v24 = vmul.f32 1.442695, %v5753_v38  ;;  %v12159_v23 = vpop.eup %9066  ;;  %8338 = vmatmul.msk.f32.gmra.mxu1 %vm426_vm3, %v6059_v26 }
0x1faa   :  { %v5822_v39 = vsel %vm426_vm3, %v12159_v23, 0.0  ;;  %v12169_v57 = vpop.eup %9068 }
0x1fab   :  { %9070 = vpow2.f32 %v5784_v24  ;;  %5814 = vadd.xlane.f32.xlu2 %v5813_v29  ;;  %5823 = vadd.xlane.f32.xlu1 %v5822_v39  ;;  %v5825_v27 = vsel %vm426_vm3, %v12169_v57, 0.0 }
0x1fac   :  { %8680 = vrot.lane.b32.xlu0 %v8679_v15, %s9216_s27 }
0x1fb1   :  { %v12171_v4 = vpop.eup %9070 }
0x1fb2   :  { %v5831_v7 = vsel %vm426_vm3, %v12171_v4, 0.0 }
0x1fb3   :  { %5826 = vadd.xlane.f32.xlu1 %v5825_v27  ;;  %5832 = vadd.xlane.f32.xlu2 %v5831_v7 }
0x1fb4   :  { %8690 = vrot.lane.b32.xlu0 %v8689_v22, %s9216_s27 }
0x1fcb   :  { %8685 = vrot.lane.b32.xlu2 %v8684_v6, %s9216_s27 }
0x1fcc   :  { %8675 = vrot.lane.b32.xlu1 %v8674_v1, %s9216_s27 }
0x1fe8   :  { %v5794_v51 = vpop.xlane.xlu1 %5793 }
0x1fe9   :  { %9072 = vrcp.f32 %v5794_v51  ;;  %v5873_v43 = vand.u32 2147483648, %v5794_v51  ;;  %v5871_v34 = vand.u32 2147483647, %v5794_v51  ;;  %vm5867_vm9 = vweird.f32 %v5794_v51 }
0x1feb   :  { %v5874_v19 = vor.u32 1.1754944e-38, %v5873_v43  ;;  %vm5872_vm14 = vcmp.eq.f32.partialorder %v5871_v34, 8.507059e+37 }
0x1fef   :  { %v9073_v47 = vpop.eup %9072 }
0x1ff0   :  { %v5863_v21 = vmul.f32 %v9073_v47, %v5794_v51  ;;  %v5806_v33 = vpop.xlane.xlu0 %5805  ;;  %vm5868_vm2 = vweird.f32 %v9073_v47 }
0x1ff1   :  { %9074 = vrcp.f32 %v5806_v33  ;;  %v12186_v42 = vpop.xlane.xlu1 %5796  ;;  %vm5869_vm15 = vmor %vm5867_vm9, %vm5868_vm2  ;;  %v5929_v45 = vand.u32 2147483648, %v5806_v33  ;;  %v5927_v9 = vand.u32 2147483647, %v5806_v33  ;;  %vm5923_vm10 = vweird.f32 %v5806_v33 }
0x1ff2   :  { %v5864_v55 = vsub.f32 1.0, %v5863_v21  ;;  %9076 = vrcp.f32 %v12186_v42  ;;  %v5887_v26 = vand.u32 2147483648, %v12186_v42  ;;  %v5885_v29 = vand.u32 2147483647, %v12186_v42 }
0x1ff3   :  { %v5930_v18 = vor.u32 1.1754944e-38, %v5929_v45  ;;  %vm5928_vm13 = vcmp.eq.f32.partialorder %v5927_v9, 8.507059e+37  ;;  %vm5881_vm2 = vweird.f32 %v12186_v42 }
0x1ff4   :  { %v5865_v46 = vmul.f32 %v9073_v47, %v5864_v55  ;;  %v5888_v27 = vor.u32 1.1754944e-38, %v5887_v26 }
0x1ff6   :  { %v5866_v16 = vadd.f32 %v9073_v47, %v5865_v46 }
0x1ff7   :  { %v9075_v60 = vpop.eup %9074 }
0x1ff8   :  { %v9077_v58 = vpop.eup %9076  ;;  %v5870_v48 = vsel %vm5869_vm15, %v9073_v47, %v5866_v16  ;;  %v5919_v50 = vmul.f32 %v9075_v60, %v5806_v33  ;;  %v5800_v3 = vpop.xlane.xlu0 %5799  ;;  %vm5924_vm11 = vweird.f32 %v9075_v60 }
0x1ff9   :  { %v5875_v30 = vsel %vm5872_vm14, %v5874_v19, %v5870_v48  ;;  %v5877_v31 = vmul.f32 %v9077_v58, %v12186_v42  ;;  %9078 = vrcp.f32 %v5800_v3  ;;  %vm5925_vm12 = vmor %vm5923_vm10, %vm5924_vm11  ;;  %vm5882_vm0 = vweird.f32 %v9077_v58 }
0x1ffa   :  { %v6060_v61 = vmul.f32 %v12103_v40, %v5875_v30  ;;  %v5920_v41 = vsub.f32 1.0, %v5919_v50  ;;  %v12191_v49 = vpop.xlane.xlu2 %5817  ;;  %v5901_v24 = vand.u32 2147483648, %v5800_v3  ;;  %v5899_v7 = vand.u32 2147483647, %v5800_v3  ;;  %vm5883_vm9 = vmor %vm5881_vm2, %vm5882_vm0 }
0x1ffb   :  { %v5878_v13 = vsub.f32 1.0, %v5877_v31  ;;  %vm5895_vm15 = vweird.f32 %v5800_v3  ;;  %vm5886_vm11 = vcmp.eq.f32.partialorder %v5885_v29, 8.507059e+37 }
0x1ffc   :  { %v5921_v28 = vmul.f32 %v9075_v60, %v5920_v41  ;;  %8339 = vmatmul.msk.f32.vlgmr.msrb.gmra.mxu2 %vm426_vm3, %v6060_v61  ;;  %v5902_v6 = vor.u32 1.1754944e-38, %v5901_v24  ;;  %vm5900_vm10 = vcmp.eq.f32.partialorder %v5899_v7, 8.507059e+37 }
0x1ffd   :  { %v5879_v32 = vmul.f32 %v9077_v58, %v5878_v13 }
0x1ffe   :  { %v5922_v53 = vadd.f32 %v9075_v60, %v5921_v28 }
0x1fff   :  { %v9079_v5 = vpop.eup %9078  ;;  %v5880_v0 = vadd.f32 %v9077_v58, %v5879_v32 }
0x2000   :  { %v5926_v52 = vsel %vm5925_vm12, %v9075_v60, %v5922_v53  ;;  %v5891_v14 = vmul.f32 %v9079_v5, %v5800_v3  ;;  %v5809_v40 = vpop.xlane.xlu0 %5808  ;;  %vm5896_vm8 = vweird.f32 %v9079_v5  ;;  %v12203_v61 = vpop.xlane.xlu1 %5811 }
0x2001   :  { %v5931_v11 = vsel %vm5928_vm13, %v5930_v18, %v5926_v52  ;;  %9080 = vrcp.f32 %v5809_v40  ;;  %vm5897_vm14 = vmor %vm5895_vm15, %vm5896_vm8  ;;  %v5884_v1 = vsel %vm5883_vm9, %v9077_v58, %v5880_v0  ;;  %v5941_v42 = vand.u32 2147483647, %v5809_v40 }
0x2002   :  { %v6064_v35 = vmul.f32 %v12108_v56, %v5931_v11  ;;  %v5892_v38 = vsub.f32 1.0, %v5891_v14  ;;  %v5803_v15 = vpop.xlane.xlu2 %5802  ;;  %v5889_v33 = vsel %vm5886_vm11, %v5888_v27, %v5884_v1  ;;  %v5943_v34 = vand.u32 2147483648, %v5809_v40 }
0x2003   :  { %9082 = vrcp.f32 %v5803_v15  ;;  %v6061_v16 = vmul.f32 %v12112_v54, %v5889_v33  ;;  %vm5937_vm13 = vweird.f32 %v5809_v40  ;;  %vm5942_vm8 = vcmp.eq.f32.partialorder %v5941_v42, 8.507059e+37 }
0x2004   :  { %v5893_v39 = vmul.f32 %v9079_v5, %v5892_v38  ;;  %8343 = vmatmul.msk.f32.vlgmr.msra.gmra.mxu0 %vm426_vm3, %v6064_v35  ;;  %v5944_v50 = vor.u32 1.1754944e-38, %v5943_v34  ;;  %v5913_v30 = vand.u32 2147483647, %v5803_v15  ;;  %vm5909_vm9 = vweird.f32 %v5803_v15 }
0x2005   :  { %8340 = vmatmul.msk.f32.gmra.mxu2 %vm426_vm3, %v6061_v16  ;;  %9084 = vrcp.f32 %v12203_v61  ;;  %v5957_v34 = vand.u32 2147483648, %v12203_v61 }
0x2006   :  { %v5894_v22 = vadd.f32 %v9079_v5, %v5893_v39 }
0x2007   :  { %v9081_v56 = vpop.eup %9080 }
0x2008   :  { %v5898_v51 = vsel %vm5897_vm14, %v9079_v5, %v5894_v22  ;;  %v5933_v47 = vmul.f32 %v9081_v56, %v5809_v40  ;;  %vm5938_vm12 = vweird.f32 %v9081_v56  ;;  %vm5914_vm14 = vcmp.eq.f32.partialorder %v5913_v30, 8.507059e+37 }
0x2009   :  { %v5903_v21 = vsel %vm5900_vm10, %v5902_v6, %v5898_v51  ;;  %v9083_v46 = vpop.eup %9082  ;;  %vm5939_vm0 = vmor %vm5937_vm13, %vm5938_vm12 }
0x200a   :  { %v6062_v55 = vmul.f32 %v12118_v25, %v5903_v21  ;;  %v5934_v43 = vsub.f32 1.0, %v5933_v47  ;;  %v5905_v19 = vmul.f32 %v9083_v46, %v5803_v15  ;;  %v5915_v25 = vand.u32 2147483648, %v5803_v15  ;;  %v12208_v53 = vpop.xlane.xlu0 %5820 }
0x200b   :  { %vm5910_vm2 = vweird.f32 %v9083_v46  ;;  %v9085_v32 = vpop.eup %9084 }
0x200c   :  { %v5935_v60 = vmul.f32 %v9081_v56, %v5934_v43  ;;  %8341 = vmatmul.msk.f32.vlgmr.msrb.gmra.mxu3 %vm426_vm3, %v6062_v55  ;;  %v5906_v48 = vsub.f32 1.0, %v5905_v19  ;;  %vm5911_vm15 = vmor %vm5909_vm9, %vm5910_vm2  ;;  %v5916_v13 = vor.u32 1.1754944e-38, %v5915_v25 }
0x200e   :  { %v5936_v58 = vadd.f32 %v9081_v56, %v5935_v60  ;;  %v5907_v3 = vmul.f32 %v9083_v46, %v5906_v48  ;;  %v5955_v60 = vand.u32 2147483647, %v12203_v61 }
0x2010   :  { %v5940_v31 = vsel %vm5939_vm0, %v9081_v56, %v5936_v58  ;;  %v5908_v41 = vadd.f32 %v9083_v46, %v5907_v3  ;;  %vm5952_vm0 = vweird.f32 %v9085_v32  ;;  %v5958_v3 = vor.u32 1.1754944e-38, %v5957_v34 }
0x2011   :  { %v5945_v54 = vsel %vm5942_vm8, %v5944_v50, %v5940_v31  ;;  %vm5951_vm8 = vweird.f32 %v12203_v61  ;;  %vm5956_vm9 = vcmp.eq.f32.partialorder %v5955_v60, 8.507059e+37 }
0x2012   :  { %v6065_v45 = vmul.f32 %v12128_v20, %v5945_v54  ;;  %v5912_v28 = vsel %vm5911_vm15, %v9083_v46, %v5908_v41  ;;  %v5947_v20 = vmul.f32 %v9085_v32, %v12203_v61  ;;  %vm5953_vm2 = vmor %vm5951_vm8, %vm5952_vm0  ;;  %vm5979_vm15 = vweird.f32 %v12191_v49 }
0x2013   :  { %v5917_v9 = vsel %vm5914_vm14, %v5916_v13, %v5912_v28 }
0x2014   :  { %8344 = vmatmul.msk.f32.gmra.mxu0 %vm426_vm3, %v6065_v45  ;;  %v6063_v18 = vmul.f32 %v12137_v36, %v5917_v9  ;;  %v5948_v36 = vsub.f32 1.0, %v5947_v20 }
0x2016   :  { %v5830_v5 = vpop.xlane.xlu2 %5829  ;;  %8342 = vmatmul.msk.f32.gmra.mxu3 %vm426_vm3, %v6063_v18  ;;  %v5949_v39 = vmul.f32 %v9085_v32, %v5948_v36 }
0x2017   :  { %9086 = vrcp.f32 %v5830_v5  ;;  %v6041_v26 = vand.u32 2147483648, %v5830_v5  ;;  %v6039_v15 = vand.u32 2147483647, %v5830_v5  ;;  %vm6035_vm10 = vweird.f32 %v5830_v5 }
0x2018   :  { %9088 = vrcp.f32 %v12191_v49  ;;  %v5950_v43 = vadd.f32 %v9085_v32, %v5949_v39 }
0x2019   :  { %v6042_v27 = vor.u32 1.1754944e-38, %v6041_v26  ;;  %vm6040_vm13 = vcmp.eq.f32.partialorder %v6039_v15, 8.507059e+37 }
0x201a   :  { %v5954_v48 = vsel %vm5953_vm2, %v9085_v32, %v5950_v43 }
0x201b   :  { %v5959_v61 = vsel %vm5956_vm9, %v5958_v3, %v5954_v48 }
0x201d   :  { %v9087_v52 = vpop.eup %9086 }
0x201e   :  { %v6031_v14 = vmul.f32 %v9087_v52, %v5830_v5  ;;  %v12214_v40 = vpop.permute.xlu0 %8680  ;;  %v12216_v11 = vpop.xlane.xlu1 %5823  ;;  %vm6036_vm11 = vweird.f32 %v9087_v52 }
0x201f   :  { %v12218_v35 = vpop.xlane.xlu2 %5814  ;;  %v12221_v24 = vpop.eup %9088  ;;  %vm6037_vm12 = vmor %vm6035_vm10, %vm6036_vm11 }
0x2020   :  { %v6032_v38 = vsub.f32 1.0, %v6031_v14  ;;  %9090 = vrcp.f32 %v12218_v35  ;;  %v5975_v22 = vmul.f32 %v12221_v24, %v12191_v49  ;;  %vm5980_vm14 = vweird.f32 %v12221_v24 }
0x2021   :  { %9092 = vrcp.f32 %v12216_v11  ;;  %v5971_v18 = vand.u32 2147483648, %v12218_v35  ;;  %vm5965_vm10 = vweird.f32 %v12218_v35  ;;  %v5969_v20 = vand.u32 2147483647, %v12218_v35 }
0x2022   :  { %v6033_v0 = vmul.f32 %v9087_v52, %v6032_v38  ;;  %9094 = vrcp.f32 %v12208_v53  ;;  %v5976_v42 = vsub.f32 1.0, %v5975_v22  ;;  %v5985_v38 = vand.u32 2147483648, %v12191_v49 }
0x2023   :  { %vm5970_vm2 = vcmp.eq.f32.partialorder %v5969_v20, 8.507059e+37 }
0x2024   :  { %v6034_v29 = vadd.f32 %v9087_v52, %v6033_v0  ;;  %v5977_v25 = vmul.f32 %v12221_v24, %v5976_v42  ;;  %v6013_v42 = vand.u32 2147483648, %v12216_v11 }
0x2026   :  { %v12224_v7 = vpop.eup %9090  ;;  %v6038_v56 = vsel %vm6037_vm12, %v9087_v52, %v6034_v29  ;;  %v8691_v6 = vpop.permute.xlu0 %8690  ;;  %v5978_v9 = vadd.f32 %v12221_v24, %v5977_v25  ;;  %v6066_v52 = vmul.f32 %v12130_v37, %v5959_v61  ;;  %v8683_v61 = vunpack.i.h.bf16 %v12214_v40 }
0x2027   :  { %v5961_v1 = vmul.f32 %v12224_v7, %v12218_v35  ;;  %v12230_v51 = vpop.xlane.xlu2 %5832  ;;  %v6043_v47 = vsel %vm6040_vm13, %v6042_v27, %v6038_v56  ;;  %v8692_v21 = vunpack.i.l.bf16 %v8691_v6  ;;  %v12232_v33 = vpop.xlane.xlu1 %5826  ;;  %v8693_v16 = vunpack.i.h.bf16 %v8691_v6  ;;  %vm12277_vm13 = vmor %vm5979_vm15, %vm5980_vm14 }
0x2028   :  { %v12234_v55 = vpop.eup %9092  ;;  %9096 = vrcp.f32 %v12230_v51  ;;  %v6072_v19 = vmul.f32 %v12149_v10, %v6043_v47  ;;  %vm5966_vm11 = vweird.f32 %v12224_v7  ;;  %v6055_v15 = vand.u32 2147483648, %v12230_v51 }
0x2029   :  { %v5962_v46 = vsub.f32 1.0, %v5961_v1  ;;  %6345 = vmatpush.msrb.mxu0 %v8692_v21  ;;  %9098 = vrcp.f32 %v12232_v33  ;;  %v6003_v58 = vmul.f32 %v12234_v55, %v12216_v11  ;;  %v12248_v30 = vpop.eup %9094  ;;  %vm12266_vm12 = vmor %vm5965_vm10, %vm5966_vm11  ;;  %v6053_v29 = vand.u32 2147483647, %v12230_v51 }
0x202a   :  { %v5989_v5 = vmul.f32 %v12248_v30, %v12208_v53  ;;  %v5982_v22 = vsel %vm12277_vm13, %v12221_v24, %v5978_v9  ;;  %v5983_v56 = vand.u32 2147483647, %v12191_v49  ;;  %v5972_v6 = vor.u32 1.1754944e-38, %v5971_v18 }
0x202b   :  { %6346 = vmatpush.msrb.mxu0 %v8693_v16  ;;  %v5963_v50 = vmul.f32 %v12224_v7, %v5962_v46  ;;  %v6004_v54 = vsub.f32 1.0, %v6003_v58  ;;  %vm6008_vm8 = vweird.f32 %v12234_v55  ;;  %vm6049_vm9 = vweird.f32 %v12230_v51 }
0x202c   :  { %8351 = vmatmul.msk.f32.vlgmr.msrb.gmra.mxu0 %vm426_vm3, %v6072_v19  ;;  %v5990_v27 = vsub.f32 1.0, %v5989_v5  ;;  %v6056_v43 = vor.u32 1.1754944e-38, %v6055_v15  ;;  %v5986_v46 = vor.u32 1.1754944e-38, %v5985_v38  ;;  %vm6054_vm14 = vcmp.eq.f32.partialorder %v6053_v29, 8.507059e+37 }
0x202d   :  { %v5964_v13 = vadd.f32 %v12224_v7, %v5963_v50  ;;  %v6005_v36 = vmul.f32 %v12234_v55, %v6004_v54  ;;  %vm5984_vm11 = vcmp.eq.f32.partialorder %v5983_v56, 8.507059e+37  ;;  %vm6007_vm10 = vweird.f32 %v12216_v11  ;;  %v8357_v56 = vld [vmem:[%s13139_s3 + $0x98] sm:$0xff] }
0x202e   :  { %v9097_v10 = vpop.eup %9096  ;;  %v6011_v49 = vand.u32 2147483647, %v12216_v11  ;;  %v5987_v16 = vsel %vm5984_vm11, %v5986_v46, %v5982_v22  ;;  %v5991_v19 = vmul.f32 %v12248_v30, %v5990_v27  ;;  %v6014_v50 = vor.u32 1.1754944e-38, %v6013_v42  ;;  %v8356_v27 = vld [vmem:[%s13139_s3 + $0x90] sm:$0xff] }
0x202f   :  { %v8686_v31 = vpop.permute.xlu2 %8685  ;;  %v12251_v45 = vpop.eup %9098  ;;  %v6045_v28 = vmul.f32 %v9097_v10, %v12230_v51  ;;  %vm6050_vm0 = vweird.f32 %v9097_v10  ;;  %v5968_v39 = vsel %vm12266_vm12, %v12224_v7, %v5964_v13  ;;  %v6006_v47 = vadd.f32 %v12234_v55, %v6005_v36  ;;  %vm6009_vm12 = vmor %vm6007_vm10, %vm6008_vm8 }
0x2030   :  { %v8687_v41 = vunpack.i.l.bf16 %v8686_v31  ;;  %v8688_v32 = vunpack.i.h.bf16 %v8686_v31  ;;  %v6017_v26 = vmul.f32 %v12251_v45, %v12232_v33  ;;  %vm6051_vm15 = vmor %vm6049_vm9, %vm6050_vm0  ;;  %v5973_v7 = vsel %vm5970_vm2, %v5972_v6, %v5968_v39  ;;  %v8355_v6 = vld [vmem:[%s13139_s3 + $0x88] sm:$0xff] }
0x2031   :  { %v6046_v14 = vsub.f32 1.0, %v6045_v28  ;;  %v6067_v60 = vmul.f32 %v12156_v2, %v5973_v7  ;;  %v6010_v58 = vsel %vm6009_vm12, %v12234_v55, %v6006_v47  ;;  %v6068_v11 = vmul.f32 %v12124_v44, %v5987_v16 }
0x2032   :  { %6240 = vmatpush.msra.mxu1 %v8687_v41  ;;  %v6018_v21 = vsub.f32 1.0, %v6017_v26  ;;  %vm6012_vm13 = vcmp.eq.f32.partialorder %v6011_v49, 8.507059e+37  ;;  %vm5994_vm0 = vweird.f32 %v12248_v30  ;;  %v5992_v31 = vadd.f32 %v12248_v30, %v5991_v19 }
0x2033   :  { %v6047_v35 = vmul.f32 %v9097_v10, %v6046_v14  ;;  %vm5993_vm8 = vweird.f32 %v12208_v53  ;;  %vm6022_vm2 = vweird.f32 %v12251_v45  ;;  %v8682_v44 = vunpack.i.l.bf16 %v12214_v40 }
0x2034   :  { %6241 = vmatpush.msra.mxu1 %v8688_v32  ;;  %v6019_v48 = vmul.f32 %v12251_v45, %v6018_v21  ;;  %v6027_v54 = vand.u32 2147483648, %v12232_v33  ;;  %vm12315_vm9 = vmor %vm5993_vm8, %vm5994_vm0  ;;  %v5997_v13 = vand.u32 2147483647, %v12208_v53  ;;  %v6025_v9 = vand.u32 2147483647, %v12232_v33 }
0x2035   :  { %8345 = vmatmul.msk.f32.vlgmr.msra.gmra.mxu1 %vm426_vm3, %v6066_v52  ;;  %v6048_v1 = vadd.f32 %v9097_v10, %v6047_v35  ;;  %v5996_v40 = vsel %vm12315_vm9, %v12248_v30, %v5992_v31  ;;  %vm13273_vm12 = vcmask 228352  }
0x2036   :  { %v6020_v55 = vadd.f32 %v12251_v45, %v6019_v48  ;;  %v6028_v18 = vor.u32 1.1754944e-38, %v6027_v54  ;;  %vm5998_vm11 = vcmp.eq.f32.partialorder %v5997_v13, 8.507059e+37  ;;  %vm6026_vm10 = vcmp.eq.f32.partialorder %v6025_v9, 8.507059e+37  ;;  %6450 = vmatpush.msrb.mxu1 %v8357_v56  ;;  %vm13275_vm0 = vmmov %vm13273_vm12  ;;  %v12378_v13 = vld [vmem:[%s13143_s7 + $0x20] sm:$0x3f]  ;;  %v8381_v56 = vld [vmem:[%s13142_s6 + $0x270] sm:$0xff] }
0x2037   :  { %v6052_v24 = vsel %vm6051_vm15, %v9097_v10, %v6048_v1  ;;  %v5999_v10 = vand.u32 2147483648, %v12208_v53  ;;  %vm6021_vm15 = vweird.f32 %v12232_v33  ;;  %v8354_v1 = vld [vmem:[%s13139_s3 + $0x80] sm:$0xff] }
0x2038   :  { %v6057_v34 = vsel %vm6054_vm14, %v6056_v43, %v6052_v24  ;;  %vm6023_vm14 = vmor %vm6021_vm15, %vm6022_vm2  ;;  %6451 = vmatpush.msrb.mxu1 %v8356_v27 }
0x2039   :  { %v6073_v51 = vmul.f32 %v12171_v4, %v6057_v34  ;;  %v6015_v4 = vsel %vm6012_vm13, %v6014_v50, %v6010_v58  ;;  %v6024_v5 = vsel %vm6023_vm14, %v12251_v45, %v6020_v55  ;;  %v6000_v53 = vor.u32 1.1754944e-38, %v5999_v10 }
0x203a   :  { %v6070_v28 = vmul.f32 %v12159_v23, %v6015_v4  ;;  %v6029_v32 = vsel %vm6026_vm10, %v6028_v18, %v6024_v5  ;;  %6452 = vmatpush.msrb.mxu1 %v8355_v6  ;;  %vm13274_vm13 = vcmask 261120  }
0x203b   :  { %8352 = vmatmul.msk.f32.gmra.mxu0 %vm426_vm3, %v6073_v51  ;;  %v6001_v23 = vsel %vm5998_vm11, %v6000_v53, %v5996_v40  ;;  %v6071_v52 = vmul.f32 %v12169_v57, %v6029_v32  ;;  %v6103_v57 = vpop.f32.mrf.mxu1  ;;  %vm13276_vm8 = vmmov %vm13274_vm13 }
0x203c   :  { %v6069_v33 = vmul.f32 %v12141_v8, %v6001_v23  ;;  %6453 = vmatpush.msrb.mxu1 %v8354_v1  ;;  %vm13277_vm2 = vmmov %vm13276_vm8 }
0x203d   :  { %8346 = vmatmul.msk.f32.gmra.mxu1 %vm426_vm3, %v6067_v60  ;;  %vm13278_vm9 = vmmov %vm13277_vm2 }
0x203e   :  { %v8676_v25 = vpop.permute.xlu1 %8675  ;;  %vm13279_vm15 = vmmov %vm13277_vm2 }
0x203f   :  { %v8678_v3 = vunpack.i.h.bf16 %v8676_v25  ;;  %v8677_v2 = vunpack.i.l.bf16 %v8676_v25  ;;  %vm13280_vm14 = vmmov %vm13277_vm2 }
0x2041   :  { %6275 = vmatpush.msra.mxu2 %v8677_v2  ;;  %6310 = vmatpush.msra.mxu3 %v8678_v3 }
0x2043   :  { %6276 = vmatpush.msra.mxu2 %v8682_v44  ;;  %6311 = vmatpush.msra.mxu3 %v8683_v61  ;;  %v6106_v36 = vpop.f32.mrf.mxu1 }
0x2044   :  { %8347 = vmatmul.msk.f32.vlgmr.msra.gmra.mxu2 %vm426_vm3, %v6068_v11  ;;  %8349 = vmatmul.msk.f32.vlgmr.msra.gmra.mxu3 %vm426_vm3, %v6070_v28  ;;  %v6431_v28 = vperm.slane %v12378_v13, 0 }
0x204c   :  { %8348 = vmatmul.msk.f32.gmra.mxu2 %vm426_vm3, %v6069_v33  ;;  %8350 = vmatmul.msk.f32.gmra.mxu3 %vm426_vm3, %v6071_v52 }
0x207f   :  { %v6138_v30 = vpop.f32.mrf.mxu2 }
0x2081   :  { %v6208_v20 = vpop.f32.mrf.mxu0 }
0x2082   :  { %6372 = vrot.lane.b32.xlu0 %v6208_v20, %s13157_s28 }
0x2088   :  { %v6141_v38 = vpop.f32.mrf.mxu2 }
0x208a   :  { %6356 = vrot.lane.b32.xlu0 %v6138_v30, %s9220_s30 }
0x208f   :  { %v6173_v45 = vpop.f32.mrf.mxu3 }
0x2090   :  { %6364 = vrot.lane.b32.xlu1 %v6173_v45, %s13250_s9 }
0x2091   :  { %v6211_v14 = vpop.f32.mrf.mxu0 }
0x2092   :  { %6374 = vrot.lane.b32.xlu2 %v6211_v14, %s13157_s28 }
0x2098   :  { %6358 = vrot.lane.b32.xlu1 %v6141_v38, %s9220_s30  ;;  %v8363_v38 = vld [vmem:[%s13140_s4 + $0x98] sm:$0xff] }
0x2099   :  { %v6176_v8 = vpop.f32.mrf.mxu3  ;;  %6545 = vmatpush.msrb.mxu2 %v8363_v38 }
0x209a   :  { %6366 = vrot.lane.b32.xlu0 %v6176_v8, %s13250_s9 }
0x20a9   :  { %v6348_v26 = vpop.f32.mrf.mxu0 }
0x20b2   :  { %v6243_v0 = vpop.f32.mrf.mxu1 }
0x20b3   :  { %6380 = vrot.lane.b32.xlu2 %v6243_v0, %s13188_s16 }
0x20b8   :  { %v6351_v22 = vpop.f32.mrf.mxu0 }
0x20ba   :  { %v6246_v35 = vpop.f32.mrf.mxu1 }
0x20bb   :  { %6404 = vrot.lane.b32.xlu2 %v6348_v26, %s13272_s17  ;;  %v8361_v26 = vld [vmem:[%s13140_s4 + $0x88] sm:$0xff] }
0x20c7   :  { %v6278_v15 = vpop.f32.mrf.mxu2  ;;  %v6313_v37 = vpop.f32.mrf.mxu3 }
0x20c8   :  { %6396 = vrot.lane.b32.xlu0 %v6313_v37, %s13209_s13  ;;  %6388 = vrot.lane.b32.xlu1 %v6278_v15, %s13187_s15  ;;  %v8360_v37 = vld [vmem:[%s13140_s4 + $0x80] sm:$0xff] }
0x20cf   :  { %v6281_v29 = vpop.f32.mrf.mxu2  ;;  %v6316_v39 = vpop.f32.mrf.mxu3 }
0x20d0   :  { %6398 = vrot.lane.b32.xlu2 %v6316_v39, %s13209_s13  ;;  %6382 = vrot.lane.b32.xlu1 %v6246_v35, %s13188_s16 }
0x20d1   :  { %6390 = vrot.lane.b32.xlu0 %v6281_v29, %s13187_s15 }
0x20d8   :  { %6406 = vrot.lane.b32.xlu1 %v6351_v22, %s13272_s17  ;;  %v8382_v22 = vld [vmem:[%s13142_s6 + $0x278] sm:$0xff] }
0x20d9   :  { %6576 = vmatpush.msrb.mxu3 %v8382_v22 }
0x20db   :  { %6577 = vmatpush.msrb.mxu3 %v8381_v56 }
0x20ec   :  { %v6375_v43 = vpop.permute.xlu2 %6374 }
0x20f4   :  { %v6373_v47 = vpop.permute.xlu0 %6372 }
0x20fc   :  { %v6357_v7 = vpop.permute.xlu0 %6356 }
0x20fd   :  { %v6410_v49 = vsel %vm149_vm1, %v6103_v57, %v6357_v7 }
0x2102   :  { %v6365_v21 = vpop.permute.xlu1 %6364 }
0x2103   :  { %v6412_v34 = vsel %vm1149_vm4, %v6410_v49, %v6365_v21  ;;  %v8380_v21 = vld [vmem:[%s13142_s6 + $0x268] sm:$0xff]  ;;  %v8378_v49 = vld [vmem:[%s13142_s6 + $0x258] sm:$0xff] }
0x2104   :  { %v6414_v16 = vsel %vm1152_vm5, %v6412_v34, %v6373_v47  ;;  %6578 = vmatpush.msrb.mxu3 %v8380_v21  ;;  %v8386_v21 = vld [vmem:[%s13137_s1 + $0xb8] sm:$0xff] }
0x2105   :  { %6683 = vmatpush.msra.mxu0 %v8386_v21 }
0x210a   :  { %v6359_v46 = vpop.permute.xlu1 %6358 }
0x210b   :  { %v6411_v11 = vsel %vm149_vm1, %v6106_v36, %v6359_v46  ;;  %v8362_v36 = vld [vmem:[%s13140_s4 + $0x90] sm:$0xff]  ;;  %v8379_v46 = vld [vmem:[%s13142_s6 + $0x260] sm:$0xff] }
0x210c   :  { %v6367_v24 = vpop.permute.xlu0 %6366  ;;  %6546 = vmatpush.msrb.mxu2 %v8362_v36  ;;  %6579 = vmatpush.msrb.mxu3 %v8379_v46 }
0x210d   :  { %v6381_v42 = vpop.permute.xlu2 %6380  ;;  %v6413_v4 = vsel %vm1149_vm4, %v6411_v11, %v6367_v24 }
0x210e   :  { %v6416_v51 = vsel %vm426_vm3, %v6414_v16, %v6381_v42  ;;  %v6415_v2 = vsel %vm1152_vm5, %v6413_v4, %v6375_v43  ;;  %6547 = vmatpush.msrb.mxu2 %v8361_v26  ;;  %v6509_v16 = vperm.slane %v12378_v13, 2  ;;  %6580 = vmatpush.msrb.mxu3 %v8378_v49  ;;  %v8384_v49 = vld [vmem:[%s13137_s1 + $0xa8] sm:$0xff] }
0x2110   :  { %6548 = vmatpush.msrb.mxu2 %v8360_v37 }
0x2115   :  { %v6405_v48 = vpop.permute.xlu2 %6404 }
0x212a   :  { %v6399_v61 = vpop.permute.xlu2 %6398 }
0x213a   :  { %v6397_v60 = vpop.permute.xlu0 %6396  ;;  %v6389_v19 = vpop.permute.xlu1 %6388 }
0x213b   :  { %v6418_v58 = vsel %vm1157_vm6, %v6416_v51, %v6389_v19  ;;  %v8377_v51 = vld [vmem:[%s13142_s6 + $0x250] sm:$0xff]  ;;  %v8376_v19 = vld [vmem:[%s13142_s6 + $0x248] sm:$0xff] }
0x213c   :  { %v6420_v50 = vsel %vm1160_vm7, %v6418_v58, %v6397_v60  ;;  %6581 = vmatpush.msrb.mxu3 %v8377_v51 }
0x213d   :  { %v6422_v25 = vsel %vm13273_vm12, %v6420_v50, %v6405_v48  ;;  %v6514_v50 = vperm.slane %v12378_v13, 3 }
0x213e   :  { %8358 = vmatmul.msk.f32.vlgmr.msrb.gmra.mxu1 %vm13274_vm13, %v6422_v25  ;;  %v8375_v25 = vld [vmem:[%s13142_s6 + $0x240] sm:$0xff]  ;;  %6582 = vmatpush.msrb.mxu3 %v8376_v19  ;;  %vm13281_vm13 = vmmov %vm13277_vm2 }
0x2140   :  { %6583 = vmatpush.msrb.mxu3 %v8375_v25 }
0x2142   :  { %v6383_v3 = vpop.permute.xlu1 %6382 }
0x2143   :  { %v6417_v31 = vsel %vm426_vm3, %v6415_v2, %v6383_v3  ;;  %v6391_v55 = vpop.permute.xlu0 %6390  ;;  %v8374_v2 = vld [vmem:[%s13142_s6 + $0x238] sm:$0xff] }
0x2144   :  { %v6419_v10 = vsel %vm1157_vm6, %v6417_v31, %v6391_v55  ;;  %6584 = vmatpush.msrb.mxu3 %v8374_v2 }
0x2145   :  { %v6421_v54 = vsel %vm1160_vm7, %v6419_v10, %v6399_v61  ;;  %v8373_v10 = vld [vmem:[%s13142_s6 + $0x230] sm:$0xff] }
0x2146   :  { %6585 = vmatpush.msrb.mxu3 %v8373_v10 }
0x214a   :  { %v6407_v44 = vpop.permute.xlu1 %6406 }
0x214b   :  { %v6423_v41 = vsel %vm13275_vm0, %v6421_v54, %v6407_v44  ;;  %v8372_v44 = vld [vmem:[%s13142_s6 + $0x228] sm:$0xff] }
0x214c   :  { %8359 = vmatmul.msk.f32.gmra.mxu1 %vm13276_vm8, %v6423_v41  ;;  %v8371_v41 = vld [vmem:[%s13142_s6 + $0x220] sm:$0xff]  ;;  %6586 = vmatpush.msrb.mxu3 %v8372_v44 }
0x214e   :  { %6587 = vmatpush.msrb.mxu3 %v8371_v41 }
0x21bb   :  { %v6455_v9 = vpop.f32.mrf.mxu1 }
0x21bc   :  { %v6456_v40 = vadd.f32 %v6455_v9, %v6431_v28  ;;  %v8370_v9 = vld [vmem:[%s13142_s6 + $0x218] sm:$0xff] }
0x21bd   :  { %6588 = vmatpush.msrb.mxu3 %v8370_v9 }
0x21be   :  { %v12382_v5 = vadd.f32 %v6456_v40, %v11899_v17 }
0x21c0   :  { %v6463_v53 = vsel %vm13277_vm2, %v12382_v5, 0.0  ;;  %v6471_v18 = vmul.f32 %v12382_v5, %v12382_v5 }
0x21c1   :  { %6464 = vadd.xlane.f32.xlu0 %v6463_v53 }
0x21c2   :  { %v6473_v23 = vsel %vm13278_vm9, %v6471_v18, 0.0 }
0x21c3   :  { %6474 = vadd.xlane.f32.xlu2 %v6473_v23 }
0x21c9   :  { %v6458_v32 = vpop.f32.mrf.mxu1 }
0x21ca   :  { %v6459_v33 = vadd.f32 %v6458_v32, %v6431_v28 }
0x21cc   :  { %v12390_v52 = vadd.f32 %v6459_v33, %v11903_v59  ;;  %v8369_v33 = vld [vmem:[%s13142_s6 + $0x210] sm:$0xff] }
0x21cd   :  { %6589 = vmatpush.msrb.mxu3 %v8369_v33 }
0x21ce   :  { %v6466_v20 = vsel %vm13279_vm15, %v12390_v52, 0.0  ;;  %v6472_v17 = vmul.f32 %v12390_v52, %v12390_v52  ;;  %vm13282_vm15 = vmmov %vm13278_vm9 }
0x21cf   :  { %6467 = vadd.xlane.f32.xlu1 %v6466_v20  ;;  %v8368_v20 = vld [vmem:[%s13142_s6 + $0x208] sm:$0xff] }
0x21d0   :  { %v6476_v30 = vsel %vm13280_vm14, %v6472_v17, 0.0  ;;  %v8367_v17 = vld [vmem:[%s13142_s6 + $0x200] sm:$0xff]  ;;  %6590 = vmatpush.msrb.mxu3 %v8368_v20  ;;  %vm13283_vm14 = vmmov %vm13278_vm9 }
0x21d1   :  { %6477 = vadd.xlane.f32.xlu0 %v6476_v30 }
0x21d2   :  { %6591 = vmatpush.msrb.mxu3 %v8367_v17 }
0x2234   :  { %v6465_v45 = vpop.xlane.xlu0 %6464 }
0x2235   :  { %v6469_v14 = vmul.f32 %v6465_v45, %v9812_v62 }
0x2236   :  { %v6475_v8 = vpop.xlane.xlu2 %6474 }
0x2237   :  { %v6481_v59 = vmul.f32 %v6469_v14, %v6469_v14  ;;  %v6479_v57 = vmul.f32 %v6475_v8, %v9812_v62  ;;  %v6485_v48 = vsub.f32 %v12382_v5, %v6469_v14 }
0x2239   :  { %v6483_v0 = vsub.f32 %v6479_v57, %v6481_v59  ;;  %v6575_v57 = vperm.slane %v12378_v13, 1 }
0x223b   :  { %v6487_v15 = vadd.f32 1e-05, %v6483_v0 }
0x223d   :  { %9100 = vrsqrt.f32 %v6487_v15  ;;  %vm6495_vm10 = vweird.f32 %v6487_v15 }
0x2242   :  { %v6468_v35 = vpop.xlane.xlu1 %6467 }
0x2243   :  { %v9101_v29 = vpop.eup %9100  ;;  %v6470_v39 = vmul.f32 %v6468_v35, %v9812_v62 }
0x2244   :  { %v6490_v27 = vmul.f32 %v9101_v29, %v6487_v15  ;;  %v6478_v6 = vpop.xlane.xlu0 %6477  ;;  %vm6496_vm11 = vweird.f32 %v9101_v29 }
0x2245   :  { %v6482_v1 = vmul.f32 %v6470_v39, %v6470_v39  ;;  %v6480_v47 = vmul.f32 %v6478_v6, %v9812_v62  ;;  %vm6497_vm12 = vmor %vm6495_vm10, %vm6496_vm11  ;;  %v6486_v53 = vsub.f32 %v12390_v52, %v6470_v39  ;;  %v8743_v52 = vld [vmem:[%s13141_s5 + $0x4] ss:$0 sm:$0xff] }
0x2246   :  { %v6491_v43 = vmul.f32 %v9101_v29, %v6490_v27  ;;  %vm13284_vm11 = vmmov %vm13278_vm9 }
0x2247   :  { %v6484_v7 = vsub.f32 %v6480_v47, %v6482_v1  ;;  %vm13285_vm10 = vmmov %vm13278_vm9 }
0x2248   :  { %v6492_v42 = vmul.f32 0.5, %v6491_v43 }
0x2249   :  { %v6488_v24 = vadd.f32 1e-05, %v6484_v7 }
0x224a   :  { %v6493_v34 = vsub.f32 1.5, %v6492_v42  ;;  %v8385_v42 = vld [vmem:[%s13137_s1 + $0xb0] sm:$0xff] }
0x224b   :  { %9102 = vrsqrt.f32 %v6488_v24  ;;  %vm6505_vm8 = vweird.f32 %v6488_v24  ;;  %6684 = vmatpush.msra.mxu0 %v8385_v42 }
0x224c   :  { %v6494_v60 = vmul.f32 %v9101_v29, %v6493_v34 }
0x224d   :  { %6685 = vmatpush.msra.mxu0 %v8384_v49 }
0x224e   :  { %v6498_v58 = vsel %vm6497_vm12, %v9101_v29, %v6494_v60 }
0x224f   :  { %v6510_v11 = vmul.f32 %v6509_v16, %v6498_v58 }
0x2251   :  { %v9103_v4 = vpop.eup %9102  ;;  %v6512_v3 = vmul.f32 %v6510_v11, %v6485_v48 }
0x2252   :  { %v6500_v31 = vmul.f32 %v9103_v4, %v6488_v24  ;;  %vm6506_vm0 = vweird.f32 %v9103_v4 }
0x2253   :  { %v6515_v55 = vadd.f32 %v6514_v50, %v6512_v3  ;;  %vm6507_vm2 = vmor %vm6505_vm8, %vm6506_vm0 }
0x2254   :  { %v6501_v61 = vmul.f32 %v9103_v4, %v6500_v31  ;;  %vm13286_vm8 = vmmov %vm13278_vm9 }
0x2255   :  { %8365 = vmatmul.msk.f32.vlgmr.msrb.gmra.mxu2 %vm13281_vm13, %v6515_v55 }
0x2256   :  { %v6502_v54 = vmul.f32 0.5, %v6501_v61 }
0x2258   :  { %v6503_v28 = vsub.f32 1.5, %v6502_v54  ;;  %v6652_v54 = vperm.slane %v12378_v13, 5 }
0x225a   :  { %v6504_v40 = vmul.f32 %v9103_v4, %v6503_v28 }
0x225c   :  { %v6508_v5 = vsel %vm6507_vm2, %v9103_v4, %v6504_v40 }
0x225d   :  { %v6511_v18 = vmul.f32 %v6509_v16, %v6508_v5  ;;  %v8383_v16 = vld [vmem:[%s13137_s1 + $0xa0] sm:$0xff] }
0x225e   :  { %6686 = vmatpush.msra.mxu0 %v8383_v16 }
0x225f   :  { %v6513_v23 = vmul.f32 %v6511_v18, %v6486_v53 }
0x2261   :  { %v6516_v32 = vadd.f32 %v6514_v50, %v6513_v23 }
0x2263   :  { %8366 = vmatmul.msk.f32.gmra.mxu2 %vm13278_vm9, %v6516_v32 }
0x22d8   :  { %v6550_v30 = vpop.f32.mrf.mxu2 }
0x22d9   :  { %v6551_v45 = vadd.f32 %v8743_v52, %v6550_v30  ;;  %v8744_v30 = vld [vmem:[%s13138_s2 + $0x5] ss:$0 sm:$0xff]  ;;  %s13300_s2 = smov 12  }
0x22db   :  { %v6556_v14 = vmax.f32 %v6551_v45, 0.0 }
0x22dd   :  { %6592 = vmatmul.f32.vlgmr.msrb.gmra.mxu3 %v6556_v14 }
0x22e6   :  { %v6553_v38 = vpop.f32.mrf.mxu2 }
0x22e7   :  { %v6554_v8 = vadd.f32 %v8743_v52, %v6553_v38 }
0x22e9   :  { %v6557_v59 = vmax.f32 %v6554_v8, 0.0 }
0x22eb   :  { %6595 = vmatmul.f32.gmra.mxu3 %v6557_v59 }
0x2360   :  { %v6593_v36 = vpop.f32.mrf.mxu3 }
0x2361   :  { %v6594_v0 = vadd.f32 %v6593_v36, %v6575_v57 }
0x2363   :  { %v6599_v26 = vadd.f32 %v6594_v0, %v6515_v55  ;;  %v6647_v55 = vperm.slane %v12378_v13, 4 }
0x2365   :  { %v6601_v15 = vsel %vm13282_vm15, %v6599_v26, 0.0  ;;  %v6609_v37 = vmul.f32 %v6599_v26, %v6599_v26 }
0x2366   :  { %6602 = vadd.xlane.f32.xlu2 %v6601_v15 }
0x2367   :  { %v6611_v35 = vsel %vm13283_vm14, %v6609_v37, 0.0  ;;  %vm13287_vm14 = vmmov %vm13286_vm8 }
0x2368   :  { %6612 = vadd.xlane.f32.xlu1 %v6611_v35 }
0x236e   :  { %v6596_v29 = vpop.f32.mrf.mxu3 }
0x236f   :  { %v6597_v39 = vadd.f32 %v6596_v29, %v6575_v57 }
0x2371   :  { %v6600_v22 = vadd.f32 %v6597_v39, %v6516_v32 }
0x2373   :  { %v6604_v56 = vsel %vm13284_vm11, %v6600_v22, 0.0  ;;  %v6610_v27 = vmul.f32 %v6600_v22, %v6600_v22 }
0x2374   :  { %6605 = vadd.xlane.f32.xlu0 %v6604_v56 }
0x2375   :  { %v6614_v6 = vsel %vm13285_vm10, %v6610_v27, 0.0 }
0x2376   :  { %6615 = vadd.xlane.f32.xlu2 %v6614_v6 }
0x23d9   :  { %v6603_v1 = vpop.xlane.xlu2 %6602 }
0x23da   :  { %v6607_v47 = vmul.f32 %v6603_v1, %v9812_v62 }
0x23db   :  { %v6613_v43 = vpop.xlane.xlu1 %6612 }
0x23dc   :  { %v6619_v7 = vmul.f32 %v6607_v47, %v6607_v47  ;;  %v6617_v46 = vmul.f32 %v6613_v43, %v9812_v62  ;;  %v6623_v44 = vsub.f32 %v6599_v26, %v6607_v47 }
0x23de   :  { %v6621_v24 = vsub.f32 %v6617_v46, %v6619_v7 }
0x23e0   :  { %v6625_v34 = vadd.f32 1e-05, %v6621_v24 }
0x23e2   :  { %9104 = vrsqrt.f32 %v6625_v34  ;;  %vm6633_vm13 = vweird.f32 %v6625_v34 }
0x23e7   :  { %v6606_v51 = vpop.xlane.xlu0 %6605 }
0x23e8   :  { %v9105_v60 = vpop.eup %9104  ;;  %v6608_v19 = vmul.f32 %v6606_v51, %v9812_v62 }
0x23e9   :  { %v6628_v58 = vmul.f32 %v9105_v60, %v6625_v34  ;;  %v6616_v48 = vpop.xlane.xlu2 %6615  ;;  %vm6634_vm12 = vweird.f32 %v9105_v60 }
0x23ea   :  { %v6620_v50 = vmul.f32 %v6608_v19, %v6608_v19  ;;  %v6618_v11 = vmul.f32 %v6616_v48, %v9812_v62  ;;  %vm6635_vm0 = vmor %vm6633_vm13, %vm6634_vm12  ;;  %v6624_v20 = vsub.f32 %v6600_v22, %v6608_v19 }
0x23eb   :  { %v6629_v25 = vmul.f32 %v9105_v60, %v6628_v58 }
0x23ec   :  { %v6622_v4 = vsub.f32 %v6618_v11, %v6620_v50 }
0x23ed   :  { %v6630_v3 = vmul.f32 0.5, %v6629_v25 }
0x23ee   :  { %v6626_v2 = vadd.f32 1e-05, %v6622_v4 }
0x23ef   :  { %v6631_v31 = vsub.f32 1.5, %v6630_v3 }
0x23f0   :  { %9106 = vrsqrt.f32 %v6626_v2  ;;  %vm6643_vm9 = vweird.f32 %v6626_v2 }
0x23f1   :  { %v6632_v10 = vmul.f32 %v9105_v60, %v6631_v31 }
0x23f3   :  { %v6636_v61 = vsel %vm6635_vm0, %v9105_v60, %v6632_v10 }
0x23f4   :  { %v6648_v41 = vmul.f32 %v6647_v55, %v6636_v61 }
0x23f6   :  { %v9107_v28 = vpop.eup %9106  ;;  %v6650_v9 = vmul.f32 %v6648_v41, %v6623_v44 }
0x23f7   :  { %v6638_v40 = vmul.f32 %v9107_v28, %v6626_v2  ;;  %vm6644_vm2 = vweird.f32 %v9107_v28 }
0x23f8   :  { %v12493_v5 = vadd.f32 %v6652_v54, %v6650_v9  ;;  %vm6645_vm15 = vmor %vm6643_vm9, %vm6644_vm2 }
0x23f9   :  { %v6639_v53 = vmul.f32 %v9107_v28, %v6638_v40 }
0x23fa   :  { %8388 = vmatmul.msk.f32.vlgmr.msra.gmra.mxu0 %vm13286_vm8, %v12493_v5 }
0x23fb   :  { %v6640_v18 = vmul.f32 0.5, %v6639_v53 }
0x23fd   :  { %v6641_v23 = vsub.f32 1.5, %v6640_v18 }
0x23ff   :  { %v6642_v32 = vmul.f32 %v9107_v28, %v6641_v23 }
0x2401   :  { %v6646_v33 = vsel %vm6645_vm15, %v9107_v28, %v6642_v32 }
0x2402   :  { %v6649_v17 = vmul.f32 %v6647_v55, %v6646_v33 }
0x2404   :  { %v6651_v13 = vmul.f32 %v6649_v17, %v6624_v20 }
0x2406   :  { %v12497_v52 = vadd.f32 %v6652_v54, %v6651_v13 }
0x2408   :  { %8389 = vmatmul.msk.f32.gmra.mxu0 %vm13287_vm14, %v12497_v52 }
0x2477   :  { %v6688_v45 = vpop.f32.mrf.mxu0 }
0x2478   :  { %v6689_v14 = vadd.f32 %v8744_v30, %v6688_v45 }
0x247a   :  { %6696 = vrot.lane.b32.xlu0 %v6689_v14, %s9210_s21 }
0x2482   :  { %6700 = vrot.lane.b32.xlu0 %v6689_v14, %s9209_s20 }
0x2485   :  { %v6691_v38 = vpop.f32.mrf.mxu0 }
0x2486   :  { %v6692_v8 = vadd.f32 %v8744_v30, %v6691_v38 }
0x2488   :  { %6702 = vrot.lane.b32.xlu2 %v6692_v8, %s9209_s20  ;;  %6698 = vrot.lane.b32.xlu1 %v6692_v8, %s9210_s21  ;;  %s9227_s20 = smov 128  }
0x248a   :  { %6706 = vrot.lane.b32.xlu0 %v6692_v8, %s9208_s19 }
0x2490   :  { %6714 = vrot.lane.b32.xlu2 %v6692_v8, %s9211_s22  ;;  %6704 = vrot.lane.b32.xlu1 %v6689_v14, %s9208_s19 }
0x2492   :  { %6712 = vrot.lane.b32.xlu0 %v6689_v14, %s9211_s22 }
0x2498   :  { %6708 = vrot.lane.b32.xlu2 %v6689_v14, %s9214_s25  ;;  %6710 = vrot.lane.b32.xlu1 %v6692_v8, %s9214_s25 }
0x249a   :  { %6716 = vrot.lane.b32.xlu0 %v6689_v14, %s9212_s23 }
0x24a0   :  { %6722 = vrot.lane.b32.xlu2 %v6692_v8, %s9213_s24  ;;  %6720 = vrot.lane.b32.xlu1 %v6689_v14, %s9213_s24 }
0x24a8   :  { %6726 = vrot.lane.b32.xlu2 %v6692_v8, %s9215_s26  ;;  %6718 = vrot.lane.b32.xlu1 %v6692_v8, %s9212_s23 }
0x24b0   :  { %6724 = vrot.lane.b32.xlu1 %v6689_v14, %s9215_s26 }
0x24e2   :  { %v12520_v59 = vpop.permute.xlu2 %6702 }
0x24ea   :  { %v12522_v57 = vpop.permute.xlu2 %6714 }
0x24ec   :  { %v6697_v36 = vpop.permute.xlu0 %6696 }
0x24ed   :  { %6759 = vrot.lane.b32.xlu2 %v6697_v36, %s9215_s26  ;;  %v8694_v47 = vpack.i.bf16 %v6697_v36, %v6689_v14 }
0x24f2   :  { %v12525_v0 = vpop.permute.xlu2 %6708 }
0x24f4   :  { %v12527_v26 = vpop.permute.xlu0 %6700 }
0x24f5   :  { %6794 = vrot.lane.b32.xlu1 %v12527_v26, %s9215_s26 }
0x24fa   :  { %v12531_v15 = vpop.permute.xlu2 %6722  ;;  %v6699_v37 = vpop.permute.xlu1 %6698 }
0x24fb   :  { %6761 = vrot.lane.b32.xlu0 %v6699_v37, %s9215_s26  ;;  %v8699_v43 = vpack.i.bf16 %v6699_v37, %v6692_v8 }
0x24fc   :  { %v6707_v35 = vpop.permute.xlu0 %6706 }
0x24fd   :  { %6831 = vrot.lane.b32.xlu1 %v6707_v35, %s9215_s26  ;;  %v8704_v7 = vpack.i.bf16 %v6707_v35, %v12520_v59 }
0x2502   :  { %v6727_v29 = vpop.permute.xlu2 %6726  ;;  %v12535_v39 = vpop.permute.xlu1 %6704 }
0x2503   :  { %8390 = vmatpush.xpose.msk.msra.mxu1 %vm149_vm1, %v6727_v29  ;;  %6796 = vrot.lane.b32.xlu0 %v12520_v59, %s9215_s26 }
0x2504   :  { %v12540_v22 = vpop.permute.xlu0 %6712 }
0x2505   :  { %6899 = vrot.lane.b32.xlu1 %v12540_v22, %s9215_s26 }
0x250a   :  { %v12544_v56 = vpop.permute.xlu1 %6710 }
0x250b   :  { %6901 = vrot.lane.b32.xlu0 %v12522_v57, %s9215_s26  ;;  %6866 = vrot.lane.b32.xlu2 %v12544_v56, %s9215_s26 }
0x250c   :  { %v12550_v27 = vpop.permute.xlu0 %6716 }
0x250d   :  { %6934 = vrot.lane.b32.xlu1 %v12550_v27, %s9215_s26 }
0x2512   :  { %v12554_v6 = vpop.permute.xlu1 %6720 }
0x2513   :  { %6864 = vrot.lane.b32.xlu0 %v12525_v0, %s9215_s26  ;;  %6829 = vrot.lane.b32.xlu2 %v12535_v39, %s9215_s26 }
0x251a   :  { %v12560_v1 = vpop.permute.xlu1 %6718 }
0x251b   :  { %6971 = vrot.lane.b32.xlu0 %v12531_v15, %s9215_s26  ;;  %6936 = vrot.lane.b32.xlu2 %v12560_v1, %s9215_s26 }
0x2522   :  { %v6725_v21 = vpop.permute.xlu1 %6724 }
0x2523   :  { %8391 = vmatpush.xpose.msk.msra.mxu1 %vm149_vm1, %v6725_v21  ;;  %8695 = vrot.lane.b32.xlu0 %v8694_v47, %s9216_s27 }
0x2524   :  { %6969 = vrot.lane.b32.xlu2 %v12554_v6, %s9215_s26 }
0x2526   :  { %8392 = vmatmul.msk.f32.vlgmr.msra.gmra.mxu1 %vm149_vm1, %v6689_v14 }
0x252c   :  { %8700 = vrot.lane.b32.xlu2 %v8699_v43, %s9216_s27 }
0x252e   :  { %8393 = vmatmul.msk.f32.gmra.mxu1 %vm149_vm1, %v6692_v8 }
0x2534   :  { %8705 = vrot.lane.b32.xlu2 %v8704_v7, %s9216_s27 }
0x2547   :  { %v6760_v46 = vpop.permute.xlu2 %6759 }
0x2565   :  { %v6867_v42 = vpop.permute.xlu2 %6866 }
0x2567   :  { %v6795_v24 = vpop.permute.xlu1 %6794 }
0x256d   :  { %v6830_v49 = vpop.permute.xlu2 %6829  ;;  %v6762_v34 = vpop.permute.xlu0 %6761 }
0x256e   :  { %8394 = vmatpush.xpose.msk.msra.mxu2 %vm149_vm1, %v6762_v34 }
0x256f   :  { %v6832_v16 = vpop.permute.xlu1 %6831 }
0x2570   :  { %8402 = vmatpush.xpose.msk.msrb.mxu1 %vm149_vm1, %v6832_v16 }
0x2572   :  { %8395 = vmatpush.xpose.msk.msra.mxu2 %vm149_vm1, %v6760_v46 }
0x2574   :  { %8403 = vmatpush.xpose.msk.msrb.mxu1 %vm149_vm1, %v6830_v49 }
0x2575   :  { %v6937_v51 = vpop.permute.xlu2 %6936  ;;  %8396 = vmatmul.msk.f32.vlgmr.msra.gmra.mxu2 %vm149_vm1, %v6697_v36  ;;  %v6797_v60 = vpop.permute.xlu0 %6796 }
0x2576   :  { %8406 = vmatpush.xpose.msk.msrb.mxu2 %vm149_vm1, %v6867_v42  ;;  %8398 = vmatpush.xpose.msk.msrb.mxu0 %vm149_vm1, %v6797_v60 }
0x2577   :  { %8404 = vmatmul.msk.f32.vlgmr.msrb.gmra.mxu1 %vm149_vm1, %v12535_v39  ;;  %v6900_v19 = vpop.permute.xlu1 %6899 }
0x257a   :  { %8399 = vmatpush.xpose.msk.msrb.mxu0 %vm149_vm1, %v6795_v24 }
0x257d   :  { %8397 = vmatmul.msk.f32.gmra.mxu2 %vm149_vm1, %v6699_v37  ;;  %8400 = vmatmul.msk.f32.vlgmr.msrb.gmra.mxu0 %vm149_vm1, %v12527_v26  ;;  %v6902_v58 = vpop.permute.xlu0 %6901 }
0x257e   :  { %8414 = vmatpush.xpose.msk.msra.mxu0 %vm149_vm1, %v6937_v51  ;;  %v6970_v48 = vpop.permute.xlu2 %6969  ;;  %8410 = vmatpush.xpose.msk.msra.mxu3 %vm149_vm1, %v6902_v58 }
0x257f   :  { %8405 = vmatmul.msk.f32.gmra.mxu1 %vm149_vm1, %v6707_v35  ;;  %v6935_v50 = vpop.permute.xlu1 %6934 }
0x2582   :  { %8415 = vmatpush.xpose.msk.msra.mxu0 %vm149_vm1, %v6935_v50  ;;  %8411 = vmatpush.xpose.msk.msra.mxu3 %vm149_vm1, %v6900_v19 }
0x2585   :  { %8401 = vmatmul.msk.f32.gmra.mxu0 %vm149_vm1, %v12520_v59  ;;  %8412 = vmatmul.msk.f32.vlgmr.msra.gmra.mxu3 %vm149_vm1, %v12540_v22  ;;  %v6865_v11 = vpop.permute.xlu0 %6864 }
0x2586   :  { %v8701_v25 = vpop.permute.xlu2 %8700  ;;  %8407 = vmatpush.xpose.msk.msrb.mxu2 %vm149_vm1, %v6865_v11 }
0x2587   :  { %v8703_v4 = vunpack.i.h.bf16 %v8701_v25  ;;  %v8702_v3 = vunpack.i.l.bf16 %v8701_v25 }
0x2589   :  { %7449 = vmatpush.msrb.mxu3 %v8703_v4  ;;  %8408 = vmatmul.msk.f32.vlgmr.msrb.gmra.mxu2 %vm149_vm1, %v12525_v0 }
0x258a   :  { %7414 = vmatpush.msra.mxu2 %v8702_v3 }
0x258d   :  { %8413 = vmatmul.msk.f32.gmra.mxu3 %vm149_vm1, %v12522_v57  ;;  %8416 = vmatmul.msk.f32.vlgmr.msra.gmra.mxu0 %vm149_vm1, %v12550_v27  ;;  %v6972_v2 = vpop.permute.xlu0 %6971 }
0x258e   :  { %v8706_v31 = vpop.permute.xlu2 %8705  ;;  %8418 = vmatpush.xpose.msk.msra.mxu1 %vm149_vm1, %v6972_v2 }
0x258f   :  { %v8707_v55 = vunpack.i.l.bf16 %v8706_v31  ;;  %v8708_v10 = vunpack.i.h.bf16 %v8706_v31 }
0x2591   :  { %7484 = vmatpush.msrb.mxu0 %v8707_v55  ;;  %8409 = vmatmul.msk.f32.gmra.mxu2 %vm149_vm1, %v12544_v56 }
0x2592   :  { %8419 = vmatpush.xpose.msk.msra.mxu1 %vm149_vm1, %v6970_v48 }
0x2595   :  { %8417 = vmatmul.msk.f32.gmra.mxu0 %vm149_vm1, %v12560_v1  ;;  %8420 = vmatmul.msk.f32.vlgmr.msra.gmra.mxu1 %vm149_vm1, %v12554_v6  ;;  %v8696_v61 = vpop.permute.xlu0 %8695 }
0x2596   :  { %7519 = vmatpush.msrb.mxu1 %v8708_v10  ;;  %v8698_v44 = vunpack.i.h.bf16 %v8696_v61  ;;  %v8697_v54 = vunpack.i.l.bf16 %v8696_v61 }
0x2598   :  { %7415 = vmatpush.msra.mxu2 %v8697_v54  ;;  %7450 = vmatpush.msrb.mxu3 %v8698_v44 }
0x259d   :  { %8421 = vmatmul.msk.f32.gmra.mxu1 %vm149_vm1, %v12531_v15 }
0x25a3   :  { %v6753_v41 = vpop.f32.mrf.mxu1 }
0x25a4   :  { %v6754_v28 = vadd.f32 %v6753_v41, %v9425_v63 }
0x25a6   :  { %v7004_v9 = vsel %vm426_vm3, %v6754_v28, -inf }
0x25a7   :  { %7005 = vmax.xlane.f32.xlu0 %v7004_v9 }
0x25ab   :  { %v6756_v40 = vpop.f32.mrf.mxu1 }
0x25ac   :  { %v6757_v53 = vadd.f32 %v6756_v40, %v9433_v12 }
0x25ae   :  { %v7007_v18 = vsel %vm426_vm3, %v6757_v53, -inf }
0x25af   :  { %7008 = vmax.xlane.f32.xlu2 %v7007_v18 }
0x25f4   :  { %v6858_v23 = vpop.f32.mrf.mxu1 }
0x25f5   :  { %v12619_v32 = vadd.f32 %v6858_v23, %v9425_v63 }
0x25f7   :  { %v7022_v33 = vsel %vm426_vm3, %v12619_v32, -inf }
0x25f8   :  { %7023 = vmax.xlane.f32.xlu2 %v7022_v33  ;;  %v6788_v20 = vpop.f32.mrf.mxu2 }
0x25f9   :  { %v12624_v17 = vadd.f32 %v6788_v20, %v9425_v63 }
0x25fa   :  { %v6823_v13 = vpop.f32.mrf.mxu0 }
0x25fb   :  { %v12627_v30 = vadd.f32 %v6823_v13, %v9425_v63  ;;  %v7010_v45 = vsel %vm426_vm3, %v12624_v17, -inf }
0x25fc   :  { %v6861_v14 = vpop.f32.mrf.mxu1  ;;  %7011 = vmax.xlane.f32.xlu1 %v7010_v45 }
0x25fd   :  { %v12632_v38 = vadd.f32 %v6861_v14, %v9433_v12  ;;  %v7016_v8 = vsel %vm426_vm3, %v12627_v30, -inf }
0x25fe   :  { %7017 = vmax.xlane.f32.xlu0 %v7016_v8 }
0x25ff   :  { %v7025_v59 = vsel %vm426_vm3, %v12632_v38, -inf }
0x2600   :  { %7026 = vmax.xlane.f32.xlu2 %v7025_v59  ;;  %v6791_v2 = vpop.f32.mrf.mxu2 }
0x2601   :  { %v12668_v31 = vadd.f32 %v6791_v2, %v9433_v12 }
0x2602   :  { %v6826_v36 = vpop.f32.mrf.mxu0 }
0x2603   :  { %v12649_v7 = vadd.f32 %v6826_v36, %v9433_v12  ;;  %v7013_v61 = vsel %vm426_vm3, %v12668_v31, -inf }
0x2605   :  { %v7019_v24 = vsel %vm426_vm3, %v12649_v7, -inf }
0x2608   :  { %v6928_v37 = vpop.f32.mrf.mxu3 }
0x2609   :  { %v12639_v35 = vadd.f32 %v6928_v37, %v9425_v63 }
0x260a   :  { %v6963_v29 = vpop.f32.mrf.mxu0 }
0x260b   :  { %v12642_v47 = vadd.f32 %v6963_v29, %v9425_v63  ;;  %v7034_v21 = vsel %vm426_vm3, %v12639_v35, -inf }
0x260c   :  { %7035 = vmax.xlane.f32.xlu0 %v7034_v21 }
0x260d   :  { %v7040_v43 = vsel %vm426_vm3, %v12642_v47, -inf }
0x260e   :  { %7041 = vmax.xlane.f32.xlu2 %v7040_v43 }
0x2610   :  { %v6931_v49 = vpop.f32.mrf.mxu3 }
0x2611   :  { %v12659_v16 = vadd.f32 %v6931_v49, %v9433_v12 }
0x2612   :  { %v6966_v46 = vpop.f32.mrf.mxu0  ;;  %v6998_v25 = vpop.f32.mrf.mxu1 }
0x2613   :  { %v12652_v42 = vadd.f32 %v6966_v46, %v9433_v12  ;;  %v7037_v19 = vsel %vm426_vm3, %v12659_v16, -inf  ;;  %v12677_v54 = vadd.f32 %v6998_v25, %v9425_v63 }
0x2614   :  { %7020 = vmax.xlane.f32.xlu0 %v7019_v24 }
0x2615   :  { %v7043_v34 = vsel %vm426_vm3, %v12652_v42, -inf  ;;  %v7046_v40 = vsel %vm426_vm3, %v12677_v54, -inf }
0x2616   :  { %7044 = vmax.xlane.f32.xlu2 %v7043_v34 }
0x261a   :  { %v7006_v51 = vpop.xlane.xlu0 %7005  ;;  %v7001_v44 = vpop.f32.mrf.mxu1 }
0x261b   :  { %v7052_v60 = vsub.f32 %v6754_v28, %v7006_v51  ;;  %v12680_v41 = vadd.f32 %v7001_v44, %v9433_v12  ;;  %v6893_v28 = vpop.f32.mrf.mxu2 }
0x261c   :  { %7038 = vmax.xlane.f32.xlu0 %v7037_v19 }
0x261d   :  { %v7068_v58 = vmul.f32 1.442695, %v7052_v60  ;;  %v7049_v9 = vsel %vm426_vm3, %v12680_v41, -inf }
0x261f   :  { %9108 = vpow2.f32 %v7068_v58 }
0x2622   :  { %v7009_v48 = vpop.xlane.xlu2 %7008 }
0x2623   :  { %v7053_v50 = vsub.f32 %v6757_v53, %v7009_v48  ;;  %v12687_v53 = vadd.f32 %v6893_v28, %v9425_v63  ;;  %v6896_v23 = vpop.f32.mrf.mxu2 }
0x2624   :  { %v12692_v33 = vadd.f32 %v6896_v23, %v9433_v12 }
0x2625   :  { %v12663_v11 = vpop.eup %9108  ;;  %v7070_v4 = vmul.f32 1.442695, %v7053_v50  ;;  %v7028_v18 = vsel %vm426_vm3, %v12687_v53, -inf }
0x2626   :  { %v7100_v3 = vsel %vm426_vm3, %v12663_v11, 0.0  ;;  %v7031_v20 = vsel %vm426_vm3, %v12692_v33, -inf }
0x2627   :  { %9110 = vpow2.f32 %v7070_v4  ;;  %7101 = vadd.xlane.f32.xlu1 %v7100_v3 }
0x262d   :  { %v12670_v55 = vpop.eup %9110 }
0x262e   :  { %v7103_v10 = vsel %vm426_vm3, %v12670_v55, 0.0 }
0x262f   :  { %7104 = vadd.xlane.f32.xlu0 %v7103_v10  ;;  %7014 = vmax.xlane.f32.xlu1 %v7013_v61 }
0x2637   :  { %7050 = vmax.xlane.f32.xlu0 %v7049_v9  ;;  %7047 = vmax.xlane.f32.xlu1 %v7046_v40 }
0x263f   :  { %7029 = vmax.xlane.f32.xlu1 %v7028_v18 }
0x2647   :  { %7032 = vmax.xlane.f32.xlu1 %v7031_v20 }
0x266b   :  { %v7024_v13 = vpop.xlane.xlu2 %7023 }
0x266c   :  { %v7058_v45 = vsub.f32 %v12619_v32, %v7024_v13 }
0x266e   :  { %v7080_v14 = vmul.f32 1.442695, %v7058_v45 }
0x266f   :  { %v7012_v8 = vpop.xlane.xlu1 %7011 }
0x2670   :  { %9112 = vpow2.f32 %v7080_v14  ;;  %v7054_v63 = vsub.f32 %v12624_v17, %v7012_v8 }
0x2671   :  { %v7018_v59 = vpop.xlane.xlu0 %7017 }
0x2672   :  { %v7072_v36 = vmul.f32 1.442695, %v7054_v63  ;;  %v7056_v37 = vsub.f32 %v12627_v30, %v7018_v59 }
0x2673   :  { %v7027_v29 = vpop.xlane.xlu2 %7026 }
0x2674   :  { %9114 = vpow2.f32 %v7072_v36  ;;  %v7076_v12 = vmul.f32 1.442695, %v7056_v37  ;;  %v7059_v21 = vsub.f32 %v12632_v38, %v7027_v29 }
0x2676   :  { %v12700_v43 = vpop.eup %9112  ;;  %9116 = vpow2.f32 %v7076_v12  ;;  %v7082_v46 = vmul.f32 1.442695, %v7059_v21 }
0x2677   :  { %v7118_v32 = vsel %vm426_vm3, %v12700_v43, 0.0 }
0x2678   :  { %9118 = vpow2.f32 %v7082_v46  ;;  %7119 = vadd.xlane.f32.xlu0 %v7118_v32 }
0x267a   :  { %v12704_v24 = vpop.eup %9114 }
0x267b   :  { %v7106_v17 = vsel %vm426_vm3, %v12704_v24, 0.0 }
0x267c   :  { %v12708_v30 = vpop.eup %9116  ;;  %7107 = vadd.xlane.f32.xlu2 %v7106_v17 }
0x267d   :  { %v7112_v38 = vsel %vm426_vm3, %v12708_v30, 0.0 }
0x267e   :  { %v12712_v49 = vpop.eup %9118  ;;  %7113 = vadd.xlane.f32.xlu1 %v7112_v38 }
0x267f   :  { %v7036_v34 = vpop.xlane.xlu0 %7035  ;;  %v7121_v51 = vsel %vm426_vm3, %v12712_v49, 0.0 }
0x2680   :  { %v7062_v60 = vsub.f32 %v12639_v35, %v7036_v34  ;;  %7122 = vadd.xlane.f32.xlu0 %v7121_v51 }
0x2681   :  { %v7042_v3 = vpop.xlane.xlu2 %7041 }
0x2682   :  { %v7088_v19 = vmul.f32 1.442695, %v7062_v60  ;;  %v7064_v35 = vsub.f32 %v12642_v47, %v7042_v3 }
0x2684   :  { %9120 = vpow2.f32 %v7088_v19  ;;  %v7092_v28 = vmul.f32 1.442695, %v7064_v35 }
0x2687   :  { %v7021_v58 = vpop.xlane.xlu0 %7020 }
0x2688   :  { %v7057_v48 = vsub.f32 %v12649_v7, %v7021_v58 }
0x268a   :  { %v12718_v50 = vpop.eup %9120  ;;  %v7078_v25 = vmul.f32 1.442695, %v7057_v48 }
0x268b   :  { %v7130_v4 = vsel %vm426_vm3, %v12718_v50, 0.0 }
0x268c   :  { %9122 = vpow2.f32 %v7078_v25  ;;  %7131 = vadd.xlane.f32.xlu1 %v7130_v4 }
0x268f   :  { %v7039_v2 = vpop.xlane.xlu0 %7038 }
0x2690   :  { %v7063_v10 = vsub.f32 %v12659_v16, %v7039_v2 }
0x2692   :  { %v12723_v61 = vpop.eup %9122  ;;  %v7090_v44 = vmul.f32 1.442695, %v7063_v10 }
0x2693   :  { %v7115_v7 = vsel %vm426_vm3, %v12723_v61, 0.0 }
0x2694   :  { %9124 = vpow2.f32 %v7090_v44  ;;  %7116 = vadd.xlane.f32.xlu1 %v7115_v7 }
0x2695   :  { %9126 = vpow2.f32 %v7092_v28 }
0x269a   :  { %v12728_v9 = vpop.eup %9124  ;;  %v7102_v40 = vpop.xlane.xlu1 %7101 }
0x269b   :  { %9128 = vrcp.f32 %v7102_v40  ;;  %v7133_v18 = vsel %vm426_vm3, %v12728_v9, 0.0  ;;  %v12732_v16 = vpop.eup %9126  ;;  %v7159_v63 = vand.u32 2147483648, %v7102_v40  ;;  %v7157_v37 = vand.u32 2147483647, %v7102_v40 }
0x269c   :  { %7134 = vadd.xlane.f32.xlu1 %v7133_v18  ;;  %v7136_v8 = vsel %vm426_vm3, %v12732_v16, 0.0  ;;  %vm7153_vm10 = vweird.f32 %v7102_v40 }
0x269d   :  { %v7160_v21 = vor.u32 1.1754944e-38, %v7159_v63  ;;  %vm7158_vm13 = vcmp.eq.f32.partialorder %v7157_v37, 8.507059e+37  ;;  %v8719_v37 = vpack.i.bf16 %v12540_v22, %v12525_v0 }
0x26a1   :  { %v9129_v23 = vpop.eup %9128 }
0x26a2   :  { %v7149_v47 = vmul.f32 %v9129_v23, %v7102_v40  ;;  %v7015_v20 = vpop.xlane.xlu1 %7014  ;;  %v7105_v13 = vpop.xlane.xlu0 %7104  ;;  %vm7154_vm11 = vweird.f32 %v9129_v23 }
0x26a3   :  { %v7055_v45 = vsub.f32 %v12668_v31, %v7015_v20  ;;  %9130 = vrcp.f32 %v7105_v13  ;;  %vm7155_vm12 = vmor %vm7153_vm10, %vm7154_vm11  ;;  %v7173_v19 = vand.u32 2147483648, %v7105_v13  ;;  %v7171_v25 = vand.u32 2147483647, %v7105_v13 }
0x26a4   :  { %v7150_v14 = vsub.f32 1.0, %v7149_v47  ;;  %7137 = vadd.xlane.f32.xlu1 %v7136_v8  ;;  %vm7167_vm8 = vweird.f32 %v7105_v13 }
0x26a5   :  { %v7074_v59 = vmul.f32 1.442695, %v7055_v45  ;;  %vm7172_vm9 = vcmp.eq.f32.partialorder %v7171_v25, 8.507059e+37 }
0x26a6   :  { %v7151_v36 = vmul.f32 %v9129_v23, %v7150_v14 }
0x26a7   :  { %9132 = vpow2.f32 %v7074_v59  ;;  %v8724_v59 = vpack.i.bf16 %v12531_v15, %v12560_v1 }
0x26a8   :  { %v7152_v29 = vadd.f32 %v9129_v23, %v7151_v36  ;;  %v8729_v36 = vpack.i.bf16 %v12554_v6, %v12550_v27 }
0x26a9   :  { %v9131_v12 = vpop.eup %9130 }
0x26aa   :  { %v7156_v46 = vsel %vm7155_vm12, %v9129_v23, %v7152_v29  ;;  %v7163_v31 = vmul.f32 %v9131_v12, %v7105_v13  ;;  %v7048_v32 = vpop.xlane.xlu1 %7047  ;;  %vm7168_vm0 = vweird.f32 %v9131_v12  ;;  %v8709_v29 = vpack.i.bf16 %v12535_v39, %v12527_v26  ;;  %v7051_v15 = vpop.xlane.xlu0 %7050 }
0x26ab   :  { %v7161_v17 = vsel %vm7158_vm13, %v7160_v21, %v7156_v46  ;;  %v7066_v38 = vsub.f32 %v12677_v54, %v7048_v32  ;;  %vm7169_vm2 = vmor %vm7167_vm8, %vm7168_vm0  ;;  %v7174_v54 = vor.u32 1.1754944e-38, %v7173_v19 }
0x26ac   :  { %v7372_v34 = vmul.f32 %v12663_v11, %v7161_v17  ;;  %v7164_v51 = vsub.f32 1.0, %v7163_v31  ;;  %v7045_v11 = vpop.xlane.xlu2 %7044 }
0x26ad   :  { %v12739_v60 = vpop.eup %9132  ;;  %v7096_v58 = vmul.f32 1.442695, %v7066_v38  ;;  %v7065_v40 = vsub.f32 %v12652_v42, %v7045_v11 }
0x26ae   :  { %v7165_v48 = vmul.f32 %v9131_v12, %v7164_v51  ;;  %8422 = vmatmul.msk.f32.vlgmr.msra.gmra.mxu2 %vm426_vm3, %v7372_v34  ;;  %v7109_v4 = vsel %vm426_vm3, %v12739_v60, 0.0 }
0x26af   :  { %9134 = vpow2.f32 %v7096_v58  ;;  %7110 = vadd.xlane.f32.xlu2 %v7109_v4  ;;  %v7094_v47 = vmul.f32 1.442695, %v7065_v40 }
0x26b0   :  { %v7166_v3 = vadd.f32 %v9131_v12, %v7165_v48 }
0x26b2   :  { %v7030_v2 = vpop.xlane.xlu1 %7029  ;;  %v7170_v10 = vsel %vm7169_vm2, %v9131_v12, %v7166_v3  ;;  %v7067_v12 = vsub.f32 %v12680_v41, %v7051_v15 }
0x26b3   :  { %v7060_v35 = vsub.f32 %v12687_v53, %v7030_v2  ;;  %v7175_v44 = vsel %vm7172_vm9, %v7174_v54, %v7170_v10 }
0x26b4   :  { %v7373_v7 = vmul.f32 %v12670_v55, %v7175_v44  ;;  %v7098_v0 = vmul.f32 1.442695, %v7067_v12 }
0x26b5   :  { %v12746_v28 = vpop.eup %9134  ;;  %v7084_v18 = vmul.f32 1.442695, %v7060_v35 }
0x26b6   :  { %8423 = vmatmul.msk.f32.gmra.mxu2 %vm426_vm3, %v7373_v7  ;;  %v7142_v23 = vsel %vm426_vm3, %v12746_v28, 0.0 }
0x26b7   :  { %9136 = vpow2.f32 %v7084_v18  ;;  %7143 = vadd.xlane.f32.xlu0 %v7142_v23 }
0x26b8   :  { %9138 = vpow2.f32 %v7094_v47 }
0x26ba   :  { %v7033_v20 = vpop.xlane.xlu1 %7032 }
0x26bb   :  { %v7061_v13 = vsub.f32 %v12692_v33, %v7033_v20  ;;  %v8714_v33 = vpack.i.bf16 %v12522_v57, %v12544_v56 }
0x26bd   :  { %v12753_v53 = vpop.eup %9136  ;;  %v7086_v55 = vmul.f32 1.442695, %v7061_v13 }
0x26be   :  { %v7124_v45 = vsel %vm426_vm3, %v12753_v53, 0.0  ;;  %v12757_v42 = vpop.eup %9138 }
0x26bf   :  { %9140 = vpow2.f32 %v7086_v55  ;;  %7125 = vadd.xlane.f32.xlu2 %v7124_v45  ;;  %v7139_v8 = vsel %vm426_vm3, %v12757_v42, 0.0 }
0x26c5   :  { %v12759_v14 = vpop.eup %9140 }
0x26c6   :  { %v7127_v63 = vsel %vm426_vm3, %v12759_v14, 0.0 }
0x26c7   :  { %7140 = vadd.xlane.f32.xlu2 %v7139_v8  ;;  %7128 = vadd.xlane.f32.xlu1 %v7127_v63 }
0x26cb   :  { %8715 = vrot.lane.b32.xlu0 %v8714_v33, %s9216_s27 }
0x26d3   :  { %8725 = vrot.lane.b32.xlu0 %v8724_v59, %s9216_s27 }
0x26db   :  { %8730 = vrot.lane.b32.xlu0 %v8729_v36, %s9216_s27 }
0x26df   :  { %8720 = vrot.lane.b32.xlu2 %v8719_v37, %s9216_s27 }
0x26e0   :  { %8710 = vrot.lane.b32.xlu1 %v8709_v29, %s9216_s27 }
0x26eb   :  { %v12791_v58 = vpop.xlane.xlu0 %7119 }
0x26ef   :  { %v7108_v57 = vpop.xlane.xlu2 %7107 }
0x26f0   :  { %9142 = vrcp.f32 %v7108_v57  ;;  %v7187_v6 = vand.u32 2147483648, %v7108_v57  ;;  %v7185_v46 = vand.u32 2147483647, %v7108_v57  ;;  %vm7181_vm14 = vweird.f32 %v7108_v57 }
0x26f1   :  { %9144 = vpow2.f32 %v7098_v0  ;;  %v12787_v38 = vpop.xlane.xlu1 %7113 }
0x26f2   :  { %v7188_v26 = vor.u32 1.1754944e-38, %v7187_v6  ;;  %vm7186_vm10 = vcmp.eq.f32.partialorder %v7185_v46, 8.507059e+37 }
0x26f3   :  { %v12797_v11 = vpop.xlane.xlu0 %7122 }
0x26f6   :  { %v9143_v56 = vpop.eup %9142 }
0x26f7   :  { %v7177_v1 = vmul.f32 %v9143_v56, %v7108_v57  ;;  %vm7182_vm15 = vweird.f32 %v9143_v56  ;;  %v12783_v17 = vpop.eup %9144 }
0x26f8   :  { %vm7183_vm11 = vmor %vm7181_vm14, %vm7182_vm15  ;;  %v7145_v41 = vsel %vm426_vm3, %v12783_v17, 0.0 }
0x26f9   :  { %v7178_v27 = vsub.f32 1.0, %v7177_v1 }
0x26fb   :  { %v7179_v21 = vmul.f32 %v9143_v56, %v7178_v27 }
0x26fd   :  { %v7180_v22 = vadd.f32 %v9143_v56, %v7179_v21 }
0x26ff   :  { %v7184_v39 = vsel %vm7183_vm11, %v9143_v56, %v7180_v22  ;;  %v7132_v34 = vpop.xlane.xlu1 %7131 }
0x2700   :  { %v7189_v31 = vsel %vm7186_vm10, %v7188_v26, %v7184_v39  ;;  %9146 = vrcp.f32 %v7132_v34  ;;  %v7299_v37 = vand.u32 2147483648, %v7132_v34  ;;  %vm7293_vm9 = vweird.f32 %v7132_v34 }
0x2701   :  { %v7374_v32 = vmul.f32 %v12704_v24, %v7189_v31  ;;  %v7297_v57 = vand.u32 2147483647, %v7132_v34 }
0x2702   :  { %v7300_v21 = vor.u32 1.1754944e-38, %v7299_v37 }
0x2703   :  { %8424 = vmatmul.msk.f32.vlgmr.msrb.gmra.mxu3 %vm426_vm3, %v7374_v32  ;;  %vm7298_vm14 = vcmp.eq.f32.partialorder %v7297_v57, 8.507059e+37 }
0x2706   :  { %v9147_v48 = vpop.eup %9146 }
0x2707   :  { %v12789_v51 = vpop.xlane.xlu1 %7116  ;;  %v7289_v4 = vmul.f32 %v9147_v48, %v7132_v34  ;;  %vm7294_vm2 = vweird.f32 %v9147_v48 }
0x2708   :  { %vm7295_vm15 = vmor %vm7293_vm9, %vm7294_vm2  ;;  %vm7237_vm2 = vweird.f32 %v12791_v58 }
0x2709   :  { %v7290_v2 = vsub.f32 1.0, %v7289_v4 }
0x270a   :  { %7146 = vadd.xlane.f32.xlu1 %v7145_v41 }
0x270b   :  { %v7291_v18 = vmul.f32 %v9147_v48, %v7290_v2 }
0x270d   :  { %v7292_v59 = vadd.f32 %v9147_v48, %v7291_v18 }
0x270f   :  { %v12793_v24 = vpop.xlane.xlu1 %7134  ;;  %v7296_v1 = vsel %vm7295_vm15, %v9147_v48, %v7292_v59 }
0x2710   :  { %v7301_v22 = vsel %vm7298_vm14, %v7300_v21, %v7296_v1 }
0x2717   :  { %v12802_v23 = vpop.xlane.xlu1 %7137 }
0x2722   :  { %v7111_v19 = vpop.xlane.xlu2 %7110 }
0x2723   :  { %9148 = vrcp.f32 %v7111_v19  ;;  %v7201_v35 = vand.u32 2147483648, %v7111_v19  ;;  %v7199_v44 = vand.u32 2147483647, %v7111_v19  ;;  %vm7195_vm13 = vweird.f32 %v7111_v19 }
0x2724   :  { %9150 = vrcp.f32 %v12793_v24 }
0x2725   :  { %9152 = vrcp.f32 %v12791_v58  ;;  %v7202_v47 = vor.u32 1.1754944e-38, %v7201_v35  ;;  %vm7200_vm8 = vcmp.eq.f32.partialorder %v7199_v44, 8.507059e+37 }
0x2726   :  { %9154 = vrcp.f32 %v12787_v38 }
0x2729   :  { %v9149_v25 = vpop.eup %9148 }
0x272a   :  { %v7191_v3 = vmul.f32 %v9149_v25, %v7111_v19  ;;  %vm7196_vm12 = vweird.f32 %v9149_v25  ;;  %v12799_v40 = vpop.eup %9150  ;;  %v12808_v63 = vpop.xlane.xlu0 %7143 }
0x272b   :  { %vm7197_vm0 = vmor %vm7195_vm13, %vm7196_vm12  ;;  %v12804_v55 = vpop.eup %9152  ;;  %v7303_v8 = vmul.f32 %v12799_v40, %v12793_v24  ;;  %vm7307_vm12 = vweird.f32 %v12793_v24 }
0x272c   :  { %v7192_v54 = vsub.f32 1.0, %v7191_v3  ;;  %v7233_v36 = vmul.f32 %v12804_v55, %v12791_v58  ;;  %v12814_v29 = vpop.eup %9154  ;;  %vm7238_vm14 = vweird.f32 %v12804_v55 }
0x272d   :  { %v7304_v56 = vsub.f32 1.0, %v7303_v8  ;;  %v7205_v46 = vmul.f32 %v12814_v29, %v12787_v38 }
0x272e   :  { %v7193_v10 = vmul.f32 %v9149_v25, %v7192_v54  ;;  %v7234_v6 = vsub.f32 1.0, %v7233_v36 }
0x272f   :  { %v7305_v26 = vmul.f32 %v12799_v40, %v7304_v56  ;;  %v7206_v4 = vsub.f32 1.0, %v7205_v46 }
0x2730   :  { %v7194_v7 = vadd.f32 %v9149_v25, %v7193_v10  ;;  %v7382_v10 = vmul.f32 %v12718_v50, %v7301_v22  ;;  %v7311_v50 = vand.u32 2147483647, %v12793_v24 }
0x2732   :  { %v7126_v20 = vpop.xlane.xlu2 %7125  ;;  %v7198_v13 = vsel %vm7197_vm0, %v9149_v25, %v7194_v7  ;;  %v7235_v25 = vmul.f32 %v12804_v55, %v7234_v6  ;;  %v7306_v7 = vadd.f32 %v12799_v40, %v7305_v26  ;;  %vm7308_vm0 = vweird.f32 %v12799_v40 }
0x2733   :  { %9156 = vrcp.f32 %v7126_v20  ;;  %v7203_v45 = vsel %vm7200_vm8, %v7202_v47, %v7198_v13  ;;  %v7269_v39 = vand.u32 2147483647, %v7126_v20  ;;  %v7271_v31 = vand.u32 2147483648, %v7126_v20  ;;  %vm12849_vm9 = vmor %vm7307_vm12, %vm7308_vm0 }
0x2734   :  { %v7375_v33 = vmul.f32 %v12739_v60, %v7203_v45  ;;  %9158 = vrcp.f32 %v12797_v11  ;;  %vm7265_vm10 = vweird.f32 %v7126_v20  ;;  %v7236_v21 = vadd.f32 %v12804_v55, %v7235_v25  ;;  %vm12881_vm0 = vmor %vm7237_vm2, %vm7238_vm14 }
0x2735   :  { %9160 = vrcp.f32 %v12789_v51  ;;  %v7272_v35 = vor.u32 1.1754944e-38, %v7271_v31  ;;  %vm7270_vm8 = vcmp.eq.f32.partialorder %v7269_v39, 8.507059e+37  ;;  %v7243_v39 = vand.u32 2147483648, %v12791_v58 }
0x2736   :  { %8425 = vmatmul.msk.f32.gmra.mxu3 %vm426_vm3, %v7375_v33  ;;  %vm7210_vm12 = vweird.f32 %v12814_v29 }
0x2739   :  { %v9157_v15 = vpop.eup %9156 }
0x273a   :  { %v7261_v12 = vmul.f32 %v9157_v15, %v7126_v20  ;;  %v12817_v60 = vpop.xlane.xlu2 %7140  ;;  %v12819_v27 = vpop.xlane.xlu1 %7128  ;;  %vm7266_vm11 = vweird.f32 %v9157_v15  ;;  %v7313_v20 = vand.u32 2147483648, %v12793_v24  ;;  %v7310_v24 = vsel %vm12849_vm9, %v12799_v40, %v7306_v7 }
0x273b   :  { %9162 = vrcp.f32 %v12819_v27  ;;  %v12826_v41 = vpop.eup %9158  ;;  %vm7267_vm13 = vmor %vm7265_vm10, %vm7266_vm11  ;;  %v7285_v56 = vand.u32 2147483648, %v12819_v27  ;;  %v7283_v6 = vand.u32 2147483647, %v12819_v27  ;;  %vm7312_vm11 = vcmp.eq.f32.partialorder %v7311_v50, 8.507059e+37 }
0x273c   :  { %v7262_v0 = vsub.f32 1.0, %v7261_v12  ;;  %v12829_v54 = vpop.eup %9160  ;;  %v12833_v2 = vmul.f32 %v12826_v41, %v12797_v11  ;;  %9164 = vrcp.f32 %v12802_v23  ;;  %v7314_v1 = vor.u32 1.1754944e-38, %v7313_v20 }
0x273d   :  { %v8716_v32 = vpop.permute.xlu0 %8715  ;;  %v7219_v36 = vmul.f32 %v12829_v54, %v12789_v51  ;;  %9166 = vrcp.f32 %v12808_v63  ;;  %vm7279_vm10 = vweird.f32 %v12819_v27  ;;  %vm7284_vm9 = vcmp.eq.f32.partialorder %v7283_v6, 8.507059e+37 }
0x273e   :  { %v7263_v34 = vmul.f32 %v9157_v15, %v7262_v0  ;;  %v8718_v19 = vunpack.i.h.bf16 %v8716_v32  ;;  %v8717_v48 = vunpack.i.l.bf16 %v8716_v32  ;;  %v7248_v46 = vsub.f32 1.0, %v12833_v2 }
0x273f   :  { %v7220_v0 = vsub.f32 1.0, %v7219_v36  ;;  %v7315_v26 = vsel %vm7312_vm11, %v7314_v1, %v7310_v24  ;;  %v7286_v32 = vor.u32 1.1754944e-38, %v7285_v56  ;;  %9168 = vrcp.f32 %v12817_v60 }
0x2740   :  { %v7264_v3 = vadd.f32 %v9157_v15, %v7263_v34  ;;  %7554 = vmatpush.msrb.mxu2 %v8717_v48  ;;  %7589 = vmatpush.msra.mxu3 %v8718_v19  ;;  %v7215_v48 = vand.u32 2147483648, %v12787_v38  ;;  %vm7251_vm11 = vweird.f32 %v12797_v11  ;;  %v7227_v1 = vand.u32 2147483647, %v12789_v51 }
0x2741   :  { %v9163_v44 = vpop.eup %9162  ;;  %v7221_v7 = vmul.f32 %v12829_v54, %v7220_v0 }
0x2742   :  { %v7268_v18 = vsel %vm7267_vm13, %v9157_v15, %v7264_v3  ;;  %v8721_v47 = vpop.permute.xlu2 %8720  ;;  %v7275_v45 = vmul.f32 %v9163_v44, %v12819_v27  ;;  %v7241_v15 = vand.u32 2147483647, %v12791_v58  ;;  %vm7280_vm15 = vweird.f32 %v9163_v44  ;;  %v12867_v40 = vpop.eup %9164 }
0x2743   :  { %v7273_v13 = vsel %vm7270_vm8, %v7272_v35, %v7268_v18  ;;  %v8723_v8 = vunpack.i.h.bf16 %v8721_v47  ;;  %v8722_v59 = vunpack.i.l.bf16 %v8721_v47  ;;  %vm7281_vm13 = vmor %vm7279_vm10, %vm7280_vm15  ;;  %v12875_v19 = vpop.eup %9166  ;;  %vm7209_vm8 = vweird.f32 %v12787_v38 }
0x2744   :  { %v7380_v33 = vmul.f32 %v12753_v53, %v7273_v13  ;;  %v7276_v57 = vsub.f32 1.0, %v7275_v45  ;;  %v7207_v53 = vmul.f32 %v12814_v29, %v7206_v4  ;;  %v7240_v4 = vsel %vm12881_vm0, %v12804_v55, %v7236_v21  ;;  %vm12892_vm15 = vmor %vm7209_vm8, %vm7210_vm12 }
0x2745   :  { %7590 = vmatpush.msra.mxu3 %v8723_v8  ;;  %7555 = vmatpush.msrb.mxu2 %v8722_v59  ;;  %v12873_v34 = vpop.permute.xlu0 %8725  ;;  %v7213_v3 = vand.u32 2147483647, %v12787_v38  ;;  %v7249_v35 = vmul.f32 %v12826_v41, %v7248_v46  ;;  %v7244_v18 = vor.u32 1.1754944e-38, %v7243_v39  ;;  %v7345_v55 = vmul.f32 %v12875_v19, %v12808_v63  ;;  %v12916_v36 = vpop.eup %9168 }
0x2746   :  { %8432 = vmatmul.msk.f32.vlgmr.msra.gmra.mxu3 %vm426_vm3, %v7382_v10  ;;  %v7277_v12 = vmul.f32 %v9163_v44, %v7276_v57  ;;  %8430 = vmatmul.msk.f32.vlgmr.msrb.gmra.mxu2 %vm426_vm3, %v7380_v33  ;;  %v7208_v31 = vadd.f32 %v12814_v29, %v7207_v53  ;;  %v7383_v10 = vmul.f32 %v12728_v9, %v7315_v26  ;;  %vm7242_vm2 = vcmp.eq.f32.partialorder %v7241_v15, 8.507059e+37 }
0x2747   :  { %v7317_v9 = vmul.f32 %v12867_v40, %v12802_v23  ;;  %v7216_v47 = vor.u32 1.1754944e-38, %v7215_v48  ;;  %v7245_v20 = vsel %vm7242_vm2, %v7244_v18, %v7240_v4  ;;  %vm7214_vm14 = vcmp.eq.f32.partialorder %v7213_v3, 8.507059e+37 }
0x2748   :  { %v7278_v22 = vadd.f32 %v9163_v44, %v7277_v12  ;;  %v7212_v38 = vsel %vm12892_vm15, %v12814_v29, %v7208_v31  ;;  %vm7252_vm10 = vweird.f32 %v12826_v41  ;;  %v7250_v29 = vadd.f32 %v12826_v41, %v7249_v35 }
0x2749   :  { %v7222_v13 = vadd.f32 %v12829_v54, %v7221_v7  ;;  %vm7224_vm12 = vweird.f32 %v12829_v54  ;;  %v7255_v45 = vand.u32 2147483647, %v12797_v11  ;;  %v7257_v8 = vand.u32 2147483648, %v12797_v11 }
0x274a   :  { %v7282_v25 = vsel %vm7281_vm13, %v9163_v44, %v7278_v22  ;;  %v7318_v50 = vsub.f32 1.0, %v7317_v9  ;;  %v7346_v33 = vsub.f32 1.0, %v7345_v55  ;;  %vm12918_vm13 = vmor %vm7251_vm11, %vm7252_vm10  ;;  %vm7223_vm0 = vweird.f32 %v12789_v51 }
0x274b   :  { %v7287_v2 = vsel %vm7284_vm9, %v7286_v32, %v7282_v25  ;;  %v7229_v57 = vand.u32 2147483648, %v12789_v51  ;;  %v7378_v56 = vmul.f32 %v12700_v43, %v7245_v20  ;;  %vm12926_vm8 = vmor %vm7223_vm0, %vm7224_vm12  ;;  %v8728_v6 = vunpack.i.h.bf16 %v12873_v34 }
0x274c   :  { %v7381_v44 = vmul.f32 %v12759_v14, %v7287_v2  ;;  %v7217_v14 = vsel %vm7214_vm14, %v7216_v47, %v7212_v38  ;;  %v8727_v21 = vunpack.i.l.bf16 %v12873_v34  ;;  %v7226_v46 = vsel %vm12926_vm8, %v12829_v54, %v7222_v13 }
0x274d   :  { %v7376_v24 = vmul.f32 %v12708_v30, %v7217_v14  ;;  %v8731_v12 = vpop.permute.xlu0 %8730  ;;  %v7254_v43 = vsel %vm12918_vm13, %v12826_v41, %v7250_v29  ;;  %v7258_v30 = vor.u32 1.1754944e-38, %v7257_v8  ;;  %v7319_v0 = vmul.f32 %v12867_v40, %v7318_v50 }
0x274e   :  { %8433 = vmatmul.msk.f32.gmra.mxu3 %vm426_vm3, %v7383_v10  ;;  %8431 = vmatmul.msk.f32.gmra.mxu2 %vm426_vm3, %v7381_v44  ;;  %v7347_v51 = vmul.f32 %v12875_v19, %v7346_v33  ;;  %v7331_v22 = vmul.f32 %v12916_v36, %v12817_v60  ;;  %vm7256_vm9 = vcmp.eq.f32.partialorder %v7255_v45, 8.507059e+37  ;;  %v7230_v26 = vor.u32 1.1754944e-38, %v7229_v57 }
0x274f   :  { %v8733_v39 = vunpack.i.h.bf16 %v8731_v12  ;;  %v8732_v54 = vunpack.i.l.bf16 %v8731_v12  ;;  %vm7228_vm15 = vcmp.eq.f32.partialorder %v7227_v1, 8.507059e+37  ;;  %v7259_v41 = vsel %vm7256_vm9, %v7258_v30, %v7254_v43  ;;  %v7417_v1 = vpop.f32.mrf.mxu2 }
0x2750   :  { %vm7322_vm2 = vweird.f32 %v12867_v40  ;;  %v7231_v31 = vsel %vm7228_vm15, %v7230_v26, %v7226_v46  ;;  %v7320_v32 = vadd.f32 %v12867_v40, %v7319_v0  ;;  %v7348_v34 = vadd.f32 %v12875_v19, %v7347_v51  ;;  %v8442_v51 = vld [vmem:[%s13139_s3 + $0xb8] sm:$0xff] }
0x2751   :  { %vm7350_vm14 = vweird.f32 %v12875_v19  ;;  %v7332_v27 = vsub.f32 1.0, %v7331_v22  ;;  %vm7321_vm11 = vweird.f32 %v12802_v23  ;;  %v7327_v48 = vand.u32 2147483648, %v12802_v23  ;;  %v8441_v22 = vld [vmem:[%s13139_s3 + $0xb0] sm:$0xff]  ;;  %7764 = vmatpush.msra.mxu2 %v8442_v51 }
0x2752   :  { %v8711_v59 = vpop.permute.xlu1 %8710  ;;  %v7355_v25 = vand.u32 2147483648, %v12808_v63  ;;  %v7379_v4 = vmul.f32 %v12712_v49, %v7259_v41  ;;  %vm12953_vm10 = vmor %vm7321_vm11, %vm7322_vm2  ;;  %v7325_v2 = vand.u32 2147483647, %v12802_v23  ;;  %vm7349_vm12 = vweird.f32 %v12808_v63 }
0x2753   :  { %v8713_v15 = vunpack.i.h.bf16 %v8711_v59  ;;  %v8712_v53 = vunpack.i.l.bf16 %v8711_v59  ;;  %v7353_v10 = vand.u32 2147483647, %v12808_v63  ;;  %v7377_v58 = vmul.f32 %v12723_v61, %v7231_v31  ;;  %vm7351_vm13 = vmor %vm7349_vm12, %vm7350_vm14  ;;  %7765 = vmatpush.msra.mxu2 %v8441_v22 }
0x2754   :  { %v7324_v35 = vsel %vm12953_vm10, %v12867_v40, %v7320_v32  ;;  %v7352_v7 = vsel %vm7351_vm13, %v12875_v19, %v7348_v34  ;;  %v7333_v49 = vmul.f32 %v12916_v36, %v7332_v27  ;;  %v7328_v23 = vor.u32 1.1754944e-38, %v7327_v48 }
0x2755   :  { %7485 = vmatpush.msrb.mxu0 %v8712_v53  ;;  %7520 = vmatpush.msrb.mxu1 %v8713_v15  ;;  %v7356_v44 = vor.u32 1.1754944e-38, %v7355_v25  ;;  %vm7326_vm0 = vcmp.eq.f32.partialorder %v7325_v2, 8.507059e+37  ;;  %vm7354_vm8 = vcmp.eq.f32.partialorder %v7353_v10, 8.507059e+37  ;;  %vm7336_vm9 = vweird.f32 %v12916_v36 }
0x2756   :  { %8426 = vmatmul.msk.f32.vlgmr.msrb.gmra.mxu0 %vm426_vm3, %v7376_v24  ;;  %8428 = vmatmul.msk.f32.vlgmr.msrb.gmra.mxu1 %vm426_vm3, %v7378_v56  ;;  %v7329_v63 = vsel %vm7326_vm0, %v7328_v23, %v7324_v35  ;;  %v7334_v61 = vadd.f32 %v12916_v36, %v7333_v49  ;;  %v7341_v40 = vand.u32 2147483648, %v12817_v60  ;;  %vm7335_vm15 = vweird.f32 %v12817_v60 }
0x2757   :  { %7624 = vmatpush.msra.mxu0 %v8727_v21  ;;  %7659 = vmatpush.msra.mxu1 %v8728_v6  ;;  %v7357_v18 = vsel %vm7354_vm8, %v7356_v44, %v7352_v7  ;;  %v7384_v19 = vmul.f32 %v12732_v16, %v7329_v63  ;;  %v7339_v9 = vand.u32 2147483647, %v12817_v60  ;;  %vm7337_vm2 = vmor %vm7335_vm15, %vm7336_vm9  ;;  %vm13301_vm0 = vcmask 228352  }
0x2758   :  { %v7386_v38 = vmul.f32 %v12746_v28, %v7357_v18  ;;  %v7338_v55 = vsel %vm7337_vm2, %v12916_v36, %v7334_v61  ;;  %v7342_v47 = vor.u32 1.1754944e-38, %v7341_v40  ;;  %vm13302_vm8 = vcmask 261120   ;;  %vm13303_vm9 = vmmov %vm13301_vm0 }
0x2759   :  { %7625 = vmatpush.msra.mxu0 %v8732_v54  ;;  %7660 = vmatpush.msra.mxu1 %v8733_v39  ;;  %vm7340_vm14 = vcmp.eq.f32.partialorder %v7339_v9, 8.507059e+37  ;;  %v8440_v39 = vld [vmem:[%s13139_s3 + $0xa8] sm:$0xff]  ;;  %v8439_v54 = vld [vmem:[%s13139_s3 + $0xa0] sm:$0xff]  ;;  %vm13304_vm15 = vmmov %vm13302_vm8 }
0x275a   :  { %v7343_v20 = vsel %vm7340_vm14, %v7342_v47, %v7338_v55  ;;  %7766 = vmatpush.msra.mxu2 %v8440_v39 }
0x275b   :  { %v7385_v14 = vmul.f32 %v12757_v42, %v7343_v20 }
0x275c   :  { %7767 = vmatpush.msra.mxu2 %v8439_v54  ;;  %v8465_v54 = vld [vmem:[%s13142_s6 + $0x2e8] sm:$0xff] }
0x275e   :  { %8427 = vmatmul.msk.f32.gmra.mxu0 %vm426_vm3, %v7377_v58  ;;  %8429 = vmatmul.msk.f32.gmra.mxu1 %vm426_vm3, %v7379_v4 }
0x2766   :  { %8434 = vmatmul.msk.f32.vlgmr.msra.gmra.mxu0 %vm426_vm3, %v7384_v19  ;;  %8436 = vmatmul.msk.f32.vlgmr.msra.gmra.mxu1 %vm426_vm3, %v7386_v38 }
0x276e   :  { %8435 = vmatmul.msk.f32.gmra.mxu0 %vm426_vm3, %v7385_v14  ;;  %v13027_v14 = vld [vmem:[%s13143_s7 + $0x28] sm:$0x3f] }
0x277d   :  { %v7147_v16 = vpop.xlane.xlu1 %7146 }
0x277e   :  { %9170 = vrcp.f32 %v7147_v16  ;;  %v7369_v45 = vand.u32 2147483648, %v7147_v16  ;;  %v7367_v50 = vand.u32 2147483647, %v7147_v16  ;;  %vm7363_vm10 = vweird.f32 %v7147_v16 }
0x2780   :  { %v7370_v59 = vor.u32 1.1754944e-38, %v7369_v45  ;;  %vm7368_vm13 = vcmp.eq.f32.partialorder %v7367_v50, 8.507059e+37 }
0x2784   :  { %v9171_v28 = vpop.eup %9170 }
0x2785   :  { %v7359_v29 = vmul.f32 %v9171_v28, %v7147_v16  ;;  %vm7364_vm11 = vweird.f32 %v9171_v28  ;;  %v7745_v16 = vperm.slane %v13027_v14, 0 }
0x2786   :  { %v7452_v13 = vpop.f32.mrf.mxu3  ;;  %vm7365_vm12 = vmor %vm7363_vm10, %vm7364_vm11 }
0x2787   :  { %v7360_v60 = vsub.f32 1.0, %v7359_v29  ;;  %7670 = vrot.lane.b32.xlu2 %v7452_v13, %s9220_s30 }
0x2789   :  { %v7361_v8 = vmul.f32 %v9171_v28, %v7360_v60 }
0x278b   :  { %v7362_v33 = vadd.f32 %v9171_v28, %v7361_v8 }
0x278d   :  { %v7366_v42 = vsel %vm7365_vm12, %v9171_v28, %v7362_v33 }
0x278e   :  { %v7371_v36 = vsel %vm7368_vm13, %v7370_v59, %v7366_v42 }
0x278f   :  { %v7387_v37 = vmul.f32 %v12783_v17, %v7371_v36  ;;  %v7420_v17 = vpop.f32.mrf.mxu2 }
0x2791   :  { %8437 = vmatmul.msk.f32.gmra.mxu1 %vm426_vm3, %v7387_v37 }
0x27b9   :  { %v7455_v57 = vpop.f32.mrf.mxu3 }
0x27c9   :  { %v7592_v56 = vpop.f32.mrf.mxu3  ;;  %v7557_v46 = vpop.f32.mrf.mxu2 }
0x27d1   :  { %v7595_v21 = vpop.f32.mrf.mxu3  ;;  %v7560_v43 = vpop.f32.mrf.mxu2 }
0x27d3   :  { %v7487_v15 = vpop.f32.mrf.mxu0  ;;  %v7522_v53 = vpop.f32.mrf.mxu1 }
0x27d4   :  { %7678 = vrot.lane.b32.xlu1 %v7487_v15, %s13250_s9  ;;  %7686 = vrot.lane.b32.xlu0 %v7522_v53, %s13300_s2  ;;  %v8448_v15 = vld [vmem:[%s13140_s4 + $0xb8] sm:$0xff] }
0x27d5   :  { %7859 = vmatpush.msrb.mxu3 %v8448_v15 }
0x27db   :  { %v7490_v24 = vpop.f32.mrf.mxu0  ;;  %v7525_v11 = vpop.f32.mrf.mxu1 }
0x27dc   :  { %7680 = vrot.lane.b32.xlu1 %v7490_v24, %s13250_s9  ;;  %v8447_v24 = vld [vmem:[%s13140_s4 + $0xb0] sm:$0xff] }
0x27dd   :  { %7860 = vmatpush.msrb.mxu3 %v8447_v24 }
0x27e1   :  { %v7671_v26 = vpop.permute.xlu2 %7670 }
0x27e2   :  { %v7724_v48 = vsel %vm149_vm1, %v7417_v1, %v7671_v26  ;;  %v8446_v1 = vld [vmem:[%s13140_s4 + $0xa8] sm:$0xff] }
0x27e3   :  { %v7627_v12 = vpop.f32.mrf.mxu0  ;;  %v7662_v6 = vpop.f32.mrf.mxu1  ;;  %7861 = vmatpush.msrb.mxu3 %v8446_v1 }
0x27e4   :  { %7718 = vrot.lane.b32.xlu0 %v7662_v6, %s13272_s17  ;;  %7710 = vrot.lane.b32.xlu2 %v7627_v12, %s13209_s13  ;;  %v8445_v6 = vld [vmem:[%s13140_s4 + $0xa0] sm:$0xff] }
0x27e5   :  { %7704 = vrot.lane.b32.xlu1 %v7595_v21, %s13187_s15  ;;  %7862 = vmatpush.msrb.mxu3 %v8445_v6 }
0x27eb   :  { %v7630_v30 = vpop.f32.mrf.mxu0 }
0x27ec   :  { %7672 = vrot.lane.b32.xlu2 %v7455_v57, %s9220_s30  ;;  %7702 = vrot.lane.b32.xlu0 %v7592_v56, %s13187_s15 }
0x27f4   :  { %7688 = vrot.lane.b32.xlu0 %v7525_v11, %s13300_s2  ;;  %7694 = vrot.lane.b32.xlu2 %v7557_v46, %s13188_s16  ;;  %s9226_s2 = smov [#allocation2]  }
0x27f5   :  { %s7975_s19 = sshll.u32 %s9226_s2, 4  ;;  %s7976_s19 = int_to_ptr.vmem [resolvable:$true] %s7975_s19 }
0x27fc   :  { %7712 = vrot.lane.b32.xlu0 %v7630_v30, %s13209_s13  ;;  %7696 = vrot.lane.b32.xlu2 %v7560_v43, %s13188_s16  ;;  %v8467_v30 = vld [vmem:[%s13142_s6 + $0x2f8] sm:$0xff] }
0x27fd   :  { %7890 = vmatpush.msrb.mxu0 %v8467_v30 }
0x280e   :  { %v7665_v0 = vpop.f32.mrf.mxu1 }
0x280f   :  { %7720 = vrot.lane.b32.xlu2 %v7665_v0, %s13272_s17  ;;  %v8466_v0 = vld [vmem:[%s13142_s6 + $0x2f0] sm:$0xff] }
0x2810   :  { %7891 = vmatpush.msrb.mxu0 %v8466_v0 }
0x2812   :  { %7892 = vmatpush.msrb.mxu0 %v8465_v54 }
0x283e   :  { %v7711_v41 = vpop.permute.xlu2 %7710 }
0x2846   :  { %v7687_v31 = vpop.permute.xlu0 %7686  ;;  %v7673_v32 = vpop.permute.xlu2 %7672 }
0x2847   :  { %v7679_v27 = vpop.permute.xlu1 %7678  ;;  %v7725_v23 = vsel %vm149_vm1, %v7420_v17, %v7673_v32  ;;  %vm13305_vm1 = vmmov %vm13302_vm8  ;;  %v8464_v32 = vld [vmem:[%s13142_s6 + $0x2e0] sm:$0xff] }
0x2848   :  { %v7726_v25 = vsel %vm1149_vm4, %v7724_v48, %v7679_v27  ;;  %v8463_v48 = vld [vmem:[%s13142_s6 + $0x2d8] sm:$0xff]  ;;  %7893 = vmatpush.msrb.mxu0 %v8464_v32  ;;  %vm13309_vm14 = vmmov %vm13305_vm1 }
0x2849   :  { %v7728_v3 = vsel %vm1152_vm5, %v7726_v25, %v7687_v31  ;;  %v7823_v25 = vperm.slane %v13027_v14, 2  ;;  %vm13310_vm13 = vmmov %vm13305_vm1 }
0x284a   :  { %7894 = vmatpush.msrb.mxu0 %v8463_v48 }
0x284e   :  { %v7695_v4 = vpop.permute.xlu2 %7694 }
0x284f   :  { %v7730_v2 = vsel %vm426_vm3, %v7728_v3, %v7695_v4  ;;  %v7681_v49 = vpop.permute.xlu1 %7680  ;;  %v8462_v3 = vld [vmem:[%s13142_s6 + $0x2d0] sm:$0xff] }
0x2850   :  { %v7727_v63 = vsel %vm1149_vm4, %v7725_v23, %v7681_v49  ;;  %vm13307_vm4 = vmmov %vm13305_vm1  ;;  %7895 = vmatpush.msrb.mxu0 %v8462_v3  ;;  %v8460_v49 = vld [vmem:[%s13142_s6 + $0x2c0] sm:$0xff] }
0x2856   :  { %v7719_v34 = vpop.permute.xlu0 %7718  ;;  %v7697_v18 = vpop.permute.xlu2 %7696 }
0x2857   :  { %v7705_v19 = vpop.permute.xlu1 %7704 }
0x285e   :  { %v7703_v10 = vpop.permute.xlu0 %7702 }
0x285f   :  { %v7732_v58 = vsel %vm1157_vm6, %v7730_v2, %v7703_v10  ;;  %v8461_v10 = vld [vmem:[%s13142_s6 + $0x2c8] sm:$0xff] }
0x2860   :  { %v7734_v35 = vsel %vm1160_vm7, %v7732_v58, %v7711_v41  ;;  %7896 = vmatpush.msrb.mxu0 %v8461_v10 }
0x2861   :  { %v7736_v7 = vsel %vm13301_vm0, %v7734_v35, %v7719_v34  ;;  %v7828_v35 = vperm.slane %v13027_v14, 3  ;;  %vm13311_vm0 = vmmov %vm13305_vm1 }
0x2862   :  { %8443 = vmatmul.msk.f32.vlgmr.msra.gmra.mxu2 %vm13302_vm8, %v7736_v7  ;;  %7897 = vmatpush.msrb.mxu0 %v8460_v49  ;;  %vm13312_vm8 = vmmov %vm13311_vm0 }
0x2866   :  { %v7689_v44 = vpop.permute.xlu0 %7688 }
0x2867   :  { %v7729_v61 = vsel %vm1152_vm5, %v7727_v63, %v7689_v44  ;;  %vm13308_vm5 = vmmov %vm13305_vm1  ;;  %v8459_v63 = vld [vmem:[%s13142_s6 + $0x2b8] sm:$0xff] }
0x2868   :  { %v7731_v40 = vsel %vm426_vm3, %v7729_v61, %v7697_v18  ;;  %vm13306_vm3 = vmmov %vm13305_vm1  ;;  %7898 = vmatpush.msrb.mxu0 %v8459_v63 }
0x2869   :  { %v7733_v9 = vsel %vm1157_vm6, %v7731_v40, %v7705_v19  ;;  %v7721_v55 = vpop.permute.xlu2 %7720  ;;  %v8458_v40 = vld [vmem:[%s13142_s6 + $0x2b0] sm:$0xff] }
0x286a   :  { %7899 = vmatpush.msrb.mxu0 %v8458_v40 }
0x286e   :  { %v7713_v38 = vpop.permute.xlu0 %7712 }
0x286f   :  { %v7735_v47 = vsel %vm1160_vm7, %v7733_v9, %v7713_v38  ;;  %v8457_v38 = vld [vmem:[%s13142_s6 + $0x2a8] sm:$0xff] }
0x2870   :  { %v7737_v20 = vsel %vm13303_vm9, %v7735_v47, %v7721_v55  ;;  %v8456_v55 = vld [vmem:[%s13142_s6 + $0x2a0] sm:$0xff]  ;;  %7900 = vmatpush.msrb.mxu0 %v8457_v38  ;;  %vm13313_vm9 = vmmov %vm13311_vm0 }
0x2871   :  { %8444 = vmatmul.msk.f32.gmra.mxu2 %vm13304_vm15, %v7737_v20  ;;  %v8455_v20 = vld [vmem:[%s13142_s6 + $0x298] sm:$0xff]  ;;  %vm13314_vm15 = vmmov %vm13311_vm0 }
0x2872   :  { %7901 = vmatpush.msrb.mxu0 %v8456_v55 }
0x2874   :  { %7902 = vmatpush.msrb.mxu0 %v8455_v20 }
0x28e5   :  { %v7769_v28 = vpop.f32.mrf.mxu2 }
0x28e6   :  { %v7770_v29 = vadd.f32 %v7769_v28, %v7745_v16 }
0x28e8   :  { %v13031_v13 = vadd.f32 %v7770_v29, %v12493_v5 }
0x28ea   :  { %v7777_v60 = vsel %vm13305_vm1, %v13031_v13, 0.0  ;;  %v7785_v45 = vmul.f32 %v13031_v13, %v13031_v13 }
0x28eb   :  { %7778 = vadd.xlane.f32.xlu1 %v7777_v60 }
0x28ec   :  { %v7787_v8 = vsel %vm13306_vm3, %v7785_v45, 0.0 }
0x28ed   :  { %7788 = vadd.xlane.f32.xlu0 %v7787_v8  ;;  %v8454_v8 = vld [vmem:[%s13142_s6 + $0x290] sm:$0xff] }
0x28ee   :  { %7903 = vmatpush.msrb.mxu0 %v8454_v8 }
0x28f4   :  { %v7772_v50 = vpop.f32.mrf.mxu2 }
0x28f5   :  { %v7773_v33 = vadd.f32 %v7772_v50, %v7745_v16  ;;  %v8453_v50 = vld [vmem:[%s13142_s6 + $0x288] sm:$0xff] }
0x28f6   :  { %7904 = vmatpush.msrb.mxu0 %v8453_v50 }
0x28f7   :  { %v13039_v59 = vadd.f32 %v7773_v33, %v12497_v52  ;;  %v8452_v33 = vld [vmem:[%s13142_s6 + $0x280] sm:$0xff] }
0x28f8   :  { %7905 = vmatpush.msrb.mxu0 %v8452_v33 }
0x28f9   :  { %v7780_v42 = vsel %vm13307_vm4, %v13039_v59, 0.0  ;;  %v7786_v5 = vmul.f32 %v13039_v59, %v13039_v59 }
0x28fa   :  { %7781 = vadd.xlane.f32.xlu2 %v7780_v42 }
0x28fb   :  { %v7790_v36 = vsel %vm13308_vm5, %v7786_v5, 0.0  ;;  %vm13315_vm5 = vmmov %vm13311_vm0 }
0x28fc   :  { %7791 = vadd.xlane.f32.xlu1 %v7790_v36 }
0x295e   :  { %v7779_v37 = vpop.xlane.xlu1 %7778 }
0x295f   :  { %v7783_v57 = vmul.f32 %v7779_v37, %v9812_v62 }
0x2960   :  { %v7789_v53 = vpop.xlane.xlu0 %7788 }
0x2961   :  { %v7795_v52 = vmul.f32 %v7783_v57, %v7783_v57  ;;  %v7793_v56 = vmul.f32 %v7789_v53, %v9812_v62  ;;  %v7799_v58 = vsub.f32 %v13031_v13, %v7783_v57  ;;  %v7889_v53 = vperm.slane %v13027_v14, 1 }
0x2963   :  { %v7797_v11 = vsub.f32 %v7793_v56, %v7795_v52 }
0x2965   :  { %v7801_v12 = vadd.f32 1e-05, %v7797_v11 }
0x2967   :  { %9172 = vrsqrt.f32 %v7801_v12  ;;  %vm7809_vm7 = vweird.f32 %v7801_v12 }
0x296d   :  { %v9173_v21 = vpop.eup %9172  ;;  %v7782_v17 = vpop.xlane.xlu2 %7781 }
0x296e   :  { %v7804_v46 = vmul.f32 %v9173_v21, %v7801_v12  ;;  %v7784_v43 = vmul.f32 %v7782_v17, %v9812_v62  ;;  %vm7810_vm6 = vweird.f32 %v9173_v21 }
0x296f   :  { %v7792_v51 = vpop.xlane.xlu1 %7791  ;;  %vm7811_vm2 = vmor %vm7809_vm7, %vm7810_vm6 }
0x2970   :  { %v7805_v22 = vmul.f32 %v9173_v21, %v7804_v46  ;;  %v7796_v26 = vmul.f32 %v7784_v43, %v7784_v43  ;;  %v7794_v39 = vmul.f32 %v7792_v51, %v9812_v62  ;;  %v7800_v29 = vsub.f32 %v13039_v59, %v7784_v43  ;;  %v8745_v59 = vld [vmem:[%s13141_s5 + $0x5] ss:$0 sm:$0xff] }
0x2972   :  { %v7806_v41 = vmul.f32 0.5, %v7805_v22  ;;  %v7798_v31 = vsub.f32 %v7794_v39, %v7796_v26 }
0x2974   :  { %v7807_v34 = vsub.f32 1.5, %v7806_v41  ;;  %v7802_v27 = vadd.f32 1e-05, %v7798_v31 }
0x2976   :  { %v7808_v4 = vmul.f32 %v9173_v21, %v7807_v34  ;;  %9174 = vrsqrt.f32 %v7802_v27  ;;  %vm7819_vm10 = vweird.f32 %v7802_v27 }
0x2978   :  { %v7812_v2 = vsel %vm7811_vm2, %v9173_v21, %v7808_v4 }
0x2979   :  { %v7824_v7 = vmul.f32 %v7823_v25, %v7812_v2 }
0x297b   :  { %v7826_v23 = vmul.f32 %v7824_v7, %v7799_v58  ;;  %v7961_v7 = vperm.slane %v13027_v14, 4 }
0x297c   :  { %v9175_v44 = vpop.eup %9174 }
0x297d   :  { %v7829_v18 = vadd.f32 %v7828_v35, %v7826_v23  ;;  %v7814_v61 = vmul.f32 %v9175_v44, %v7802_v27  ;;  %vm7820_vm11 = vweird.f32 %v9175_v44 }
0x297e   :  { %vm7821_vm12 = vmor %vm7819_vm10, %vm7820_vm11 }
0x297f   :  { %v7815_v19 = vmul.f32 %v9175_v44, %v7814_v61  ;;  %8450 = vmatmul.msk.f32.vlgmr.msrb.gmra.mxu3 %vm13309_vm14, %v7829_v18  ;;  %vm13316_vm14 = vmmov %vm13311_vm0 }
0x2981   :  { %v7816_v9 = vmul.f32 0.5, %v7815_v19 }
0x2983   :  { %v7817_v47 = vsub.f32 1.5, %v7816_v9 }
0x2985   :  { %v7818_v16 = vmul.f32 %v9175_v44, %v7817_v47 }
0x2987   :  { %v7822_v28 = vsel %vm7821_vm12, %v9175_v44, %v7818_v16 }
0x2988   :  { %v7825_v13 = vmul.f32 %v7823_v25, %v7822_v28 }
0x298a   :  { %v7827_v60 = vmul.f32 %v7825_v13, %v7800_v29 }
0x298c   :  { %v7830_v45 = vadd.f32 %v7828_v35, %v7827_v60 }
0x298e   :  { %8451 = vmatmul.msk.f32.gmra.mxu3 %vm13310_vm13, %v7830_v45 }
0x2a02   :  { %v7864_v42 = vpop.f32.mrf.mxu3 }
0x2a03   :  { %v7865_v5 = vadd.f32 %v8745_v59, %v7864_v42 }
0x2a05   :  { %v7870_v36 = vmax.f32 %v7865_v5, 0.0 }
0x2a07   :  { %7906 = vmatmul.f32.vlgmr.msrb.gmra.mxu0 %v7870_v36 }
0x2a11   :  { %v7867_v37 = vpop.f32.mrf.mxu3 }
0x2a12   :  { %v7868_v57 = vadd.f32 %v8745_v59, %v7867_v37 }
0x2a14   :  { %v7871_v15 = vmax.f32 %v7868_v57, 0.0 }
0x2a16   :  { %7909 = vmatmul.f32.gmra.mxu0 %v7871_v15 }
0x2a84   :  { %v7907_v52 = vpop.f32.mrf.mxu0 }
0x2a85   :  { %v7908_v56 = vadd.f32 %v7907_v52, %v7889_v53 }
0x2a87   :  { %v7913_v24 = vadd.f32 %v7908_v56, %v7829_v18  ;;  %v7966_v18 = vperm.slane %v13027_v14, 5 }
0x2a89   :  { %v7915_v11 = vsel %vm13311_vm0, %v7913_v24, 0.0  ;;  %v7923_v1 = vmul.f32 %v7913_v24, %v7913_v24 }
0x2a8a   :  { %7916 = vadd.xlane.f32.xlu0 %v7915_v11 }
0x2a8b   :  { %v7925_v12 = vsel %vm13312_vm8, %v7923_v1, 0.0 }
0x2a8c   :  { %7926 = vadd.xlane.f32.xlu1 %v7925_v12 }
0x2a93   :  { %v7910_v6 = vpop.f32.mrf.mxu0 }
0x2a94   :  { %v7911_v21 = vadd.f32 %v7910_v6, %v7889_v53 }
0x2a96   :  { %v7914_v17 = vadd.f32 %v7911_v21, %v7830_v45 }
0x2a98   :  { %v7918_v46 = vsel %vm13313_vm9, %v7914_v17, 0.0  ;;  %v7924_v43 = vmul.f32 %v7914_v17, %v7914_v17 }
0x2a99   :  { %7919 = vadd.xlane.f32.xlu2 %v7918_v46 }
0x2a9a   :  { %v7928_v30 = vsel %vm13314_vm15, %v7924_v43, 0.0 }
0x2a9b   :  { %7929 = vadd.xlane.f32.xlu0 %v7928_v30 }
0x2afd   :  { %v7917_v0 = vpop.xlane.xlu0 %7916 }
0x2afe   :  { %v7921_v51 = vmul.f32 %v7917_v0, %v9812_v62 }
0x2aff   :  { %v7927_v22 = vpop.xlane.xlu1 %7926 }
0x2b00   :  { %v7933_v26 = vmul.f32 %v7921_v51, %v7921_v51  ;;  %v7931_v39 = vmul.f32 %v7927_v22, %v9812_v62  ;;  %v7937_v44 = vsub.f32 %v7913_v24, %v7921_v51 }
0x2b02   :  { %v7935_v54 = vsub.f32 %v7931_v39, %v7933_v26 }
0x2b04   :  { %v7939_v41 = vadd.f32 1e-05, %v7935_v54 }
0x2b06   :  { %9176 = vrsqrt.f32 %v7939_v41  ;;  %vm7947_vm3 = vweird.f32 %v7939_v41 }
0x2b0c   :  { %v9177_v31 = vpop.eup %9176  ;;  %v7920_v32 = vpop.xlane.xlu2 %7919 }
0x2b0d   :  { %v7942_v34 = vmul.f32 %v9177_v31, %v7939_v41  ;;  %v7922_v27 = vmul.f32 %v7920_v32, %v9812_v62  ;;  %vm7948_vm1 = vweird.f32 %v9177_v31 }
0x2b0e   :  { %v7930_v48 = vpop.xlane.xlu0 %7929  ;;  %vm7949_vm4 = vmor %vm7947_vm3, %vm7948_vm1 }
0x2b0f   :  { %v7943_v25 = vmul.f32 %v9177_v31, %v7942_v34  ;;  %v7934_v4 = vmul.f32 %v7922_v27, %v7922_v27  ;;  %v7932_v3 = vmul.f32 %v7930_v48, %v9812_v62  ;;  %v7938_v16 = vsub.f32 %v7914_v17, %v7922_v27 }
0x2b11   :  { %v7944_v2 = vmul.f32 0.5, %v7943_v25  ;;  %v7936_v10 = vsub.f32 %v7932_v3, %v7934_v4 }
0x2b13   :  { %v7945_v58 = vsub.f32 1.5, %v7944_v2  ;;  %v7940_v35 = vadd.f32 1e-05, %v7936_v10 }
0x2b15   :  { %v7946_v49 = vmul.f32 %v9177_v31, %v7945_v58  ;;  %9178 = vrsqrt.f32 %v7940_v35  ;;  %vm7957_vm7 = vweird.f32 %v7940_v35 }
0x2b17   :  { %v7950_v23 = vsel %vm7949_vm4, %v9177_v31, %v7946_v49 }
0x2b18   :  { %v7962_v63 = vmul.f32 %v7961_v7, %v7950_v23 }
0x2b1a   :  { %v7964_v61 = vmul.f32 %v7962_v63, %v7937_v44 }
0x2b1b   :  { %v9179_v40 = vpop.eup %9178 }
0x2b1c   :  { %v7952_v19 = vmul.f32 %v9179_v40, %v7940_v35  ;;  %v7967_v62 = vadd.f32 %v7966_v18, %v7964_v61  ;;  %vm7958_vm6 = vweird.f32 %v9179_v40 }
0x2b1d   :  { %vm7959_vm2 = vmor %vm7957_vm7, %vm7958_vm6 }
0x2b1e   :  { %v7953_v38 = vmul.f32 %v9179_v40, %v7952_v19  ;;  %7969 = vst.msk [vmem:[#allocation2] sm:$0xff] %vm13315_vm5, %v7967_v62 }
0x2b20   :  { %v7954_v9 = vmul.f32 0.5, %v7953_v38 }
0x2b22   :  { %v7955_v55 = vsub.f32 1.5, %v7954_v9 }
0x2b24   :  { %v7956_v47 = vmul.f32 %v9179_v40, %v7955_v55 }
0x2b26   :  { %v7960_v20 = vsel %vm7959_vm2, %v9179_v40, %v7956_v47 }
0x2b27   :  { %v7963_v28 = vmul.f32 %v7961_v7, %v7960_v20 }
0x2b29   :  { %v7965_v14 = vmul.f32 %v7963_v28, %v7938_v16 }
0x2b2b   :  { %v7968_v29 = vadd.f32 %v7966_v18, %v7965_v14 }
0x2b2d   :  { %7970 = vst.msk [vmem:[#allocation2 + $0x8] sm:$0xff] %vm13316_vm14, %v7968_v29 }
0x2b2e   :  { %7983 = dma.vmem_to_hbm [thread:$0]  %s7976_s19, 256, %s7978_s29, [#allocation3], %s9227_s20, %s9227_s20, %s13250_s9  }
0x2b2f   :  { %9206 = dma.done.wait [#allocation3], 256  }
0x2b30   :  { %9207 = vsyncadd [#allocation3], 4294967040 }
0x2b31   :  { %7988 = vsyncpa [#allocation3], 1 }

</bundles_post_ra>
